<compile_context>
chip_gen: v7x
topology: tpu7x:2x2x1
jax: 0.10.0
libtpu: 0.0.40
codegen_flags: <defaults>
</compile_context>

<pallas_src>
import functools

import jax
import jax.numpy as jnp
from jax.experimental import pallas as pl
from jax.experimental.pallas import tpu as pltpu

LN_EPS = 1e-5  # PyTorch nn.LayerNorm default


def _round_up(a, m):
    return ((a + m - 1) // m) * m


def _layernorm_f32(h, gamma, beta, *, relu=False):
    """LayerNorm over the last axis (f32), optional fused ReLU.

    The centered value is computed once and reused for variance and
    normalization so Mosaic does not have to CSE it.
    """
    mu = jnp.mean(h, axis=-1, keepdims=True)
    d = h - mu
    var = jnp.mean(d * d, axis=-1, keepdims=True)
    y = d * jax.lax.rsqrt(var + LN_EPS) * gamma + beta
    return jnp.maximum(y, 0.0) if relu else y


def _pointnet_kernel(
    x_ref,                      # (BT, TN, CP)  bf16
    w1_ref, p1_ref,             # (CP, 64) bf16, (3, 64) f32  rows = [bias, gamma, beta]
    w2_ref, p2_ref,             # (64, 128), (3, 128)
    w3_ref, p3_ref,             # (128, 256), (3, 256)
    wp_ref, pp_ref,             # (256, C_out), (3, C_out)
    o_ref,                      # (BT, C_out) f32
    gmax_ref,                   # VMEM scratch (BT, 256) f32 -- running max over points
    *, n_valid, mask_points,
):
    n_idx = pl.program_id(1)

    @pl.when(n_idx == 0)
    def _():
        gmax_ref[...] = jnp.full(gmax_ref.shape, -jnp.inf, gmax_ref.dtype)

    bt, tn, cp = x_ref.shape
    # Flatten batch-tile x point-tile into one big M dimension for the MXU.
    # TN is a multiple of 16 and CP is the full last dim, so this reshape is a
    # pure tile relabeling (no data movement).
    x = x_ref[...].reshape(bt * tn, cp)                      # bf16 (BT*TN, CP)

    def layer(h_bf16, w_ref, p_ref, relu):
        h = jnp.dot(h_bf16, w_ref[...], preferred_element_type=jnp.float32)
        h = h + p_ref[0:1, :]                                # bias
        return _layernorm_f32(h, p_ref[1:2, :], p_ref[2:3, :], relu=relu)

    h = layer(x, w1_ref, p1_ref, relu=True)                       # (BT*TN, 64)  f32
    h = layer(h.astype(jnp.bfloat16), w2_ref, p2_ref, relu=True)  # (BT*TN, 128) f32
    # Layer 3: ReLU is deferred past the max-pool (relu(max(x)) == max(relu(x))
    # because ReLU is monotonic) -> saves a full-width pass on the 256-wide act.
    h = layer(h.astype(jnp.bfloat16), w3_ref, p3_ref, relu=False)  # (BT*TN, 256)

    h = h.reshape(bt, tn, h.shape[-1])                       # (BT, TN, 256)
    if mask_points:
        # Padded point rows must not contribute to the max-pool.  Every point
        # tile contains at least one valid point, so no row ends up all -inf.
        pt = jax.lax.broadcasted_iota(jnp.int32, (bt, tn, 1), 1)
        h = jnp.where(n_idx * tn + pt < n_valid, h, -jnp.inf)

    gmax_ref[...] = jnp.maximum(gmax_ref[...], jnp.max(h, axis=1))

    @pl.when(n_idx == pl.num_programs(1) - 1)
    def _():
        g = jnp.maximum(gmax_ref[...], 0.0)                  # deferred layer-3 ReLU
        y = jnp.dot(g.astype(jnp.bfloat16), wp_ref[...],
                    preferred_element_type=jnp.float32)
        y = y + pp_ref[0:1, :]
        y = _layernorm_f32(y, pp_ref[1:2, :], pp_ref[2:3, :], relu=False)
        o_ref[...] = y.astype(o_ref.dtype)


def pointnet_encoder_xyz(x, params, *, b_tile=8, n_tile=512):
    """x: (B, N, C_in) float. params: dict from init_params ((in, out) weights)."""
    B, N, C_in = x.shape
    out_channels = params["wp"].shape[1]
    feat = params["w3"].shape[1]  # 256

    # ---- pad shapes to TPU-friendly tiles -------------------------------
    c_pad = 8                                    # lane-pad xyz channels 3 -> 8
    assert C_in <= c_pad
    b_tile = max(8, _round_up(b_tile, 8))
    B_pad = _round_up(B, b_tile)
    # 16-granular point tiles (bf16 sublane packing) so in-kernel reshapes
    # are pure tile relabelings.
    tn = min(_round_up(n_tile, 16), _round_up(N, 16))
    N_pad = _round_up(N, tn)

    x_p = jnp.pad(x, ((0, B_pad - B), (0, N_pad - N), (0, c_pad - C_in)))
    x_p = x_p.astype(jnp.bfloat16)               # halve HBM traffic; MXU-native

    # Weights as bf16 MXU operands; bias/gamma/beta packed (3, C) in f32.
    w1 = jnp.pad(params["w1"], ((0, c_pad - C_in), (0, 0))).astype(jnp.bfloat16)
    w2 = params["w2"].astype(jnp.bfloat16)
    w3 = params["w3"].astype(jnp.bfloat16)
    wp = params["wp"].astype(jnp.bfloat16)

    def pack(b, g, be):
        return jnp.concatenate([b, g, be], axis=0).astype(jnp.float32)

    p1 = pack(params["b1"], params["g1"], params["be1"])
    p2 = pack(params["b2"], params["g2"], params["be2"])
    p3 = pack(params["b3"], params["g3"], params["be3"])
    pp = pack(params["bp"], params["gp"], params["bep"])

    def full(a):
        # Full-array block; block index never changes -> weights stay resident
        # in VMEM across the whole grid (no re-DMA).
        return pl.BlockSpec(a.shape, lambda b, n: (0, 0))

    kernel = functools.partial(
        _pointnet_kernel, n_valid=N, mask_points=(N_pad != N))

    out = pl.pallas_call(
        kernel,
        out_shape=jax.ShapeDtypeStruct((B_pad, out_channels), jnp.float32),
        grid_spec=pltpu.PrefetchScalarGridSpec(
            num_scalar_prefetch=0,
            grid=(B_pad // b_tile, N_pad // tn),
            in_specs=[
                pl.BlockSpec((b_tile, tn, c_pad), lambda b, n: (b, n, 0)),
                full(w1), full(p1),
                full(w2), full(p2),
                full(w3), full(p3),
                full(wp), full(pp),
            ],
            out_specs=pl.BlockSpec((b_tile, out_channels), lambda b, n: (b, 0)),
            scratch_shapes=[pltpu.VMEM((b_tile, feat), jnp.float32)],
        ),
        compiler_params=pltpu.CompilerParams(
            dimension_semantics=("parallel", "arbitrary"),
            vmem_limit_bytes=64 * 1024 * 1024,
        ),
    )(x_p, w1, p1, w2, p2, w3, p3, wp, pp)

    return out[:B]


def init_params(key, in_channels=3, out_channels=64, dtype=jnp.float32):
    """Deterministic synthetic init. Linear weights stored as (in, out)."""
    block_channel = [64, 128, 256]
    dims = [in_channels] + block_channel  # 3 -> 64 -> 128 -> 256
    params = {}
    keys = jax.random.split(key, 8)
    k_it = iter(keys)

    def linear(k, fan_in, fan_out):
        bound = 1.0 / jnp.sqrt(fan_in)
        kw, kb = jax.random.split(k)
        w = jax.random.uniform(kw, (fan_in, fan_out), dtype, -bound, bound)
        b = jax.random.uniform(kb, (1, fan_out), dtype, -bound, bound)
        return w, b

    for i in range(3):
        w, b = linear(next(k_it), dims[i], dims[i + 1])
        params[f"w{i+1}"] = w
        params[f"b{i+1}"] = b
        params[f"g{i+1}"] = jnp.ones((1, dims[i + 1]), dtype)    # LN gamma
        params[f"be{i+1}"] = jnp.zeros((1, dims[i + 1]), dtype)  # LN beta

    wp, bp = linear(next(k_it), block_channel[-1], out_channels)
    params["wp"] = wp
    params["bp"] = bp
    params["gp"] = jnp.ones((1, out_channels), dtype)
    params["bep"] = jnp.zeros((1, out_channels), dtype)
    return params


def reference_forward(x, p):
    """Pure-JAX f32 reference of the PyTorch forward."""
    h = x
    for i in range(3):
        h = h @ p[f"w{i+1}"] + p[f"b{i+1}"]
        h = _layernorm_f32(h, p[f"g{i+1}"], p[f"be{i+1}"], relu=True)
    g = jnp.max(h, axis=1)
    y = g @ p["wp"] + p["bp"]
    return _layernorm_f32(y, p["gp"], p["bep"])


def reference_forward_matched(x, p, c_pad=8):
    """Reference mimicking the kernel's bf16 matmul operands (f32 accumulate)."""
    B, N, C_in = x.shape
    xb = jnp.pad(x, ((0, 0), (0, 0), (0, c_pad - C_in)))
    xb = xb.reshape(B * N, c_pad).astype(jnp.bfloat16)
    w1 = jnp.pad(p["w1"], ((0, c_pad - C_in), (0, 0)))

    def lin_ln_relu(hb, w, b, g, be):
        h = jnp.dot(hb, w.astype(jnp.bfloat16),
                    preferred_element_type=jnp.float32) + b
        return _layernorm_f32(h, g, be, relu=True)

    h = lin_ln_relu(xb, w1, p["b1"], p["g1"], p["be1"])
    h = lin_ln_relu(h.astype(jnp.bfloat16), p["w2"], p["b2"], p["g2"], p["be2"])
    h = lin_ln_relu(h.astype(jnp.bfloat16), p["w3"], p["b3"], p["g3"], p["be3"])
    g = jnp.max(h.reshape(B, N, -1), axis=1)
    y = jnp.dot(g.astype(jnp.bfloat16), p["wp"].astype(jnp.bfloat16),
                preferred_element_type=jnp.float32) + p["bp"]
    return _layernorm_f32(y, p["gp"], p["bep"])


def _check(x, params, C_out):
    out = jax.block_until_ready(pointnet_encoder_xyz(x, params))
    assert out.shape == (x.shape[0], C_out), out.shape
    # Tight check vs a reference using the same bf16 operand casts as the kernel.
    ref_b = reference_forward_matched(x, params)
    assert jnp.allclose(out, ref_b, atol=1e-2, rtol=1e-2), float(
        jnp.max(jnp.abs(out - ref_b)))
    # Looser check vs the pure-f32 PyTorch-semantics reference (bf16 precision).
    ref_f = reference_forward(x, params)
    assert jnp.allclose(out, ref_f, atol=1e-1, rtol=1e-1), float(
        jnp.max(jnp.abs(out - ref_f)))
    return out


if __name__ == "__main__":
    key = jax.random.PRNGKey(0)
    k_x, k_x2, k_p = jax.random.split(key, 3)

    C_in, C_out = 3, 64
    params = init_params(k_p, in_channels=C_in, out_channels=C_out)

    # Small point cloud: 2 batches x 64 points x xyz (aligned shapes).
    x = jax.random.normal(k_x, (2, 64, C_in), dtype=jnp.float32)
    _check(x, params, C_out)

    # Unaligned shapes: exercises batch padding + point-mask path.
    x2 = jax.random.normal(k_x2, (3, 50, C_in), dtype=jnp.float32)
    _check(x2, params, C_out)

    print("KERNEL_OK")
</pallas_src>

<mosaic_0001>
module attributes {stable_mosaic.version = 11 : i64} {
  func.func @_pointnet_kernel(%arg0: i32, %arg1: i32, %arg2: memref<8x64x8xbf16, #tpu.memory_space<vmem>>, %arg3: memref<8x64xbf16, #tpu.memory_space<vmem>>, %arg4: memref<3x64xf32, #tpu.memory_space<vmem>>, %arg5: memref<64x128xbf16, #tpu.memory_space<vmem>>, %arg6: memref<3x128xf32, #tpu.memory_space<vmem>>, %arg7: memref<128x256xbf16, #tpu.memory_space<vmem>>, %arg8: memref<3x256xf32, #tpu.memory_space<vmem>>, %arg9: memref<256x64xbf16, #tpu.memory_space<vmem>>, %arg10: memref<3x64xf32, #tpu.memory_space<vmem>>, %arg11: memref<8x64xf32, #tpu.memory_space<vmem>>, %arg12: memref<8x256xf32, #tpu.memory_space<vmem>>) attributes {dimension_semantics = [#tpu.dimension_semantics<parallel>, #tpu.dimension_semantics<arbitrary>], iteration_bounds = array<i64: 1, 1>, scalar_prefetch = 0 : i64, scratch_operands = 1 : i64, tpu.core_type = #tpu.core_type<tc>, window_params = [{transform_indices = @transform_0, window_bounds = array<i64: 8, 64, 8>}, {pipeline_mode = #tpu.pipeline_mode<synchronous>, transform_indices = @transform_1, window_bounds = array<i64: 8, 64>}, {pipeline_mode = #tpu.pipeline_mode<synchronous>, transform_indices = @transform_2, window_bounds = array<i64: 3, 64>}, {pipeline_mode = #tpu.pipeline_mode<synchronous>, transform_indices = @transform_3, window_bounds = array<i64: 64, 128>}, {pipeline_mode = #tpu.pipeline_mode<synchronous>, transform_indices = @transform_4, window_bounds = array<i64: 3, 128>}, {pipeline_mode = #tpu.pipeline_mode<synchronous>, transform_indices = @transform_5, window_bounds = array<i64: 128, 256>}, {pipeline_mode = #tpu.pipeline_mode<synchronous>, transform_indices = @transform_6, window_bounds = array<i64: 3, 256>}, {pipeline_mode = #tpu.pipeline_mode<synchronous>, transform_indices = @transform_7, window_bounds = array<i64: 256, 64>}, {pipeline_mode = #tpu.pipeline_mode<synchronous>, transform_indices = @transform_8, window_bounds = array<i64: 3, 64>}, {transform_indices = @transform_9, window_bounds = array<i64: 8, 64>}]} {
    %c0_i32 = arith.constant 0 : i32
    %0 = arith.cmpi eq, %arg1, %c0_i32 : i32
    %1 = arith.extui %0 : i1 to i32
    %c0_i32_0 = arith.constant 0 : i32
    %2 = arith.cmpi ne, %1, %c0_i32_0 : i32
    scf.if %2 {
      %cst_51 = arith.constant 0xFF800000 : f32
      %100 = vector.broadcast %cst_51 : f32 to vector<8x256xf32>
      %c0_52 = arith.constant 0 : index
      %c0_53 = arith.constant 0 : index
      %101 = vector.load %arg12[%c0_52, %c0_53] : memref<8x256xf32, #tpu.memory_space<vmem>>, vector<8x256xf32>
      tpu.vector_store %arg12[%c0_52, %c0_53], %100 {strides = array<i32>} : memref<8x256xf32, #tpu.memory_space<vmem>>, vector<8x256xf32>,
    } else {
    }
    %c0 = arith.constant 0 : index
    %c0_1 = arith.constant 0 : index
    %c0_2 = arith.constant 0 : index
    %3 = vector.load %arg2[%c0, %c0_1, %c0_2] : memref<8x64x8xbf16, #tpu.memory_space<vmem>>, vector<8x64x8xbf16>
    %4 = vector.shape_cast %3 : vector<8x64x8xbf16> to vector<512x8xbf16>
    %c0_3 = arith.constant 0 : index
    %c0_4 = arith.constant 0 : index
    %5 = vector.load %arg3[%c0_3, %c0_4] : memref<8x64xbf16, #tpu.memory_space<vmem>>, vector<8x64xbf16>
    %cst = arith.constant dense<0.000000e+00> : vector<512x64xf32>
    %6 = tpu.matmul %4, %5, %cst {dimension_numbers = #tpu.dot_dimension_numbers<[1], [0], [0], [1], [0, 0, 1, 1], [], []>} : vector<512x8xbf16>, vector<8x64xbf16>, vector<512x64xf32> -> vector<512x64xf32>
    %c0_5 = arith.constant 0 : index
    %c0_6 = arith.constant 0 : index
    %7 = vector.load %arg4[%c0_5, %c0_6] : memref<3x64xf32, #tpu.memory_space<vmem>>, vector<1x64xf32>
    %8 = vector.broadcast %7 : vector<1x64xf32> to vector<512x64xf32>
    %9 = arith.addf %6, %8 : vector<512x64xf32>
    %c1 = arith.constant 1 : index
    %c0_7 = arith.constant 0 : index
    %10 = vector.load %arg4[%c1, %c0_7] : memref<3x64xf32, #tpu.memory_space<vmem>>, vector<1x64xf32>
    %c2 = arith.constant 2 : index
    %c0_8 = arith.constant 0 : index
    %11 = vector.load %arg4[%c2, %c0_8] : memref<3x64xf32, #tpu.memory_space<vmem>>, vector<1x64xf32>
    %cst_9 = arith.constant dense<0.000000e+00> : vector<512xf32>
    %12 = vector.multi_reduction <add>, %9, %cst_9 [1] : vector<512x64xf32> to vector<512xf32>
    %13 = vector.shape_cast %12 : vector<512xf32> to vector<512x1xf32>
    %cst_10 = arith.constant 6.400000e+01 : f32
    %14 = vector.broadcast %cst_10 : f32 to vector<512x1xf32>
    %15 = arith.divf %13, %14 : vector<512x1xf32>
    %16 = vector.broadcast %15 : vector<512x1xf32> to vector<512x64xf32>
    %17 = arith.subf %9, %16 : vector<512x64xf32>
    %18 = arith.mulf %17, %17 : vector<512x64xf32>
    %cst_11 = arith.constant dense<0.000000e+00> : vector<512xf32>
    %19 = vector.multi_reduction <add>, %18, %cst_11 [1] : vector<512x64xf32> to vector<512xf32>
    %20 = vector.shape_cast %19 : vector<512xf32> to vector<512x1xf32>
    %cst_12 = arith.constant 6.400000e+01 : f32
    %21 = vector.broadcast %cst_12 : f32 to vector<512x1xf32>
    %22 = arith.divf %20, %21 : vector<512x1xf32>
    %cst_13 = arith.constant 9.99999974E-6 : f32
    %23 = vector.broadcast %cst_13 : f32 to vector<512x1xf32>
    %24 = arith.addf %22, %23 : vector<512x1xf32>
    %25 = math.rsqrt %24 : vector<512x1xf32>
    %26 = vector.broadcast %25 : vector<512x1xf32> to vector<512x64xf32>
    %27 = arith.mulf %17, %26 : vector<512x64xf32>
    %28 = vector.broadcast %10 : vector<1x64xf32> to vector<512x64xf32>
    %29 = arith.mulf %27, %28 : vector<512x64xf32>
    %30 = vector.broadcast %11 : vector<1x64xf32> to vector<512x64xf32>
    %31 = arith.addf %29, %30 : vector<512x64xf32>
    %cst_14 = arith.constant 0.000000e+00 : f32
    %32 = vector.broadcast %cst_14 : f32 to vector<512x64xf32>
    %33 = arith.maximumf %31, %32 : vector<512x64xf32>
    %34 = arith.truncf %33 : vector<512x64xf32> to vector<512x64xbf16>
    %c0_15 = arith.constant 0 : index
    %c0_16 = arith.constant 0 : index
    %35 = vector.load %arg5[%c0_15, %c0_16] : memref<64x128xbf16, #tpu.memory_space<vmem>>, vector<64x128xbf16>
    %cst_17 = arith.constant dense<0.000000e+00> : vector<512x128xf32>
    %36 = tpu.matmul %34, %35, %cst_17 {dimension_numbers = #tpu.dot_dimension_numbers<[1], [0], [0], [1], [0, 0, 1, 1], [], []>} : vector<512x64xbf16>, vector<64x128xbf16>, vector<512x128xf32> -> vector<512x128xf32>
    %c0_18 = arith.constant 0 : index
    %c0_19 = arith.constant 0 : index
    %37 = vector.load %arg6[%c0_18, %c0_19] : memref<3x128xf32, #tpu.memory_space<vmem>>, vector<1x128xf32>
    %38 = vector.broadcast %37 : vector<1x128xf32> to vector<512x128xf32>
    %39 = arith.addf %36, %38 : vector<512x128xf32>
    %c1_20 = arith.constant 1 : index
    %c0_21 = arith.constant 0 : index
    %40 = vector.load %arg6[%c1_20, %c0_21] : memref<3x128xf32, #tpu.memory_space<vmem>>, vector<1x128xf32>
    %c2_22 = arith.constant 2 : index
    %c0_23 = arith.constant 0 : index
    %41 = vector.load %arg6[%c2_22, %c0_23] : memref<3x128xf32, #tpu.memory_space<vmem>>, vector<1x128xf32>
    %cst_24 = arith.constant dense<0.000000e+00> : vector<512xf32>
    %42 = vector.multi_reduction <add>, %39, %cst_24 [1] : vector<512x128xf32> to vector<512xf32>
    %43 = vector.shape_cast %42 : vector<512xf32> to vector<512x1xf32>
    %cst_25 = arith.constant 1.280000e+02 : f32
    %44 = vector.broadcast %cst_25 : f32 to vector<512x1xf32>
    %45 = arith.divf %43, %44 : vector<512x1xf32>
    %46 = vector.broadcast %45 : vector<512x1xf32> to vector<512x128xf32>
    %47 = arith.subf %39, %46 : vector<512x128xf32>
    %48 = arith.mulf %47, %47 : vector<512x128xf32>
    %cst_26 = arith.constant dense<0.000000e+00> : vector<512xf32>
    %49 = vector.multi_reduction <add>, %48, %cst_26 [1] : vector<512x128xf32> to vector<512xf32>
    %50 = vector.shape_cast %49 : vector<512xf32> to vector<512x1xf32>
    %cst_27 = arith.constant 1.280000e+02 : f32
    %51 = vector.broadcast %cst_27 : f32 to vector<512x1xf32>
    %52 = arith.divf %50, %51 : vector<512x1xf32>
    %cst_28 = arith.constant 9.99999974E-6 : f32
    %53 = vector.broadcast %cst_28 : f32 to vector<512x1xf32>
    %54 = arith.addf %52, %53 : vector<512x1xf32>
    %55 = math.rsqrt %54 : vector<512x1xf32>
    %56 = vector.broadcast %55 : vector<512x1xf32> to vector<512x128xf32>
    %57 = arith.mulf %47, %56 : vector<512x128xf32>
    %58 = vector.broadcast %40 : vector<1x128xf32> to vector<512x128xf32>
    %59 = arith.mulf %57, %58 : vector<512x128xf32>
    %60 = vector.broadcast %41 : vector<1x128xf32> to vector<512x128xf32>
    %61 = arith.addf %59, %60 : vector<512x128xf32>
    %cst_29 = arith.constant 0.000000e+00 : f32
    %62 = vector.broadcast %cst_29 : f32 to vector<512x128xf32>
    %63 = arith.maximumf %61, %62 : vector<512x128xf32>
    %64 = arith.truncf %63 : vector<512x128xf32> to vector<512x128xbf16>
    %c0_30 = arith.constant 0 : index
    %c0_31 = arith.constant 0 : index
    %65 = vector.load %arg7[%c0_30, %c0_31] : memref<128x256xbf16, #tpu.memory_space<vmem>>, vector<128x256xbf16>
    %cst_32 = arith.constant dense<0.000000e+00> : vector<512x256xf32>
    %66 = tpu.matmul %64, %65, %cst_32 {dimension_numbers = #tpu.dot_dimension_numbers<[1], [0], [0], [1], [0, 0, 1, 1], [], []>} : vector<512x128xbf16>, vector<128x256xbf16>, vector<512x256xf32> -> vector<512x256xf32>
    %c0_33 = arith.constant 0 : index
    %c0_34 = arith.constant 0 : index
    %67 = vector.load %arg8[%c0_33, %c0_34] : memref<3x256xf32, #tpu.memory_space<vmem>>, vector<1x256xf32>
    %68 = vector.broadcast %67 : vector<1x256xf32> to vector<512x256xf32>
    %69 = arith.addf %66, %68 : vector<512x256xf32>
    %c1_35 = arith.constant 1 : index
    %c0_36 = arith.constant 0 : index
    %70 = vector.load %arg8[%c1_35, %c0_36] : memref<3x256xf32, #tpu.memory_space<vmem>>, vector<1x256xf32>
    %c2_37 = arith.constant 2 : index
    %c0_38 = arith.constant 0 : index
    %71 = vector.load %arg8[%c2_37, %c0_38] : memref<3x256xf32, #tpu.memory_space<vmem>>, vector<1x256xf32>
    %cst_39 = arith.constant dense<0.000000e+00> : vector<512xf32>
    %72 = vector.multi_reduction <add>, %69, %cst_39 [1] : vector<512x256xf32> to vector<512xf32>
    %73 = vector.shape_cast %72 : vector<512xf32> to vector<512x1xf32>
    %cst_40 = arith.constant 2.560000e+02 : f32
    %74 = vector.broadcast %cst_40 : f32 to vector<512x1xf32>
    %75 = arith.divf %73, %74 : vector<512x1xf32>
    %76 = vector.broadcast %75 : vector<512x1xf32> to vector<512x256xf32>
    %77 = arith.subf %69, %76 : vector<512x256xf32>
    %78 = arith.mulf %77, %77 : vector<512x256xf32>
    %cst_41 = arith.constant dense<0.000000e+00> : vector<512xf32>
    %79 = vector.multi_reduction <add>, %78, %cst_41 [1] : vector<512x256xf32> to vector<512xf32>
    %80 = vector.shape_cast %79 : vector<512xf32> to vector<512x1xf32>
    %cst_42 = arith.constant 2.560000e+02 : f32
    %81 = vector.broadcast %cst_42 : f32 to vector<512x1xf32>
    %82 = arith.divf %80, %81 : vector<512x1xf32>
    %cst_43 = arith.constant 9.99999974E-6 : f32
    %83 = vector.broadcast %cst_43 : f32 to vector<512x1xf32>
    %84 = arith.addf %82, %83 : vector<512x1xf32>
    %85 = math.rsqrt %84 : vector<512x1xf32>
    %86 = vector.broadcast %85 : vector<512x1xf32> to vector<512x256xf32>
    %87 = arith.mulf %77, %86 : vector<512x256xf32>
    %88 = vector.broadcast %70 : vector<1x256xf32> to vector<512x256xf32>
    %89 = arith.mulf %87, %88 : vector<512x256xf32>
    %90 = vector.broadcast %71 : vector<1x256xf32> to vector<512x256xf32>
    %91 = arith.addf %89, %90 : vector<512x256xf32>
    %92 = vector.shape_cast %91 : vector<512x256xf32> to vector<8x64x256xf32>
    %c0_44 = arith.constant 0 : index
    %c0_45 = arith.constant 0 : index
    %93 = vector.load %arg12[%c0_44, %c0_45] : memref<8x256xf32, #tpu.memory_space<vmem>>, vector<8x256xf32>
    %cst_46 = arith.constant dense<0xFF800000> : vector<8x256xf32>
    %94 = vector.multi_reduction <maximumf>, %92, %cst_46 [1] : vector<8x64x256xf32> to vector<8x256xf32>
    %95 = arith.maximumf %93, %94 : vector<8x256xf32>
    %c0_47 = arith.constant 0 : index
    %c0_48 = arith.constant 0 : index
    %96 = vector.load %arg12[%c0_47, %c0_48] : memref<8x256xf32, #tpu.memory_space<vmem>>, vector<8x256xf32>
    tpu.vector_store %arg12[%c0_47, %c0_48], %95 {strides = array<i32>} : memref<8x256xf32, #tpu.memory_space<vmem>>, vector<8x256xf32>,
    %c0_i32_49 = arith.constant 0 : i32
    %97 = arith.cmpi eq, %arg1, %c0_i32_49 : i32
    %98 = arith.extui %97 : i1 to i32
    %c0_i32_50 = arith.constant 0 : i32
    %99 = arith.cmpi ne, %98, %c0_i32_50 : i32
    scf.if %99 {
      %c0_51 = arith.constant 0 : index
      %c0_52 = arith.constant 0 : index
      %100 = vector.load %arg12[%c0_51, %c0_52] : memref<8x256xf32, #tpu.memory_space<vmem>>, vector<8x256xf32>
      %cst_53 = arith.constant 0.000000e+00 : f32
      %101 = vector.broadcast %cst_53 : f32 to vector<8x256xf32>
      %102 = arith.maximumf %100, %101 : vector<8x256xf32>
      %103 = arith.truncf %102 : vector<8x256xf32> to vector<8x256xbf16>
      %c0_54 = arith.constant 0 : index
      %c0_55 = arith.constant 0 : index
      %104 = vector.load %arg9[%c0_54, %c0_55] : memref<256x64xbf16, #tpu.memory_space<vmem>>, vector<256x64xbf16>
      %cst_56 = arith.constant dense<0.000000e+00> : vector<8x64xf32>
      %105 = tpu.matmul %103, %104, %cst_56 {dimension_numbers = #tpu.dot_dimension_numbers<[1], [0], [0], [1], [0, 0, 1, 1], [], []>} : vector<8x256xbf16>, vector<256x64xbf16>, vector<8x64xf32> -> vector<8x64xf32>
      %c0_57 = arith.constant 0 : index
      %c0_58 = arith.constant 0 : index
      %106 = vector.load %arg10[%c0_57, %c0_58] : memref<3x64xf32, #tpu.memory_space<vmem>>, vector<1x64xf32>
      %107 = vector.broadcast %106 : vector<1x64xf32> to vector<8x64xf32>
      %108 = arith.addf %105, %107 : vector<8x64xf32>
      %c1_59 = arith.constant 1 : index
      %c0_60 = arith.constant 0 : index
      %109 = vector.load %arg10[%c1_59, %c0_60] : memref<3x64xf32, #tpu.memory_space<vmem>>, vector<1x64xf32>
      %c2_61 = arith.constant 2 : index
      %c0_62 = arith.constant 0 : index
      %110 = vector.load %arg10[%c2_61, %c0_62] : memref<3x64xf32, #tpu.memory_space<vmem>>, vector<1x64xf32>
      %cst_63 = arith.constant dense<0.000000e+00> : vector<8xf32>
      %111 = vector.multi_reduction <add>, %108, %cst_63 [1] : vector<8x64xf32> to vector<8xf32>
      %112 = vector.shape_cast %111 : vector<8xf32> to vector<8x1xf32>
      %cst_64 = arith.constant 6.400000e+01 : f32
      %113 = vector.broadcast %cst_64 : f32 to vector<8x1xf32>
      %114 = arith.divf %112, %113 : vector<8x1xf32>
      %115 = vector.broadcast %114 : vector<8x1xf32> to vector<8x64xf32>
      %116 = arith.subf %108, %115 : vector<8x64xf32>
      %117 = arith.mulf %116, %116 : vector<8x64xf32>
      %cst_65 = arith.constant dense<0.000000e+00> : vector<8xf32>
      %118 = vector.multi_reduction <add>, %117, %cst_65 [1] : vector<8x64xf32> to vector<8xf32>
      %119 = vector.shape_cast %118 : vector<8xf32> to vector<8x1xf32>
      %cst_66 = arith.constant 6.400000e+01 : f32
      %120 = vector.broadcast %cst_66 : f32 to vector<8x1xf32>
      %121 = arith.divf %119, %120 : vector<8x1xf32>
      %cst_67 = arith.constant 9.99999974E-6 : f32
      %122 = vector.broadcast %cst_67 : f32 to vector<8x1xf32>
      %123 = arith.addf %121, %122 : vector<8x1xf32>
      %124 = math.rsqrt %123 : vector<8x1xf32>
      %125 = vector.broadcast %124 : vector<8x1xf32> to vector<8x64xf32>
      %126 = arith.mulf %116, %125 : vector<8x64xf32>
      %127 = vector.broadcast %109 : vector<1x64xf32> to vector<8x64xf32>
      %128 = arith.mulf %126, %127 : vector<8x64xf32>
      %129 = vector.broadcast %110 : vector<1x64xf32> to vector<8x64xf32>
      %130 = arith.addf %128, %129 : vector<8x64xf32>
      %c0_68 = arith.constant 0 : index
      %c0_69 = arith.constant 0 : index
      %131 = vector.load %arg11[%c0_68, %c0_69] : memref<8x64xf32, #tpu.memory_space<vmem>>, vector<8x64xf32>
      tpu.vector_store %arg11[%c0_68, %c0_69], %130 {strides = array<i32>} : memref<8x64xf32, #tpu.memory_space<vmem>>, vector<8x64xf32>,
    } else {
    }
    return
  }
  func.func @transform_0(%arg0: i32, %arg1: i32) -> (i32, i32, i32) {
    %c0_i32 = arith.constant 0 : i32
    %c0_i32_0 = arith.constant 0 : i32
    return %arg0, %arg1, %c0_i32 : i32, i32, i32
  }
  func.func @transform_1(%arg0: i32, %arg1: i32) -> (i32, i32) {
    %c0_i32 = arith.constant 0 : i32
    %c0_i32_0 = arith.constant 0 : i32
    %c0_i32_1 = arith.constant 0 : i32
    return %c0_i32, %c0_i32_0 : i32, i32
  }
  func.func @transform_2(%arg0: i32, %arg1: i32) -> (i32, i32) {
    %c0_i32 = arith.constant 0 : i32
    %c0_i32_0 = arith.constant 0 : i32
    %c0_i32_1 = arith.constant 0 : i32
    return %c0_i32, %c0_i32_0 : i32, i32
  }
  func.func @transform_3(%arg0: i32, %arg1: i32) -> (i32, i32) {
    %c0_i32 = arith.constant 0 : i32
    %c0_i32_0 = arith.constant 0 : i32
    %c0_i32_1 = arith.constant 0 : i32
    return %c0_i32, %c0_i32_0 : i32, i32
  }
  func.func @transform_4(%arg0: i32, %arg1: i32) -> (i32, i32) {
    %c0_i32 = arith.constant 0 : i32
    %c0_i32_0 = arith.constant 0 : i32
    %c0_i32_1 = arith.constant 0 : i32
    return %c0_i32, %c0_i32_0 : i32, i32
  }
  func.func @transform_5(%arg0: i32, %arg1: i32) -> (i32, i32) {
    %c0_i32 = arith.constant 0 : i32
    %c0_i32_0 = arith.constant 0 : i32
    %c0_i32_1 = arith.constant 0 : i32
    return %c0_i32, %c0_i32_0 : i32, i32
  }
  func.func @transform_6(%arg0: i32, %arg1: i32) -> (i32, i32) {
    %c0_i32 = arith.constant 0 : i32
    %c0_i32_0 = arith.constant 0 : i32
    %c0_i32_1 = arith.constant 0 : i32
    return %c0_i32, %c0_i32_0 : i32, i32
  }
  func.func @transform_7(%arg0: i32, %arg1: i32) -> (i32, i32) {
    %c0_i32 = arith.constant 0 : i32
    %c0_i32_0 = arith.constant 0 : i32
    %c0_i32_1 = arith.constant 0 : i32
    return %c0_i32, %c0_i32_0 : i32, i32
  }
  func.func @transform_8(%arg0: i32, %arg1: i32) -> (i32, i32) {
    %c0_i32 = arith.constant 0 : i32
    %c0_i32_0 = arith.constant 0 : i32
    %c0_i32_1 = arith.constant 0 : i32
    return %c0_i32, %c0_i32_0 : i32, i32
  }
  func.func @transform_9(%arg0: i32, %arg1: i32) -> (i32, i32) {
    %c0_i32 = arith.constant 0 : i32
    %c0_i32_0 = arith.constant 0 : i32
    return %arg0, %c0_i32 : i32, i32
  }
}

</mosaic_0001>

<bundles_post_ra>
// kernel: tpu_custom_call.1
= control target key start
LH: loop header
LB: loop body
LE: loop exit
PB: predicated region body
PF: predicated region fallthrough
CT: control target
= control target key end

     0   :  { %14 = vsyncpa [#allocation4], 0  ;;  %s10742_s0 = inlined_call_operand.hbm [shape: bf16[8,64,8], index: 0, kind: input, shape index: {}]   ;;  %s10743_s1 = inlined_call_operand.hbm [shape: bf16[8,64], index: 1, kind: input, shape index: {}]   ;;  %s10744_s2 = inlined_call_operand.hbm [shape: f32[3,64], index: 2, kind: input, shape index: {}]   ;;  %s10745_s3 = inlined_call_operand.hbm [shape: bf16[64,128], index: 3, kind: input, shape index: {}]   ;;  %s10746_s4 = inlined_call_operand.hbm [shape: f32[3,128], index: 4, kind: input, shape index: {}]   ;;  %s10747_s5 = inlined_call_operand.hbm [shape: bf16[128,256], index: 5, kind: input, shape index: {}]   ;;  %s10748_s6 = inlined_call_operand.hbm [shape: f32[3,256], index: 6, kind: input, shape index: {}]   ;;  %s10749_s7 = inlined_call_operand.hbm [shape: bf16[256,64], index: 7, kind: input, shape index: {}]   ;;  %s10750_s8 = inlined_call_operand.hbm [shape: f32[3,64], index: 8, kind: input, shape index: {}]   ;;  %s10751_s9 = inlined_call_operand.hbm [shape: f32[8,64], index: 9, kind: output, shape index: {}]  }
   0x1   :  { %15 = vsyncpa [#allocation7], 0 }
   0x2   :  { %16 = vsyncpa [#allocation10], 0 }
   0x3   :  { %17 = vsyncpa [#allocation13], 0 }
   0x4   :  { %18 = vsyncpa [#allocation16], 0 }
   0x5   :  { %19 = vsyncpa [#allocation5], 0  ;;  %s6550_s30 = smov [#allocation6]   ;;  %s6318_s13 = scalar_lea.hbm %s10743_s1, 64 }
   0x6   :  { %s38_s10 = sshll.u32 %s6550_s30, 4  ;;  %p6319_p0 = scmp.ne.s32.totalorder %s10743_s1, %s6318_s13  ;;  %s39_s10 = int_to_ptr.vmem [resolvable:$true] %s38_s10 }
   0x7   :  { %p6322_p1 = scmp.lt.u32.totalorder %s6318_s13, %s10743_s1 }
   0x9   :  { %p6324_p2 = pnand %p6322_p1, %p6319_p0 }
   0xb   :  { %6327 = shalt.err (!%p6324_p2)
}
   0xc   :  { %s6328_s18 = scalar_lea.vmem %s39_s10, 64  ;;  %p6333_p4 = scmp.lt.s32.totalorder %s39_s10, %s39_s10 }
   0xd   :  { %p6329_p3 = scmp.ne.s32.totalorder %s39_s10, %s6328_s18  ;;  %p6334_p5 = scmp.lt.s32.totalorder %s6328_s18, %s6328_s18 }
   0xf   :  { %p6335_p6 = por %p6334_p5, %p6333_p4 }
  0x11   :  { %p6336_p7 = pnand %p6335_p6, %p6329_p3 }
  0x13   :  { %6339 = shalt.err (!%p6336_p7)
}
  0x14   :  { %41 = dma.hbm_to_vmem [thread:$0]  %s10743_s1, 64, %s39_s10, [#allocation7]  }
  0x15   :  { %s6551_s21 = smov [#allocation9]   ;;  %s6552_s23 = smov [#allocation12]  }
  0x16   :  { %s57_s22 = sshll.u32 %s6551_s21, 4  ;;  %s79_s24 = sshll.u32 %s6552_s23, 4  ;;  %s58_s22 = int_to_ptr.vmem [resolvable:$true] %s57_s22  ;;  %s80_s24 = int_to_ptr.vmem [resolvable:$true] %s79_s24 }
  0x17   :  { %s6340_s27 = scalar_lea.hbm %s10745_s3, 512 }
  0x18   :  { %p6341_p8 = scmp.ne.s32.totalorder %s10745_s3, %s6340_s27  ;;  %p6344_p9 = scmp.lt.u32.totalorder %s6340_s27, %s10745_s3 }
  0x1a   :  { %p6346_p10 = pnand %p6344_p9, %p6341_p8 }
  0x1c   :  { %6349 = shalt.err (!%p6346_p10)
}
  0x1d   :  { %s6350_s1 = scalar_lea.vmem %s58_s22, 512  ;;  %p6355_p12 = scmp.lt.s32.totalorder %s58_s22, %s58_s22 }
  0x1e   :  { %p6351_p11 = scmp.ne.s32.totalorder %s58_s22, %s6350_s1  ;;  %p6356_p13 = scmp.lt.s32.totalorder %s6350_s1, %s6350_s1 }
  0x20   :  { %p6357_p0 = por %p6356_p13, %p6355_p12 }
  0x22   :  { %p6358_p1 = pnand %p6357_p0, %p6351_p11 }
  0x24   :  { %6361 = shalt.err (!%p6358_p1)
}
  0x25   :  { %s6553_s10 = smov 64   ;;  %s6554_s12 = smov 4  }
  0x26   :  { %63 = dma.hbm_to_vmem [thread:$0]  %s10745_s3, 512, %s58_s22, [#allocation10], %s6553_s10, %s6553_s10, %s6554_s12  }
  0x27   :  { %s6362_s17 = scalar_lea.hbm %s10747_s5, 2048 }
  0x28   :  { %p6363_p2 = scmp.ne.s32.totalorder %s10747_s5, %s6362_s17  ;;  %p6366_p3 = scmp.lt.u32.totalorder %s6362_s17, %s10747_s5 }
  0x2a   :  { %p6368_p4 = pnand %p6366_p3, %p6363_p2 }
  0x2c   :  { %6371 = shalt.err (!%p6368_p4)
}
  0x2d   :  { %s6372_s23 = scalar_lea.vmem %s80_s24, 2048  ;;  %p6377_p6 = scmp.lt.s32.totalorder %s80_s24, %s80_s24 }
  0x2e   :  { %p6373_p5 = scmp.ne.s32.totalorder %s80_s24, %s6372_s23  ;;  %p6378_p7 = scmp.lt.s32.totalorder %s6372_s23, %s6372_s23 }
  0x30   :  { %p6379_p8 = por %p6378_p7, %p6377_p6 }
  0x32   :  { %p6380_p9 = pnand %p6379_p8, %p6373_p5 }
  0x34   :  { %6383 = shalt.err (!%p6380_p9)
}
  0x35   :  { %s6555_s3 = smov 128   ;;  %s6556_s22 = smov 8  }
  0x36   :  { %85 = dma.hbm_to_vmem [thread:$0]  %s10747_s5, 2048, %s80_s24, [#allocation13], %s6555_s3, %s6555_s3, %s6556_s22  }
  0x37   :  { %s6557_s27 = smov [#allocation15]   ;;  %s6558_s29 = smov [#allocation3]  }
  0x38   :  { %s101_s28 = sshll.u32 %s6557_s27, 4  ;;  %s25_s30 = sshll.u32 %s6558_s29, 4  ;;  %s102_s28 = int_to_ptr.vmem [resolvable:$true] %s101_s28  ;;  %s26_s30 = int_to_ptr.vmem [resolvable:$true] %s25_s30 }
  0x39   :  { %s6384_s13 = scalar_lea.hbm %s10749_s7, 2048 }
  0x3a   :  { %p6385_p10 = scmp.ne.s32.totalorder %s10749_s7, %s6384_s13  ;;  %p6388_p11 = scmp.lt.u32.totalorder %s6384_s13, %s10749_s7 }
  0x3c   :  { %p6390_p12 = pnand %p6388_p11, %p6385_p10 }
  0x3e   :  { %6393 = shalt.err (!%p6390_p12)
}
  0x3f   :  { %s6394_s5 = scalar_lea.vmem %s102_s28, 2048  ;;  %p6399_p0 = scmp.lt.s32.totalorder %s102_s28, %s102_s28 }
  0x40   :  { %p6395_p13 = scmp.ne.s32.totalorder %s102_s28, %s6394_s5  ;;  %p6400_p1 = scmp.lt.s32.totalorder %s6394_s5, %s6394_s5 }
  0x42   :  { %p6401_p2 = por %p6400_p1, %p6399_p0 }
  0x44   :  { %p6402_p3 = pnand %p6401_p2, %p6395_p13 }
  0x46   :  { %6405 = shalt.err (!%p6402_p3)
}
  0x47   :  { %107 = dma.hbm_to_vmem [thread:$0]  %s10749_s7, 2048, %s102_s28, [#allocation16], %s6553_s10, %s6553_s10, %s6554_s12  }
  0x48   :  { %s6406_s21 = scalar_lea.hbm %s10742_s0, 4096 }
  0x49   :  { %p6407_p4 = scmp.ne.s32.totalorder %s10742_s0, %s6406_s21  ;;  %p6410_p5 = scmp.lt.u32.totalorder %s6406_s21, %s10742_s0 }
  0x4b   :  { %p6412_p6 = pnand %p6410_p5, %p6407_p4 }
  0x4d   :  { %6415 = shalt.err (!%p6412_p6)
}
  0x4e   :  { %s6416_s26 = scalar_lea.vmem %s26_s30, 4096  ;;  %p6421_p8 = scmp.lt.s32.totalorder %s26_s30, %s26_s30 }
  0x4f   :  { %p6417_p7 = scmp.ne.s32.totalorder %s26_s30, %s6416_s26  ;;  %p6422_p9 = scmp.lt.s32.totalorder %s6416_s26, %s6416_s26 }
  0x51   :  { %p6423_p10 = por %p6422_p9, %p6421_p8 }
  0x53   :  { %p6424_p11 = pnand %p6423_p10, %p6417_p7 }
  0x55   :  { %6427 = shalt.err (!%p6424_p11)
}
  0x56   :  { %31 = dma.hbm_to_vmem [thread:$0]  %s10742_s0, 4096, %s26_s30, [#allocation4], %s6553_s10, %s6553_s10, %s6554_s12  }
  0x57   :  { %s6559_s28 = smov [#allocation8]   ;;  %s6560_s11 = smov [#allocation11]  }
  0x58   :  { %s48_s29 = sshll.u32 %s6559_s28, 4  ;;  %s70_s1 = sshll.u32 %s6560_s11, 4  ;;  %s49_s29 = int_to_ptr.vmem [resolvable:$true] %s48_s29  ;;  %s71_s1 = int_to_ptr.vmem [resolvable:$true] %s70_s1 }
  0x59   :  { %s6428_s15 = scalar_lea.hbm %s10744_s2, 64 }
  0x5a   :  { %p6429_p12 = scmp.ne.s32.totalorder %s10744_s2, %s6428_s15  ;;  %p6432_p13 = scmp.lt.u32.totalorder %s6428_s15, %s10744_s2 }
  0x5c   :  { %p6434_p0 = pnand %p6432_p13, %p6429_p12 }
  0x5e   :  { %6437 = shalt.err (!%p6434_p0)
}
  0x5f   :  { %s6438_s0 = scalar_lea.vmem %s49_s29, 64  ;;  %p6443_p2 = scmp.lt.s32.totalorder %s49_s29, %s49_s29 }
  0x60   :  { %p6439_p1 = scmp.ne.s32.totalorder %s49_s29, %s6438_s0  ;;  %p6444_p3 = scmp.lt.s32.totalorder %s6438_s0, %s6438_s0 }
  0x62   :  { %p6445_p4 = por %p6444_p3, %p6443_p2 }
  0x64   :  { %p6446_p5 = pnand %p6445_p4, %p6439_p1 }
  0x66   :  { %6449 = shalt.err (!%p6446_p5)
}
  0x67   :  { %51 = dma.hbm_to_vmem [thread:$0]  %s10744_s2, 64, %s49_s29, [#allocation7]  }
  0x68   :  { %s6450_s19 = scalar_lea.hbm %s10746_s4, 64 }
  0x69   :  { %p6451_p6 = scmp.ne.s32.totalorder %s10746_s4, %s6450_s19  ;;  %p6454_p7 = scmp.lt.u32.totalorder %s6450_s19, %s10746_s4 }
  0x6b   :  { %p6456_p8 = pnand %p6454_p7, %p6451_p6 }
  0x6d   :  { %6459 = shalt.err (!%p6456_p8)
}
  0x6e   :  { %s6460_s22 = scalar_lea.vmem %s71_s1, 64  ;;  %p6465_p10 = scmp.lt.s32.totalorder %s71_s1, %s71_s1 }
  0x6f   :  { %p6461_p9 = scmp.ne.s32.totalorder %s71_s1, %s6460_s22  ;;  %p6466_p11 = scmp.lt.s32.totalorder %s6460_s22, %s6460_s22 }
  0x71   :  { %p6467_p12 = por %p6466_p11, %p6465_p10 }
  0x73   :  { %p6468_p13 = pnand %p6467_p12, %p6461_p9 }
  0x75   :  { %6471 = shalt.err (!%p6468_p13)
}
  0x76   :  { %73 = dma.hbm_to_vmem [thread:$0]  %s10746_s4, 64, %s71_s1, [#allocation10]  }
  0x77   :  { %s6561_s26 = smov [#allocation14]   ;;  %s6562_s27 = smov [#allocation17]  }
  0x78   :  { %s92_s7 = sshll.u32 %s6561_s26, 4  ;;  %s114_s28 = sshll.u32 %s6562_s27, 4  ;;  %s93_s7 = int_to_ptr.vmem [resolvable:$true] %s92_s7  ;;  %s115_s28 = int_to_ptr.vmem [resolvable:$true] %s114_s28 }
  0x79   :  { %s6472_s13 = scalar_lea.hbm %s10748_s6, 128 }
  0x7a   :  { %p6473_p0 = scmp.ne.s32.totalorder %s10748_s6, %s6472_s13  ;;  %p6476_p1 = scmp.lt.u32.totalorder %s6472_s13, %s10748_s6 }
  0x7c   :  { %p6478_p2 = pnand %p6476_p1, %p6473_p0 }
  0x7e   :  { %6481 = shalt.err (!%p6478_p2)
}
  0x7f   :  { %s6482_s4 = scalar_lea.vmem %s93_s7, 128  ;;  %p6487_p4 = scmp.lt.s32.totalorder %s93_s7, %s93_s7 }
  0x80   :  { %p6483_p3 = scmp.ne.s32.totalorder %s93_s7, %s6482_s4  ;;  %p6488_p5 = scmp.lt.s32.totalorder %s6482_s4, %s6482_s4 }
  0x82   :  { %p6489_p6 = por %p6488_p5, %p6487_p4 }
  0x84   :  { %p6490_p7 = pnand %p6489_p6, %p6483_p3 }
  0x86   :  { %6493 = shalt.err (!%p6490_p7)
}
  0x87   :  { %95 = dma.hbm_to_vmem [thread:$0]  %s10748_s6, 128, %s93_s7, [#allocation13]  }
  0x88   :  { %s6494_s10 = scalar_lea.hbm %s10750_s8, 64 }
  0x89   :  { %p6495_p8 = scmp.ne.s32.totalorder %s10750_s8, %s6494_s10  ;;  %p6498_p9 = scmp.lt.u32.totalorder %s6494_s10, %s10750_s8 }
  0x8b   :  { %p6500_p10 = pnand %p6498_p9, %p6495_p8 }
  0x8d   :  { %6503 = shalt.err (!%p6500_p10)
}
  0x8e   :  { %s6504_s20 = scalar_lea.vmem %s115_s28, 64  ;;  %p6509_p12 = scmp.lt.s32.totalorder %s115_s28, %s115_s28 }
  0x8f   :  { %p6505_p11 = scmp.ne.s32.totalorder %s115_s28, %s6504_s20  ;;  %p6510_p13 = scmp.lt.s32.totalorder %s6504_s20, %s6504_s20 }
  0x91   :  { %p6511_p0 = por %p6510_p13, %p6509_p12 }
  0x93   :  { %p6512_p1 = pnand %p6511_p0, %p6505_p11 }
  0x95   :  { %6515 = shalt.err (!%p6512_p1)
}
  0x96   :  { %117 = dma.hbm_to_vmem [thread:$0]  %s10750_s8, 64, %s115_s28, [#allocation16]  }
  0x97   :  { %6538 = dma.done.wait [#allocation4], 4096  }
  0x98   :  { %6539 = vsyncadd [#allocation4], 4294963200 }
  0x99   :  { %6540 = dma.done.wait [#allocation7], 128  }
  0x9a   :  { %6541 = vsyncadd [#allocation7], 4294967168 }
  0x9b   :  { %6542 = dma.done.wait [#allocation10], 576  }
  0x9c   :  { %6543 = vsyncadd [#allocation10], 4294966720 }
  0x9d   :  { %6544 = dma.done.wait [#allocation13], 2176  }
  0x9e   :  { %6545 = vsyncadd [#allocation13], 4294965120 }
  0x9f   :  { %6546 = dma.done.wait [#allocation16], 2112  }
  0xa0   :  { %6547 = vsyncadd [#allocation16], 4294965184  ;;  %vm479_vm0 = vcmask 1043456   ;;  %vm382_vm1 = vcmask 64512   ;;  %v216_v0 = vld [vmem:[#allocation6] sm:$0xf] }
  0xa1   :  { %5835 = vmatprep.subr.msk.bf16.mxu0 %vm479_vm0, %v216_v0  ;;  %v481_v1 = vsel %vm479_vm0, %v216_v0, 0  ;;  %v5851_v2 = vld [vmem:[#allocation3] sm:$0xff]   ;;  %v5852_v3 = vld [vmem:[#allocation3 + $0x8] sm:$0xff]   ;;  %v5853_v4 = vld [vmem:[#allocation3 + $0x10] sm:$0xff]   ;;  %vm774_vm2 = vcmask 523264   ;;  %vm5195_vm3 = vcmask 1041409  }
  0xa2   :  { %5682 = vmatpush3.bf16.msra.mxu0 %v481_v1  ;;  %5683 = vmatprep.mubr.msk.bf16.mxu0 %vm382_vm1, %v5851_v2  ;;  %v5854_v5 = vld [vmem:[#allocation3 + $0x18] sm:$0xff]   ;;  %v5855_v6 = vld [vmem:[#allocation3 + $0x20] sm:$0xff]   ;;  %v5856_v7 = vld [vmem:[#allocation3 + $0x28] sm:$0xff]   ;;  %vm5197_vm4 = vcmask 1042434   ;;  %vm5199_vm5 = vcmask 1043459   ;;  %vm5201_vm6 = vcmask 1044484  }
  0xa3   :  { %v5857_v8 = vld [vmem:[#allocation3 + $0x30] sm:$0xff]   ;;  %v5858_v9 = vld [vmem:[#allocation3 + $0x38] sm:$0xff]   ;;  %v5859_v10 = vld [vmem:[#allocation3 + $0x40] sm:$0xff]   ;;  %vm5203_vm7 = vcmask 1045509   ;;  %vm5205_vm8 = vcmask 1046534   ;;  %vm5207_vm9 = vcmask 1047559  }
  0xa4   :  { %v5860_v11 = vld [vmem:[#allocation3 + $0x48] sm:$0xff]   ;;  %v5861_v12 = vld [vmem:[#allocation3 + $0x50] sm:$0xff]   ;;  %v5862_v13 = vld [vmem:[#allocation3 + $0x58] sm:$0xff]   ;;  %s6564_s8 = smov [#allocation18]  }
  0xa5   :  { %5684 = vmatmul.mubr.msk.bf16.vlgmr.msra.gmra.mrb[0].mxu0 %vm382_vm1, %v5852_v3  ;;  %v5863_v14 = vld [vmem:[#allocation3 + $0x60] sm:$0xff]   ;;  %v5864_v15 = vld [vmem:[#allocation3 + $0x68] sm:$0xff]   ;;  %v5865_v16 = vld [vmem:[#allocation3 + $0x70] sm:$0xff]   ;;  %s5436_s23 = sshll.u32 %s6564_s8, 4  ;;  %s5437_s23 = int_to_ptr.vmem [resolvable:$true] %s5436_s23 }
  0xa6   :  { %5687 = vmatprep.mubr.msk.bf16.mxu0 %vm382_vm1, %v5853_v4  ;;  %v5866_v17 = vld [vmem:[#allocation3 + $0x78] sm:$0xff]   ;;  %v5867_v18 = vld [vmem:[#allocation3 + $0x80] sm:$0xff]   ;;  %v5868_v19 = vld [vmem:[#allocation3 + $0x88] sm:$0xff]   ;;  %s6516_s3 = scalar_lea.vmem %s5437_s23, 128  ;;  %p6521_p3 = scmp.lt.s32.totalorder %s5437_s23, %s5437_s23 }
  0xa7   :  { %v5869_v20 = vld [vmem:[#allocation3 + $0x90] sm:$0xff]   ;;  %v5870_v21 = vld [vmem:[#allocation3 + $0x98] sm:$0xff]   ;;  %v5871_v22 = vld [vmem:[#allocation3 + $0xa0] sm:$0xff]   ;;  %p6517_p2 = scmp.ne.s32.totalorder %s5437_s23, %s6516_s3  ;;  %p6522_p4 = scmp.lt.s32.totalorder %s6516_s3, %s6516_s3 }
  0xa8   :  { %v5872_v23 = vld [vmem:[#allocation3 + $0xa8] sm:$0xff]   ;;  %v5873_v24 = vld [vmem:[#allocation3 + $0xb0] sm:$0xff]   ;;  %v5874_v25 = vld [vmem:[#allocation3 + $0xb8] sm:$0xff]  }
  0xa9   :  { %v5875_v26 = vld [vmem:[#allocation3 + $0xc0] sm:$0xff]   ;;  %v5876_v27 = vld [vmem:[#allocation3 + $0xc8] sm:$0xff]   ;;  %v5877_v28 = vld [vmem:[#allocation3 + $0xd0] sm:$0xff]   ;;  %p6523_p5 = por %p6522_p4, %p6521_p3 }
  0xaa   :  { %v5878_v29 = vld [vmem:[#allocation3 + $0xd8] sm:$0xff]   ;;  %v5879_v30 = vld [vmem:[#allocation3 + $0xe0] sm:$0xff]   ;;  %v5880_v31 = vld [vmem:[#allocation3 + $0xe8] sm:$0xff]  }
  0xab   :  { %v5881_v32 = vld [vmem:[#allocation3 + $0xf0] sm:$0xff]   ;;  %v5882_v33 = vld [vmem:[#allocation3 + $0xf8] sm:$0xff]   ;;  %v6764_v34 = vld [vmem:[#allocation8] ss:$0 sm:$0xff]  ;;  %p6524_p6 = pnand %p6523_p5, %p6517_p2 }
  0xad   :  { %5688 = vmatmul.mubr.msk.bf16.gmra.mrb[4].mxu0 %vm382_vm1, %v5854_v5 }
  0xae   :  { %5691 = vmatprep.mubr.msk.bf16.mxu0 %vm382_vm1, %v5855_v6 }
  0xb5   :  { %5692 = vmatmul.mubr.msk.bf16.gmra.mrb[8].mxu0 %vm382_vm1, %v5856_v7 }
  0xb6   :  { %5695 = vmatprep.mubr.msk.bf16.mxu0 %vm382_vm1, %v5857_v8 }
  0xbd   :  { %5696 = vmatmul.mubr.msk.bf16.gmra.mrb[12].mxu0 %vm382_vm1, %v5858_v9 }
  0xbe   :  { %5699 = vmatprep.mubr.msk.bf16.mxu0 %vm382_vm1, %v5859_v10 }
  0xc5   :  { %5700 = vmatmul.mubr.msk.bf16.gmra.mrb[16].mxu0 %vm382_vm1, %v5860_v11 }
  0xc6   :  { %5703 = vmatprep.mubr.msk.bf16.mxu0 %vm382_vm1, %v5861_v12 }
  0xcd   :  { %5704 = vmatmul.mubr.msk.bf16.gmra.mrb[20].mxu0 %vm382_vm1, %v5862_v13 }
  0xce   :  { %5707 = vmatprep.mubr.msk.bf16.mxu0 %vm382_vm1, %v5863_v14 }
  0xd5   :  { %5708 = vmatmul.mubr.msk.bf16.gmra.mrb[24].mxu0 %vm382_vm1, %v5864_v15 }
  0xd6   :  { %5711 = vmatprep.mubr.msk.bf16.mxu0 %vm382_vm1, %v5865_v16 }
  0xdd   :  { %5712 = vmatmul.mubr.msk.bf16.gmra.mrb[28].mxu0 %vm382_vm1, %v5866_v17 }
  0xde   :  { %5715 = vmatprep.mubr.msk.bf16.mxu0 %vm382_vm1, %v5867_v18 }
  0xe5   :  { %5716 = vmatmul.mubr.msk.bf16.gmra.mrb[32].mxu0 %vm382_vm1, %v5868_v19 }
  0xe6   :  { %5719 = vmatprep.mubr.msk.bf16.mxu0 %vm382_vm1, %v5869_v20 }
  0xed   :  { %5720 = vmatmul.mubr.msk.bf16.gmra.mrb[36].mxu0 %vm382_vm1, %v5870_v21 }
  0xee   :  { %5723 = vmatprep.mubr.msk.bf16.mxu0 %vm382_vm1, %v5871_v22 }
  0xf5   :  { %5724 = vmatmul.mubr.msk.bf16.gmra.mrb[40].mxu0 %vm382_vm1, %v5872_v23 }
  0xf6   :  { %5727 = vmatprep.mubr.msk.bf16.mxu0 %vm382_vm1, %v5873_v24 }
  0xfd   :  { %5728 = vmatmul.mubr.msk.bf16.gmra.mrb[44].mxu0 %vm382_vm1, %v5874_v25 }
  0xfe   :  { %5731 = vmatprep.mubr.msk.bf16.mxu0 %vm382_vm1, %v5875_v26 }
 0x105   :  { %5732 = vmatmul.mubr.msk.bf16.gmra.mrb[48].mxu0 %vm382_vm1, %v5876_v27 }
 0x106   :  { %5735 = vmatprep.mubr.msk.bf16.mxu0 %vm382_vm1, %v5877_v28 }
 0x10d   :  { %5736 = vmatmul.mubr.msk.bf16.gmra.mrb[52].mxu0 %vm382_vm1, %v5878_v29 }
 0x10e   :  { %5739 = vmatprep.mubr.msk.bf16.mxu0 %vm382_vm1, %v5879_v30 }
 0x115   :  { %5740 = vmatmul.mubr.msk.bf16.gmra.mrb[56].mxu0 %vm382_vm1, %v5880_v31 }
 0x116   :  { %5743 = vmatprep.mubr.msk.bf16.mxu0 %vm382_vm1, %v5881_v32 }
 0x11d   :  { %5744 = vmatmul.mubr.msk.bf16.gmra.mrb[60].mxu0 %vm382_vm1, %v5882_v33 }
 0x178   :  { %v5685_v35 = vpop.f32.mrb[0].mxu0 }
 0x179   :  { %v6767_v36 = vadd.f32 %v5685_v35, %v6764_v34  ;;  %v517_v37 = vpop.f32.mrb[1].mxu0 }
 0x17a   :  { %v6770_v38 = vadd.f32 %v6764_v34, %v517_v37  ;;  %v5686_v39 = vpop.f32.mrb[2].mxu0 }
 0x17b   :  { %v6773_v40 = vadd.f32 %v5686_v39, %v6764_v34  ;;  %v520_v41 = vpop.f32.mrb[3].mxu0  ;;  %v781_v42 = vsel %vm774_vm2, %v6767_v36, 0.0 }
 0x17c   :  { %v6778_v43 = vadd.f32 %v6764_v34, %v520_v41  ;;  %782 = vadd.xlane.f32.xlu1 %v781_v42  ;;  %v775_v44 = vsel %vm774_vm2, %v6770_v38, 0.0 }
 0x17d   :  { %776 = vadd.xlane.f32.xlu0 %v775_v44  ;;  %v784_v45 = vsel %vm774_vm2, %v6773_v40, 0.0 }
 0x17e   :  { %v778_v47 = vsel %vm774_vm2, %v6778_v43, 0.0 }
 0x180   :  { %785 = vadd.xlane.f32.xlu1 %v784_v45  ;;  %v5689_v46 = vpop.f32.mrb[4].mxu0 }
 0x181   :  { %v6787_v48 = vadd.f32 %v5689_v46, %v6764_v34  ;;  %v533_v49 = vpop.f32.mrb[5].mxu0  ;;  %779 = vadd.xlane.f32.xlu0 %v778_v47 }
 0x182   :  { %v5690_v50 = vpop.f32.mrb[6].mxu0  ;;  %v6795_v54 = vadd.f32 %v6764_v34, %v533_v49 }
 0x183   :  { %v6790_v51 = vadd.f32 %v5690_v50, %v6764_v34  ;;  %v536_v52 = vpop.f32.mrb[7].mxu0  ;;  %v793_v53 = vsel %vm774_vm2, %v6787_v48, 0.0 }
 0x184   :  { %v6798_v55 = vadd.f32 %v6764_v34, %v536_v52  ;;  %v787_v58 = vsel %vm774_vm2, %v6795_v54, 0.0 }
 0x185   :  { %794 = vadd.xlane.f32.xlu0 %v793_v53  ;;  %v796_v56 = vsel %vm774_vm2, %v6790_v51, 0.0 }
 0x186   :  { %797 = vadd.xlane.f32.xlu1 %v796_v56  ;;  %v790_v61 = vsel %vm774_vm2, %v6798_v55, 0.0 }
 0x188   :  { %v5693_v57 = vpop.f32.mrb[8].mxu0 }
 0x189   :  { %v6805_v59 = vadd.f32 %v5693_v57, %v6764_v34  ;;  %v549_v60 = vpop.f32.mrb[9].mxu0  ;;  %788 = vadd.xlane.f32.xlu0 %v787_v58 }
 0x18a   :  { %v5694_v62 = vpop.f32.mrb[10].mxu0  ;;  %791 = vadd.xlane.f32.xlu1 %v790_v61  ;;  %v6815_v2 = vadd.f32 %v6764_v34, %v549_v60 }
 0x18b   :  { %v6810_v63 = vadd.f32 %v5694_v62, %v6764_v34  ;;  %v552_v0 = vpop.f32.mrb[11].mxu0  ;;  %v805_v1 = vsel %vm774_vm2, %v6805_v59, 0.0 }
 0x18c   :  { %v6818_v3 = vadd.f32 %v6764_v34, %v552_v0  ;;  %v799_v6 = vsel %vm774_vm2, %v6815_v2, 0.0 }
 0x18d   :  { %806 = vadd.xlane.f32.xlu0 %v805_v1  ;;  %v808_v4 = vsel %vm774_vm2, %v6810_v63, 0.0 }
 0x18e   :  { %809 = vadd.xlane.f32.xlu1 %v808_v4  ;;  %v802_v9 = vsel %vm774_vm2, %v6818_v3, 0.0 }
 0x190   :  { %v5697_v5 = vpop.f32.mrb[12].mxu0 }
 0x191   :  { %v6825_v7 = vadd.f32 %v5697_v5, %v6764_v34  ;;  %v565_v8 = vpop.f32.mrb[13].mxu0  ;;  %800 = vadd.xlane.f32.xlu0 %v799_v6 }
 0x192   :  { %v5698_v10 = vpop.f32.mrb[14].mxu0  ;;  %803 = vadd.xlane.f32.xlu1 %v802_v9  ;;  %v6835_v14 = vadd.f32 %v6764_v34, %v565_v8 }
 0x193   :  { %v6830_v11 = vadd.f32 %v5698_v10, %v6764_v34  ;;  %v568_v12 = vpop.f32.mrb[15].mxu0  ;;  %v817_v13 = vsel %vm774_vm2, %v6825_v7, 0.0 }
 0x194   :  { %v6838_v15 = vadd.f32 %v6764_v34, %v568_v12  ;;  %v811_v18 = vsel %vm774_vm2, %v6835_v14, 0.0 }
 0x195   :  { %818 = vadd.xlane.f32.xlu0 %v817_v13  ;;  %v820_v16 = vsel %vm774_vm2, %v6830_v11, 0.0 }
 0x196   :  { %821 = vadd.xlane.f32.xlu1 %v820_v16  ;;  %v814_v21 = vsel %vm774_vm2, %v6838_v15, 0.0 }
 0x198   :  { %v5701_v17 = vpop.f32.mrb[16].mxu0 }
 0x199   :  { %v6845_v19 = vadd.f32 %v5701_v17, %v6764_v34  ;;  %v581_v20 = vpop.f32.mrb[17].mxu0  ;;  %812 = vadd.xlane.f32.xlu0 %v811_v18 }
 0x19a   :  { %v5702_v22 = vpop.f32.mrb[18].mxu0  ;;  %815 = vadd.xlane.f32.xlu1 %v814_v21  ;;  %v6855_v26 = vadd.f32 %v6764_v34, %v581_v20 }
 0x19b   :  { %v6850_v23 = vadd.f32 %v5702_v22, %v6764_v34  ;;  %v584_v24 = vpop.f32.mrb[19].mxu0  ;;  %v829_v25 = vsel %vm774_vm2, %v6845_v19, 0.0 }
 0x19c   :  { %v6858_v27 = vadd.f32 %v6764_v34, %v584_v24  ;;  %v823_v30 = vsel %vm774_vm2, %v6855_v26, 0.0 }
 0x19d   :  { %830 = vadd.xlane.f32.xlu0 %v829_v25  ;;  %v832_v28 = vsel %vm774_vm2, %v6850_v23, 0.0 }
 0x19e   :  { %833 = vadd.xlane.f32.xlu1 %v832_v28  ;;  %v826_v33 = vsel %vm774_vm2, %v6858_v27, 0.0 }
 0x1a0   :  { %v5705_v29 = vpop.f32.mrb[20].mxu0 }
 0x1a1   :  { %v6865_v31 = vadd.f32 %v5705_v29, %v6764_v34  ;;  %v597_v32 = vpop.f32.mrb[21].mxu0  ;;  %824 = vadd.xlane.f32.xlu0 %v823_v30 }
 0x1a2   :  { %v5706_v35 = vpop.f32.mrb[22].mxu0  ;;  %827 = vadd.xlane.f32.xlu1 %v826_v33  ;;  %v6875_v42 = vadd.f32 %v6764_v34, %v597_v32 }
 0x1a3   :  { %v6870_v37 = vadd.f32 %v5706_v35, %v6764_v34  ;;  %v600_v39 = vpop.f32.mrb[23].mxu0  ;;  %v841_v41 = vsel %vm774_vm2, %v6865_v31, 0.0 }
 0x1a4   :  { %v6878_v44 = vadd.f32 %v6764_v34, %v600_v39  ;;  %v835_v47 = vsel %vm774_vm2, %v6875_v42, 0.0 }
 0x1a5   :  { %842 = vadd.xlane.f32.xlu0 %v841_v41  ;;  %v844_v45 = vsel %vm774_vm2, %v6870_v37, 0.0 }
 0x1a6   :  { %845 = vadd.xlane.f32.xlu1 %v844_v45  ;;  %v838_v52 = vsel %vm774_vm2, %v6878_v44, 0.0 }
 0x1a8   :  { %v5709_v46 = vpop.f32.mrb[24].mxu0 }
 0x1a9   :  { %v6885_v49 = vadd.f32 %v5709_v46, %v6764_v34  ;;  %v613_v50 = vpop.f32.mrb[25].mxu0  ;;  %836 = vadd.xlane.f32.xlu0 %v835_v47 }
 0x1aa   :  { %v5710_v53 = vpop.f32.mrb[26].mxu0  ;;  %839 = vadd.xlane.f32.xlu1 %v838_v52  ;;  %v6895_v60 = vadd.f32 %v6764_v34, %v613_v50 }
 0x1ab   :  { %v6890_v56 = vadd.f32 %v5710_v53, %v6764_v34  ;;  %v616_v57 = vpop.f32.mrb[27].mxu0  ;;  %v853_v58 = vsel %vm774_vm2, %v6885_v49, 0.0 }
 0x1ac   :  { %v6898_v61 = vadd.f32 %v6764_v34, %v616_v57  ;;  %v847_v1 = vsel %vm774_vm2, %v6895_v60, 0.0 }
 0x1ad   :  { %854 = vadd.xlane.f32.xlu0 %v853_v58  ;;  %v856_v62 = vsel %vm774_vm2, %v6890_v56, 0.0 }
 0x1ae   :  { %857 = vadd.xlane.f32.xlu1 %v856_v62  ;;  %v850_v6 = vsel %vm774_vm2, %v6898_v61, 0.0 }
 0x1b0   :  { %v5713_v0 = vpop.f32.mrb[28].mxu0 }
 0x1b1   :  { %v6905_v4 = vadd.f32 %v5713_v0, %v6764_v34  ;;  %v629_v5 = vpop.f32.mrb[29].mxu0  ;;  %848 = vadd.xlane.f32.xlu0 %v847_v1 }
 0x1b2   :  { %v5714_v8 = vpop.f32.mrb[30].mxu0  ;;  %851 = vadd.xlane.f32.xlu1 %v850_v6  ;;  %v6915_v13 = vadd.f32 %v6764_v34, %v629_v5 }
 0x1b3   :  { %v6910_v9 = vadd.f32 %v5714_v8, %v6764_v34  ;;  %v632_v10 = vpop.f32.mrb[31].mxu0  ;;  %v865_v12 = vsel %vm774_vm2, %v6905_v4, 0.0 }
 0x1b4   :  { %v6918_v16 = vadd.f32 %v6764_v34, %v632_v10  ;;  %v859_v20 = vsel %vm774_vm2, %v6915_v13, 0.0 }
 0x1b5   :  { %866 = vadd.xlane.f32.xlu0 %v865_v12  ;;  %v868_v17 = vsel %vm774_vm2, %v6910_v9, 0.0 }
 0x1b6   :  { %869 = vadd.xlane.f32.xlu1 %v868_v17  ;;  %v862_v24 = vsel %vm774_vm2, %v6918_v16, 0.0 }
 0x1b8   :  { %v5717_v18 = vpop.f32.mrb[32].mxu0 }
 0x1b9   :  { %v6925_v21 = vadd.f32 %v5717_v18, %v6764_v34  ;;  %v645_v22 = vpop.f32.mrb[33].mxu0  ;;  %860 = vadd.xlane.f32.xlu0 %v859_v20 }
 0x1ba   :  { %v5718_v25 = vpop.f32.mrb[34].mxu0  ;;  %863 = vadd.xlane.f32.xlu1 %v862_v24  ;;  %v6935_v32 = vadd.f32 %v6764_v34, %v645_v22 }
 0x1bb   :  { %v6930_v28 = vadd.f32 %v5718_v25, %v6764_v34  ;;  %v648_v29 = vpop.f32.mrb[35].mxu0  ;;  %v877_v30 = vsel %vm774_vm2, %v6925_v21, 0.0 }
 0x1bc   :  { %v6938_v33 = vadd.f32 %v6764_v34, %v648_v29  ;;  %v871_v41 = vsel %vm774_vm2, %v6935_v32, 0.0 }
 0x1bd   :  { %878 = vadd.xlane.f32.xlu0 %v877_v30  ;;  %v880_v35 = vsel %vm774_vm2, %v6930_v28, 0.0 }
 0x1be   :  { %881 = vadd.xlane.f32.xlu1 %v880_v35  ;;  %v874_v47 = vsel %vm774_vm2, %v6938_v33, 0.0 }
 0x1c0   :  { %v5721_v39 = vpop.f32.mrb[36].mxu0 }
 0x1c1   :  { %v6945_v45 = vadd.f32 %v5721_v39, %v6764_v34  ;;  %v661_v46 = vpop.f32.mrb[37].mxu0  ;;  %872 = vadd.xlane.f32.xlu0 %v871_v41 }
 0x1c2   :  { %v5722_v50 = vpop.f32.mrb[38].mxu0  ;;  %875 = vadd.xlane.f32.xlu1 %v874_v47  ;;  %v6955_v58 = vadd.f32 %v6764_v34, %v661_v46 }
 0x1c3   :  { %v6950_v52 = vadd.f32 %v5722_v50, %v6764_v34  ;;  %v664_v53 = vpop.f32.mrb[39].mxu0  ;;  %v889_v57 = vsel %vm774_vm2, %v6945_v45, 0.0 }
 0x1c4   :  { %v6958_v62 = vadd.f32 %v6764_v34, %v664_v53  ;;  %v883_v5 = vsel %vm774_vm2, %v6955_v58, 0.0 }
 0x1c5   :  { %890 = vadd.xlane.f32.xlu0 %v889_v57  ;;  %v892_v0 = vsel %vm774_vm2, %v6950_v52, 0.0 }
 0x1c6   :  { %893 = vadd.xlane.f32.xlu1 %v892_v0  ;;  %v886_v10 = vsel %vm774_vm2, %v6958_v62, 0.0 }
 0x1c8   :  { %v5725_v1 = vpop.f32.mrb[40].mxu0 }
 0x1c9   :  { %v6965_v6 = vadd.f32 %v5725_v1, %v6764_v34  ;;  %v677_v8 = vpop.f32.mrb[41].mxu0  ;;  %884 = vadd.xlane.f32.xlu0 %v883_v5 }
 0x1ca   :  { %v6970_v12 = vadd.f32 %v6764_v34, %v677_v8  ;;  %v5726_v17 = vpop.f32.mrb[42].mxu0  ;;  %887 = vadd.xlane.f32.xlu1 %v886_v10 }
 0x1cb   :  { %v6973_v18 = vadd.f32 %v5726_v17, %v6764_v34  ;;  %v901_v20 = vsel %vm774_vm2, %v6965_v6, 0.0  ;;  %v680_v22 = vpop.f32.mrb[43].mxu0 }
 0x1cc   :  { %v6978_v24 = vadd.f32 %v6764_v34, %v680_v22  ;;  %v895_v29 = vsel %vm774_vm2, %v6970_v12, 0.0 }
 0x1cd   :  { %902 = vadd.xlane.f32.xlu0 %v901_v20  ;;  %v904_v25 = vsel %vm774_vm2, %v6973_v18, 0.0 }
 0x1ce   :  { %905 = vadd.xlane.f32.xlu1 %v904_v25  ;;  %v898_v30 = vsel %vm774_vm2, %v6978_v24, 0.0 }
 0x1d0   :  { %v5729_v35 = vpop.f32.mrb[44].mxu0 }
 0x1d1   :  { %v6987_v39 = vadd.f32 %v5729_v35, %v6764_v34  ;;  %v693_v41 = vpop.f32.mrb[45].mxu0  ;;  %896 = vadd.xlane.f32.xlu0 %v895_v29 }
 0x1d2   :  { %v6990_v46 = vadd.f32 %v6764_v34, %v693_v41  ;;  %v5730_v47 = vpop.f32.mrb[46].mxu0  ;;  %899 = vadd.xlane.f32.xlu1 %v898_v30 }
 0x1d3   :  { %11025 = vst [vmem:[#allocation25_spill] sm:$0xff] %v6987_v39  ;;  %v6993_v50 = vadd.f32 %v5730_v47, %v6764_v34  ;;  %v913_v53 = vsel %vm774_vm2, %v6987_v39, 0.0  ;;  %v696_v57 = vpop.f32.mrb[47].mxu0 }
 0x1d4   :  { %v6998_v0 = vadd.f32 %v6764_v34, %v696_v57  ;;  %v907_v5 = vsel %vm774_vm2, %v6990_v46, 0.0 }
 0x1d5   :  { %11026 = vst [vmem:[#allocation26_spill] sm:$0xff] %v6993_v50  ;;  %914 = vadd.xlane.f32.xlu0 %v913_v53  ;;  %v916_v1 = vsel %vm774_vm2, %v6993_v50, 0.0 }
 0x1d6   :  { %11027 = vst [vmem:[#allocation27_spill] sm:$0xff] %v6998_v0  ;;  %917 = vadd.xlane.f32.xlu1 %v916_v1  ;;  %v910_v8 = vsel %vm774_vm2, %v6998_v0, 0.0 }
 0x1d8   :  { %v5733_v10 = vpop.f32.mrb[48].mxu0 }
 0x1d9   :  { %v7007_v17 = vadd.f32 %v5733_v10, %v6764_v34  ;;  %v709_v20 = vpop.f32.mrb[49].mxu0  ;;  %908 = vadd.xlane.f32.xlu0 %v907_v5 }
 0x1da   :  { %v7010_v22 = vadd.f32 %v6764_v34, %v709_v20  ;;  %v5734_v25 = vpop.f32.mrb[50].mxu0  ;;  %911 = vadd.xlane.f32.xlu1 %v910_v8 }
 0x1db   :  { %11028 = vst [vmem:[#allocation28_spill] sm:$0xff] %v7007_v17  ;;  %v7013_v29 = vadd.f32 %v5734_v25, %v6764_v34  ;;  %v925_v30 = vsel %vm774_vm2, %v7007_v17, 0.0  ;;  %v712_v35 = vpop.f32.mrb[51].mxu0 }
 0x1dc   :  { %11029 = vst [vmem:[#allocation29_spill] sm:$0xff] %v7010_v22  ;;  %v7018_v41 = vadd.f32 %v6764_v34, %v712_v35  ;;  %v919_v53 = vsel %vm774_vm2, %v7010_v22, 0.0 }
 0x1dd   :  { %11030 = vst [vmem:[#allocation30_spill] sm:$0xff] %v7013_v29  ;;  %926 = vadd.xlane.f32.xlu0 %v925_v30  ;;  %v928_v47 = vsel %vm774_vm2, %v7013_v29, 0.0 }
 0x1de   :  { %11031 = vst [vmem:[#allocation31_spill] sm:$0xff] %v7018_v41  ;;  %929 = vadd.xlane.f32.xlu1 %v928_v47  ;;  %v922_v57 = vsel %vm774_vm2, %v7018_v41, 0.0 }
 0x1e0   :  { %v5737_v1 = vpop.f32.mrb[52].mxu0 }
 0x1e1   :  { %v7027_v5 = vadd.f32 %v5737_v1, %v6764_v34  ;;  %v725_v8 = vpop.f32.mrb[53].mxu0  ;;  %920 = vadd.xlane.f32.xlu0 %v919_v53 }
 0x1e2   :  { %v7030_v10 = vadd.f32 %v6764_v34, %v725_v8  ;;  %v5738_v20 = vpop.f32.mrb[54].mxu0  ;;  %923 = vadd.xlane.f32.xlu1 %v922_v57 }
 0x1e3   :  { %11032 = vst [vmem:[#allocation32_spill] sm:$0xff] %v7027_v5  ;;  %v7033_v25 = vadd.f32 %v5738_v20, %v6764_v34  ;;  %v937_v30 = vsel %vm774_vm2, %v7027_v5, 0.0  ;;  %v728_v35 = vpop.f32.mrb[55].mxu0 }
 0x1e4   :  { %11033 = vst [vmem:[#allocation33_spill] sm:$0xff] %v7030_v10  ;;  %v7038_v47 = vadd.f32 %v6764_v34, %v728_v35  ;;  %v931_v53 = vsel %vm774_vm2, %v7030_v10, 0.0 }
 0x1e5   :  { %11034 = vst [vmem:[#allocation34_spill] sm:$0xff] %v7033_v25  ;;  %938 = vadd.xlane.f32.xlu0 %v937_v30  ;;  %v940_v1 = vsel %vm774_vm2, %v7033_v25, 0.0 }
 0x1e6   :  { %11035 = vst [vmem:[#allocation35_spill] sm:$0xff] %v7038_v47  ;;  %941 = vadd.xlane.f32.xlu1 %v940_v1  ;;  %v934_v57 = vsel %vm774_vm2, %v7038_v47, 0.0 }
 0x1e8   :  { %v7046_v8 = vpop.f32.mrb[56].mxu0 }
 0x1e9   :  { %v741_v20 = vpop.f32.mrb[57].mxu0  ;;  %932 = vadd.xlane.f32.xlu0 %v931_v53 }
 0x1ea   :  { %v7049_v5 = vadd.f32 %v6764_v34, %v741_v20  ;;  %v7051_v35 = vpop.f32.mrb[58].mxu0  ;;  %935 = vadd.xlane.f32.xlu1 %v934_v57 }
 0x1eb   :  { %v744_v30 = vpop.f32.mrb[59].mxu0 }
 0x1ec   :  { %11036 = vst [vmem:[#allocation36_spill] sm:$0xff] %v7049_v5  ;;  %v7054_v25 = vadd.f32 %v6764_v34, %v744_v30  ;;  %v943_v1 = vsel %vm774_vm2, %v7049_v5, 0.0 }
 0x1ed   :  { %944 = vadd.xlane.f32.xlu0 %v943_v1 }
 0x1ee   :  { %11037 = vst [vmem:[#allocation37_spill] sm:$0xff] %v7054_v25  ;;  %v946_v47 = vsel %vm774_vm2, %v7054_v25, 0.0 }
 0x1ef   :  { %947 = vadd.xlane.f32.xlu1 %v946_v47 }
 0x1f0   :  { %v7060_v10 = vpop.f32.mrb[60].mxu0 }
 0x1f1   :  { %v7062_v53 = vpop.f32.mrb[61].mxu0 }
 0x1f2   :  { %v7064_v20 = vpop.f32.mrb[62].mxu0 }
 0x1f3   :  { %v7066_v29 = vpop.f32.mrb[63].mxu0 }
 0x209   :  { %v783_v57 = vpop.xlane.xlu1 %782 }
 0x20a   :  { %v970_v17 = vmul.f32 0.015625, %v783_v57  ;;  %v777_v30 = vpop.xlane.xlu0 %776 }
 0x20b   :  { %v968_v41 = vmul.f32 0.015625, %v777_v30 }
 0x20c   :  { %v7069_v22 = vsub.f32 %v6767_v36, %v970_v17 }
 0x20d   :  { %v7072_v1 = vsub.f32 %v6770_v38, %v968_v41  ;;  %v786_v25 = vpop.xlane.xlu1 %785 }
 0x20e   :  { %11038 = vst [vmem:[#allocation38_spill] sm:$0xff] %v7069_v22  ;;  %v971_v47 = vmul.f32 0.015625, %v786_v25  ;;  %v780_v5 = vpop.xlane.xlu0 %779  ;;  %v1098_v50 = vmul.f32 %v7069_v22, %v7069_v22 }
 0x20f   :  { %v969_v39 = vmul.f32 0.015625, %v780_v5  ;;  %v1096_v30 = vmul.f32 %v7072_v1, %v7072_v1 }
 0x210   :  { %v7077_v0 = vsub.f32 %v6773_v40, %v971_v47  ;;  %v1166_v57 = vsel %vm774_vm2, %v1098_v50, 0.0 }
 0x211   :  { %v7083_v36 = vsub.f32 %v6778_v43, %v969_v39  ;;  %1167 = vadd.xlane.f32.xlu0 %v1166_v57  ;;  %v1160_v40 = vsel %vm774_vm2, %v1096_v30, 0.0 }
 0x212   :  { %v795_v38 = vpop.xlane.xlu0 %794  ;;  %v1099_v17 = vmul.f32 %v7077_v0, %v7077_v0 }
 0x213   :  { %11039 = vst [vmem:[#allocation39_spill] sm:$0xff] %v7083_v36  ;;  %v974_v41 = vmul.f32 0.015625, %v795_v38  ;;  %v798_v25 = vpop.xlane.xlu1 %797  ;;  %v1097_v50 = vmul.f32 %v7083_v36, %v7083_v36 }
 0x214   :  { %v975_v22 = vmul.f32 0.015625, %v798_v25  ;;  %v1169_v5 = vsel %vm774_vm2, %v1099_v17, 0.0 }
 0x215   :  { %v7092_v47 = vsub.f32 %v6787_v48, %v974_v41  ;;  %1170 = vadd.xlane.f32.xlu1 %v1169_v5  ;;  %1161 = vadd.xlane.f32.xlu0 %v1160_v40  ;;  %v1163_v30 = vsel %vm774_vm2, %v1097_v50, 0.0 }
 0x216   :  { %v7095_v43 = vsub.f32 %v6790_v51, %v975_v22  ;;  %v789_v39 = vpop.xlane.xlu0 %788 }
 0x217   :  { %v972_v57 = vmul.f32 0.015625, %v789_v39  ;;  %v792_v38 = vpop.xlane.xlu1 %791  ;;  %v1102_v25 = vmul.f32 %v7092_v47, %v7092_v47 }
 0x218   :  { %v973_v17 = vmul.f32 0.015625, %v792_v38  ;;  %v1103_v36 = vmul.f32 %v7095_v43, %v7095_v43 }
 0x219   :  { %v7103_v48 = vsub.f32 %v6795_v54, %v972_v57  ;;  %1164 = vadd.xlane.f32.xlu1 %v1163_v30  ;;  %v1178_v41 = vsel %vm774_vm2, %v1102_v25, 0.0 }
 0x21a   :  { %v7107_v51 = vsub.f32 %v6798_v55, %v973_v17  ;;  %1179 = vadd.xlane.f32.xlu0 %v1178_v41  ;;  %v807_v22 = vpop.xlane.xlu0 %806  ;;  %v1181_v38 = vsel %vm774_vm2, %v1103_v36, 0.0 }
 0x21b   :  { %v978_v5 = vmul.f32 0.015625, %v807_v22  ;;  %v810_v40 = vpop.xlane.xlu1 %809  ;;  %v1100_v39 = vmul.f32 %v7103_v48, %v7103_v48 }
 0x21c   :  { %v979_v50 = vmul.f32 0.015625, %v810_v40  ;;  %v1101_v54 = vmul.f32 %v7107_v51, %v7107_v51 }
 0x21d   :  { %v7115_v57 = vsub.f32 %v6805_v59, %v978_v5  ;;  %1182 = vadd.xlane.f32.xlu1 %v1181_v38  ;;  %v1172_v55 = vsel %vm774_vm2, %v1100_v39, 0.0 }
 0x21e   :  { %v7119_v25 = vsub.f32 %v6810_v63, %v979_v50  ;;  %1173 = vadd.xlane.f32.xlu0 %v1172_v55  ;;  %v801_v17 = vpop.xlane.xlu0 %800  ;;  %v1175_v40 = vsel %vm774_vm2, %v1101_v54, 0.0 }
 0x21f   :  { %v976_v30 = vmul.f32 0.015625, %v801_v17  ;;  %v804_v41 = vpop.xlane.xlu1 %803  ;;  %v1106_v22 = vmul.f32 %v7115_v57, %v7115_v57 }
 0x220   :  { %v977_v36 = vmul.f32 0.015625, %v804_v41  ;;  %v1107_v59 = vmul.f32 %v7119_v25, %v7119_v25 }
 0x221   :  { %v7127_v5 = vsub.f32 %v6815_v2, %v976_v30  ;;  %1176 = vadd.xlane.f32.xlu1 %v1175_v40  ;;  %v1190_v63 = vsel %vm774_vm2, %v1106_v22, 0.0 }
 0x222   :  { %v7131_v39 = vsub.f32 %v6818_v3, %v977_v36  ;;  %1191 = vadd.xlane.f32.xlu0 %v1190_v63  ;;  %v819_v50 = vpop.xlane.xlu0 %818  ;;  %v1193_v41 = vsel %vm774_vm2, %v1107_v59, 0.0 }
 0x223   :  { %v982_v38 = vmul.f32 0.015625, %v819_v50  ;;  %v822_v55 = vpop.xlane.xlu1 %821  ;;  %v1104_v17 = vmul.f32 %v7127_v5, %v7127_v5 }
 0x224   :  { %v983_v54 = vmul.f32 0.015625, %v822_v55  ;;  %v1105_v2 = vmul.f32 %v7131_v39, %v7131_v39 }
 0x225   :  { %v7139_v30 = vsub.f32 %v6825_v7, %v982_v38  ;;  %1194 = vadd.xlane.f32.xlu1 %v1193_v41  ;;  %v1184_v3 = vsel %vm774_vm2, %v1104_v17, 0.0 }
 0x226   :  { %v7143_v22 = vsub.f32 %v6830_v11, %v983_v54  ;;  %1185 = vadd.xlane.f32.xlu0 %v1184_v3  ;;  %v813_v36 = vpop.xlane.xlu0 %812  ;;  %v1187_v55 = vsel %vm774_vm2, %v1105_v2, 0.0 }
 0x227   :  { %v980_v40 = vmul.f32 0.015625, %v813_v36  ;;  %v816_v63 = vpop.xlane.xlu1 %815  ;;  %v1110_v50 = vmul.f32 %v7139_v30, %v7139_v30 }
 0x228   :  { %v981_v59 = vmul.f32 0.015625, %v816_v63  ;;  %v1111_v7 = vmul.f32 %v7143_v22, %v7143_v22 }
 0x229   :  { %v7151_v38 = vsub.f32 %v6835_v14, %v980_v40  ;;  %1188 = vadd.xlane.f32.xlu1 %v1187_v55  ;;  %v1202_v11 = vsel %vm774_vm2, %v1110_v50, 0.0 }
 0x22a   :  { %v7155_v17 = vsub.f32 %v6838_v15, %v981_v59  ;;  %1203 = vadd.xlane.f32.xlu0 %v1202_v11  ;;  %v831_v54 = vpop.xlane.xlu0 %830  ;;  %v1205_v63 = vsel %vm774_vm2, %v1111_v7, 0.0 }
 0x22b   :  { %v986_v41 = vmul.f32 0.015625, %v831_v54  ;;  %v834_v3 = vpop.xlane.xlu1 %833  ;;  %v1108_v36 = vmul.f32 %v7151_v38, %v7151_v38 }
 0x22c   :  { %v987_v2 = vmul.f32 0.015625, %v834_v3  ;;  %v1109_v14 = vmul.f32 %v7155_v17, %v7155_v17 }
 0x22d   :  { %v7163_v40 = vsub.f32 %v6845_v19, %v986_v41  ;;  %1206 = vadd.xlane.f32.xlu1 %v1205_v63  ;;  %v1196_v15 = vsel %vm774_vm2, %v1108_v36, 0.0  ;;  %v5883_v41 = vld [vmem:[#allocation9] sm:$0xff]  }
 0x22e   :  { %v7167_v50 = vsub.f32 %v6850_v23, %v987_v2  ;;  %1197 = vadd.xlane.f32.xlu0 %v1196_v15  ;;  %v825_v59 = vpop.xlane.xlu0 %824  ;;  %v1199_v3 = vsel %vm774_vm2, %v1109_v14, 0.0  ;;  %5747 = vmatprep.subr.bf16.mxu1 %v5883_v41 }
 0x22f   :  { %v984_v55 = vmul.f32 0.015625, %v825_v59  ;;  %v828_v11 = vpop.xlane.xlu1 %827  ;;  %v1114_v54 = vmul.f32 %v7163_v40, %v7163_v40  ;;  %5748 = vmatpush3.bf16.msra.mxu1 %v5883_v41 }
 0x230   :  { %11040 = vst [vmem:[#allocation40_spill] sm:$0xff] %v7167_v50  ;;  %v985_v7 = vmul.f32 0.015625, %v828_v11  ;;  %v1115_v19 = vmul.f32 %v7167_v50, %v7167_v50 }
 0x231   :  { %v7175_v63 = vsub.f32 %v6855_v26, %v984_v55  ;;  %1200 = vadd.xlane.f32.xlu1 %v1199_v3  ;;  %v1214_v23 = vsel %vm774_vm2, %v1114_v54, 0.0  ;;  %v5884_v55 = vld [vmem:[#allocation9 + $0x8] sm:$0xff]  }
 0x232   :  { %v7179_v36 = vsub.f32 %v6858_v27, %v985_v7  ;;  %1215 = vadd.xlane.f32.xlu0 %v1214_v23  ;;  %v843_v2 = vpop.xlane.xlu0 %842  ;;  %v1217_v50 = vsel %vm774_vm2, %v1115_v19, 0.0  ;;  %5749 = vmatprep.subr.bf16.mxu1 %v5884_v55 }
 0x233   :  { %v990_v15 = vmul.f32 0.015625, %v843_v2  ;;  %v846_v59 = vpop.xlane.xlu1 %845  ;;  %v1112_v14 = vmul.f32 %v7175_v63, %v7175_v63  ;;  %5750 = vmatpush3.bf16.msra.mxu1 %v5884_v55 }
 0x234   :  { %v991_v11 = vmul.f32 0.015625, %v846_v59  ;;  %v1113_v26 = vmul.f32 %v7179_v36, %v7179_v36 }
 0x235   :  { %v7187_v54 = vsub.f32 %v6865_v31, %v990_v15  ;;  %1218 = vadd.xlane.f32.xlu1 %v1217_v50  ;;  %v1208_v27 = vsel %vm774_vm2, %v1112_v14, 0.0  ;;  %v5885_v50 = vld [vmem:[#allocation9 + $0x10] sm:$0xff]  }
 0x236   :  { %v7191_v7 = vsub.f32 %v6870_v37, %v991_v11  ;;  %1209 = vadd.xlane.f32.xlu0 %v1208_v27  ;;  %v837_v3 = vpop.xlane.xlu0 %836  ;;  %v1211_v59 = vsel %vm774_vm2, %v1113_v26, 0.0  ;;  %5751 = vmatprep.subr.bf16.mxu1 %v5885_v50 }
 0x237   :  { %v988_v41 = vmul.f32 0.015625, %v837_v3  ;;  %v840_v23 = vpop.xlane.xlu1 %839  ;;  %v1118_v19 = vmul.f32 %v7187_v54, %v7187_v54  ;;  %5752 = vmatpush3.bf16.msra.mxu1 %v5885_v50 }
 0x238   :  { %v989_v2 = vmul.f32 0.015625, %v840_v23  ;;  %v1119_v31 = vmul.f32 %v7191_v7, %v7191_v7 }
 0x239   :  { %v7199_v15 = vsub.f32 %v6875_v42, %v988_v41  ;;  %1212 = vadd.xlane.f32.xlu1 %v1211_v59  ;;  %v1226_v37 = vsel %vm774_vm2, %v1118_v19, 0.0  ;;  %v5886_v41 = vld [vmem:[#allocation9 + $0x18] sm:$0xff]  }
 0x23a   :  { %v7203_v14 = vsub.f32 %v6878_v44, %v989_v2  ;;  %1227 = vadd.xlane.f32.xlu0 %v1226_v37  ;;  %v855_v11 = vpop.xlane.xlu0 %854  ;;  %v1229_v23 = vsel %vm774_vm2, %v1119_v31, 0.0  ;;  %5753 = vmatprep.subr.bf16.mxu1 %v5886_v41 }
 0x23b   :  { %v994_v55 = vmul.f32 0.015625, %v855_v11  ;;  %v858_v27 = vpop.xlane.xlu1 %857  ;;  %v1116_v26 = vmul.f32 %v7199_v15, %v7199_v15  ;;  %5754 = vmatpush3.bf16.msra.mxu1 %v5886_v41 }
 0x23c   :  { %v995_v3 = vmul.f32 0.015625, %v858_v27  ;;  %v1117_v42 = vmul.f32 %v7203_v14, %v7203_v14 }
 0x23d   :  { %v7211_v19 = vsub.f32 %v6885_v49, %v994_v55  ;;  %1230 = vadd.xlane.f32.xlu1 %v1229_v23  ;;  %v1220_v44 = vsel %vm774_vm2, %v1116_v26, 0.0 }
 0x23e   :  { %v7215_v2 = vsub.f32 %v6890_v56, %v995_v3  ;;  %1221 = vadd.xlane.f32.xlu0 %v1220_v44  ;;  %v849_v59 = vpop.xlane.xlu0 %848  ;;  %v1223_v27 = vsel %vm774_vm2, %v1117_v42, 0.0 }
 0x23f   :  { %v992_v50 = vmul.f32 0.015625, %v849_v59  ;;  %v852_v37 = vpop.xlane.xlu1 %851  ;;  %v1122_v31 = vmul.f32 %v7211_v19, %v7211_v19 }
 0x240   :  { %v993_v11 = vmul.f32 0.015625, %v852_v37  ;;  %v1123_v49 = vmul.f32 %v7215_v2, %v7215_v2 }
 0x241   :  { %v7223_v55 = vsub.f32 %v6895_v60, %v992_v50  ;;  %1224 = vadd.xlane.f32.xlu1 %v1223_v27  ;;  %v1238_v56 = vsel %vm774_vm2, %v1122_v31, 0.0 }
 0x242   :  { %v7227_v26 = vsub.f32 %v6898_v61, %v993_v11  ;;  %1239 = vadd.xlane.f32.xlu0 %v1238_v56  ;;  %v867_v3 = vpop.xlane.xlu0 %866  ;;  %v1241_v59 = vsel %vm774_vm2, %v1123_v49, 0.0 }
 0x243   :  { %v998_v23 = vmul.f32 0.015625, %v867_v3  ;;  %v870_v44 = vpop.xlane.xlu1 %869  ;;  %v1120_v41 = vmul.f32 %v7223_v55, %v7223_v55 }
 0x244   :  { %v999_v42 = vmul.f32 0.015625, %v870_v44  ;;  %v1121_v60 = vmul.f32 %v7227_v26, %v7227_v26 }
 0x245   :  { %v7235_v50 = vsub.f32 %v6905_v4, %v998_v23  ;;  %1242 = vadd.xlane.f32.xlu1 %v1241_v59  ;;  %v1232_v61 = vsel %vm774_vm2, %v1120_v41, 0.0 }
 0x246   :  { %v7239_v37 = vsub.f32 %v6910_v9, %v999_v42  ;;  %1233 = vadd.xlane.f32.xlu0 %v1232_v61  ;;  %v861_v31 = vpop.xlane.xlu0 %860  ;;  %v1235_v3 = vsel %vm774_vm2, %v1121_v60, 0.0 }
 0x247   :  { %v996_v11 = vmul.f32 0.015625, %v861_v31  ;;  %v864_v27 = vpop.xlane.xlu1 %863  ;;  %v1126_v56 = vmul.f32 %v7235_v50, %v7235_v50 }
 0x248   :  { %v997_v49 = vmul.f32 0.015625, %v864_v27  ;;  %v1127_v4 = vmul.f32 %v7239_v37, %v7239_v37 }
 0x249   :  { %v7247_v23 = vsub.f32 %v6915_v13, %v996_v11  ;;  %1236 = vadd.xlane.f32.xlu1 %v1235_v3  ;;  %v1250_v9 = vsel %vm774_vm2, %v1126_v56, 0.0 }
 0x24a   :  { %v7251_v44 = vsub.f32 %v6918_v16, %v997_v49  ;;  %1251 = vadd.xlane.f32.xlu0 %v1250_v9  ;;  %v879_v41 = vpop.xlane.xlu0 %878  ;;  %v1253_v31 = vsel %vm774_vm2, %v1127_v4, 0.0 }
 0x24b   :  { %v1002_v42 = vmul.f32 0.015625, %v879_v41  ;;  %v882_v59 = vpop.xlane.xlu1 %881  ;;  %v1124_v61 = vmul.f32 %v7247_v23, %v7247_v23 }
 0x24c   :  { %v1003_v60 = vmul.f32 0.015625, %v882_v59  ;;  %v1125_v13 = vmul.f32 %v7251_v44, %v7251_v44 }
 0x24d   :  { %v7259_v11 = vsub.f32 %v6925_v21, %v1002_v42  ;;  %1254 = vadd.xlane.f32.xlu1 %v1253_v31  ;;  %v1244_v16 = vsel %vm774_vm2, %v1124_v61, 0.0 }
 0x24e   :  { %v7263_v27 = vsub.f32 %v6930_v28, %v1003_v60  ;;  %1245 = vadd.xlane.f32.xlu0 %v1244_v16  ;;  %v873_v56 = vpop.xlane.xlu0 %872  ;;  %v1247_v41 = vsel %vm774_vm2, %v1125_v13, 0.0 }
 0x24f   :  { %v1000_v49 = vmul.f32 0.015625, %v873_v56  ;;  %v876_v3 = vpop.xlane.xlu1 %875  ;;  %v1130_v9 = vmul.f32 %v7259_v11, %v7259_v11 }
 0x250   :  { %v1001_v4 = vmul.f32 0.015625, %v876_v3  ;;  %v1131_v21 = vmul.f32 %v7263_v27, %v7263_v27 }
 0x251   :  { %v7271_v42 = vsub.f32 %v6935_v32, %v1000_v49  ;;  %1248 = vadd.xlane.f32.xlu1 %v1247_v41  ;;  %v1262_v28 = vsel %vm774_vm2, %v1130_v9, 0.0 }
 0x252   :  { %v7275_v59 = vsub.f32 %v6938_v33, %v1001_v4  ;;  %1263 = vadd.xlane.f32.xlu0 %v1262_v28  ;;  %v891_v61 = vpop.xlane.xlu0 %890  ;;  %v1265_v56 = vsel %vm774_vm2, %v1131_v21, 0.0 }
 0x253   :  { %v1006_v60 = vmul.f32 0.015625, %v891_v61  ;;  %v894_v31 = vpop.xlane.xlu1 %893  ;;  %v1128_v16 = vmul.f32 %v7271_v42, %v7271_v42 }
 0x254   :  { %v1007_v13 = vmul.f32 0.015625, %v894_v31  ;;  %v1129_v32 = vmul.f32 %v7275_v59, %v7275_v59 }
 0x255   :  { %v7283_v49 = vsub.f32 %v6945_v45, %v1006_v60  ;;  %1266 = vadd.xlane.f32.xlu1 %v1265_v56  ;;  %v1256_v33 = vsel %vm774_vm2, %v1128_v16, 0.0 }
 0x256   :  { %v7287_v3 = vsub.f32 %v6950_v52, %v1007_v13  ;;  %1257 = vadd.xlane.f32.xlu0 %v1256_v33  ;;  %v885_v9 = vpop.xlane.xlu0 %884  ;;  %v1259_v61 = vsel %vm774_vm2, %v1129_v32, 0.0 }
 0x257   :  { %v1004_v4 = vmul.f32 0.015625, %v885_v9  ;;  %v888_v41 = vpop.xlane.xlu1 %887  ;;  %v1134_v28 = vmul.f32 %v7283_v49, %v7283_v49 }
 0x258   :  { %v1005_v21 = vmul.f32 0.015625, %v888_v41  ;;  %v1135_v45 = vmul.f32 %v7287_v3, %v7287_v3 }
 0x259   :  { %v7295_v60 = vsub.f32 %v6955_v58, %v1004_v4  ;;  %1260 = vadd.xlane.f32.xlu1 %v1259_v61  ;;  %v1274_v52 = vsel %vm774_vm2, %v1134_v28, 0.0  ;;  %v7308_v58 = vadd.f32 %v7046_v8, %v6764_v34  ;;  %v7313_v28 = vadd.f32 %v6764_v34, %v7062_v53 }
 0x25a   :  { %v7299_v31 = vsub.f32 %v6958_v62, %v1005_v21  ;;  %1275 = vadd.xlane.f32.xlu0 %v1274_v52  ;;  %v903_v16 = vpop.xlane.xlu0 %902  ;;  %v1277_v32 = vsel %vm774_vm2, %v1135_v45, 0.0  ;;  %v7317_v21 = vadd.f32 %v7051_v35, %v6764_v34  ;;  %v7327_v53 = vadd.f32 %v6764_v34, %v7066_v29 }
 0x25b   :  { %v906_v13 = vpop.xlane.xlu1 %905  ;;  %v1132_v56 = vmul.f32 %v7295_v60, %v7295_v60  ;;  %v1010_v9 = vmul.f32 0.015625, %v903_v16  ;;  %v949_v16 = vsel %vm774_vm2, %v7308_v58, 0.0  ;;  %v955_v35 = vsel %vm774_vm2, %v7313_v28, 0.0 }
 0x25c   :  { %11041 = vst [vmem:[#allocation41_spill] sm:$0xff] %v7299_v31  ;;  %v1133_v33 = vmul.f32 %v7299_v31, %v7299_v31  ;;  %v1011_v61 = vmul.f32 0.015625, %v906_v13  ;;  %v958_v29 = vsel %vm774_vm2, %v7327_v53, 0.0 }
 0x25d   :  { %1278 = vadd.xlane.f32.xlu1 %v1277_v32  ;;  %v1268_v62 = vsel %vm774_vm2, %v1132_v56, 0.0  ;;  %v7321_v8 = vsub.f32 %v6965_v6, %v1010_v9 }
 0x25e   :  { %1269 = vadd.xlane.f32.xlu0 %v1268_v62  ;;  %v897_v4 = vpop.xlane.xlu0 %896  ;;  %v1271_v45 = vsel %vm774_vm2, %v1133_v33, 0.0  ;;  %v7332_v13 = vsub.f32 %v6973_v18, %v1011_v61  ;;  %v952_v33 = vsel %vm774_vm2, %v7317_v21, 0.0 }
 0x25f   :  { %v900_v41 = vpop.xlane.xlu1 %899  ;;  %11042 = vst [vmem:[#allocation42_spill] sm:$0xff] %v7321_v8  ;;  %v1008_v52 = vmul.f32 0.015625, %v897_v4  ;;  %v1138_v62 = vmul.f32 %v7321_v8, %v7321_v8 }
 0x260   :  { %11043 = vst [vmem:[#allocation43_spill] sm:$0xff] %v7332_v13  ;;  %v1009_v6 = vmul.f32 0.015625, %v900_v41  ;;  %v1139_v41 = vmul.f32 %v7332_v13, %v7332_v13  ;;  %v11048_v13 = vld [vmem:[#allocation27_spill] sm:$0xff] }
 0x261   :  { %1272 = vadd.xlane.f32.xlu1 %v1271_v45  ;;  %v7337_v9 = vsub.f32 %v6970_v12, %v1008_v52  ;;  %v1286_v12 = vsel %vm774_vm2, %v1138_v62, 0.0 }
 0x262   :  { %950 = vadd.xlane.f32.xlu0 %v949_v16  ;;  %v915_v56 = vpop.xlane.xlu0 %914  ;;  %v7344_v18 = vsub.f32 %v6978_v24, %v1009_v6  ;;  %v6313_v16 = vld [vmem:[#allocation8] ss:$0 sm:$0xff]  ;;  %v1289_v24 = vsel %vm774_vm2, %v1139_v41, 0.0 }
 0x263   :  { %v918_v32 = vpop.xlane.xlu1 %917  ;;  %11044 = vst [vmem:[#allocation44_spill] sm:$0xff] %v7337_v9  ;;  %v1136_v45 = vmul.f32 %v7337_v9, %v7337_v9 }
 0x264   :  { %11045 = vst [vmem:[#allocation45_spill] sm:$0xff] %v7344_v18  ;;  %v1137_v6 = vmul.f32 %v7344_v18, %v7344_v18  ;;  %v1015_v41 = vmul.f32 0.015625, %v918_v32  ;;  %v11052_v32 = vld [vmem:[#allocation26_spill] sm:$0xff] }
 0x265   :  { %953 = vadd.xlane.f32.xlu1 %v952_v33  ;;  %v1280_v62 = vsel %vm774_vm2, %v1136_v45, 0.0 }
 0x266   :  { %956 = vadd.xlane.f32.xlu0 %v955_v35  ;;  %v909_v34 = vpop.xlane.xlu0 %908  ;;  %v7352_v35 = vadd.f32 %v6313_v16, %v7060_v10  ;;  %v7378_v18 = vsub.f32 %v11052_v32, %v1015_v41  ;;  %v11058_v32 = vld [vmem:[#allocation28_spill] sm:$0xff] }
 0x267   :  { %v912_v4 = vpop.xlane.xlu1 %911  ;;  %v1012_v61 = vmul.f32 0.015625, %v909_v34  ;;  %v1014_v34 = vmul.f32 0.015625, %v915_v56  ;;  %v1283_v56 = vsel %vm774_vm2, %v1137_v6, 0.0 }
 0x268   :  { %v1013_v8 = vmul.f32 0.015625, %v912_v4  ;;  %v961_v4 = vsel %vm774_vm2, %v7352_v35, 0.0  ;;  %11053 = vst [vmem:[#allocation26_spill] sm:$0xff] %v7378_v18 }
 0x269   :  { %959 = vadd.xlane.f32.xlu1 %v958_v29  ;;  %v7358_v29 = vsub.f32 %v6990_v46, %v1012_v61  ;;  %v11050_v46 = vld [vmem:[#allocation25_spill] sm:$0xff] }
 0x26a   :  { %1287 = vadd.xlane.f32.xlu0 %v1286_v12  ;;  %v927_v52 = vpop.xlane.xlu0 %926  ;;  %v7362_v12 = vadd.f32 %v6313_v16, %v7064_v20  ;;  %v7367_v31 = vsub.f32 %v11048_v13, %v1013_v8  ;;  %v7371_v61 = vsub.f32 %v11050_v46, %v1014_v34  ;;  %v11054_v34 = vld [vmem:[#allocation29_spill] sm:$0xff] }
 0x26b   :  { %v930_v33 = vpop.xlane.xlu1 %929  ;;  %11046 = vst [vmem:[#allocation46_spill] sm:$0xff] %v7358_v29  ;;  %v1140_v20 = vmul.f32 %v7358_v29, %v7358_v29  ;;  %v1018_v6 = vmul.f32 0.015625, %v927_v52  ;;  %v1143_v52 = vmul.f32 %v7378_v18, %v7378_v18 }
 0x26c   :  { %11047 = vst [vmem:[#allocation47_spill] sm:$0xff] %v7362_v12  ;;  %11049 = vst [vmem:[#allocation27_spill] sm:$0xff] %v7367_v31  ;;  %v964_v16 = vsel %vm774_vm2, %v7362_v12, 0.0  ;;  %v1141_v13 = vmul.f32 %v7367_v31, %v7367_v31  ;;  %v1019_v29 = vmul.f32 0.015625, %v930_v33  ;;  %v11056_v12 = vld [vmem:[#allocation31_spill] sm:$0xff]  ;;  %v11060_v33 = vld [vmem:[#allocation30_spill] sm:$0xff] }
 0x26d   :  { %1290 = vadd.xlane.f32.xlu1 %v1289_v24  ;;  %11051 = vst [vmem:[#allocation25_spill] sm:$0xff] %v7371_v61 }
 0x26e   :  { %1281 = vadd.xlane.f32.xlu0 %v1280_v62  ;;  %v921_v10 = vpop.xlane.xlu0 %920 }
 0x26f   :  { %v924_v9 = vpop.xlane.xlu1 %923  ;;  %v1016_v24 = vmul.f32 0.015625, %v921_v10 }
 0x270   :  { %v1017_v8 = vmul.f32 0.015625, %v924_v9  ;;  %v1295_v9 = vsel %vm774_vm2, %v1141_v13, 0.0  ;;  %v1301_v13 = vsel %vm774_vm2, %v1143_v52, 0.0 }
 0x271   :  { %1284 = vadd.xlane.f32.xlu1 %v1283_v56  ;;  %v7383_v10 = vsub.f32 %v11054_v34, %v1016_v24  ;;  %v1292_v56 = vsel %vm774_vm2, %v1140_v20, 0.0  ;;  %v7395_v24 = vsub.f32 %v11058_v32, %v1018_v6  ;;  %v11062_v32 = vld [vmem:[#allocation33_spill] sm:$0xff] }
 0x272   :  { %962 = vadd.xlane.f32.xlu0 %v961_v4  ;;  %v939_v45 = vpop.xlane.xlu0 %938  ;;  %v1142_v4 = vmul.f32 %v7371_v61, %v7371_v61  ;;  %v7389_v41 = vsub.f32 %v11056_v12, %v1017_v8  ;;  %v7401_v12 = vsub.f32 %v11060_v33, %v1019_v29  ;;  %v11064_v33 = vld [vmem:[#allocation35_spill] sm:$0xff] }
 0x273   :  { %v942_v62 = vpop.xlane.xlu1 %941  ;;  %11055 = vst [vmem:[#allocation29_spill] sm:$0xff] %v7383_v10  ;;  %11059 = vst [vmem:[#allocation28_spill] sm:$0xff] %v7395_v24  ;;  %v1022_v6 = vmul.f32 0.015625, %v939_v45 }
 0x274   :  { %11057 = vst [vmem:[#allocation31_spill] sm:$0xff] %v7389_v41  ;;  %v1298_v20 = vsel %vm774_vm2, %v1142_v4, 0.0  ;;  %11061 = vst [vmem:[#allocation30_spill] sm:$0xff] %v7401_v12  ;;  %v1145_v18 = vmul.f32 %v7389_v41, %v7389_v41  ;;  %v1023_v29 = vmul.f32 0.015625, %v942_v62  ;;  %v1147_v45 = vmul.f32 %v7401_v12, %v7401_v12  ;;  %v11066_v41 = vld [vmem:[#allocation32_spill] sm:$0xff]  ;;  %v11068_v62 = vld [vmem:[#allocation34_spill] sm:$0xff] }
 0x275   :  { %965 = vadd.xlane.f32.xlu1 %v964_v16 }
 0x276   :  { %1293 = vadd.xlane.f32.xlu0 %v1292_v56  ;;  %v933_v46 = vpop.xlane.xlu0 %932  ;;  %v1144_v56 = vmul.f32 %v7383_v10, %v7383_v10  ;;  %v1307_v52 = vsel %vm774_vm2, %v1145_v18, 0.0  ;;  %v1313_v18 = vsel %vm774_vm2, %v1147_v45, 0.0 }
 0x277   :  { %v1020_v16 = vmul.f32 0.015625, %v933_v46  ;;  %v936_v34 = vpop.xlane.xlu1 %935 }
 0x278   :  { %v1021_v8 = vmul.f32 0.015625, %v936_v34  ;;  %v1304_v4 = vsel %vm774_vm2, %v1144_v56, 0.0 }
 0x279   :  { %1296 = vadd.xlane.f32.xlu1 %v1295_v9  ;;  %v7407_v46 = vsub.f32 %v11062_v32, %v1020_v16  ;;  %v1146_v9 = vmul.f32 %v7395_v24, %v7395_v24  ;;  %v7419_v16 = vsub.f32 %v11066_v41, %v1022_v6  ;;  %v11070_v41 = vld [vmem:[#allocation36_spill] sm:$0xff]  ;;  %v11075_v24 = vld [vmem:[#allocation39_spill] sm:$0xff] }
 0x27a   :  { %1299 = vadd.xlane.f32.xlu0 %v1298_v20  ;;  %v945_v20 = vpop.xlane.xlu0 %944  ;;  %v7413_v34 = vsub.f32 %v11064_v33, %v1021_v8  ;;  %v7425_v8 = vsub.f32 %v11068_v62, %v1023_v29 }
 0x27b   :  { %11063 = vst [vmem:[#allocation33_spill] sm:$0xff] %v7407_v46  ;;  %11067 = vst [vmem:[#allocation32_spill] sm:$0xff] %v7419_v16  ;;  %v1310_v56 = vsel %vm774_vm2, %v1146_v9, 0.0  ;;  %v1150_v9 = vmul.f32 %v7419_v16, %v7419_v16 }
 0x27c   :  { %11065 = vst [vmem:[#allocation35_spill] sm:$0xff] %v7413_v34  ;;  %v948_v32 = vpop.xlane.xlu1 %947  ;;  %11069 = vst [vmem:[#allocation34_spill] sm:$0xff] %v7425_v8  ;;  %v1149_v12 = vmul.f32 %v7413_v34, %v7413_v34  ;;  %v1151_v45 = vmul.f32 %v7425_v8, %v7425_v8 }
 0x27d   :  { %1302 = vadd.xlane.f32.xlu1 %v1301_v13  ;;  %v1024_v13 = vmul.f32 0.015625, %v945_v20  ;;  %v1025_v33 = vmul.f32 0.015625, %v948_v32  ;;  %v1322_v32 = vsel %vm774_vm2, %v1150_v9, 0.0 }
 0x27e   :  { %1305 = vadd.xlane.f32.xlu0 %v1304_v4  ;;  %v1148_v4 = vmul.f32 %v7407_v46, %v7407_v46  ;;  %v1319_v29 = vsel %vm774_vm2, %v1149_v12, 0.0  ;;  %v7451_v46 = vld [vmem:[#allocation8 + $0x1] ss:$0 sm:$0xff] }
 0x27f   :  { %v7431_v6 = vsub.f32 %v11070_v41, %v1024_v13 }
 0x280   :  { %v1316_v20 = vsel %vm774_vm2, %v1148_v4, 0.0  ;;  %v1325_v4 = vsel %vm774_vm2, %v1151_v45, 0.0 }
 0x281   :  { %1308 = vadd.xlane.f32.xlu1 %v1307_v52  ;;  %11071 = vst [vmem:[#allocation36_spill] sm:$0xff] %v7431_v6  ;;  %v11072_v52 = vld [vmem:[#allocation37_spill] sm:$0xff]  ;;  %v1152_v13 = vmul.f32 %v7431_v6, %v7431_v6 }
 0x282   :  { %1311 = vadd.xlane.f32.xlu0 %v1310_v56  ;;  %v7437_v56 = vsub.f32 %v11072_v52, %v1025_v33 }
 0x283   :  { %v1328_v33 = vsel %vm774_vm2, %v1152_v13, 0.0 }
 0x284   :  { %11073 = vst [vmem:[#allocation37_spill] sm:$0xff] %v7437_v56  ;;  %v1153_v62 = vmul.f32 %v7437_v56, %v7437_v56 }
 0x285   :  { %1314 = vadd.xlane.f32.xlu1 %v1313_v18 }
 0x286   :  { %1317 = vadd.xlane.f32.xlu0 %v1316_v20  ;;  %v1331_v12 = vsel %vm774_vm2, %v1153_v62, 0.0 }
 0x289   :  { %1320 = vadd.xlane.f32.xlu1 %v1319_v29 }
 0x28a   :  { %1323 = vadd.xlane.f32.xlu0 %v1322_v32 }
 0x28d   :  { %1326 = vadd.xlane.f32.xlu1 %v1325_v4 }
 0x28e   :  { %1329 = vadd.xlane.f32.xlu0 %v1328_v33 }
 0x291   :  { %1332 = vadd.xlane.f32.xlu1 %v1331_v12 }
 0x29e   :  { %v1168_v18 = vpop.xlane.xlu0 %1167 }
 0x29f   :  { %v1354_v41 = vmul.f32 0.015625, %v1168_v18 }
 0x2a1   :  { %v1418_v20 = vadd.f32 1e-05, %v1354_v41 }
 0x2a2   :  { %v1171_v9 = vpop.xlane.xlu1 %1170  ;;  %v1162_v52 = vpop.xlane.xlu0 %1161 }
 0x2a3   :  { %5927 = vrsqrt.f32 %v1418_v20  ;;  %v1355_v29 = vmul.f32 0.015625, %v1171_v9  ;;  %v1352_v32 = vmul.f32 0.015625, %v1162_v52  ;;  %v11074_v9 = vld [vmem:[#allocation38_spill] sm:$0xff] }
 0x2a5   :  { %v1419_v6 = vadd.f32 1e-05, %v1355_v29  ;;  %v1416_v45 = vadd.f32 1e-05, %v1352_v32 }
 0x2a6   :  { %v1165_v8 = vpop.xlane.xlu1 %1164 }
 0x2a7   :  { %5929 = vrsqrt.f32 %v1419_v6  ;;  %v1353_v56 = vmul.f32 0.015625, %v1165_v8  ;;  %v1180_v4 = vpop.xlane.xlu0 %1179 }
 0x2a8   :  { %5931 = vrsqrt.f32 %v1416_v45  ;;  %v1358_v13 = vmul.f32 0.015625, %v1180_v4 }
 0x2a9   :  { %v1417_v33 = vadd.f32 1e-05, %v1353_v56 }
 0x2aa   :  { %v1422_v16 = vadd.f32 1e-05, %v1358_v13  ;;  %v1183_v62 = vpop.xlane.xlu1 %1182 }
 0x2ab   :  { %5933 = vrsqrt.f32 %v1417_v33  ;;  %v1359_v12 = vmul.f32 0.015625, %v1183_v62  ;;  %v1174_v18 = vpop.xlane.xlu0 %1173 }
 0x2ac   :  { %5935 = vrsqrt.f32 %v1422_v16  ;;  %v1356_v41 = vmul.f32 0.015625, %v1174_v18 }
 0x2ad   :  { %v5928_v34 = vpop.eup %5927  ;;  %v1423_v20 = vadd.f32 1e-05, %v1359_v12 }
 0x2ae   :  { %v1546_v52 = vmul.f32 %v5928_v34, %v11074_v9  ;;  %v1420_v29 = vadd.f32 1e-05, %v1356_v41  ;;  %v1177_v32 = vpop.xlane.xlu1 %1176  ;;  %v7455_v41 = vld [vmem:[#allocation8 + $0x2] ss:$0 sm:$0xff] }
 0x2af   :  { %5937 = vrsqrt.f32 %v1423_v20  ;;  %v1357_v6 = vmul.f32 0.015625, %v1177_v32  ;;  %v1192_v8 = vpop.xlane.xlu0 %1191 }
 0x2b0   :  { %5939 = vrsqrt.f32 %v1420_v29  ;;  %v1362_v56 = vmul.f32 0.015625, %v1192_v8  ;;  %v1614_v12 = vmul.f32 %v7451_v46, %v1546_v52 }
 0x2b1   :  { %v5930_v45 = vpop.eup %5929  ;;  %v1421_v4 = vadd.f32 1e-05, %v1357_v6 }
 0x2b2   :  { %v5932_v13 = vpop.eup %5931  ;;  %v1547_v33 = vmul.f32 %v5930_v45, %v7077_v0  ;;  %v1426_v16 = vadd.f32 1e-05, %v1362_v56  ;;  %v1195_v62 = vpop.xlane.xlu1 %1194 }
 0x2b3   :  { %5941 = vrsqrt.f32 %v1421_v4  ;;  %v1363_v34 = vmul.f32 0.015625, %v1195_v62  ;;  %v1186_v18 = vpop.xlane.xlu0 %1185  ;;  %v1544_v20 = vmul.f32 %v5932_v13, %v7072_v1  ;;  %v1682_v4 = vadd.f32 %v7455_v41, %v1614_v12 }
 0x2b4   :  { %5943 = vrsqrt.f32 %v1426_v16  ;;  %v1360_v9 = vmul.f32 0.015625, %v1186_v18  ;;  %v1615_v29 = vmul.f32 %v7451_v46, %v1547_v33 }
 0x2b5   :  { %v5934_v32 = vpop.eup %5933  ;;  %v1427_v6 = vadd.f32 1e-05, %v1363_v34  ;;  %v1612_v8 = vmul.f32 %v7451_v46, %v1544_v20 }
 0x2b6   :  { %v5936_v0 = vpop.eup %5935  ;;  %v1424_v56 = vadd.f32 1e-05, %v1360_v9  ;;  %v1189_v45 = vpop.xlane.xlu1 %1188  ;;  %v1545_v52 = vmul.f32 %v5934_v32, %v11075_v24  ;;  %v1683_v62 = vadd.f32 %v7455_v41, %v1615_v29 }
 0x2b7   :  { %v1550_v10 = vmul.f32 %v5936_v0, %v7092_v47  ;;  %5945 = vrsqrt.f32 %v1427_v6  ;;  %v1361_v1 = vmul.f32 0.015625, %v1189_v45  ;;  %v1204_v13 = vpop.xlane.xlu0 %1203  ;;  %v1680_v33 = vadd.f32 %v7455_v41, %v1612_v8 }
 0x2b8   :  { %5947 = vrsqrt.f32 %v1424_v56  ;;  %v1366_v16 = vmul.f32 0.015625, %v1204_v13  ;;  %v1613_v34 = vmul.f32 %v7451_v46, %v1545_v52  ;;  %v1747_v9 = vmax.f32 %v1683_v62, 0.0 }
 0x2b9   :  { %v5938_v18 = vpop.eup %5937  ;;  %v1425_v20 = vadd.f32 1e-05, %v1361_v1  ;;  %v1618_v24 = vmul.f32 %v7451_v46, %v1550_v10  ;;  %v1746_v6 = vmax.f32 %v1682_v4, 0.0  ;;  %v1744_v45 = vmax.f32 %v1680_v33, 0.0 }
 0x2ba   :  { %v5940_v32 = vpop.eup %5939  ;;  %v1551_v12 = vmul.f32 %v5938_v18, %v7095_v43  ;;  %v1430_v29 = vadd.f32 1e-05, %v1366_v16  ;;  %v1207_v61 = vpop.xlane.xlu1 %1206  ;;  %v1681_v47 = vadd.f32 %v7455_v41, %v1613_v34 }
 0x2bb   :  { %v1548_v0 = vmul.f32 %v5940_v32, %v7103_v48  ;;  %5949 = vrsqrt.f32 %v1425_v20  ;;  %v1367_v8 = vmul.f32 0.015625, %v1207_v61  ;;  %v1198_v56 = vpop.xlane.xlu0 %1197  ;;  %v1809_v31 = vpack.c.bf16 %v1747_v9, %v1746_v6 }
 0x2bc   :  { %5951 = vrsqrt.f32 %v1430_v29  ;;  %v1364_v52 = vmul.f32 0.015625, %v1198_v56  ;;  %v1745_v1 = vmax.f32 %v1681_v47, 0.0  ;;  %v1619_v62 = vmul.f32 %v7451_v46, %v1551_v12 }
 0x2bd   :  { %v5942_v10 = vpop.eup %5941  ;;  %v1431_v13 = vadd.f32 1e-05, %v1367_v8  ;;  %v1616_v43 = vmul.f32 %v7451_v46, %v1548_v0  ;;  %v1686_v16 = vadd.f32 %v7455_v41, %v1618_v24 }
 0x2be   :  { %v5944_v34 = vpop.eup %5943  ;;  %v1549_v4 = vmul.f32 %v5942_v10, %v7107_v51  ;;  %v1428_v48 = vadd.f32 1e-05, %v1364_v52  ;;  %v1201_v18 = vpop.xlane.xlu1 %1200  ;;  %v1808_v61 = vpack.c.bf16 %v1745_v1, %v1744_v45  ;;  %v1687_v33 = vadd.f32 %v7455_v41, %v1619_v62 }
 0x2bf   :  { %v1554_v20 = vmul.f32 %v5944_v34, %v7115_v57  ;;  %5953 = vrsqrt.f32 %v1431_v13  ;;  %v1365_v32 = vmul.f32 0.015625, %v1201_v18  ;;  %v1216_v12 = vpop.xlane.xlu0 %1215  ;;  %v1684_v29 = vadd.f32 %v7455_v41, %v1616_v43 }
 0x2c0   :  { %5955 = vrsqrt.f32 %v1428_v48  ;;  %v1370_v9 = vmul.f32 0.015625, %v1216_v12  ;;  %5755 = vmatprep.mubr.msk.bf16.mxu1 %vm774_vm2, %v1808_v61  ;;  %v1617_v24 = vmul.f32 %v7451_v46, %v1549_v4  ;;  %v1751_v6 = vmax.f32 %v1687_v33, 0.0 }
 0x2c1   :  { %v5946_v47 = vpop.eup %5945  ;;  %v1429_v51 = vadd.f32 1e-05, %v1365_v32  ;;  %5756 = vmatmul.mubr.msk.bf16.vlgmr.msra.gmra.mrb[0].mxu1 %vm774_vm2, %v1809_v31  ;;  %v1622_v0 = vmul.f32 %v7451_v46, %v1554_v20  ;;  %v1750_v1 = vmax.f32 %v1686_v16, 0.0  ;;  %v1748_v43 = vmax.f32 %v1684_v29, 0.0 }
 0x2c2   :  { %v5948_v8 = vpop.eup %5947  ;;  %v1555_v57 = vmul.f32 %v5946_v47, %v7119_v25  ;;  %v1434_v56 = vadd.f32 1e-05, %v1370_v9  ;;  %v1219_v45 = vpop.xlane.xlu1 %1218  ;;  %v1685_v52 = vadd.f32 %v7455_v41, %v1617_v24 }
 0x2c3   :  { %v1552_v62 = vmul.f32 %v5948_v8, %v7127_v5  ;;  %5957 = vrsqrt.f32 %v1429_v51  ;;  %v1371_v10 = vmul.f32 0.015625, %v1219_v45  ;;  %v1210_v13 = vpop.xlane.xlu0 %1209  ;;  %v1811_v61 = vpack.c.bf16 %v1751_v6, %v1750_v1 }
 0x2c4   :  { %5959 = vrsqrt.f32 %v1434_v56  ;;  %v1368_v34 = vmul.f32 0.015625, %v1210_v13  ;;  %v1749_v31 = vmax.f32 %v1685_v52, 0.0  ;;  %v1623_v4 = vmul.f32 %v7451_v46, %v1555_v57 }
 0x2c5   :  { %v5950_v48 = vpop.eup %5949  ;;  %v1435_v18 = vadd.f32 1e-05, %v1371_v10  ;;  %v1620_v25 = vmul.f32 %v7451_v46, %v1552_v62  ;;  %v1690_v33 = vadd.f32 %v7455_v41, %v1622_v0 }
 0x2c6   :  { %v5952_v20 = vpop.eup %5951  ;;  %v1553_v16 = vmul.f32 %v5950_v48, %v7131_v39  ;;  %v1432_v5 = vadd.f32 1e-05, %v1368_v34  ;;  %v1213_v32 = vpop.xlane.xlu1 %1212  ;;  %v1810_v12 = vpack.c.bf16 %v1749_v31, %v1748_v43  ;;  %v1691_v29 = vadd.f32 %v7455_v41, %v1623_v4 }
 0x2c7   :  { %v1558_v9 = vmul.f32 %v5952_v20, %v7139_v30  ;;  %5961 = vrsqrt.f32 %v1435_v18  ;;  %v1369_v24 = vmul.f32 0.015625, %v1213_v32  ;;  %v1228_v47 = vpop.xlane.xlu0 %1227  ;;  %v1688_v51 = vadd.f32 %v7455_v41, %v1620_v25 }
 0x2c8   :  { %5963 = vrsqrt.f32 %v1432_v5  ;;  %v1374_v6 = vmul.f32 0.015625, %v1228_v47  ;;  %5759 = vmatprep.mubr.msk.bf16.mxu1 %vm774_vm2, %v1810_v12  ;;  %v1621_v0 = vmul.f32 %v7451_v46, %v1553_v16  ;;  %v1755_v57 = vmax.f32 %v1691_v29, 0.0 }
 0x2c9   :  { %v5954_v8 = vpop.eup %5953  ;;  %v1433_v39 = vadd.f32 1e-05, %v1369_v24  ;;  %5760 = vmatmul.mubr.msk.bf16.gmra.mrb[4].mxu1 %vm774_vm2, %v1811_v61  ;;  %v1626_v56 = vmul.f32 %v7451_v46, %v1558_v9  ;;  %v1754_v10 = vmax.f32 %v1690_v33, 0.0  ;;  %v1752_v31 = vmax.f32 %v1688_v51, 0.0 }
 0x2ca   :  { %v5956_v45 = vpop.eup %5955  ;;  %v1559_v30 = vmul.f32 %v5954_v8, %v7143_v22  ;;  %v1438_v52 = vadd.f32 1e-05, %v1374_v6  ;;  %v1231_v1 = vpop.xlane.xlu1 %1230  ;;  %v1689_v62 = vadd.f32 %v7455_v41, %v1621_v0 }
 0x2cb   :  { %v1556_v13 = vmul.f32 %v5956_v45, %v7151_v38  ;;  %5965 = vrsqrt.f32 %v1433_v39  ;;  %v1375_v43 = vmul.f32 0.015625, %v1231_v1  ;;  %v1222_v34 = vpop.xlane.xlu0 %1221  ;;  %v1813_v20 = vpack.c.bf16 %v1755_v57, %v1754_v10 }
 0x2cc   :  { %5967 = vrsqrt.f32 %v1438_v52  ;;  %v1372_v4 = vmul.f32 0.015625, %v1222_v34  ;;  %v1753_v48 = vmax.f32 %v1689_v62, 0.0  ;;  %v1627_v18 = vmul.f32 %v7451_v46, %v1559_v30 }
 0x2cd   :  { %v5958_v61 = vpop.eup %5957  ;;  %v1439_v25 = vadd.f32 1e-05, %v1375_v43  ;;  %v1624_v22 = vmul.f32 %v7451_v46, %v1556_v13  ;;  %v1694_v16 = vadd.f32 %v7455_v41, %v1626_v56 }
 0x2ce   :  { %v5960_v5 = vpop.eup %5959  ;;  %v1557_v33 = vmul.f32 %v5958_v61, %v7155_v17  ;;  %v1436_v38 = vadd.f32 1e-05, %v1372_v4  ;;  %v1225_v32 = vpop.xlane.xlu1 %1224  ;;  %v1812_v12 = vpack.c.bf16 %v1753_v48, %v1752_v31  ;;  %v1695_v29 = vadd.f32 %v7455_v41, %v1627_v18 }
 0x2cf   :  { %v1562_v9 = vmul.f32 %v5960_v5, %v7163_v40  ;;  %5969 = vrsqrt.f32 %v1439_v25  ;;  %v1373_v24 = vmul.f32 0.015625, %v1225_v32  ;;  %v1240_v47 = vpop.xlane.xlu0 %1239  ;;  %v1692_v51 = vadd.f32 %v7455_v41, %v1624_v22  ;;  %v11076_v40 = vld [vmem:[#allocation40_spill] sm:$0xff] }
 0x2d0   :  { %5971 = vrsqrt.f32 %v1436_v38  ;;  %v1378_v6 = vmul.f32 0.015625, %v1240_v47  ;;  %5763 = vmatprep.mubr.msk.bf16.mxu1 %vm774_vm2, %v1812_v12  ;;  %v1625_v0 = vmul.f32 %v7451_v46, %v1557_v33  ;;  %v1759_v39 = vmax.f32 %v1695_v29, 0.0 }
 0x2d1   :  { %v5962_v8 = vpop.eup %5961  ;;  %v1437_v17 = vadd.f32 1e-05, %v1373_v24  ;;  %5764 = vmatmul.mubr.msk.bf16.gmra.mrb[8].mxu1 %vm774_vm2, %v1813_v20  ;;  %v1630_v57 = vmul.f32 %v7451_v46, %v1562_v9  ;;  %v1758_v62 = vmax.f32 %v1694_v16, 0.0  ;;  %v1756_v34 = vmax.f32 %v1692_v51, 0.0 }
 0x2d2   :  { %v5964_v56 = vpop.eup %5963  ;;  %v1563_v45 = vmul.f32 %v5962_v8, %v11076_v40  ;;  %v1442_v30 = vadd.f32 1e-05, %v1378_v6  ;;  %v1243_v52 = vpop.xlane.xlu1 %1242  ;;  %v1693_v1 = vadd.f32 %v7455_v41, %v1625_v0 }
 0x2d3   :  { %v1560_v10 = vmul.f32 %v5964_v56, %v7175_v63  ;;  %5973 = vrsqrt.f32 %v1437_v17  ;;  %v1379_v13 = vmul.f32 0.015625, %v1243_v52  ;;  %v1234_v43 = vpop.xlane.xlu0 %1233  ;;  %v1815_v25 = vpack.c.bf16 %v1759_v39, %v1758_v62 }
 0x2d4   :  { %5975 = vrsqrt.f32 %v1442_v30  ;;  %v1376_v31 = vmul.f32 0.015625, %v1234_v43  ;;  %v1757_v4 = vmax.f32 %v1693_v1, 0.0  ;;  %v1631_v48 = vmul.f32 %v7451_v46, %v1563_v45 }
 0x2d5   :  { %v5966_v18 = vpop.eup %5965  ;;  %v1443_v61 = vadd.f32 1e-05, %v1379_v13  ;;  %v1628_v20 = vmul.f32 %v7451_v46, %v1560_v10  ;;  %v1698_v22 = vadd.f32 %v7455_v41, %v1630_v57 }
 0x2d6   :  { %v5968_v5 = vpop.eup %5967  ;;  %v1561_v16 = vmul.f32 %v5966_v18, %v7179_v36  ;;  %v1440_v63 = vadd.f32 1e-05, %v1376_v31  ;;  %v1237_v33 = vpop.xlane.xlu1 %1236  ;;  %v1814_v38 = vpack.c.bf16 %v1757_v4, %v1756_v34  ;;  %v1699_v32 = vadd.f32 %v7455_v41, %v1631_v48 }
 0x2d7   :  { %v1566_v12 = vmul.f32 %v5968_v5, %v7187_v54  ;;  %5977 = vrsqrt.f32 %v1443_v61  ;;  %v1377_v29 = vmul.f32 0.015625, %v1237_v33  ;;  %v1252_v9 = vpop.xlane.xlu0 %1251  ;;  %v1696_v24 = vadd.f32 %v7455_v41, %v1628_v20 }
 0x2d8   :  { %5979 = vrsqrt.f32 %v1440_v63  ;;  %v1382_v47 = vmul.f32 0.015625, %v1252_v9  ;;  %5767 = vmatprep.mubr.msk.bf16.mxu1 %vm774_vm2, %v1814_v38  ;;  %v1629_v51 = vmul.f32 %v7451_v46, %v1561_v16  ;;  %v1763_v0 = vmax.f32 %v1699_v32, 0.0 }
 0x2d9   :  { %v5970_v6 = vpop.eup %5969  ;;  %v1441_v36 = vadd.f32 1e-05, %v1377_v29  ;;  %5768 = vmatmul.mubr.msk.bf16.gmra.mrb[12].mxu1 %vm774_vm2, %v1815_v25  ;;  %v1634_v8 = vmul.f32 %v7451_v46, %v1566_v12  ;;  %v1762_v40 = vmax.f32 %v1698_v22, 0.0  ;;  %v1760_v1 = vmax.f32 %v1696_v24, 0.0 }
 0x2da   :  { %v5972_v17 = vpop.eup %5971  ;;  %v1567_v54 = vmul.f32 %v5970_v6, %v7191_v7  ;;  %v1446_v39 = vadd.f32 1e-05, %v1382_v47  ;;  %v1255_v57 = vpop.xlane.xlu1 %1254  ;;  %v1697_v56 = vadd.f32 %v7455_v41, %v1629_v51 }
 0x2db   :  { %v1564_v45 = vmul.f32 %v5972_v17, %v7199_v15  ;;  %5981 = vrsqrt.f32 %v1441_v36  ;;  %v1383_v30 = vmul.f32 0.015625, %v1255_v57  ;;  %v1246_v52 = vpop.xlane.xlu0 %1245  ;;  %v1817_v31 = vpack.c.bf16 %v1763_v0, %v1762_v40 }
 0x2dc   :  { %5983 = vrsqrt.f32 %v1446_v39  ;;  %v1380_v62 = vmul.f32 0.015625, %v1246_v52  ;;  %v1761_v10 = vmax.f32 %v1697_v56, 0.0  ;;  %v1635_v13 = vmul.f32 %v7451_v46, %v1567_v54 }
 0x2dd   :  { %v5974_v43 = vpop.eup %5973  ;;  %v1447_v34 = vadd.f32 1e-05, %v1383_v30  ;;  %v1632_v7 = vmul.f32 %v7451_v46, %v1564_v45  ;;  %v1702_v4 = vadd.f32 %v7455_v41, %v1634_v8 }
 0x2de   :  { %v5976_v48 = vpop.eup %5975  ;;  %v1565_v18 = vmul.f32 %v5974_v43, %v7203_v14  ;;  %v1444_v15 = vadd.f32 1e-05, %v1380_v62  ;;  %v1249_v61 = vpop.xlane.xlu1 %1248  ;;  %v1816_v25 = vpack.c.bf16 %v1761_v10, %v1760_v1  ;;  %v1703_v20 = vadd.f32 %v7455_v41, %v1635_v13 }
 0x2df   :  { %v1570_v22 = vmul.f32 %v5976_v48, %v7211_v19  ;;  %5985 = vrsqrt.f32 %v1447_v34  ;;  %v1381_v5 = vmul.f32 0.015625, %v1249_v61  ;;  %v1264_v16 = vpop.xlane.xlu0 %1263  ;;  %v1700_v63 = vadd.f32 %v7455_v41, %v1632_v7 }
 0x2e0   :  { %5987 = vrsqrt.f32 %v1444_v15  ;;  %v1386_v33 = vmul.f32 0.015625, %v1264_v16  ;;  %5771 = vmatprep.mubr.msk.bf16.mxu1 %vm774_vm2, %v1816_v25  ;;  %v1633_v38 = vmul.f32 %v7451_v46, %v1565_v18  ;;  %v1767_v12 = vmax.f32 %v1703_v20, 0.0 }
 0x2e1   :  { %v5978_v32 = vpop.eup %5977  ;;  %v1445_v14 = vadd.f32 1e-05, %v1381_v5  ;;  %5772 = vmatmul.mubr.msk.bf16.gmra.mrb[16].mxu1 %vm774_vm2, %v1817_v31  ;;  %v1638_v29 = vmul.f32 %v7451_v46, %v1570_v22  ;;  %v1766_v6 = vmax.f32 %v1702_v4, 0.0  ;;  %v1764_v17 = vmax.f32 %v1700_v63, 0.0 }
 0x2e2   :  { %v5980_v9 = vpop.eup %5979  ;;  %v1571_v19 = vmul.f32 %v5978_v32, %v7215_v2  ;;  %v1450_v24 = vadd.f32 1e-05, %v1386_v33  ;;  %v1267_v47 = vpop.xlane.xlu1 %1266  ;;  %v1701_v51 = vadd.f32 %v7455_v41, %v1633_v38 }
 0x2e3   :  { %v1568_v36 = vmul.f32 %v5980_v9, %v7223_v55  ;;  %5989 = vrsqrt.f32 %v1445_v14  ;;  %v1387_v0 = vmul.f32 0.015625, %v1267_v47  ;;  %v1258_v8 = vpop.xlane.xlu0 %1257  ;;  %v1819_v45 = vpack.c.bf16 %v1767_v12, %v1766_v6 }
 0x2e4   :  { %5991 = vrsqrt.f32 %v1450_v24  ;;  %v1384_v54 = vmul.f32 0.015625, %v1258_v8  ;;  %v1765_v39 = vmax.f32 %v1701_v51, 0.0  ;;  %v1639_v57 = vmul.f32 %v7451_v46, %v1571_v19 }
 0x2e5   :  { %v5982_v56 = vpop.eup %5981  ;;  %v1451_v40 = vadd.f32 1e-05, %v1387_v0  ;;  %v1636_v2 = vmul.f32 %v7451_v46, %v1568_v36  ;;  %v1706_v30 = vadd.f32 %v7455_v41, %v1638_v29 }
 0x2e6   :  { %v5984_v52 = vpop.eup %5983  ;;  %v1569_v1 = vmul.f32 %v5982_v56, %v7227_v26  ;;  %v1448_v55 = vadd.f32 1e-05, %v1384_v54  ;;  %v1261_v62 = vpop.xlane.xlu1 %1260  ;;  %v1818_v10 = vpack.c.bf16 %v1765_v39, %v1764_v17  ;;  %v1707_v13 = vadd.f32 %v7455_v41, %v1639_v57 }
 0x2e7   :  { %v1574_v43 = vmul.f32 %v5984_v52, %v7235_v50  ;;  %5993 = vrsqrt.f32 %v1451_v40  ;;  %v1385_v34 = vmul.f32 0.015625, %v1261_v62  ;;  %v1276_v31 = vpop.xlane.xlu0 %1275  ;;  %v1704_v7 = vadd.f32 %v7455_v41, %v1636_v2 }
 0x2e8   :  { %5995 = vrsqrt.f32 %v1448_v55  ;;  %v1390_v4 = vmul.f32 0.015625, %v1276_v31  ;;  %5775 = vmatprep.mubr.msk.bf16.mxu1 %vm774_vm2, %v1818_v10  ;;  %v1637_v48 = vmul.f32 %v7451_v46, %v1569_v1  ;;  %v1771_v15 = vmax.f32 %v1707_v13, 0.0 }
 0x2e9   :  { %v5986_v18 = vpop.eup %5985  ;;  %v1449_v26 = vadd.f32 1e-05, %v1385_v34  ;;  %5776 = vmatmul.mubr.msk.bf16.gmra.mrb[20].mxu1 %vm774_vm2, %v1819_v45  ;;  %v1642_v61 = vmul.f32 %v7451_v46, %v1574_v43  ;;  %v1770_v16 = vmax.f32 %v1706_v30, 0.0  ;;  %v1768_v32 = vmax.f32 %v1704_v7, 0.0 }
 0x2ea   :  { %v5988_v25 = vpop.eup %5987  ;;  %v1575_v50 = vmul.f32 %v5986_v18, %v7239_v37  ;;  %v1454_v20 = vadd.f32 1e-05, %v1390_v4  ;;  %v1279_v22 = vpop.xlane.xlu1 %1278  ;;  %v1705_v5 = vadd.f32 %v7455_v41, %v1637_v48 }
 0x2eb   :  { %v1572_v63 = vmul.f32 %v5988_v25, %v7247_v23  ;;  %5997 = vrsqrt.f32 %v1449_v26  ;;  %v1391_v33 = vmul.f32 0.015625, %v1279_v22  ;;  %v1270_v38 = vpop.xlane.xlu0 %1269  ;;  %v1821_v24 = vpack.c.bf16 %v1771_v15, %v1770_v16 }
 0x2ec   :  { %5999 = vrsqrt.f32 %v1454_v20  ;;  %v1388_v14 = vmul.f32 0.015625, %v1270_v38  ;;  %v1769_v12 = vmax.f32 %v1705_v5, 0.0  ;;  %v1643_v29 = vmul.f32 %v7451_v46, %v1575_v50 }
 0x2ed   :  { %v5990_v9 = vpop.eup %5989  ;;  %v1455_v19 = vadd.f32 1e-05, %v1391_v33  ;;  %v1640_v37 = vmul.f32 %v7451_v46, %v1572_v63  ;;  %v1710_v47 = vadd.f32 %v7455_v41, %v1642_v61 }
 0x2ee   :  { %v5992_v51 = vpop.eup %5991  ;;  %v1573_v6 = vmul.f32 %v5990_v9, %v7251_v44  ;;  %v1452_v23 = vadd.f32 1e-05, %v1388_v14  ;;  %v1273_v36 = vpop.xlane.xlu1 %1272  ;;  %v1820_v0 = vpack.c.bf16 %v1769_v12, %v1768_v32  ;;  %v1711_v8 = vadd.f32 %v7455_v41, %v1643_v29 }
 0x2ef   :  { %v1578_v17 = vmul.f32 %v5992_v51, %v7259_v11  ;;  %6001 = vrsqrt.f32 %v1455_v19  ;;  %v1389_v54 = vmul.f32 0.015625, %v1273_v36  ;;  %v951_v39 = vpop.xlane.xlu0 %950  ;;  %v1708_v57 = vadd.f32 %v7455_v41, %v1640_v37 }
 0x2f0   :  { %6003 = vrsqrt.f32 %v1452_v23  ;;  %v1026_v56 = vmul.f32 0.015625, %v951_v39  ;;  %5779 = vmatprep.mubr.msk.bf16.mxu1 %vm774_vm2, %v1820_v0  ;;  %v1641_v40 = vmul.f32 %v7451_v46, %v1573_v6  ;;  %v1774_v2 = vmax.f32 %v1710_v47, 0.0 }
 0x2f1   :  { %v5994_v45 = vpop.eup %5993  ;;  %v1453_v44 = vadd.f32 1e-05, %v1389_v54  ;;  %5780 = vmatmul.mubr.msk.bf16.gmra.mrb[24].mxu1 %vm774_vm2, %v1821_v24  ;;  %v1775_v30 = vmax.f32 %v1711_v8, 0.0  ;;  %v1646_v52 = vmul.f32 %v7451_v46, %v1578_v17  ;;  %v1772_v13 = vmax.f32 %v1708_v57, 0.0 }
 0x2f2   :  { %v5996_v11 = vpop.eup %5995  ;;  %v1579_v1 = vmul.f32 %v5994_v45, %v7263_v27  ;;  %v7567_v55 = vsub.f32 %v7308_v58, %v1026_v56  ;;  %v954_v62 = vpop.xlane.xlu1 %953  ;;  %v1709_v10 = vadd.f32 %v7455_v41, %v1641_v40 }
 0x2f3   :  { %v1576_v43 = vmul.f32 %v5996_v11, %v7271_v42  ;;  %6005 = vrsqrt.f32 %v1453_v44  ;;  %v1027_v34 = vmul.f32 0.015625, %v954_v62  ;;  %v957_v31 = vpop.xlane.xlu0 %956  ;;  %v7572_v7 = vadd.f32 %v7455_v41, %v1646_v52  ;;  %v11077_v44 = vld [vmem:[#allocation41_spill] sm:$0xff] }
 0x2f4   :  { %v1028_v4 = vmul.f32 0.015625, %v957_v31  ;;  %v1154_v48 = vmul.f32 %v7567_v55, %v7567_v55  ;;  %v1773_v27 = vmax.f32 %v1709_v10, 0.0  ;;  %v1647_v58 = vmul.f32 %v7451_v46, %v1579_v1 }
 0x2f5   :  { %v5998_v18 = vpop.eup %5997  ;;  %v7578_v26 = vsub.f32 %v7317_v21, %v1027_v34  ;;  %v1823_v15 = vpack.c.bf16 %v1775_v30, %v1774_v2  ;;  %v1644_v42 = vmul.f32 %v7451_v46, %v1576_v43  ;;  %v1778_v38 = vmax.f32 %v7572_v7, 0.0 }
 0x2f6   :  { %v6000_v61 = vpop.eup %5999  ;;  %v1577_v25 = vmul.f32 %v5998_v18, %v7275_v59  ;;  %v7583_v50 = vsub.f32 %v7313_v28, %v1028_v4  ;;  %v960_v20 = vpop.xlane.xlu1 %959  ;;  %v1334_v22 = vsel %vm774_vm2, %v1154_v48, 0.0  ;;  %v1822_v5 = vpack.c.bf16 %v1773_v27, %v1772_v13 }
 0x2f7   :  { %v1029_v16 = vmul.f32 0.015625, %v960_v20  ;;  %1335 = vadd.xlane.f32.xlu0 %v1334_v22  ;;  %v1288_v63 = vpop.xlane.xlu0 %1287  ;;  %v1155_v21 = vmul.f32 %v7578_v26, %v7578_v26  ;;  %v1712_v33 = vadd.f32 %v7455_v41, %v1644_v42  ;;  %v1715_v14 = vadd.f32 %v7455_v41, %v1647_v58 }
 0x2f8   :  { %v1394_v32 = vmul.f32 0.015625, %v1288_v63  ;;  %5783 = vmatprep.mubr.msk.bf16.mxu1 %vm774_vm2, %v1822_v5  ;;  %v1156_v59 = vmul.f32 %v7583_v50, %v7583_v50  ;;  %v1645_v28 = vmul.f32 %v7451_v46, %v1577_v25  ;;  %v1582_v29 = vmul.f32 %v6000_v61, %v7283_v49  ;;  %v11078_v5 = vld [vmem:[#allocation47_spill] sm:$0xff] }
 0x2f9   :  { %v6002_v12 = vpop.eup %6001  ;;  %v7597_v9 = vsub.f32 %v7327_v53, %v1029_v16  ;;  %5784 = vmatmul.mubr.msk.bf16.gmra.mrb[28].mxu1 %vm774_vm2, %v1823_v15  ;;  %v1337_v19 = vsel %vm774_vm2, %v1155_v21, 0.0  ;;  %v1776_v24 = vmax.f32 %v1712_v33, 0.0  ;;  %v1779_v17 = vmax.f32 %v1715_v14, 0.0 }
 0x2fa   :  { %v6004_v37 = vpop.eup %6003  ;;  %v1583_v47 = vmul.f32 %v6002_v12, %v7287_v3  ;;  %v1458_v51 = vadd.f32 1e-05, %v1394_v32  ;;  %1338 = vadd.xlane.f32.xlu1 %v1337_v19  ;;  %v1291_v6 = vpop.xlane.xlu1 %1290  ;;  %v1340_v23 = vsel %vm774_vm2, %v1156_v59, 0.0  ;;  %v1713_v36 = vadd.f32 %v7455_v41, %v1645_v28  ;;  %v11079_v59 = vld [vmem:[#allocation42_spill] sm:$0xff] }
 0x2fb   :  { %v1580_v49 = vmul.f32 %v6004_v37, %v7295_v60  ;;  %v1395_v0 = vmul.f32 0.015625, %v1291_v6  ;;  %1341 = vadd.xlane.f32.xlu0 %v1340_v23  ;;  %v1282_v53 = vpop.xlane.xlu0 %1281  ;;  %v1157_v8 = vmul.f32 %v7597_v9, %v7597_v9  ;;  %v1650_v60 = vmul.f32 %v7451_v46, %v1582_v29  ;;  %v11080_v23 = vld [vmem:[#allocation43_spill] sm:$0xff] }
 0x2fc   :  { %6007 = vrsqrt.f32 %v1458_v51  ;;  %v1392_v54 = vmul.f32 0.015625, %v1282_v53  ;;  %v1777_v39 = vmax.f32 %v1713_v36, 0.0  ;;  %v1651_v3 = vmul.f32 %v7451_v46, %v1583_v47  ;;  %v11081_v53 = vld [vmem:[#allocation44_spill] sm:$0xff] }
 0x2fd   :  { %v6006_v57 = vpop.eup %6005  ;;  %v1459_v56 = vadd.f32 1e-05, %v1395_v0  ;;  %v1343_v40 = vsel %vm774_vm2, %v1157_v8, 0.0  ;;  %v1648_v45 = vmul.f32 %v7451_v46, %v1580_v49  ;;  %v1825_v10 = vpack.c.bf16 %v1779_v17, %v1778_v38 }
 0x2fe   :  { %v1581_v2 = vmul.f32 %v6006_v57, %v11077_v44  ;;  %v1456_v30 = vadd.f32 1e-05, %v1392_v54  ;;  %1344 = vadd.xlane.f32.xlu1 %v1343_v40  ;;  %v1285_v52 = vpop.xlane.xlu1 %1284  ;;  %v1824_v11 = vpack.c.bf16 %v1777_v39, %v1776_v24  ;;  %v1719_v13 = vadd.f32 %v7455_v41, %v1651_v3 }
 0x2ff   :  { %6009 = vrsqrt.f32 %v1459_v56  ;;  %v1393_v1 = vmul.f32 0.015625, %v1285_v52  ;;  %v963_v62 = vpop.xlane.xlu0 %962  ;;  %v1716_v31 = vadd.f32 %v7455_v41, %v1648_v45  ;;  %v1718_v4 = vadd.f32 %v7455_v41, %v1650_v60  ;;  %v11082_v60 = vld [vmem:[#allocation45_spill] sm:$0xff] }
 0x300   :  { %6011 = vrsqrt.f32 %v1456_v30  ;;  %v1030_v43 = vmul.f32 0.015625, %v963_v62  ;;  %5787 = vmatprep.mubr.msk.bf16.mxu1 %vm774_vm2, %v1824_v11  ;;  %v1649_v34 = vmul.f32 %v7451_v46, %v1581_v2  ;;  %v1783_v42 = vmax.f32 %v1719_v13, 0.0 }
 0x301   :  { %v1457_v7 = vadd.f32 1e-05, %v1393_v1  ;;  %5788 = vmatmul.mubr.msk.bf16.gmra.mrb[32].mxu1 %vm774_vm2, %v1825_v10  ;;  %v1780_v20 = vmax.f32 %v1716_v31, 0.0  ;;  %v1782_v63 = vmax.f32 %v1718_v4, 0.0 }
 0x302   :  { %v7619_v48 = vsub.f32 %v7352_v35, %v1030_v43  ;;  %v966_v27 = vpop.xlane.xlu1 %965  ;;  %v1717_v58 = vadd.f32 %v7455_v41, %v1649_v34 }
 0x303   :  { %6013 = vrsqrt.f32 %v1457_v7  ;;  %v1031_v18 = vmul.f32 0.015625, %v966_v27  ;;  %v1294_v15 = vpop.xlane.xlu0 %1293  ;;  %v1827_v29 = vpack.c.bf16 %v1783_v42, %v1782_v63 }
 0x304   :  { %v1396_v61 = vmul.f32 0.015625, %v1294_v15  ;;  %v1158_v25 = vmul.f32 %v7619_v48, %v7619_v48  ;;  %v1781_v22 = vmax.f32 %v1717_v58, 0.0 }
 0x305   :  { %v7625_v16 = vsub.f32 %v11078_v5, %v1031_v18  ;;  %v11083_v18 = vld [vmem:[#allocation46_spill] sm:$0xff] }
 0x306   :  { %v6008_v21 = vpop.eup %6007  ;;  %v1460_v35 = vadd.f32 1e-05, %v1396_v61  ;;  %v1297_v33 = vpop.xlane.xlu1 %1296  ;;  %v1346_v38 = vsel %vm774_vm2, %v1158_v25, 0.0  ;;  %v1826_v32 = vpack.c.bf16 %v1781_v22, %v1780_v20 }
 0x307   :  { %v1586_v28 = vmul.f32 %v6008_v21, %v11079_v59  ;;  %v1397_v14 = vmul.f32 0.015625, %v1297_v33  ;;  %1347 = vadd.xlane.f32.xlu0 %v1346_v38  ;;  %v1300_v12 = vpop.xlane.xlu0 %1299  ;;  %v1159_v19 = vmul.f32 %v7625_v16, %v7625_v16  ;;  %v11084_v38 = vld [vmem:[#allocation27_spill] sm:$0xff] }
 0x308   :  { %6015 = vrsqrt.f32 %v1460_v35  ;;  %v1398_v24 = vmul.f32 0.015625, %v1300_v12  ;;  %5791 = vmatprep.mubr.msk.bf16.mxu1 %vm774_vm2, %v1826_v32 }
 0x309   :  { %v6010_v37 = vpop.eup %6009  ;;  %v1461_v47 = vadd.f32 1e-05, %v1397_v14  ;;  %5792 = vmatmul.mubr.msk.bf16.gmra.mrb[36].mxu1 %vm774_vm2, %v1827_v29  ;;  %v1349_v51 = vsel %vm774_vm2, %v1159_v19, 0.0  ;;  %v1654_v39 = vmul.f32 %v7451_v46, %v1586_v28  ;;  %v11085_v29 = vld [vmem:[#allocation25_spill] sm:$0xff] }
 0x30a   :  { %v6012_v6 = vpop.eup %6011  ;;  %v1587_v36 = vmul.f32 %v6010_v37, %v11080_v23  ;;  %v1462_v49 = vadd.f32 1e-05, %v1398_v24  ;;  %1350 = vadd.xlane.f32.xlu1 %v1349_v51  ;;  %v1303_v0 = vpop.xlane.xlu1 %1302 }
 0x30b   :  { %v1584_v8 = vmul.f32 %v6012_v6, %v11081_v53  ;;  %6017 = vrsqrt.f32 %v1461_v47  ;;  %v1399_v17 = vmul.f32 0.015625, %v1303_v0  ;;  %v1306_v54 = vpop.xlane.xlu0 %1305  ;;  %v1722_v62 = vadd.f32 %v7455_v41, %v1654_v39  ;;  %v11086_v53 = vld [vmem:[#allocation26_spill] sm:$0xff] }
 0x30c   :  { %6019 = vrsqrt.f32 %v1462_v49  ;;  %v1400_v3 = vmul.f32 0.015625, %v1306_v54  ;;  %v1655_v57 = vmul.f32 %v7451_v46, %v1587_v36 }
 0x30d   :  { %v6014_v56 = vpop.eup %6013  ;;  %v1463_v40 = vadd.f32 1e-05, %v1399_v17  ;;  %v1652_v45 = vmul.f32 %v7451_v46, %v1584_v8  ;;  %v1786_v25 = vmax.f32 %v1722_v62, 0.0 }
 0x30e   :  { %v1585_v44 = vmul.f32 %v6014_v56, %v11082_v60  ;;  %v1464_v2 = vadd.f32 1e-05, %v1400_v3  ;;  %v1309_v30 = vpop.xlane.xlu1 %1308  ;;  %v1723_v52 = vadd.f32 %v7455_v41, %v1655_v57  ;;  %v11087_v57 = vld [vmem:[#allocation29_spill] sm:$0xff] }
 0x30f   :  { %6021 = vrsqrt.f32 %v1463_v40  ;;  %v1401_v11 = vmul.f32 0.015625, %v1309_v30  ;;  %v1312_v1 = vpop.xlane.xlu0 %1311  ;;  %v1720_v43 = vadd.f32 %v7455_v41, %v1652_v45  ;;  %v7658_v30 = vld [vmem:[#allocation8 + $0x1] ss:$0 sm:$0xff] }
 0x310   :  { %6023 = vrsqrt.f32 %v1464_v2  ;;  %v1402_v10 = vmul.f32 0.015625, %v1312_v1  ;;  %v1653_v13 = vmul.f32 %v7451_v46, %v1585_v44  ;;  %v1787_v58 = vmax.f32 %v1723_v52, 0.0 }
 0x311   :  { %v1465_v34 = vadd.f32 1e-05, %v1401_v11  ;;  %v1784_v22 = vmax.f32 %v1720_v43, 0.0 }
 0x312   :  { %v6016_v31 = vpop.eup %6015  ;;  %v1466_v7 = vadd.f32 1e-05, %v1402_v10  ;;  %v1315_v4 = vpop.xlane.xlu1 %1314  ;;  %v1721_v27 = vadd.f32 %v7455_v41, %v1653_v13  ;;  %v1829_v12 = vpack.c.bf16 %v1787_v58, %v1786_v25  ;;  %v11088_v10 = vld [vmem:[#allocation31_spill] sm:$0xff] }
 0x313   :  { %v1588_v15 = vmul.f32 %v6016_v31, %v11083_v18  ;;  %6025 = vrsqrt.f32 %v1465_v34  ;;  %v1403_v42 = vmul.f32 0.015625, %v1315_v4  ;;  %v1318_v61 = vpop.xlane.xlu0 %1317  ;;  %v11089_v4 = vld [vmem:[#allocation28_spill] sm:$0xff] }
 0x314   :  { %6027 = vrsqrt.f32 %v1466_v7  ;;  %v1404_v20 = vmul.f32 0.015625, %v1318_v61  ;;  %v1785_v5 = vmax.f32 %v1721_v27, 0.0  ;;  %v7667_v61 = vld [vmem:[#allocation8 + $0x2] ss:$0 sm:$0xff] }
 0x315   :  { %v6018_v63 = vpop.eup %6017  ;;  %v1467_v21 = vadd.f32 1e-05, %v1403_v42  ;;  %v1656_v35 = vmul.f32 %v7451_v46, %v1588_v15 }
 0x316   :  { %v6020_v33 = vpop.eup %6019  ;;  %v1589_v32 = vmul.f32 %v6018_v63, %v11084_v38  ;;  %v1468_v59 = vadd.f32 1e-05, %v1404_v20  ;;  %v1321_v28 = vpop.xlane.xlu1 %1320  ;;  %v1828_v14 = vpack.c.bf16 %v1785_v5, %v1784_v22  ;;  %v11090_v63 = vld [vmem:[#allocation30_spill] sm:$0xff]  ;;  %v11091_v38 = vld [vmem:[#allocation33_spill] sm:$0xff] }
 0x317   :  { %v1590_v19 = vmul.f32 %v6020_v33, %v11085_v29  ;;  %6029 = vrsqrt.f32 %v1467_v21  ;;  %v1405_v24 = vmul.f32 0.015625, %v1321_v28  ;;  %v1324_v37 = vpop.xlane.xlu0 %1323  ;;  %v1724_v47 = vadd.f32 %v7455_v41, %v1656_v35 }
 0x318   :  { %6031 = vrsqrt.f32 %v1468_v59  ;;  %v1406_v51 = vmul.f32 0.015625, %v1324_v37  ;;  %5795 = vmatprep.mubr.msk.bf16.mxu1 %vm774_vm2, %v1828_v14  ;;  %v1657_v6 = vmul.f32 %v7451_v46, %v1589_v32  ;;  %v11092_v37 = vld [vmem:[#allocation35_spill] sm:$0xff] }
 0x319   :  { %v6022_v23 = vpop.eup %6021  ;;  %v1469_v36 = vadd.f32 1e-05, %v1405_v24  ;;  %5796 = vmatmul.mubr.msk.bf16.gmra.mrb[40].mxu1 %vm774_vm2, %v1829_v12  ;;  %v1658_v49 = vmul.f32 %v7451_v46, %v1590_v19  ;;  %v1788_v3 = vmax.f32 %v1724_v47, 0.0 }
 0x31a   :  { %v6024_v0 = vpop.eup %6023  ;;  %v1591_v8 = vmul.f32 %v6022_v23, %v11086_v53  ;;  %v1470_v17 = vadd.f32 1e-05, %v1406_v51  ;;  %v1327_v54 = vpop.xlane.xlu1 %1326  ;;  %v1725_v39 = vadd.f32 %v7455_v41, %v1657_v6  ;;  %v11093_v23 = vld [vmem:[#allocation32_spill] sm:$0xff] }
 0x31b   :  { %v1592_v56 = vmul.f32 %v6024_v0, %v11087_v57  ;;  %6033 = vrsqrt.f32 %v1469_v36  ;;  %v1407_v40 = vmul.f32 0.015625, %v1327_v54  ;;  %v1330_v45 = vpop.xlane.xlu0 %1329  ;;  %v1726_v60 = vadd.f32 %v7455_v41, %v1658_v49 }
 0x31c   :  { %6035 = vrsqrt.f32 %v1470_v17  ;;  %v1408_v44 = vmul.f32 0.015625, %v1330_v45  ;;  %v1789_v2 = vmax.f32 %v1725_v39, 0.0  ;;  %v1659_v46 = vmul.f32 %v7658_v30, %v1591_v8  ;;  %v11095_v45 = vld [vmem:[#allocation36_spill] sm:$0xff] }
 0x31d   :  { %v6026_v52 = vpop.eup %6025  ;;  %v1471_v11 = vadd.f32 1e-05, %v1407_v40  ;;  %v1660_v1 = vmul.f32 %v7658_v30, %v1592_v56  ;;  %v1790_v18 = vmax.f32 %v1726_v60, 0.0 }
 0x31e   :  { %v6028_v62 = vpop.eup %6027  ;;  %v1593_v13 = vmul.f32 %v6026_v52, %v11088_v10  ;;  %v1472_v43 = vadd.f32 1e-05, %v1408_v44  ;;  %v1333_v34 = vpop.xlane.xlu1 %1332  ;;  %v1830_v31 = vpack.c.bf16 %v1789_v2, %v1788_v3  ;;  %v1727_v7 = vadd.f32 %v7455_v41, %v1659_v46  ;;  %v11094_v3 = vld [vmem:[#allocation34_spill] sm:$0xff] }
 0x31f   :  { %v1594_v27 = vmul.f32 %v6028_v62, %v11089_v4  ;;  %6037 = vrsqrt.f32 %v1471_v11  ;;  %v1409_v58 = vmul.f32 0.015625, %v1333_v34  ;;  %v1728_v25 = vadd.f32 %v7667_v61, %v1660_v1  ;;  %v11096_v62 = vld [vmem:[#allocation37_spill] sm:$0xff] }
 0x320   :  { %6039 = vrsqrt.f32 %v1472_v43  ;;  %5799 = vmatprep.mubr.msk.bf16.mxu1 %vm774_vm2, %v1830_v31  ;;  %v1791_v15 = vmax.f32 %v1727_v7, 0.0  ;;  %v1661_v42 = vmul.f32 %v7658_v30, %v1593_v13 }
 0x321   :  { %v6030_v20 = vpop.eup %6029  ;;  %v1473_v22 = vadd.f32 1e-05, %v1409_v58  ;;  %v1662_v5 = vmul.f32 %v7658_v30, %v1594_v27  ;;  %v1792_v59 = vmax.f32 %v1728_v25, 0.0 }
 0x322   :  { %v6032_v41 = vpop.eup %6031  ;;  %v1595_v21 = vmul.f32 %v6030_v20, %v11090_v63  ;;  %v1831_v35 = vpack.c.bf16 %v1791_v15, %v1790_v18  ;;  %v1729_v33 = vadd.f32 %v7667_v61, %v1661_v42 }
 0x323   :  { %v1596_v32 = vmul.f32 %v6032_v41, %v11091_v38  ;;  %6041 = vrsqrt.f32 %v1473_v22  ;;  %v1730_v12 = vadd.f32 %v7667_v61, %v1662_v5 }
 0x324   :  { %5800 = vmatmul.mubr.msk.bf16.gmra.mrb[44].mxu1 %vm774_vm2, %v1831_v35  ;;  %v1793_v28 = vmax.f32 %v1729_v33, 0.0  ;;  %v1663_v14 = vmul.f32 %v7658_v30, %v1595_v21 }
 0x325   :  { %v6034_v29 = vpop.eup %6033  ;;  %v1664_v19 = vmul.f32 %v7658_v30, %v1596_v32  ;;  %v1794_v49 = vmax.f32 %v1730_v12, 0.0 }
 0x326   :  { %v6036_v24 = vpop.eup %6035  ;;  %v1597_v47 = vmul.f32 %v6034_v29, %v11092_v37  ;;  %v1832_v51 = vpack.c.bf16 %v1793_v28, %v1792_v59  ;;  %v1731_v6 = vadd.f32 %v7667_v61, %v1663_v14  ;;  %v7700_v28 = vld [vmem:[#allocation11] ss:$0 sm:$0xff] }
 0x327   :  { %v1598_v36 = vmul.f32 %v6036_v24, %v11093_v23  ;;  %v1732_v8 = vadd.f32 %v7667_v61, %v1664_v19 }
 0x328   :  { %5803 = vmatprep.mubr.msk.bf16.mxu1 %vm774_vm2, %v1832_v51  ;;  %v1795_v0 = vmax.f32 %v1731_v6, 0.0  ;;  %v1665_v53 = vmul.f32 %v7658_v30, %v1597_v47 }
 0x329   :  { %v6038_v17 = vpop.eup %6037  ;;  %v1666_v54 = vmul.f32 %v7658_v30, %v1598_v36  ;;  %v1796_v44 = vmax.f32 %v1732_v8, 0.0 }
 0x32a   :  { %v6040_v39 = vpop.eup %6039  ;;  %v1599_v57 = vmul.f32 %v6038_v17, %v11094_v3  ;;  %v1833_v56 = vpack.c.bf16 %v1795_v0, %v1794_v49  ;;  %v1733_v40 = vadd.f32 %v7667_v61, %v1665_v53 }
 0x32b   :  { %v1600_v60 = vmul.f32 %v6040_v39, %v11095_v45  ;;  %v1734_v52 = vadd.f32 %v7667_v61, %v1666_v54 }
 0x32c   :  { %5804 = vmatmul.mubr.msk.bf16.gmra.mrb[48].mxu1 %vm774_vm2, %v1833_v56  ;;  %v1797_v2 = vmax.f32 %v1733_v40, 0.0  ;;  %v1667_v46 = vmul.f32 %v7658_v30, %v1599_v57 }
 0x32d   :  { %v6042_v11 = vpop.eup %6041  ;;  %v1668_v1 = vmul.f32 %v7658_v30, %v1600_v60  ;;  %v1798_v34 = vmax.f32 %v1734_v52, 0.0 }
 0x32e   :  { %v1601_v10 = vmul.f32 %v6042_v11, %v11096_v62  ;;  %v1834_v13 = vpack.c.bf16 %v1797_v2, %v1796_v44  ;;  %v1735_v43 = vadd.f32 %v7667_v61, %v1667_v46 }
 0x32f   :  { %v1736_v4 = vadd.f32 %v7667_v61, %v1668_v1 }
 0x330   :  { %5807 = vmatprep.mubr.msk.bf16.mxu1 %vm774_vm2, %v1834_v13  ;;  %v1799_v31 = vmax.f32 %v1735_v43, 0.0  ;;  %v1669_v7 = vmul.f32 %v7658_v30, %v1601_v10 }
 0x331   :  { %v1800_v18 = vmax.f32 %v1736_v4, 0.0 }
 0x332   :  { %v1835_v27 = vpack.c.bf16 %v1799_v31, %v1798_v34  ;;  %v1737_v58 = vadd.f32 %v7667_v61, %v1669_v7 }
 0x334   :  { %5808 = vmatmul.mubr.msk.bf16.gmra.mrb[52].mxu1 %vm774_vm2, %v1835_v27  ;;  %v1801_v15 = vmax.f32 %v1737_v58, 0.0 }
 0x336   :  { %v1836_v42 = vpack.c.bf16 %v1801_v15, %v1800_v18 }
 0x338   :  { %5811 = vmatprep.mubr.msk.bf16.mxu1 %vm774_vm2, %v1836_v42 }
 0x384   :  { %v1336_v25 = vpop.xlane.xlu0 %1335 }
 0x385   :  { %v1410_v20 = vmul.f32 0.015625, %v1336_v25 }
 0x387   :  { %v1474_v22 = vadd.f32 1e-05, %v1410_v20  ;;  %v1339_v5 = vpop.xlane.xlu1 %1338 }
 0x388   :  { %v1411_v41 = vmul.f32 0.015625, %v1339_v5  ;;  %v1342_v63 = vpop.xlane.xlu0 %1341 }
 0x389   :  { %6043 = vrsqrt.f32 %v1474_v22  ;;  %v1412_v21 = vmul.f32 0.015625, %v1342_v63 }
 0x38a   :  { %v1475_v35 = vadd.f32 1e-05, %v1411_v41 }
 0x38b   :  { %v1476_v33 = vadd.f32 1e-05, %v1412_v21  ;;  %v1345_v38 = vpop.xlane.xlu1 %1344 }
 0x38c   :  { %6045 = vrsqrt.f32 %v1475_v35  ;;  %v1413_v32 = vmul.f32 0.015625, %v1345_v38 }
 0x38d   :  { %6047 = vrsqrt.f32 %v1476_v33 }
 0x38e   :  { %v1477_v59 = vadd.f32 1e-05, %v1413_v32 }
 0x390   :  { %6049 = vrsqrt.f32 %v1477_v59 }
 0x393   :  { %v6044_v14 = vpop.eup %6043 }
 0x394   :  { %v1602_v12 = vmul.f32 %v6044_v14, %v7567_v55  ;;  %v5757_v29 = vpop.f32.mrb[0].mxu1  ;;  %v1348_v19 = vpop.xlane.xlu0 %1347 }
 0x395   :  { %v7704_v24 = vadd.f32 %v5757_v29, %v7700_v28  ;;  %v1414_v37 = vmul.f32 0.015625, %v1348_v19  ;;  %v2007_v47 = vpop.f32.mrb[1].mxu1 }
 0x396   :  { %v6046_v51 = vpop.eup %6045  ;;  %v5758_v6 = vpop.f32.mrb[2].mxu1  ;;  %v1670_v23 = vmul.f32 %v7658_v30, %v1602_v12  ;;  %v7715_v3 = vadd.f32 %v7700_v28, %v2007_v47 }
 0x397   :  { %v6048_v36 = vpop.eup %6047  ;;  %v1603_v49 = vmul.f32 %v6046_v51, %v7578_v26  ;;  %v1478_v0 = vadd.f32 1e-05, %v1414_v37  ;;  %v7709_v53 = vadd.f32 %v5758_v6, %v7700_v28  ;;  %v1351_v8 = vpop.xlane.xlu1 %1350  ;;  %2268 = vadd.xlane.f32.xlu0 %v7704_v24 }
 0x398   :  { %v2010_v55 = vpop.f32.mrb[3].mxu1  ;;  %v1604_v17 = vmul.f32 %v6048_v36, %v7583_v50  ;;  %v1415_v54 = vmul.f32 0.015625, %v1351_v8  ;;  %v1738_v39 = vadd.f32 %v7667_v61, %v1670_v23 }
 0x399   :  { %6051 = vrsqrt.f32 %v1478_v0  ;;  %2270 = vadd.xlane.f32.xlu1 %v7709_v53  ;;  %v1671_v26 = vmul.f32 %v7658_v30, %v1603_v49  ;;  %v7722_v60 = vadd.f32 %v7700_v28, %v2010_v55 }
 0x39a   :  { %v6050_v57 = vpop.eup %6049  ;;  %v1479_v56 = vadd.f32 1e-05, %v1415_v54  ;;  %v1672_v40 = vmul.f32 %v7658_v30, %v1604_v17  ;;  %v1802_v2 = vmax.f32 %v1738_v39, 0.0 }
 0x39b   :  { %v1605_v45 = vmul.f32 %v6050_v57, %v7597_v9  ;;  %2264 = vadd.xlane.f32.xlu0 %v7715_v3  ;;  %v1739_v50 = vadd.f32 %v7667_v61, %v1671_v26 }
 0x39c   :  { %6053 = vrsqrt.f32 %v1479_v56  ;;  %v5761_v44 = vpop.f32.mrb[4].mxu1  ;;  %v1740_v9 = vadd.f32 %v7667_v61, %v1672_v40 }
 0x39d   :  { %v7727_v46 = vadd.f32 %v5761_v44, %v7700_v28  ;;  %2266 = vadd.xlane.f32.xlu1 %v7722_v60  ;;  %v2023_v52 = vpop.f32.mrb[5].mxu1  ;;  %v1803_v11 = vmax.f32 %v1739_v50, 0.0  ;;  %v1673_v1 = vmul.f32 %v7658_v30, %v1605_v45 }
 0x39e   :  { %v5762_v62 = vpop.f32.mrb[6].mxu1  ;;  %v7738_v31 = vadd.f32 %v7700_v28, %v2023_v52  ;;  %v1804_v7 = vmax.f32 %v1740_v9, 0.0 }
 0x39f   :  { %v7733_v10 = vadd.f32 %v5762_v62, %v7700_v28  ;;  %v2026_v13 = vpop.f32.mrb[7].mxu1  ;;  %2276 = vadd.xlane.f32.xlu0 %v7727_v46  ;;  %v1837_v43 = vpack.c.bf16 %v1803_v11, %v1802_v2  ;;  %v1741_v34 = vadd.f32 %v7667_v61, %v1673_v1 }
 0x3a0   :  { %v7743_v58 = vadd.f32 %v7700_v28, %v2026_v13 }
 0x3a1   :  { %2278 = vadd.xlane.f32.xlu1 %v7733_v10  ;;  %5812 = vmatmul.mubr.msk.bf16.gmra.mrb[56].mxu1 %vm774_vm2, %v1837_v43  ;;  %v1805_v4 = vmax.f32 %v1741_v34, 0.0 }
 0x3a3   :  { %v6052_v27 = vpop.eup %6051  ;;  %2272 = vadd.xlane.f32.xlu0 %v7738_v31  ;;  %v1838_v18 = vpack.c.bf16 %v1805_v4, %v1804_v7 }
 0x3a4   :  { %v1606_v15 = vmul.f32 %v6052_v27, %v7619_v48  ;;  %v5765_v42 = vpop.f32.mrb[8].mxu1 }
 0x3a5   :  { %v7748_v25 = vadd.f32 %v5765_v42, %v7700_v28  ;;  %2274 = vadd.xlane.f32.xlu1 %v7743_v58  ;;  %v2039_v20 = vpop.f32.mrb[9].mxu1  ;;  %5815 = vmatprep.mubr.msk.bf16.mxu1 %vm774_vm2, %v1838_v18 }
 0x3a6   :  { %v6054_v22 = vpop.eup %6053  ;;  %v5766_v5 = vpop.f32.mrb[10].mxu1  ;;  %v1674_v41 = vmul.f32 %v7658_v30, %v1606_v15  ;;  %v7759_v48 = vadd.f32 %v7700_v28, %v2039_v20 }
 0x3a7   :  { %v1607_v63 = vmul.f32 %v6054_v22, %v7625_v16  ;;  %v7755_v21 = vadd.f32 %v5766_v5, %v7700_v28  ;;  %v2042_v35 = vpop.f32.mrb[11].mxu1  ;;  %2284 = vadd.xlane.f32.xlu0 %v7748_v25 }
 0x3a8   :  { %v1742_v38 = vadd.f32 %v7667_v61, %v1674_v41  ;;  %v7765_v32 = vadd.f32 %v7700_v28, %v2042_v35 }
 0x3a9   :  { %2286 = vadd.xlane.f32.xlu1 %v7755_v21  ;;  %v1675_v33 = vmul.f32 %v7658_v30, %v1607_v63 }
 0x3aa   :  { %v1806_v29 = vmax.f32 %v1742_v38, 0.0 }
 0x3ab   :  { %2280 = vadd.xlane.f32.xlu0 %v7759_v48  ;;  %v1743_v16 = vadd.f32 %v7667_v61, %v1675_v33 }
 0x3ac   :  { %v5769_v59 = vpop.f32.mrb[12].mxu1 }
 0x3ad   :  { %v7770_v14 = vadd.f32 %v5769_v59, %v7700_v28  ;;  %2282 = vadd.xlane.f32.xlu1 %v7765_v32  ;;  %v2055_v12 = vpop.f32.mrb[13].mxu1  ;;  %v1807_v19 = vmax.f32 %v1743_v16, 0.0 }
 0x3ae   :  { %v5770_v37 = vpop.f32.mrb[14].mxu1  ;;  %v7778_v6 = vadd.f32 %v7700_v28, %v2055_v12 }
 0x3af   :  { %v7774_v30 = vadd.f32 %v5770_v37, %v7700_v28  ;;  %v2058_v47 = vpop.f32.mrb[15].mxu1  ;;  %2292 = vadd.xlane.f32.xlu0 %v7770_v14  ;;  %v1839_v51 = vpack.c.bf16 %v1807_v19, %v1806_v29 }
 0x3b0   :  { %v7783_v61 = vadd.f32 %v7700_v28, %v2058_v47 }
 0x3b1   :  { %2294 = vadd.xlane.f32.xlu1 %v7774_v30  ;;  %5816 = vmatmul.mubr.msk.bf16.gmra.mrb[60].mxu1 %vm774_vm2, %v1839_v51 }
 0x3b3   :  { %2288 = vadd.xlane.f32.xlu0 %v7778_v6 }
 0x3b4   :  { %v5773_v23 = vpop.f32.mrb[16].mxu1 }
 0x3b5   :  { %v7787_v36 = vadd.f32 %v5773_v23, %v7700_v28  ;;  %2290 = vadd.xlane.f32.xlu1 %v7783_v61  ;;  %v2071_v49 = vpop.f32.mrb[17].mxu1 }
 0x3b6   :  { %v5774_v0 = vpop.f32.mrb[18].mxu1  ;;  %v7795_v17 = vadd.f32 %v7700_v28, %v2071_v49 }
 0x3b7   :  { %v7791_v8 = vadd.f32 %v5774_v0, %v7700_v28  ;;  %v2074_v55 = vpop.f32.mrb[19].mxu1  ;;  %2300 = vadd.xlane.f32.xlu0 %v7787_v36 }
 0x3b8   :  { %v7799_v54 = vadd.f32 %v7700_v28, %v2074_v55 }
 0x3b9   :  { %2302 = vadd.xlane.f32.xlu1 %v7791_v8 }
 0x3bb   :  { %2296 = vadd.xlane.f32.xlu0 %v7795_v17 }
 0x3bc   :  { %v5777_v39 = vpop.f32.mrb[20].mxu1 }
 0x3bd   :  { %v7803_v26 = vadd.f32 %v5777_v39, %v7700_v28  ;;  %2298 = vadd.xlane.f32.xlu1 %v7799_v54  ;;  %v2087_v57 = vpop.f32.mrb[21].mxu1 }
 0x3be   :  { %v5778_v56 = vpop.f32.mrb[22].mxu1  ;;  %v7811_v50 = vadd.f32 %v7700_v28, %v2087_v57 }
 0x3bf   :  { %11097 = vst [vmem:[#allocation38_spill] sm:$0xff] %v7803_v26  ;;  %v7807_v40 = vadd.f32 %v5778_v56, %v7700_v28  ;;  %v2090_v45 = vpop.f32.mrb[23].mxu1  ;;  %2308 = vadd.xlane.f32.xlu0 %v7803_v26 }
 0x3c0   :  { %v7815_v44 = vadd.f32 %v7700_v28, %v2090_v45 }
 0x3c1   :  { %11098 = vst [vmem:[#allocation39_spill] sm:$0xff] %v7807_v40  ;;  %2310 = vadd.xlane.f32.xlu1 %v7807_v40 }
 0x3c3   :  { %2304 = vadd.xlane.f32.xlu0 %v7811_v50 }
 0x3c4   :  { %v5781_v2 = vpop.f32.mrb[24].mxu1 }
 0x3c5   :  { %v7819_v52 = vadd.f32 %v5781_v2, %v7700_v28  ;;  %2306 = vadd.xlane.f32.xlu1 %v7815_v44  ;;  %v2103_v11 = vpop.f32.mrb[25].mxu1 }
 0x3c6   :  { %v5782_v1 = vpop.f32.mrb[26].mxu1  ;;  %v7827_v13 = vadd.f32 %v7700_v28, %v2103_v11 }
 0x3c7   :  { %11099 = vst [vmem:[#allocation40_spill] sm:$0xff] %v7819_v52  ;;  %v7823_v9 = vadd.f32 %v5782_v1, %v7700_v28  ;;  %v2106_v62 = vpop.f32.mrb[27].mxu1  ;;  %2316 = vadd.xlane.f32.xlu0 %v7819_v52 }
 0x3c8   :  { %11101 = vst [vmem:[#allocation47_spill] sm:$0xff] %v7827_v13  ;;  %v7831_v43 = vadd.f32 %v7700_v28, %v2106_v62 }
 0x3c9   :  { %11100 = vst [vmem:[#allocation41_spill] sm:$0xff] %v7823_v9  ;;  %2318 = vadd.xlane.f32.xlu1 %v7823_v9  ;;  %v5899_v9 = vld [vmem:[#allocation12 + $0x40] ss:$8 sps:$4 sm:$0xff]  }
 0x3ca   :  { %11102 = vst [vmem:[#allocation42_spill] sm:$0xff] %v7831_v43 }
 0x3cb   :  { %2312 = vadd.xlane.f32.xlu0 %v7827_v13 }
 0x3cc   :  { %v5785_v34 = vpop.f32.mrb[28].mxu1 }
 0x3cd   :  { %v7835_v7 = vadd.f32 %v5785_v34, %v7700_v28  ;;  %2314 = vadd.xlane.f32.xlu1 %v7831_v43  ;;  %v2119_v4 = vpop.f32.mrb[29].mxu1  ;;  %v10806_v43 = vmov 0  }
 0x3ce   :  { %v5786_v27 = vpop.f32.mrb[30].mxu1  ;;  %v7843_v42 = vadd.f32 %v7700_v28, %v2119_v4  ;;  %3341 = vmatprep.mubr.bf16.mxu0 %v10806_v43  ;;  %3521 = vmatprep.mubr.bf16.mxu1 %v10806_v43 }
 0x3cf   :  { %11103 = vst [vmem:[#allocation43_spill] sm:$0xff] %v7835_v7  ;;  %v7839_v18 = vadd.f32 %v5786_v27, %v7700_v28  ;;  %v2122_v15 = vpop.f32.mrb[31].mxu1  ;;  %2324 = vadd.xlane.f32.xlu0 %v7835_v7 }
 0x3d0   :  { %11105 = vst [vmem:[#allocation45_spill] sm:$0xff] %v7843_v42  ;;  %v7847_v20 = vadd.f32 %v7700_v28, %v2122_v15 }
 0x3d1   :  { %11104 = vst [vmem:[#allocation44_spill] sm:$0xff] %v7839_v18  ;;  %2326 = vadd.xlane.f32.xlu1 %v7839_v18 }
 0x3d2   :  { %11106 = vst [vmem:[#allocation46_spill] sm:$0xff] %v7847_v20 }
 0x3d3   :  { %2320 = vadd.xlane.f32.xlu0 %v7843_v42  ;;  %v5893_v42 = vld [vmem:[#allocation12 + $0x20] ss:$8 sps:$4 sm:$0xff]  }
 0x3d4   :  { %v7850_v22 = vpop.f32.mrb[32].mxu1 }
 0x3d5   :  { %2322 = vadd.xlane.f32.xlu1 %v7847_v20  ;;  %v7853_v5 = vpop.f32.mrb[33].mxu1 }
 0x3d6   :  { %v7855_v41 = vpop.f32.mrb[34].mxu1 }
 0x3d7   :  { %v7857_v63 = vpop.f32.mrb[35].mxu1 }
 0x3dc   :  { %v5793_v35 = vpop.f32.mrb[36].mxu1 }
 0x3dd   :  { %v7860_v33 = vadd.f32 %v5793_v35, %v7700_v28  ;;  %v2151_v38 = vpop.f32.mrb[37].mxu1 }
 0x3de   :  { %v5794_v16 = vpop.f32.mrb[38].mxu1  ;;  %v7867_v29 = vadd.f32 %v7700_v28, %v2151_v38 }
 0x3df   :  { %v7863_v59 = vadd.f32 %v5794_v16, %v7700_v28  ;;  %v2154_v12 = vpop.f32.mrb[39].mxu1  ;;  %2340 = vadd.xlane.f32.xlu0 %v7860_v33 }
 0x3e0   :  { %v7871_v19 = vadd.f32 %v7700_v28, %v2154_v12 }
 0x3e1   :  { %2342 = vadd.xlane.f32.xlu1 %v7863_v59 }
 0x3e3   :  { %2336 = vadd.xlane.f32.xlu0 %v7867_v29 }
 0x3e5   :  { %2338 = vadd.xlane.f32.xlu1 %v7871_v19 }
 0x3ec   :  { %v5797_v37 = vpop.f32.mrb[40].mxu1 }
 0x3ed   :  { %v7876_v47 = vadd.f32 %v5797_v37, %v7700_v28  ;;  %v2167_v51 = vpop.f32.mrb[41].mxu1 }
 0x3ee   :  { %v5798_v23 = vpop.f32.mrb[42].mxu1  ;;  %v7883_v55 = vadd.f32 %v7700_v28, %v2167_v51 }
 0x3ef   :  { %v7879_v49 = vadd.f32 %v5798_v23, %v7700_v28  ;;  %v2170_v0 = vpop.f32.mrb[43].mxu1  ;;  %2348 = vadd.xlane.f32.xlu0 %v7876_v47 }
 0x3f0   :  { %v7887_v39 = vadd.f32 %v7700_v28, %v2170_v0 }
 0x3f1   :  { %2350 = vadd.xlane.f32.xlu1 %v7879_v49 }
 0x3f3   :  { %2344 = vadd.xlane.f32.xlu0 %v7883_v55 }
 0x3f5   :  { %2346 = vadd.xlane.f32.xlu1 %v7887_v39 }
 0x3f7   :  { %v5801_v57 = vpop.f32.mrb[44].mxu1 }
 0x3f8   :  { %v7892_v56 = vadd.f32 %v5801_v57, %v7700_v28  ;;  %v2183_v45 = vpop.f32.mrb[45].mxu1 }
 0x3f9   :  { %v5802_v2 = vpop.f32.mrb[46].mxu1  ;;  %v7899_v62 = vadd.f32 %v7700_v28, %v2183_v45 }
 0x3fa   :  { %11107 = vst [vmem:[#allocation27_spill] sm:$0xff] %v7892_v56  ;;  %v7895_v11 = vadd.f32 %v5802_v2, %v7700_v28  ;;  %2356 = vadd.xlane.f32.xlu0 %v7892_v56  ;;  %v2186_v1 = vpop.f32.mrb[47].mxu1 }
 0x3fb   :  { %v7903_v34 = vadd.f32 %v7700_v28, %v2186_v1 }
 0x3fc   :  { %11108 = vst [vmem:[#allocation25_spill] sm:$0xff] %v7895_v11  ;;  %2358 = vadd.xlane.f32.xlu1 %v7895_v11 }
 0x3fe   :  { %2352 = vadd.xlane.f32.xlu0 %v7899_v62 }
 0x3ff   :  { %v5805_v4 = vpop.f32.mrb[48].mxu1 }
 0x400   :  { %v7907_v27 = vadd.f32 %v5805_v4, %v7700_v28  ;;  %2354 = vadd.xlane.f32.xlu1 %v7903_v34  ;;  %v2199_v15 = vpop.f32.mrb[49].mxu1 }
 0x401   :  { %v5806_v35 = vpop.f32.mrb[50].mxu1  ;;  %v7915_v12 = vadd.f32 %v7700_v28, %v2199_v15 }
 0x402   :  { %11109 = vst [vmem:[#allocation26_spill] sm:$0xff] %v7907_v27  ;;  %v7911_v38 = vadd.f32 %v5806_v35, %v7700_v28  ;;  %2364 = vadd.xlane.f32.xlu0 %v7907_v27  ;;  %v2202_v16 = vpop.f32.mrb[51].mxu1  ;;  %v5907_v27 = vld [vmem:[#allocation12 + $0x64] ss:$8 sps:$4 sm:$0xff]  }
 0x403   :  { %11111 = vst [vmem:[#allocation31_spill] sm:$0xff] %v7915_v12  ;;  %v7919_v37 = vadd.f32 %v7700_v28, %v2202_v16 }
 0x404   :  { %11110 = vst [vmem:[#allocation29_spill] sm:$0xff] %v7911_v38  ;;  %2366 = vadd.xlane.f32.xlu1 %v7911_v38 }
 0x405   :  { %11112 = vst [vmem:[#allocation28_spill] sm:$0xff] %v7919_v37 }
 0x406   :  { %2360 = vadd.xlane.f32.xlu0 %v7915_v12 }
 0x407   :  { %v5809_v51 = vpop.f32.mrb[52].mxu1 }
 0x408   :  { %v7923_v23 = vadd.f32 %v5809_v51, %v7700_v28  ;;  %2362 = vadd.xlane.f32.xlu1 %v7919_v37  ;;  %v2215_v0 = vpop.f32.mrb[53].mxu1 }
 0x409   :  { %v5810_v57 = vpop.f32.mrb[54].mxu1  ;;  %v7931_v1 = vadd.f32 %v7700_v28, %v2215_v0 }
 0x40a   :  { %11113 = vst [vmem:[#allocation30_spill] sm:$0xff] %v7923_v23  ;;  %v7927_v45 = vadd.f32 %v5810_v57, %v7700_v28  ;;  %2372 = vadd.xlane.f32.xlu0 %v7923_v23  ;;  %v2218_v2 = vpop.f32.mrb[55].mxu1 }
 0x40b   :  { %11115 = vst [vmem:[#allocation35_spill] sm:$0xff] %v7931_v1  ;;  %v7935_v4 = vadd.f32 %v7700_v28, %v2218_v2 }
 0x40c   :  { %11114 = vst [vmem:[#allocation33_spill] sm:$0xff] %v7927_v45  ;;  %2374 = vadd.xlane.f32.xlu1 %v7927_v45 }
 0x40d   :  { %11116 = vst [vmem:[#allocation32_spill] sm:$0xff] %v7935_v4 }
 0x40e   :  { %2368 = vadd.xlane.f32.xlu0 %v7931_v1 }
 0x410   :  { %2370 = vadd.xlane.f32.xlu1 %v7935_v4 }
 0x424   :  { %v2269_v15 = vpop.xlane.xlu0 %2268 }
 0x425   :  { %v2395_v35 = vmul.f32 0.0078125, %v2269_v15 }
 0x426   :  { %v2271_v16 = vpop.xlane.xlu1 %2270 }
 0x427   :  { %v7940_v51 = vsub.f32 %v7704_v24, %v2395_v35  ;;  %v2396_v57 = vmul.f32 0.0078125, %v2271_v16  ;;  %v5889_v16 = vld [vmem:[#allocation12 + $0x4] ss:$8 sps:$4 sm:$0xff]  }
 0x428   :  { %v2265_v18 = vpop.xlane.xlu0 %2264  ;;  %3309 = vmatprep.subr.bf16.mxu0 %v5889_v16  ;;  %5819 = vmatprep.subr.bf16.mxu1 %v5889_v16  ;;  %v5896_v16 = vld [vmem:[#allocation12 + $0x30] ss:$8 sps:$4 sm:$0xff]  }
 0x429   :  { %11117 = vst [vmem:[#allocation34_spill] sm:$0xff] %v7940_v51  ;;  %v7943_v0 = vsub.f32 %v7709_v53, %v2396_v57  ;;  %v2393_v7 = vmul.f32 0.0078125, %v2265_v18  ;;  %v2523_v2 = vmul.f32 %v7940_v51, %v7940_v51 }
 0x42a   :  { %v2267_v45 = vpop.xlane.xlu1 %2266 }
 0x42b   :  { %11118 = vst [vmem:[#allocation36_spill] sm:$0xff] %v7943_v0  ;;  %v7948_v23 = vsub.f32 %v7715_v3, %v2393_v7  ;;  %v2394_v20 = vmul.f32 0.0078125, %v2267_v45  ;;  %2589 = vadd.xlane.f32.xlu0 %v2523_v2  ;;  %v2524_v15 = vmul.f32 %v7943_v0, %v7943_v0  ;;  %v5887_v45 = vld [vmem:[#allocation12] ss:$8 sps:$4 sm:$0xff]  }
 0x42c   :  { %v7959_v35 = vpop.xlane.xlu0 %2276  ;;  %3310 = vmatpush1.bf16.msra.mxu0 %v5887_v45  ;;  %5827 = vmatpush1.bf16.msra.mxu1 %v5887_v45  ;;  %v5898_v45 = vld [vmem:[#allocation12 + $0x34] ss:$8 sps:$4 sm:$0xff]  }
 0x42d   :  { %11119 = vst [vmem:[#allocation37_spill] sm:$0xff] %v7948_v23  ;;  %v7953_v24 = vsub.f32 %v7722_v60, %v2394_v20  ;;  %2591 = vadd.xlane.f32.xlu1 %v2524_v15  ;;  %v2521_v53 = vmul.f32 %v7948_v23, %v7948_v23  ;;  %v5892_v20 = vld [vmem:[#allocation12 + $0x14] ss:$8 sps:$4 sm:$0xff]   ;;  %v5890_v15 = vld [vmem:[#allocation12 + $0x10] ss:$8 sps:$4 sm:$0xff]   ;;  %v2399_v12 = vmul.f32 0.0078125, %v7959_v35 }
 0x42e   :  { %v7961_v3 = vpop.xlane.xlu1 %2278  ;;  %3311 = vmatprep.subr.bf16.mxu0 %v5892_v20  ;;  %5820 = vmatprep.subr.bf16.mxu1 %v5892_v20  ;;  %v5901_v20 = vld [vmem:[#allocation12 + $0x44] ss:$8 sps:$4 sm:$0xff]  }
 0x42f   :  { %11120 = vst [vmem:[#allocation48_spill] sm:$0xff] %v7953_v24  ;;  %2585 = vadd.xlane.f32.xlu0 %v2521_v53  ;;  %v2522_v18 = vmul.f32 %v7953_v24, %v7953_v24  ;;  %v5895_v53 = vld [vmem:[#allocation12 + $0x24] ss:$8 sps:$4 sm:$0xff]   ;;  %v8025_v35 = vsub.f32 %v7727_v46, %v2399_v12 }
 0x430   :  { %v7963_v7 = vpop.xlane.xlu0 %2272  ;;  %3312 = vmatpush1.bf16.msra.mxu0 %v5890_v15  ;;  %5828 = vmatpush1.bf16.msra.mxu1 %v5890_v15 }
 0x431   :  { %2587 = vadd.xlane.f32.xlu1 %v2522_v18  ;;  %3313 = vmatprep.subr.bf16.mxu0 %v5895_v53  ;;  %11127 = vst [vmem:[#allocation55_spill] sm:$0xff] %v8025_v35  ;;  %v2527_v12 = vmul.f32 %v8025_v35, %v8025_v35 }
 0x432   :  { %v7965_v57 = vpop.xlane.xlu1 %2274  ;;  %5821 = vmatprep.subr.bf16.mxu1 %v5895_v53  ;;  %v5904_v53 = vld [vmem:[#allocation12 + $0x54] ss:$8 sps:$4 sm:$0xff]  }
 0x434   :  { %v7967_v60 = vpop.xlane.xlu0 %2284  ;;  %3314 = vmatpush1.bf16.msra.mxu0 %v5893_v42  ;;  %5829 = vmatpush1.bf16.msra.mxu1 %v5893_v42  ;;  %v5902_v42 = vld [vmem:[#allocation12 + $0x50] ss:$8 sps:$4 sm:$0xff]  }
 0x435   :  { %3315 = vmatprep.subr.bf16.mxu0 %v5898_v45  ;;  %5822 = vmatprep.subr.bf16.mxu1 %v5898_v45  ;;  %v5905_v45 = vld [vmem:[#allocation12 + $0x60] ss:$8 sps:$4 sm:$0xff]  }
 0x436   :  { %v7969_v2 = vpop.xlane.xlu1 %2286 }
 0x438   :  { %v7971_v18 = vpop.xlane.xlu0 %2280  ;;  %3316 = vmatpush1.bf16.msra.mxu0 %v5896_v16  ;;  %5830 = vmatpush1.bf16.msra.mxu1 %v5896_v16  ;;  %v5910_v16 = vld [vmem:[#allocation12 + $0x74] ss:$8 sps:$4 sm:$0xff]  }
 0x439   :  { %3317 = vmatprep.subr.bf16.mxu0 %v5901_v20  ;;  %5823 = vmatprep.subr.bf16.mxu1 %v5901_v20  ;;  %v5908_v20 = vld [vmem:[#allocation12 + $0x70] ss:$8 sps:$4 sm:$0xff]  }
 0x43a   :  { %v7973_v4 = vpop.xlane.xlu1 %2282 }
 0x43c   :  { %v7975_v1 = vpop.xlane.xlu0 %2292  ;;  %3318 = vmatpush1.bf16.msra.mxu0 %v5899_v9  ;;  %5831 = vmatpush1.bf16.msra.mxu1 %v5899_v9 }
 0x43d   :  { %3319 = vmatprep.subr.bf16.mxu0 %v5904_v53  ;;  %5824 = vmatprep.subr.bf16.mxu1 %v5904_v53 }
 0x43e   :  { %v7977_v15 = vpop.xlane.xlu1 %2294 }
 0x440   :  { %v7979_v52 = vpop.xlane.xlu0 %2288  ;;  %3320 = vmatpush1.bf16.msra.mxu0 %v5902_v42  ;;  %5832 = vmatpush1.bf16.msra.mxu1 %v5902_v42 }
 0x441   :  { %3321 = vmatprep.subr.bf16.mxu0 %v5907_v27  ;;  %5825 = vmatprep.subr.bf16.mxu1 %v5907_v27 }
 0x442   :  { %v7981_v38 = vpop.xlane.xlu1 %2290 }
 0x444   :  { %v7983_v51 = vpop.xlane.xlu0 %2300  ;;  %3322 = vmatpush1.bf16.msra.mxu0 %v5905_v45  ;;  %5833 = vmatpush1.bf16.msra.mxu1 %v5905_v45 }
 0x445   :  { %3323 = vmatprep.subr.bf16.mxu0 %v5910_v16  ;;  %5826 = vmatprep.subr.bf16.mxu1 %v5910_v16 }
 0x446   :  { %v7985_v9 = vpop.xlane.xlu1 %2302 }
 0x448   :  { %3324 = vmatpush1.bf16.msra.mxu0 %v5908_v20  ;;  %5834 = vmatpush1.bf16.msra.mxu1 %v5908_v20  ;;  %v7989_v53 = vpop.xlane.xlu0 %2296 }
 0x44a   :  { %v7991_v42 = vpop.xlane.xlu1 %2298 }
 0x44c   :  { %v7993_v27 = vpop.xlane.xlu0 %2308 }
 0x44e   :  { %v7995_v0 = vpop.xlane.xlu1 %2310 }
 0x44f   :  { %11121 = vst [vmem:[#allocation49_spill] sm:$0xff] %v7995_v0  ;;  %v2400_v0 = vmul.f32 0.0078125, %v7961_v3  ;;  %v8033_v3 = vadd.f32 %v7700_v28, %v7857_v63 }
 0x450   :  { %v7997_v45 = vpop.xlane.xlu0 %2304 }
 0x451   :  { %11128 = vst [vmem:[#allocation56_spill] sm:$0xff] %v8033_v3 }
 0x452   :  { %v7999_v16 = vpop.xlane.xlu1 %2306 }
 0x454   :  { %v8001_v24 = vpop.xlane.xlu0 %2316 }
 0x455   :  { %11122 = vst [vmem:[#allocation50_spill] sm:$0xff] %v8001_v24 }
 0x456   :  { %v8003_v13 = vpop.xlane.xlu1 %2318 }
 0x457   :  { %11123 = vst [vmem:[#allocation51_spill] sm:$0xff] %v8003_v13  ;;  %v8022_v13 = vadd.f32 %v7700_v28, %v7853_v5 }
 0x458   :  { %v8005_v23 = vpop.xlane.xlu0 %2312 }
 0x459   :  { %11126 = vst [vmem:[#allocation54_spill] sm:$0xff] %v8022_v13 }
 0x45a   :  { %v8007_v43 = vpop.xlane.xlu1 %2314 }
 0x45b   :  { %11124 = vst [vmem:[#allocation52_spill] sm:$0xff] %v8007_v43 }
 0x45c   :  { %v8014_v56 = vpop.xlane.xlu0 %2324 }
 0x45e   :  { %v8028_v43 = vpop.xlane.xlu1 %2326 }
 0x460   :  { %v8043_v5 = vpop.xlane.xlu0 %2320 }
 0x474   :  { %v5813_v20 = vpop.f32.mrb[56].mxu1 }
 0x475   :  { %v2231_v37 = vpop.f32.mrb[57].mxu1 }
 0x476   :  { %v8011_v40 = vadd.f32 %v7700_v28, %v2231_v37  ;;  %v5814_v26 = vpop.f32.mrb[58].mxu1  ;;  %v2397_v37 = vmul.f32 0.0078125, %v7963_v7  ;;  %v8051_v7 = vpop.xlane.xlu1 %2322 }
 0x477   :  { %v2234_v11 = vpop.f32.mrb[59].mxu1 }
 0x478   :  { %11125 = vst [vmem:[#allocation53_spill] sm:$0xff] %v8011_v40  ;;  %v8017_v24 = vadd.f32 %v7700_v28, %v2234_v11  ;;  %2376 = vadd.xlane.f32.xlu0 %v8011_v40  ;;  %v8036_v11 = vsub.f32 %v7733_v10, %v2400_v0  ;;  %v2398_v40 = vmul.f32 0.0078125, %v7965_v57  ;;  %v8041_v46 = vsub.f32 %v7738_v31, %v2397_v37  ;;  %v2341_v31 = vpop.xlane.xlu0 %2340 }
 0x479   :  { %v2403_v0 = vmul.f32 0.0078125, %v7967_v60  ;;  %v2404_v37 = vmul.f32 0.0078125, %v7969_v2  ;;  %v2401_v60 = vmul.f32 0.0078125, %v7971_v18  ;;  %v2407_v18 = vmul.f32 0.0078125, %v7975_v1 }
 0x47a   :  { %2378 = vadd.xlane.f32.xlu1 %v8017_v24  ;;  %11129 = vst [vmem:[#allocation57_spill] sm:$0xff] %v8036_v11  ;;  %11130 = vst [vmem:[#allocation58_spill] sm:$0xff] %v8041_v46  ;;  %v8049_v63 = vsub.f32 %v7743_v58, %v2398_v40  ;;  %v2528_v10 = vmul.f32 %v8036_v11, %v8036_v11  ;;  %v2525_v57 = vmul.f32 %v8041_v46, %v8041_v46 }
 0x47b   :  { %v2405_v1 = vmul.f32 0.0078125, %v7979_v52 }
 0x47c   :  { %2328 = vadd.xlane.f32.xlu0 %v8022_v13  ;;  %11131 = vst [vmem:[#allocation59_spill] sm:$0xff] %v8049_v63  ;;  %v2526_v58 = vmul.f32 %v8049_v63, %v8049_v63  ;;  %v2402_v63 = vmul.f32 0.0078125, %v7973_v4  ;;  %v2337_v46 = vpop.xlane.xlu0 %2336  ;;  %v8081_v13 = vadd.f32 %v5814_v26, %v7700_v28  ;;  %v2408_v4 = vmul.f32 0.0078125, %v7977_v15 }
 0x47d   :  { %v2406_v15 = vmul.f32 0.0078125, %v7981_v38 }
 0x47e   :  { %2330 = vadd.xlane.f32.xlu1 %v8033_v3  ;;  %v2343_v3 = vpop.xlane.xlu1 %2342 }
 0x480   :  { %2597 = vadd.xlane.f32.xlu0 %v2527_v12  ;;  %v8066_v12 = vsub.f32 %v7748_v25, %v2403_v0  ;;  %v8085_v25 = vsub.f32 %v7759_v48, %v2401_v60  ;;  %v8092_v0 = vsub.f32 %v7765_v32, %v2402_v63  ;;  %v2349_v26 = vpop.xlane.xlu0 %2348  ;;  %v8098_v48 = vsub.f32 %v7770_v14, %v2407_v18 }
 0x481   :  { %v8104_v32 = vsub.f32 %v7774_v30, %v2408_v4  ;;  %v2431_v14 = vmul.f32 0.0078125, %v2341_v31  ;;  %v2432_v30 = vmul.f32 0.0078125, %v2343_v3 }
 0x482   :  { %2599 = vadd.xlane.f32.xlu1 %v2528_v10  ;;  %v8070_v10 = vadd.f32 %v5813_v20, %v7700_v28  ;;  %v2339_v20 = vpop.xlane.xlu1 %2338  ;;  %v2529_v60 = vmul.f32 %v8085_v25, %v8085_v25  ;;  %v2530_v63 = vmul.f32 %v8092_v0, %v8092_v0  ;;  %v2535_v52 = vmul.f32 %v8098_v48, %v8098_v48 }
 0x483   :  { %v2536_v38 = vmul.f32 %v8104_v32, %v8104_v32 }
 0x484   :  { %v8059_v35 = vpop.f32.mrb[60].mxu1  ;;  %2593 = vadd.xlane.f32.xlu0 %v2525_v57  ;;  %v8077_v57 = vsub.f32 %v7755_v21, %v2404_v37  ;;  %v2531_v21 = vmul.f32 %v8066_v12, %v8066_v12  ;;  %v2345_v18 = vpop.xlane.xlu0 %2344 }
 0x485   :  { %v8063_v40 = vpop.f32.mrb[61].mxu1 }
 0x486   :  { %2595 = vadd.xlane.f32.xlu1 %v2526_v58  ;;  %v8072_v11 = vpop.f32.mrb[62].mxu1  ;;  %v2532_v37 = vmul.f32 %v8077_v57, %v8077_v57  ;;  %v2351_v58 = vpop.xlane.xlu1 %2350 }
 0x487   :  { %v8074_v2 = vpop.f32.mrb[63].mxu1 }
 0x488   :  { %2380 = vadd.xlane.f32.xlu0 %v8070_v10 }
 0x48a   :  { %2382 = vadd.xlane.f32.xlu1 %v8081_v13  ;;  %v2347_v4 = vpop.xlane.xlu1 %2346 }
 0x48c   :  { %2605 = vadd.xlane.f32.xlu0 %v2531_v21  ;;  %v8110_v21 = vsub.f32 %v7778_v6, %v2405_v1  ;;  %v2429_v6 = vmul.f32 0.0078125, %v2337_v46  ;;  %v8122_v1 = vpop.xlane.xlu0 %2356 }
 0x48e   :  { %2607 = vadd.xlane.f32.xlu1 %v2532_v37  ;;  %v8115_v37 = vsub.f32 %v7783_v61, %v2406_v15  ;;  %v2533_v31 = vmul.f32 %v8110_v21, %v8110_v21  ;;  %v2430_v61 = vmul.f32 0.0078125, %v2339_v20  ;;  %v8129_v3 = vpop.xlane.xlu1 %2358 }
 0x490   :  { %2601 = vadd.xlane.f32.xlu0 %v2529_v60  ;;  %v8120_v60 = vsub.f32 %v7860_v33, %v2431_v14  ;;  %v2534_v15 = vmul.f32 %v8115_v37, %v8115_v37  ;;  %v8134_v33 = vsub.f32 %v7867_v29, %v2429_v6  ;;  %v8139_v14 = vsub.f32 %v7871_v19, %v2430_v61 }
 0x491   :  { %v2409_v19 = vmul.f32 0.0078125, %v7989_v53  ;;  %v2410_v61 = vmul.f32 0.0078125, %v7991_v42  ;;  %v8167_v53 = vadd.f32 %v7700_v28, %v8063_v40  ;;  %v8175_v42 = vadd.f32 %v7700_v28, %v8074_v2 }
 0x492   :  { %2603 = vadd.xlane.f32.xlu1 %v2530_v63  ;;  %v8127_v63 = vsub.f32 %v7863_v59, %v2432_v30  ;;  %v2559_v46 = vmul.f32 %v8120_v60, %v8120_v60  ;;  %v2355_v20 = vpop.xlane.xlu1 %2354  ;;  %v2557_v30 = vmul.f32 %v8134_v33, %v8134_v33  ;;  %v2558_v29 = vmul.f32 %v8139_v14, %v8139_v14 }
 0x494   :  { %2613 = vadd.xlane.f32.xlu0 %v2535_v52  ;;  %v2353_v52 = vpop.xlane.xlu0 %2352  ;;  %v2560_v59 = vmul.f32 %v8127_v63, %v8127_v63 }
 0x496   :  { %2615 = vadd.xlane.f32.xlu1 %v2536_v38  ;;  %v8149_v38 = vadd.f32 %v7850_v22, %v7700_v28  ;;  %v2433_v22 = vmul.f32 0.0078125, %v2345_v18 }
 0x498   :  { %2609 = vadd.xlane.f32.xlu0 %v2533_v31  ;;  %v8152_v6 = vpop.xlane.xlu0 %2364  ;;  %v8156_v31 = vadd.f32 %v7855_v41, %v7700_v28  ;;  %v2434_v41 = vmul.f32 0.0078125, %v2347_v4  ;;  %v8181_v18 = vsub.f32 %v7883_v55, %v2433_v22  ;;  %v2436_v4 = vmul.f32 0.0078125, %v2351_v58 }
 0x499   :  { %v2411_v22 = vmul.f32 0.0078125, %v7983_v51  ;;  %v2437_v51 = vmul.f32 0.0078125, %v2353_v52 }
 0x49a   :  { %2611 = vadd.xlane.f32.xlu1 %v2534_v15  ;;  %v8159_v15 = vpop.xlane.xlu1 %2366 }
 0x49c   :  { %2661 = vadd.xlane.f32.xlu0 %v2559_v46  ;;  %v8163_v46 = vsub.f32 %v7795_v17, %v2409_v19  ;;  %v2435_v17 = vmul.f32 0.0078125, %v2349_v26  ;;  %v2561_v19 = vmul.f32 %v8181_v18, %v8181_v18 }
 0x49e   :  { %2663 = vadd.xlane.f32.xlu1 %v2560_v59  ;;  %v8171_v59 = vsub.f32 %v7799_v54, %v2410_v61  ;;  %v8183_v40 = vpop.xlane.xlu1 %2362  ;;  %v2537_v54 = vmul.f32 %v8163_v46, %v8163_v46  ;;  %v8194_v26 = vsub.f32 %v7876_v47, %v2435_v17  ;;  %v8201_v61 = vsub.f32 %v7879_v49, %v2436_v4 }
 0x49f   :  { %v8220_v4 = vadd.f32 %v8059_v35, %v7700_v28  ;;  %v8234_v35 = vsub.f32 %v7899_v62, %v2437_v51 }
 0x4a0   :  { %2657 = vadd.xlane.f32.xlu0 %v2557_v30  ;;  %v8177_v30 = vpop.xlane.xlu0 %2360  ;;  %v2538_v2 = vmul.f32 %v8171_v59, %v8171_v59  ;;  %11132 = vst [vmem:[#allocation60_spill] sm:$0xff] %v8201_v61  ;;  %v2563_v47 = vmul.f32 %v8194_v26, %v8194_v26  ;;  %v2564_v49 = vmul.f32 %v8201_v61, %v8201_v61 }
 0x4a2   :  { %2659 = vadd.xlane.f32.xlu1 %v2558_v29  ;;  %v8189_v29 = vsub.f32 %v7887_v39, %v2434_v41  ;;  %v8203_v58 = vpop.xlane.xlu1 %2374  ;;  %v2412_v41 = vmul.f32 0.0078125, %v7985_v9  ;;  %v8229_v9 = vadd.f32 %v8072_v11, %v7700_v28  ;;  %v2414_v28 = vmul.f32 0.0078125, %v7999_v16 }
 0x4a3   :  { %v2565_v16 = vmul.f32 %v8234_v35, %v8234_v35 }
 0x4a4   :  { %2332 = vadd.xlane.f32.xlu0 %v8149_v38  ;;  %v8196_v55 = vpop.xlane.xlu0 %2372  ;;  %v2562_v39 = vmul.f32 %v8189_v29, %v8189_v29 }
 0x4a6   :  { %2334 = vadd.xlane.f32.xlu1 %v8156_v31 }
 0x4a8   :  { %2384 = vadd.xlane.f32.xlu0 %v8167_v53  ;;  %v8211_v17 = vpop.xlane.xlu0 %2368 }
 0x4aa   :  { %2386 = vadd.xlane.f32.xlu1 %v8175_v42 }
 0x4ac   :  { %2617 = vadd.xlane.f32.xlu0 %v2537_v54  ;;  %v8216_v54 = vsub.f32 %v7787_v36, %v2411_v22  ;;  %v2413_v22 = vmul.f32 0.0078125, %v7997_v45 }
 0x4ae   :  { %2619 = vadd.xlane.f32.xlu1 %v2538_v2  ;;  %11133 = vst [vmem:[#allocation61_spill] sm:$0xff] %v8216_v54  ;;  %v8222_v2 = vpop.xlane.xlu1 %2370  ;;  %v8246_v51 = vsub.f32 %v7811_v50, %v2413_v22  ;;  %v2415_v22 = vmul.f32 0.0078125, %v7993_v27 }
 0x4b0   :  { %2665 = vadd.xlane.f32.xlu0 %v2561_v19  ;;  %v8225_v19 = vsub.f32 %v7791_v8, %v2412_v41  ;;  %v2539_v8 = vmul.f32 %v8216_v54, %v8216_v54 }
 0x4b2   :  { %2667 = vadd.xlane.f32.xlu1 %v2562_v39  ;;  %v2438_v39 = vmul.f32 0.0078125, %v2355_v20  ;;  %v2540_v45 = vmul.f32 %v8225_v19, %v8225_v19 }
 0x4b4   :  { %2669 = vadd.xlane.f32.xlu0 %v2563_v47  ;;  %v8241_v11 = vsub.f32 %v7903_v34, %v2438_v39 }
 0x4b6   :  { %2671 = vadd.xlane.f32.xlu1 %v2564_v49  ;;  %v2566_v50 = vmul.f32 %v8241_v11, %v8241_v11 }
 0x4b8   :  { %2388 = vadd.xlane.f32.xlu0 %v8220_v4  ;;  %v2590_v36 = vpop.xlane.xlu0 %2589 }
 0x4b9   :  { %v2715_v52 = vmul.f32 0.0078125, %v2590_v36  ;;  %v2439_v36 = vmul.f32 0.0078125, %v8122_v1 }
 0x4ba   :  { %v2592_v47 = vpop.xlane.xlu1 %2591  ;;  %2390 = vadd.xlane.f32.xlu1 %v8229_v9 }
 0x4bb   :  { %v2716_v41 = vmul.f32 0.0078125, %v2592_v47  ;;  %v2779_v61 = vadd.f32 1e-05, %v2715_v52  ;;  %v8252_v47 = vsub.f32 %v7815_v44, %v2414_v28  ;;  %v11134_v52 = vld [vmem:[#allocation27_spill] sm:$0xff]  ;;  %v2541_v44 = vmul.f32 %v8246_v51, %v8246_v51  ;;  %v11136_v28 = vld [vmem:[#allocation25_spill] sm:$0xff] }
 0x4bc   :  { %2621 = vadd.xlane.f32.xlu0 %v2539_v8  ;;  %v2586_v20 = vpop.xlane.xlu0 %2585  ;;  %v2440_v8 = vmul.f32 0.0078125, %v8129_v3 }
 0x4bd   :  { %v2780_v62 = vadd.f32 1e-05, %v2716_v41  ;;  %v2713_v49 = vmul.f32 0.0078125, %v2586_v20  ;;  %v8259_v41 = vsub.f32 %v11134_v52, %v2439_v36  ;;  %v11140_v36 = vld [vmem:[#allocation39_spill] sm:$0xff] }
 0x4be   :  { %v2588_v54 = vpop.xlane.xlu1 %2587  ;;  %2623 = vadd.xlane.f32.xlu1 %v2540_v45  ;;  %v8265_v20 = vsub.f32 %v11136_v28, %v2440_v8  ;;  %v2542_v45 = vmul.f32 %v8252_v47, %v8252_v47  ;;  %v2417_v8 = vmul.f32 0.0078125, %v8005_v23  ;;  %v11145_v28 = vld [vmem:[#allocation28_spill] sm:$0xff] }
 0x4bf   :  { %v2777_v34 = vadd.f32 1e-05, %v2713_v49  ;;  %v2714_v39 = vmul.f32 0.0078125, %v2588_v54  ;;  %6055 = vrsqrt.f32 %v2780_v62  ;;  %v11135_v54 = vld [vmem:[#allocation49_spill] sm:$0xff]  ;;  %v11138_v62 = vld [vmem:[#allocation38_spill] sm:$0xff]  ;;  %v2441_v49 = vmul.f32 0.0078125, %v8177_v30 }
 0x4c0   :  { %2673 = vadd.xlane.f32.xlu0 %v2565_v16  ;;  %v2416_v3 = vmul.f32 0.0078125, %v11135_v54  ;;  %11137 = vst [vmem:[#allocation27_spill] sm:$0xff] %v8265_v20  ;;  %v8270_v27 = vsub.f32 %v11138_v62, %v2415_v22 }
 0x4c1   :  { %6057 = vrsqrt.f32 %v2777_v34  ;;  %v2778_v1 = vadd.f32 1e-05, %v2714_v39  ;;  %v2442_v34 = vmul.f32 0.0078125, %v8183_v40  ;;  %v2568_v39 = vmul.f32 %v8265_v20, %v8265_v20 }
 0x4c2   :  { %6059 = vrsqrt.f32 %v2779_v61  ;;  %2675 = vadd.xlane.f32.xlu1 %v2566_v50  ;;  %11139 = vst [vmem:[#allocation49_spill] sm:$0xff] %v8270_v27  ;;  %v2567_v61 = vmul.f32 %v8259_v41, %v8259_v41  ;;  %v8276_v16 = vsub.f32 %v11140_v36, %v2416_v3  ;;  %v2543_v30 = vmul.f32 %v8270_v27, %v8270_v27  ;;  %v11150_v27 = vld [vmem:[#allocation48_spill] sm:$0xff] }
 0x4c3   :  { %6061 = vrsqrt.f32 %v2778_v1  ;;  %v11142_v1 = vld [vmem:[#allocation31_spill] sm:$0xff]  ;;  %v8289_v40 = vsub.f32 %v11145_v28, %v2442_v34  ;;  %v11152_v28 = vld [vmem:[#allocation42_spill] sm:$0xff] }
 0x4c4   :  { %2625 = vadd.xlane.f32.xlu0 %v2541_v44  ;;  %11141 = vst [vmem:[#allocation25_spill] sm:$0xff] %v8276_v16  ;;  %v8283_v22 = vsub.f32 %v11142_v1, %v2441_v49  ;;  %v11144_v44 = vld [vmem:[#allocation52_spill] sm:$0xff]  ;;  %v2544_v23 = vmul.f32 %v8276_v16, %v8276_v16  ;;  %v11148_v49 = vld [vmem:[#allocation47_spill] sm:$0xff]  ;;  %v8298_v1 = vld [vmem:[#allocation11 + $0x1] ss:$0 sm:$0xff] }
 0x4c5   :  { %v2418_v54 = vmul.f32 0.0078125, %v11144_v44  ;;  %11146 = vst [vmem:[#allocation39_spill] sm:$0xff] %v8289_v40  ;;  %v8295_v36 = vsub.f32 %v11148_v49, %v2417_v8  ;;  %v2444_v8 = vmul.f32 0.0078125, %v8159_v15  ;;  %v8309_v49 = vld [vmem:[#allocation11 + $0x2] ss:$0 sm:$0xff] }
 0x4c6   :  { %2627 = vadd.xlane.f32.xlu1 %v2542_v45  ;;  %11143 = vst [vmem:[#allocation38_spill] sm:$0xff] %v8283_v22  ;;  %v11147_v45 = vld [vmem:[#allocation37_spill] sm:$0xff]  ;;  %v2569_v34 = vmul.f32 %v8283_v22, %v8283_v22  ;;  %v11155_v22 = vld [vmem:[#allocation50_spill] sm:$0xff] }
 0x4c7   :  { %11149 = vst [vmem:[#allocation31_spill] sm:$0xff] %v8295_v36  ;;  %v2419_v16 = vmul.f32 0.0078125, %v11155_v22  ;;  %v2545_v15 = vmul.f32 %v8295_v36, %v8295_v36  ;;  %v11160_v36 = vld [vmem:[#allocation41_spill] sm:$0xff] }
 0x4c8   :  { %2677 = vadd.xlane.f32.xlu0 %v2567_v61 }
 0x4c9   :  { %v6056_v50 = vpop.eup %6055 }
 0x4ca   :  { %2679 = vadd.xlane.f32.xlu1 %v2568_v39  ;;  %v2443_v39 = vmul.f32 0.0078125, %v8152_v6 }
 0x4cb   :  { %v6058_v52 = vpop.eup %6057 }
 0x4cc   :  { %v6060_v3 = vpop.eup %6059  ;;  %v2905_v62 = vmul.f32 %v6058_v52, %v11147_v45  ;;  %2629 = vadd.xlane.f32.xlu0 %v2543_v30  ;;  %v11151_v30 = vld [vmem:[#allocation36_spill] sm:$0xff]  ;;  %v8306_v45 = vsub.f32 %v11152_v28, %v2418_v54 }
 0x4cd   :  { %v6062_v61 = vpop.eup %6061  ;;  %v2908_v52 = vmul.f32 %v6056_v50, %v11151_v30  ;;  %v11156_v50 = vld [vmem:[#allocation26_spill] sm:$0xff] }
 0x4ce   :  { %v2973_v44 = vmul.f32 %v8298_v1, %v2905_v62  ;;  %v2906_v20 = vmul.f32 %v6062_v61, %v11150_v27  ;;  %2631 = vadd.xlane.f32.xlu1 %v2544_v23  ;;  %11153 = vst [vmem:[#allocation52_spill] sm:$0xff] %v8306_v45  ;;  %v2570_v62 = vmul.f32 %v8289_v40, %v8289_v40  ;;  %v11154_v23 = vld [vmem:[#allocation34_spill] sm:$0xff]  ;;  %v11158_v40 = vld [vmem:[#allocation29_spill] sm:$0xff] }
 0x4cf   :  { %v2907_v61 = vmul.f32 %v6060_v3, %v11154_v23  ;;  %v8318_v30 = vsub.f32 %v11156_v50, %v2443_v39  ;;  %v8328_v3 = vsub.f32 %v11158_v40, %v2444_v8  ;;  %v11159_v23 = vld [vmem:[#allocation40_spill] sm:$0xff]  ;;  %v2446_v8 = vmul.f32 0.0078125, %v8222_v2 }
 0x4d0   :  { %v2974_v6 = vmul.f32 %v8298_v1, %v2906_v20  ;;  %2681 = vadd.xlane.f32.xlu0 %v2569_v34  ;;  %v3041_v27 = vadd.f32 %v8309_v49, %v2973_v44  ;;  %v2976_v20 = vmul.f32 %v8298_v1, %v2908_v52  ;;  %v11157_v34 = vld [vmem:[#allocation51_spill] sm:$0xff]  ;;  %v2546_v44 = vmul.f32 %v8306_v45, %v8306_v45 }
 0x4d1   :  { %v2420_v28 = vmul.f32 0.0078125, %v11157_v34  ;;  %v8332_v50 = vsub.f32 %v11159_v23, %v2419_v16  ;;  %v2571_v52 = vmul.f32 %v8318_v30, %v8318_v30  ;;  %v2572_v16 = vmul.f32 %v8328_v3, %v8328_v3 }
 0x4d2   :  { %2683 = vadd.xlane.f32.xlu1 %v2570_v62  ;;  %v3042_v54 = vadd.f32 %v8309_v49, %v2974_v6  ;;  %v3105_v22 = vmax.f32 %v3041_v27, 0.0  ;;  %v2975_v62 = vmul.f32 %v8298_v1, %v2907_v61  ;;  %v2445_v6 = vmul.f32 0.0078125, %v8211_v17 }
 0x4d3   :  { %v3044_v45 = vadd.f32 %v8309_v49, %v2976_v20  ;;  %v8339_v40 = vsub.f32 %v11160_v36, %v2420_v28  ;;  %v11161_v17 = vmov 0   ;;  %v2421_v61 = vmul.f32 0.0078125, %v8043_v5  ;;  %v11163_v28 = vld [vmem:[#allocation32_spill] sm:$0xff] }
 0x4d4   :  { %2633 = vadd.xlane.f32.xlu0 %v2545_v15  ;;  %v3106_v39 = vmax.f32 %v3042_v54, 0.0  ;;  %v3043_v27 = vadd.f32 %v8309_v49, %v2975_v62  ;;  %v11162_v15 = vld [vmem:[#allocation35_spill] sm:$0xff]  ;;  %v2547_v36 = vmul.f32 %v8332_v50, %v8332_v50  ;;  %v2422_v2 = vmul.f32 0.0078125, %v8051_v7  ;;  %v11164_v62 = vld [vmem:[#allocation45_spill] sm:$0xff] }
 0x4d5   :  { %v8348_v54 = vsub.f32 %v11162_v15, %v2445_v6  ;;  %v3108_v20 = vmax.f32 %v3044_v45, 0.0  ;;  %v8359_v5 = vsub.f32 %v11164_v62, %v2421_v61  ;;  %v2447_v23 = vmul.f32 0.0078125, %v8196_v55  ;;  %v11167_v55 = vld [vmem:[#allocation30_spill] sm:$0xff] }
 0x4d6   :  { %2635 = vadd.xlane.f32.xlu1 %v2546_v44  ;;  %v3169_v34 = vpack.c.bf16 %v3106_v39, %v3105_v22  ;;  %v8354_v44 = vsub.f32 %v11163_v28, %v2446_v8  ;;  %v2548_v22 = vmul.f32 %v8339_v40, %v8339_v40  ;;  %v3107_v39 = vmax.f32 %v3043_v27, 0.0 }
 0x4d7   :  { %v2573_v6 = vmul.f32 %v8348_v54, %v8348_v54  ;;  %v8373_v27 = vsub.f32 %v11167_v55, %v2447_v23  ;;  %v2549_v61 = vmul.f32 %v8359_v5, %v8359_v5  ;;  %v2424_v15 = vmul.f32 0.0078125, %v8028_v43 }
 0x4d8   :  { %2685 = vadd.xlane.f32.xlu0 %v2571_v52  ;;  %3342 = vmatmul.mubr.bf16.vlgmr.msra.gmra.mrb[64].mxu0 %v3169_v34  ;;  %v3170_v45 = vpack.c.bf16 %v3108_v20, %v3107_v39  ;;  %v11165_v52 = vld [vmem:[#allocation46_spill] sm:$0xff]  ;;  %v2448_v34 = vmul.f32 0.0078125, %v8203_v58  ;;  %v2574_v8 = vmul.f32 %v8354_v44, %v8354_v44 }
 0x4d9   :  { %3351 = vmatprep.mubr.bf16.mxu0 %v11161_v17  ;;  %v8365_v7 = vsub.f32 %v11165_v52, %v2422_v2  ;;  %11168 = vst [vmem:[#allocation37_spill] sm:$0xff] %v8373_v27  ;;  %v11171_v2 = vld [vmem:[#allocation43_spill] sm:$0xff] }
 0x4da   :  { %2687 = vadd.xlane.f32.xlu1 %v2572_v16  ;;  %v2423_v16 = vmul.f32 0.0078125, %v8014_v56  ;;  %v2575_v56 = vmul.f32 %v8373_v27, %v8373_v27 }
 0x4db   :  { %11166 = vst [vmem:[#allocation28_spill] sm:$0xff] %v8365_v7  ;;  %v2550_v20 = vmul.f32 %v8365_v7, %v8365_v7 }
 0x4dc   :  { %2637 = vadd.xlane.f32.xlu0 %v2547_v36  ;;  %v11169_v36 = vld [vmem:[#allocation33_spill] sm:$0xff]  ;;  %v8384_v28 = vsub.f32 %v11171_v2, %v2423_v16  ;;  %v11178_v2 = vld [vmem:[#allocation54_spill] sm:$0xff] }
 0x4dd   :  { %v8379_v58 = vsub.f32 %v11169_v36, %v2448_v34  ;;  %v11175_v34 = vld [vmem:[#allocation53_spill] sm:$0xff] }
 0x4de   :  { %2639 = vadd.xlane.f32.xlu1 %v2548_v22  ;;  %11172 = vst [vmem:[#allocation48_spill] sm:$0xff] %v8384_v28  ;;  %v11173_v22 = vld [vmem:[#allocation44_spill] sm:$0xff]  ;;  %v2551_v62 = vmul.f32 %v8384_v28, %v8384_v28 }
 0x4df   :  { %11170 = vst [vmem:[#allocation47_spill] sm:$0xff] %v8379_v58  ;;  %v8389_v39 = vsub.f32 %v11173_v22, %v2424_v15  ;;  %v2576_v43 = vmul.f32 %v8379_v58, %v8379_v58 }
 0x4e0   :  { %2689 = vadd.xlane.f32.xlu0 %v2573_v6  ;;  %3352 = vmatmul.mubr.bf16.gmra.mrb[68].mxu0 %v3170_v45 }
 0x4e1   :  { %3361 = vmatprep.mubr.bf16.mxu0 %v11161_v17  ;;  %11174 = vst [vmem:[#allocation36_spill] sm:$0xff] %v8389_v39  ;;  %v2552_v23 = vmul.f32 %v8389_v39, %v8389_v39  ;;  %v11185_v39 = vld [vmem:[#allocation55_spill] sm:$0xff] }
 0x4e2   :  { %2691 = vadd.xlane.f32.xlu1 %v2574_v8 }
 0x4e4   :  { %2641 = vadd.xlane.f32.xlu0 %v2549_v61 }
 0x4e6   :  { %2643 = vadd.xlane.f32.xlu1 %v2550_v20 }
 0x4e8   :  { %2693 = vadd.xlane.f32.xlu0 %v2575_v56 }
 0x4ea   :  { %2695 = vadd.xlane.f32.xlu1 %v2576_v43 }
 0x4ec   :  { %2645 = vadd.xlane.f32.xlu0 %v2551_v62 }
 0x4ee   :  { %2647 = vadd.xlane.f32.xlu1 %v2552_v23  ;;  %v11180_v23 = vld [vmem:[#allocation56_spill] sm:$0xff] }
 0x505   :  { %v2377_v6 = vpop.xlane.xlu0 %2376 }
 0x506   :  { %v2449_v45 = vmul.f32 0.0078125, %v2377_v6 }
 0x507   :  { %v2379_v52 = vpop.xlane.xlu1 %2378 }
 0x508   :  { %v8398_v8 = vsub.f32 %v11175_v34, %v2449_v45  ;;  %v2450_v16 = vmul.f32 0.0078125, %v2379_v52 }
 0x509   :  { %v2329_v55 = vpop.xlane.xlu0 %2328 }
 0x50a   :  { %11176 = vst [vmem:[#allocation42_spill] sm:$0xff] %v8398_v8  ;;  %v8401_v61 = vsub.f32 %v8017_v24, %v2450_v16  ;;  %v2425_v15 = vmul.f32 0.0078125, %v2329_v55  ;;  %v2577_v36 = vmul.f32 %v8398_v8, %v8398_v8 }
 0x50b   :  { %v2331_v20 = vpop.xlane.xlu1 %2330 }
 0x50c   :  { %11177 = vst [vmem:[#allocation34_spill] sm:$0xff] %v8401_v61  ;;  %v8406_v56 = vsub.f32 %v11178_v2, %v2425_v15  ;;  %v2426_v22 = vmul.f32 0.0078125, %v2331_v20  ;;  %2697 = vadd.xlane.f32.xlu0 %v2577_v36  ;;  %v2578_v43 = vmul.f32 %v8401_v61, %v8401_v61 }
 0x50d   :  { %v2598_v62 = vpop.xlane.xlu0 %2597 }
 0x50e   :  { %11179 = vst [vmem:[#allocation50_spill] sm:$0xff] %v8406_v56  ;;  %v8411_v6 = vsub.f32 %v11180_v23, %v2426_v22  ;;  %v2719_v45 = vmul.f32 0.0078125, %v2598_v62  ;;  %2699 = vadd.xlane.f32.xlu1 %v2578_v43  ;;  %v2553_v24 = vmul.f32 %v8406_v56, %v8406_v56 }
 0x50f   :  { %v2600_v52 = vpop.xlane.xlu1 %2599 }
 0x510   :  { %11181 = vst [vmem:[#allocation26_spill] sm:$0xff] %v8411_v6  ;;  %v2783_v34 = vadd.f32 1e-05, %v2719_v45  ;;  %v2720_v16 = vmul.f32 0.0078125, %v2600_v52  ;;  %2649 = vadd.xlane.f32.xlu0 %v2553_v24  ;;  %v2554_v55 = vmul.f32 %v8411_v6, %v8411_v6  ;;  %v11184_v6 = vld [vmem:[#allocation58_spill] sm:$0xff] }
 0x511   :  { %v2594_v15 = vpop.xlane.xlu0 %2593 }
 0x512   :  { %v2784_v36 = vadd.f32 1e-05, %v2720_v16  ;;  %v2717_v20 = vmul.f32 0.0078125, %v2594_v15  ;;  %2651 = vadd.xlane.f32.xlu1 %v2554_v55  ;;  %6063 = vrsqrt.f32 %v2783_v34 }
 0x513   :  { %v2596_v2 = vpop.xlane.xlu1 %2595 }
 0x514   :  { %v2781_v22 = vadd.f32 1e-05, %v2717_v20  ;;  %v2718_v23 = vmul.f32 0.0078125, %v2596_v2  ;;  %6065 = vrsqrt.f32 %v2784_v36 }
 0x515   :  { %v2381_v43 = vpop.xlane.xlu0 %2380 }
 0x516   :  { %6067 = vrsqrt.f32 %v2781_v22  ;;  %v2782_v62 = vadd.f32 1e-05, %v2718_v23  ;;  %v2451_v56 = vmul.f32 0.0078125, %v2381_v43 }
 0x517   :  { %v2383_v61 = vpop.xlane.xlu1 %2382 }
 0x518   :  { %6069 = vrsqrt.f32 %v2782_v62  ;;  %v8418_v45 = vsub.f32 %v8070_v10, %v2451_v56  ;;  %v2452_v24 = vmul.f32 0.0078125, %v2383_v61 }
 0x519   :  { %v2606_v52 = vpop.xlane.xlu0 %2605 }
 0x51a   :  { %11182 = vst [vmem:[#allocation51_spill] sm:$0xff] %v8418_v45  ;;  %v8421_v16 = vsub.f32 %v8081_v13, %v2452_v24  ;;  %v2579_v34 = vmul.f32 %v8418_v45, %v8418_v45  ;;  %v2723_v22 = vmul.f32 0.0078125, %v2606_v52  ;;  %v11186_v52 = vld [vmem:[#allocation59_spill] sm:$0xff] }
 0x51b   :  { %v2608_v55 = vpop.xlane.xlu1 %2607 }
 0x51c   :  { %11183 = vst [vmem:[#allocation29_spill] sm:$0xff] %v8421_v16  ;;  %v2724_v15 = vmul.f32 0.0078125, %v2608_v55  ;;  %2701 = vadd.xlane.f32.xlu0 %v2579_v34  ;;  %v2580_v36 = vmul.f32 %v8421_v16, %v8421_v16  ;;  %v6064_v2 = vpop.eup %6063  ;;  %v2787_v55 = vadd.f32 1e-05, %v2723_v22 }
 0x51d   :  { %v2602_v20 = vpop.xlane.xlu0 %2601  ;;  %v2911_v16 = vmul.f32 %v6064_v2, %v11185_v39 }
 0x51e   :  { %v2721_v23 = vmul.f32 0.0078125, %v2602_v20  ;;  %2703 = vadd.xlane.f32.xlu1 %v2580_v36  ;;  %v6066_v10 = vpop.eup %6065  ;;  %v2788_v61 = vadd.f32 1e-05, %v2724_v15  ;;  %v11187_v15 = vld [vmem:[#allocation57_spill] sm:$0xff] }
 0x51f   :  { %v2604_v56 = vpop.xlane.xlu1 %2603  ;;  %v2912_v58 = vmul.f32 %v6066_v10, %v11187_v15  ;;  %v2979_v39 = vmul.f32 %v8298_v1, %v2911_v16 }
 0x520   :  { %v6068_v43 = vpop.eup %6067  ;;  %v2785_v13 = vadd.f32 1e-05, %v2721_v23  ;;  %v2722_v62 = vmul.f32 0.0078125, %v2604_v56 }
 0x521   :  { %v2614_v24 = vpop.xlane.xlu0 %2613  ;;  %v2909_v45 = vmul.f32 %v6068_v43, %v11184_v6  ;;  %v2980_v2 = vmul.f32 %v8298_v1, %v2912_v58 }
 0x522   :  { %v6070_v8 = vpop.eup %6069  ;;  %6071 = vrsqrt.f32 %v2785_v13  ;;  %v2786_v34 = vadd.f32 1e-05, %v2722_v62 }
 0x523   :  { %6073 = vrsqrt.f32 %v2788_v61  ;;  %v2616_v28 = vpop.xlane.xlu1 %2615  ;;  %v2910_v20 = vmul.f32 %v6070_v8, %v11186_v52  ;;  %v2977_v36 = vmul.f32 %v8298_v1, %v2909_v45 }
 0x524   :  { %6075 = vrsqrt.f32 %v2786_v34  ;;  %v2728_v27 = vmul.f32 0.0078125, %v2616_v28 }
 0x525   :  { %v2610_v23 = vpop.xlane.xlu0 %2609  ;;  %v2978_v56 = vmul.f32 %v8298_v1, %v2910_v20  ;;  %v3045_v6 = vadd.f32 %v8309_v49, %v2977_v36  ;;  %6077 = vrsqrt.f32 %v2787_v55  ;;  %v3047_v20 = vadd.f32 %v8309_v49, %v2979_v39 }
 0x526   :  { %v2725_v61 = vmul.f32 0.0078125, %v2610_v23  ;;  %v3048_v55 = vadd.f32 %v8309_v49, %v2980_v2 }
 0x527   :  { %v2612_v22 = vpop.xlane.xlu1 %2611  ;;  %v3046_v43 = vadd.f32 %v8309_v49, %v2978_v56  ;;  %v3109_v45 = vmax.f32 %v3045_v6, 0.0 }
 0x528   :  { %v2726_v8 = vmul.f32 0.0078125, %v2612_v22  ;;  %v2789_v56 = vadd.f32 1e-05, %v2725_v61  ;;  %v2727_v22 = vmul.f32 0.0078125, %v2614_v24  ;;  %v3112_v2 = vmax.f32 %v3048_v55, 0.0 }
 0x529   :  { %v2662_v13 = vpop.xlane.xlu0 %2661  ;;  %v3110_v62 = vmax.f32 %v3046_v43, 0.0  ;;  %v2792_v61 = vadd.f32 1e-05, %v2728_v27 }
 0x52a   :  { %v2790_v10 = vadd.f32 1e-05, %v2726_v8  ;;  %v2751_v34 = vmul.f32 0.0078125, %v2662_v13 }
 0x52b   :  { %v2664_v52 = vpop.xlane.xlu1 %2663  ;;  %v3171_v15 = vpack.c.bf16 %v3110_v62, %v3109_v45  ;;  %v3111_v45 = vmax.f32 %v3047_v20, 0.0  ;;  %v2791_v20 = vadd.f32 1e-05, %v2727_v22 }
 0x52c   :  { %v6072_v36 = vpop.eup %6071  ;;  %v2752_v7 = vmul.f32 0.0078125, %v2664_v52  ;;  %6079 = vrsqrt.f32 %v2790_v10  ;;  %v2815_v13 = vadd.f32 1e-05, %v2751_v34 }
 0x52d   :  { %v6074_v16 = vpop.eup %6073  ;;  %3362 = vmatmul.mubr.bf16.gmra.mrb[72].mxu0 %v3171_v15  ;;  %v2658_v58 = vpop.xlane.xlu0 %2657  ;;  %v2913_v23 = vmul.f32 %v6072_v36, %v8085_v25  ;;  %6081 = vrsqrt.f32 %v2789_v56 }
 0x52e   :  { %v6076_v6 = vpop.eup %6075  ;;  %v2816_v43 = vadd.f32 1e-05, %v2752_v7  ;;  %v2749_v8 = vmul.f32 0.0078125, %v2658_v58  ;;  %3371 = vmatprep.mubr.bf16.mxu0 %v11161_v17  ;;  %v2916_v24 = vmul.f32 %v6074_v16, %v8077_v57 }
 0x52f   :  { %v2660_v39 = vpop.xlane.xlu1 %2659  ;;  %v2914_v28 = vmul.f32 %v6076_v6, %v8092_v0  ;;  %v6078_v52 = vpop.eup %6077  ;;  %v2981_v25 = vmul.f32 %v8298_v1, %v2913_v23  ;;  %v3172_v0 = vpack.c.bf16 %v3112_v2, %v3111_v45 }
 0x530   :  { %v2813_v62 = vadd.f32 1e-05, %v2749_v8  ;;  %v2750_v10 = vmul.f32 0.0078125, %v2660_v39  ;;  %6083 = vrsqrt.f32 %v2816_v43  ;;  %v2915_v23 = vmul.f32 %v6078_v52, %v8066_v12 }
 0x531   :  { %v2333_v15 = vpop.xlane.xlu0 %2332  ;;  %v2982_v7 = vmul.f32 %v8298_v1, %v2914_v28  ;;  %v3049_v57 = vadd.f32 %v8309_v49, %v2981_v25  ;;  %v2984_v16 = vmul.f32 %v8298_v1, %v2916_v24 }
 0x532   :  { %6085 = vrsqrt.f32 %v2813_v62  ;;  %v2814_v34 = vadd.f32 1e-05, %v2750_v10  ;;  %v2427_v36 = vmul.f32 0.0078125, %v2333_v15 }
 0x533   :  { %6087 = vrsqrt.f32 %v2815_v13  ;;  %v2335_v55 = vpop.xlane.xlu1 %2334  ;;  %v3050_v27 = vadd.f32 %v8309_v49, %v2982_v7  ;;  %v3052_v62 = vadd.f32 %v8309_v49, %v2984_v16 }
 0x534   :  { %6089 = vrsqrt.f32 %v2814_v34  ;;  %v8447_v56 = vsub.f32 %v8149_v38, %v2427_v36  ;;  %v2428_v58 = vmul.f32 0.0078125, %v2335_v55 }
 0x535   :  { %6091 = vrsqrt.f32 %v2792_v61  ;;  %3372 = vmatmul.mubr.bf16.gmra.mrb[76].mxu0 %v3172_v0  ;;  %v2385_v6 = vpop.xlane.xlu0 %2384  ;;  %v3114_v12 = vmax.f32 %v3050_v27, 0.0  ;;  %v3113_v61 = vmax.f32 %v3049_v57, 0.0 }
 0x536   :  { %v8453_v22 = vsub.f32 %v8156_v31, %v2428_v58  ;;  %v2453_v43 = vmul.f32 0.0078125, %v2385_v6  ;;  %v2555_v8 = vmul.f32 %v8447_v56, %v8447_v56  ;;  %3381 = vmatprep.mubr.bf16.mxu0 %v11161_v17  ;;  %v6080_v38 = vpop.eup %6079  ;;  %6093 = vrsqrt.f32 %v2791_v20 }
 0x537   :  { %v2387_v13 = vpop.xlane.xlu1 %2386  ;;  %v2983_v31 = vmul.f32 %v8298_v1, %v2915_v23  ;;  %v6082_v10 = vpop.eup %6081  ;;  %v2918_v25 = vmul.f32 %v6080_v38, %v8115_v37  ;;  %v3173_v34 = vpack.c.bf16 %v3114_v12, %v3113_v61 }
 0x538   :  { %v8459_v39 = vsub.f32 %v8167_v53, %v2453_v43  ;;  %v2454_v45 = vmul.f32 0.0078125, %v2387_v13  ;;  %2653 = vadd.xlane.f32.xlu0 %v2555_v8  ;;  %v2556_v2 = vmul.f32 %v8453_v22, %v8453_v22  ;;  %v2917_v6 = vmul.f32 %v6082_v10, %v8110_v21 }
 0x539   :  { %v2618_v28 = vpop.xlane.xlu0 %2617  ;;  %v3116_v43 = vmax.f32 %v3052_v62, 0.0  ;;  %v2986_v8 = vmul.f32 %v8298_v1, %v2918_v25 }
 0x53a   :  { %v8466_v52 = vsub.f32 %v8175_v42, %v2454_v45  ;;  %v2729_v15 = vmul.f32 0.0078125, %v2618_v28  ;;  %2655 = vadd.xlane.f32.xlu1 %v2556_v2  ;;  %v2581_v53 = vmul.f32 %v8459_v39, %v8459_v39  ;;  %v6084_v7 = vpop.eup %6083  ;;  %v3051_v42 = vadd.f32 %v8309_v49, %v2983_v31 }
 0x53b   :  { %v2620_v24 = vpop.xlane.xlu1 %2619  ;;  %v2944_v45 = vmul.f32 %v6084_v7, %v8127_v63 }
 0x53c   :  { %v6086_v36 = vpop.eup %6085  ;;  %v2793_v20 = vadd.f32 1e-05, %v2729_v15  ;;  %v2730_v55 = vmul.f32 0.0078125, %v2620_v24  ;;  %2705 = vadd.xlane.f32.xlu0 %v2581_v53  ;;  %v2582_v0 = vmul.f32 %v8466_v52, %v8466_v52  ;;  %v3115_v31 = vmax.f32 %v3051_v42, 0.0 }
 0x53d   :  { %v6088_v27 = vpop.eup %6087  ;;  %v2941_v58 = vmul.f32 %v6086_v36, %v8134_v33  ;;  %3382 = vmatmul.mubr.bf16.gmra.mrb[80].mxu0 %v3173_v34  ;;  %v2666_v23 = vpop.xlane.xlu0 %2665  ;;  %v2985_v15 = vmul.f32 %v8298_v1, %v2917_v6  ;;  %v3054_v36 = vadd.f32 %v8309_v49, %v2986_v8 }
 0x53e   :  { %v6090_v37 = vpop.eup %6089  ;;  %v2794_v57 = vadd.f32 1e-05, %v2730_v55  ;;  %v2753_v16 = vmul.f32 0.0078125, %v2666_v23  ;;  %2707 = vadd.xlane.f32.xlu1 %v2582_v0  ;;  %3391 = vmatprep.mubr.bf16.mxu0 %v11161_v17  ;;  %6095 = vrsqrt.f32 %v2793_v20  ;;  %v2943_v53 = vmul.f32 %v6088_v27, %v8120_v60 }
 0x53f   :  { %v6092_v38 = vpop.eup %6091  ;;  %v3009_v13 = vmul.f32 %v8298_v1, %v2941_v58  ;;  %v2942_v12 = vmul.f32 %v6090_v37, %v8139_v14  ;;  %v2668_v33 = vpop.xlane.xlu1 %2667  ;;  %v3174_v7 = vpack.c.bf16 %v3116_v43, %v3115_v31  ;;  %v3012_v20 = vmul.f32 %v8298_v1, %v2944_v45 }
 0x540   :  { %6097 = vrsqrt.f32 %v2794_v57  ;;  %v2817_v21 = vadd.f32 1e-05, %v2753_v16  ;;  %v2754_v2 = vmul.f32 0.0078125, %v2668_v33  ;;  %v6094_v28 = vpop.eup %6093  ;;  %v2920_v24 = vmul.f32 %v6092_v38, %v8104_v32 }
 0x541   :  { %v3010_v61 = vmul.f32 %v8298_v1, %v2942_v12  ;;  %v2670_v10 = vpop.xlane.xlu0 %2669  ;;  %v3077_v62 = vadd.f32 %v8309_v49, %v3009_v13  ;;  %v2919_v42 = vmul.f32 %v6094_v28, %v8098_v48  ;;  %v3053_v23 = vadd.f32 %v8309_v49, %v2985_v15 }
 0x542   :  { %6099 = vrsqrt.f32 %v2817_v21  ;;  %v2818_v14 = vadd.f32 1e-05, %v2754_v2  ;;  %v2755_v25 = vmul.f32 0.0078125, %v2670_v10  ;;  %v3011_v32 = vmul.f32 %v8298_v1, %v2943_v53 }
 0x543   :  { %v2672_v63 = vpop.xlane.xlu1 %2671  ;;  %v3078_v34 = vadd.f32 %v8309_v49, %v3010_v61  ;;  %v3141_v27 = vmax.f32 %v3077_v62, 0.0  ;;  %v2988_v57 = vmul.f32 %v8298_v1, %v2920_v24  ;;  %v3118_v8 = vmax.f32 %v3054_v36, 0.0 }
 0x544   :  { %6101 = vrsqrt.f32 %v2818_v14  ;;  %v2819_v55 = vadd.f32 1e-05, %v2755_v25  ;;  %v2756_v0 = vmul.f32 0.0078125, %v2672_v63  ;;  %v3080_v48 = vadd.f32 %v8309_v49, %v3012_v20 }
 0x545   :  { %3392 = vmatmul.mubr.bf16.gmra.mrb[84].mxu0 %v3174_v7  ;;  %v2389_v60 = vpop.xlane.xlu0 %2388  ;;  %v3142_v58 = vmax.f32 %v3078_v34, 0.0  ;;  %v3117_v45 = vmax.f32 %v3053_v23, 0.0  ;;  %v3079_v21 = vadd.f32 %v8309_v49, %v3011_v32  ;;  %v2987_v2 = vmul.f32 %v8298_v1, %v2919_v42 }
 0x546   :  { %6103 = vrsqrt.f32 %v2819_v55  ;;  %v2820_v6 = vadd.f32 1e-05, %v2756_v0  ;;  %v2455_v37 = vmul.f32 0.0078125, %v2389_v60  ;;  %3401 = vmatprep.mubr.bf16.mxu0 %v11161_v17  ;;  %v3144_v53 = vmax.f32 %v3080_v48, 0.0 }
 0x547   :  { %v2391_v16 = vpop.xlane.xlu1 %2390  ;;  %v3187_v43 = vpack.c.bf16 %v3142_v58, %v3141_v27  ;;  %v3175_v15 = vpack.c.bf16 %v3118_v8, %v3117_v45  ;;  %v3143_v36 = vmax.f32 %v3079_v21, 0.0  ;;  %v3055_v20 = vadd.f32 %v8309_v49, %v2987_v2 }
 0x548   :  { %6105 = vrsqrt.f32 %v2820_v6  ;;  %v8496_v38 = vsub.f32 %v8220_v4, %v2455_v37  ;;  %v2456_v13 = vmul.f32 0.0078125, %v2391_v16  ;;  %v6096_v12 = vpop.eup %6095  ;;  %v3056_v4 = vadd.f32 %v8309_v49, %v2988_v57 }
 0x549   :  { %3522 = vmatmul.mubr.bf16.vlgmr.msra.gmra.mrb[64].mxu1 %v3187_v43  ;;  %v2622_v33 = vpop.xlane.xlu0 %2621  ;;  %v2921_v7 = vmul.f32 %v6096_v12, %v8163_v46  ;;  %v3188_v58 = vpack.c.bf16 %v3144_v53, %v3143_v36  ;;  %v3119_v43 = vmax.f32 %v3055_v20, 0.0 }
 0x54a   :  { %v6098_v31 = vpop.eup %6097  ;;  %v8501_v28 = vsub.f32 %v8229_v9, %v2456_v13  ;;  %v2731_v61 = vmul.f32 0.0078125, %v2622_v33  ;;  %v2583_v10 = vmul.f32 %v8496_v38, %v8496_v38  ;;  %3531 = vmatprep.mubr.bf16.mxu1 %v11161_v17  ;;  %v3120_v60 = vmax.f32 %v3056_v4, 0.0 }
 0x54b   :  { %v2624_v62 = vpop.xlane.xlu1 %2623  ;;  %v2922_v14 = vmul.f32 %v6098_v31, %v8171_v59  ;;  %v2989_v57 = vmul.f32 %v8298_v1, %v2921_v7 }
 0x54c   :  { %v6100_v25 = vpop.eup %6099  ;;  %v2795_v24 = vadd.f32 1e-05, %v2731_v61  ;;  %v2732_v63 = vmul.f32 0.0078125, %v2624_v62  ;;  %2709 = vadd.xlane.f32.xlu0 %v2583_v10  ;;  %v2584_v9 = vmul.f32 %v8501_v28, %v8501_v28  ;;  %v3176_v21 = vpack.c.bf16 %v3120_v60, %v3119_v43  ;;  %v11188_v61 = vld [vmem:[#allocation60_spill] sm:$0xff] }
 0x54d   :  { %3402 = vmatmul.mubr.bf16.gmra.mrb[88].mxu0 %v3175_v15  ;;  %v2674_v34 = vpop.xlane.xlu0 %2673  ;;  %v2945_v55 = vmul.f32 %v6100_v25, %v8181_v18  ;;  %v2990_v32 = vmul.f32 %v8298_v1, %v2922_v14  ;;  %v3057_v15 = vadd.f32 %v8309_v49, %v2989_v57 }
 0x54e   :  { %v6102_v0 = vpop.eup %6101  ;;  %6107 = vrsqrt.f32 %v2795_v24  ;;  %v2796_v42 = vadd.f32 1e-05, %v2732_v63  ;;  %v2757_v59 = vmul.f32 0.0078125, %v2674_v34  ;;  %2711 = vadd.xlane.f32.xlu1 %v2584_v9  ;;  %3411 = vmatprep.mubr.bf16.mxu0 %v11161_v17 }
 0x54f   :  { %v2676_v27 = vpop.xlane.xlu1 %2675  ;;  %v2946_v23 = vmul.f32 %v6102_v0, %v8189_v29  ;;  %v3013_v46 = vmul.f32 %v8298_v1, %v2945_v55  ;;  %v3058_v31 = vadd.f32 %v8309_v49, %v2990_v32  ;;  %v3121_v60 = vmax.f32 %v3057_v15, 0.0 }
 0x550   :  { %v6104_v6 = vpop.eup %6103  ;;  %6109 = vrsqrt.f32 %v2796_v42  ;;  %v2821_v37 = vadd.f32 1e-05, %v2757_v59  ;;  %v2758_v18 = vmul.f32 0.0078125, %v2676_v27 }
 0x551   :  { %3532 = vmatmul.mubr.bf16.gmra.mrb[68].mxu1 %v3188_v58  ;;  %v2626_v16 = vpop.xlane.xlu0 %2625  ;;  %v3014_v8 = vmul.f32 %v8298_v1, %v2946_v23  ;;  %v3081_v48 = vadd.f32 %v8309_v49, %v3013_v46  ;;  %v2947_v13 = vmul.f32 %v6104_v6, %v8194_v26  ;;  %v3122_v36 = vmax.f32 %v3058_v31, 0.0  ;;  %v11189_v58 = vld [vmem:[#allocation61_spill] sm:$0xff] }
 0x552   :  { %v6106_v29 = vpop.eup %6105  ;;  %6111 = vrsqrt.f32 %v2821_v37  ;;  %v2822_v12 = vadd.f32 1e-05, %v2758_v18  ;;  %v2733_v33 = vmul.f32 0.0078125, %v2626_v16  ;;  %3541 = vmatprep.mubr.bf16.mxu1 %v11161_v17 }
 0x553   :  { %v2628_v45 = vpop.xlane.xlu1 %2627  ;;  %v3082_v2 = vadd.f32 %v8309_v49, %v3014_v8  ;;  %v2948_v10 = vmul.f32 %v6106_v29, %v11188_v61  ;;  %v3145_v53 = vmax.f32 %v3081_v48, 0.0  ;;  %v3015_v25 = vmul.f32 %v8298_v1, %v2947_v13 }
 0x554   :  { %6113 = vrsqrt.f32 %v2822_v12  ;;  %v2797_v4 = vadd.f32 1e-05, %v2733_v33  ;;  %v2734_v62 = vmul.f32 0.0078125, %v2628_v45  ;;  %v3177_v18 = vpack.c.bf16 %v3122_v36, %v3121_v60 }
 0x555   :  { %3412 = vmatmul.mubr.bf16.gmra.mrb[92].mxu0 %v3176_v21  ;;  %v2678_v26 = vpop.xlane.xlu0 %2677  ;;  %v3146_v14 = vmax.f32 %v3082_v2, 0.0  ;;  %v3016_v24 = vmul.f32 %v8298_v1, %v2948_v10  ;;  %v3083_v27 = vadd.f32 %v8309_v49, %v3015_v25 }
 0x556   :  { %6115 = vrsqrt.f32 %v2797_v4  ;;  %v2798_v63 = vadd.f32 1e-05, %v2734_v62  ;;  %v2759_v9 = vmul.f32 0.0078125, %v2678_v26  ;;  %3421 = vmatprep.mubr.bf16.mxu0 %v11161_v17 }
 0x557   :  { %v2680_v7 = vpop.xlane.xlu1 %2679  ;;  %v3189_v34 = vpack.c.bf16 %v3146_v14, %v3145_v53  ;;  %v3084_v20 = vadd.f32 %v8309_v49, %v3016_v24  ;;  %v3147_v12 = vmax.f32 %v3083_v27, 0.0 }
 0x558   :  { %v6108_v55 = vpop.eup %6107  ;;  %6117 = vrsqrt.f32 %v2798_v63  ;;  %v2823_v0 = vadd.f32 1e-05, %v2759_v9  ;;  %v2760_v42 = vmul.f32 0.0078125, %v2680_v7 }
 0x559   :  { %3542 = vmatmul.mubr.bf16.gmra.mrb[72].mxu1 %v3189_v34  ;;  %v2630_v59 = vpop.xlane.xlu0 %2629  ;;  %v2923_v23 = vmul.f32 %v6108_v55, %v11189_v58  ;;  %v3148_v57 = vmax.f32 %v3084_v20, 0.0 }
 0x55a   :  { %v6110_v46 = vpop.eup %6109  ;;  %6119 = vrsqrt.f32 %v2823_v0  ;;  %v2824_v32 = vadd.f32 1e-05, %v2760_v42  ;;  %v2735_v6 = vmul.f32 0.0078125, %v2630_v59  ;;  %3551 = vmatprep.mubr.bf16.mxu1 %v11161_v17 }
 0x55b   :  { %v2632_v37 = vpop.xlane.xlu1 %2631  ;;  %v2924_v16 = vmul.f32 %v6110_v46, %v8225_v19  ;;  %v2991_v43 = vmul.f32 %v8298_v1, %v2923_v23  ;;  %v3190_v10 = vpack.c.bf16 %v3148_v57, %v3147_v12 }
 0x55c   :  { %v6112_v8 = vpop.eup %6111  ;;  %6121 = vrsqrt.f32 %v2824_v32  ;;  %v2799_v48 = vadd.f32 1e-05, %v2735_v6  ;;  %v2736_v13 = vmul.f32 0.0078125, %v2632_v37 }
 0x55d   :  { %3422 = vmatmul.mubr.bf16.gmra.mrb[96].mxu0 %v3177_v18  ;;  %v2682_v29 = vpop.xlane.xlu0 %2681  ;;  %v2992_v33 = vmul.f32 %v8298_v1, %v2924_v16  ;;  %v3059_v45 = vadd.f32 %v8309_v49, %v2991_v43  ;;  %v2949_v21 = vmul.f32 %v6112_v8, %v8234_v35 }
 0x55e   :  { %v6114_v2 = vpop.eup %6113  ;;  %6123 = vrsqrt.f32 %v2799_v48  ;;  %v2800_v31 = vadd.f32 1e-05, %v2736_v13  ;;  %v2761_v61 = vmul.f32 0.0078125, %v2682_v29  ;;  %3431 = vmatprep.mubr.bf16.mxu0 %v11161_v17  ;;  %v11190_v48 = vld [vmem:[#allocation27_spill] sm:$0xff] }
 0x55f   :  { %v2684_v19 = vpop.xlane.xlu1 %2683  ;;  %v3060_v4 = vadd.f32 %v8309_v49, %v2992_v33  ;;  %v2950_v62 = vmul.f32 %v6114_v2, %v8241_v11  ;;  %v3017_v15 = vmul.f32 %v8298_v1, %v2949_v21  ;;  %v3123_v25 = vmax.f32 %v3059_v45, 0.0 }
 0x560   :  { %v6116_v26 = vpop.eup %6115  ;;  %6125 = vrsqrt.f32 %v2800_v31  ;;  %v2825_v53 = vadd.f32 1e-05, %v2761_v61  ;;  %v2762_v14 = vmul.f32 0.0078125, %v2684_v19  ;;  %v11191_v19 = vld [vmem:[#allocation49_spill] sm:$0xff] }
 0x561   :  { %3552 = vmatmul.mubr.bf16.gmra.mrb[76].mxu1 %v3190_v10  ;;  %v2634_v35 = vpop.xlane.xlu0 %2633  ;;  %v3124_v24 = vmax.f32 %v3060_v4, 0.0  ;;  %v3018_v63 = vmul.f32 %v8298_v1, %v2950_v62  ;;  %v3085_v9 = vadd.f32 %v8309_v49, %v3017_v15  ;;  %v2925_v7 = vmul.f32 %v6116_v26, %v8246_v51 }
 0x562   :  { %v6118_v34 = vpop.eup %6117  ;;  %6127 = vrsqrt.f32 %v2825_v53  ;;  %v2826_v36 = vadd.f32 1e-05, %v2762_v14  ;;  %v2737_v11 = vmul.f32 0.0078125, %v2634_v35  ;;  %3561 = vmatprep.mubr.bf16.mxu1 %v11161_v17 }
 0x563   :  { %v2636_v20 = vpop.xlane.xlu1 %2635  ;;  %v3178_v55 = vpack.c.bf16 %v3124_v24, %v3123_v25  ;;  %v3086_v0 = vadd.f32 %v8309_v49, %v3018_v63  ;;  %v2926_v42 = vmul.f32 %v6118_v34, %v8252_v47  ;;  %v2993_v58 = vmul.f32 %v8298_v1, %v2925_v7  ;;  %v11192_v25 = vld [vmem:[#allocation25_spill] sm:$0xff] }
 0x564   :  { %v6120_v59 = vpop.eup %6119  ;;  %6129 = vrsqrt.f32 %v2826_v36  ;;  %v2801_v60 = vadd.f32 1e-05, %v2737_v11  ;;  %v2738_v27 = vmul.f32 0.0078125, %v2636_v20  ;;  %v3149_v23 = vmax.f32 %v3085_v9, 0.0 }
 0x565   :  { %3432 = vmatmul.mubr.bf16.gmra.mrb[100].mxu0 %v3178_v55  ;;  %v2686_v51 = vpop.xlane.xlu0 %2685  ;;  %v3150_v46 = vmax.f32 %v3086_v0, 0.0  ;;  %v2994_v32 = vmul.f32 %v8298_v1, %v2926_v42  ;;  %v2951_v6 = vmul.f32 %v6120_v59, %v8259_v41  ;;  %v3061_v47 = vadd.f32 %v8309_v49, %v2993_v58  ;;  %v11193_v55 = vld [vmem:[#allocation38_spill] sm:$0xff] }
 0x566   :  { %v6122_v37 = vpop.eup %6121  ;;  %6131 = vrsqrt.f32 %v2801_v60  ;;  %v2802_v18 = vadd.f32 1e-05, %v2738_v27  ;;  %v2763_v57 = vmul.f32 0.0078125, %v2686_v51  ;;  %3441 = vmatprep.mubr.bf16.mxu0 %v11161_v17 }
 0x567   :  { %v2688_v16 = vpop.xlane.xlu1 %2687  ;;  %v3191_v43 = vpack.c.bf16 %v3150_v46, %v3149_v23  ;;  %v3062_v8 = vadd.f32 %v8309_v49, %v2994_v32  ;;  %v2952_v13 = vmul.f32 %v6122_v37, %v11190_v48  ;;  %v3019_v29 = vmul.f32 %v8298_v1, %v2951_v6  ;;  %v11194_v46 = vld [vmem:[#allocation39_spill] sm:$0xff] }
 0x568   :  { %v6124_v12 = vpop.eup %6123  ;;  %6133 = vrsqrt.f32 %v2802_v18  ;;  %v2827_v33 = vadd.f32 1e-05, %v2763_v57  ;;  %v2764_v41 = vmul.f32 0.0078125, %v2688_v16  ;;  %v3125_v45 = vmax.f32 %v3061_v47, 0.0 }
 0x569   :  { %3562 = vmatmul.mubr.bf16.gmra.mrb[80].mxu1 %v3191_v43  ;;  %v2638_v21 = vpop.xlane.xlu0 %2637  ;;  %v3126_v2 = vmax.f32 %v3062_v8, 0.0  ;;  %v3020_v31 = vmul.f32 %v8298_v1, %v2952_v13  ;;  %v3087_v61 = vadd.f32 %v8309_v49, %v3019_v29  ;;  %v2927_v10 = vmul.f32 %v6124_v12, %v11191_v19  ;;  %v8570_v8 = vld [vmem:[#allocation11 + $0x1] ss:$0 sm:$0xff]  ;;  %v11195_v29 = vld [vmem:[#allocation31_spill] sm:$0xff] }
 0x56a   :  { %v6126_v4 = vpop.eup %6125  ;;  %6135 = vrsqrt.f32 %v2827_v33  ;;  %v2828_v62 = vadd.f32 1e-05, %v2764_v41  ;;  %v2739_v15 = vmul.f32 0.0078125, %v2638_v21  ;;  %3571 = vmatprep.mubr.bf16.mxu1 %v11161_v17 }
 0x56b   :  { %v2640_v26 = vpop.xlane.xlu1 %2639  ;;  %v3179_v53 = vpack.c.bf16 %v3126_v2, %v3125_v45  ;;  %v3088_v14 = vadd.f32 %v8309_v49, %v3020_v31  ;;  %v2928_v35 = vmul.f32 %v6126_v4, %v11192_v25  ;;  %v2995_v7 = vmul.f32 %v8298_v1, %v2927_v10  ;;  %v8576_v2 = vld [vmem:[#allocation11 + $0x2] ss:$0 sm:$0xff] }
 0x56c   :  { %v6128_v24 = vpop.eup %6127  ;;  %6137 = vrsqrt.f32 %v2828_v62  ;;  %v2803_v63 = vadd.f32 1e-05, %v2739_v15  ;;  %v2740_v9 = vmul.f32 0.0078125, %v2640_v26  ;;  %v3151_v36 = vmax.f32 %v3087_v61, 0.0  ;;  %v11196_v61 = vld [vmem:[#allocation52_spill] sm:$0xff] }
 0x56d   :  { %3442 = vmatmul.mubr.bf16.gmra.mrb[104].mxu0 %v3179_v53  ;;  %v2690_v34 = vpop.xlane.xlu0 %2689  ;;  %v3152_v11 = vmax.f32 %v3088_v14, 0.0  ;;  %v2996_v20 = vmul.f32 %v8298_v1, %v2928_v35  ;;  %v2953_v0 = vmul.f32 %v6128_v24, %v11193_v55  ;;  %v3063_v27 = vadd.f32 %v8309_v49, %v2995_v7 }
 0x56e   :  { %v6130_v42 = vpop.eup %6129  ;;  %6139 = vrsqrt.f32 %v2803_v63  ;;  %v2804_v59 = vadd.f32 1e-05, %v2740_v9  ;;  %v2765_v60 = vmul.f32 0.0078125, %v2690_v34  ;;  %3451 = vmatprep.mubr.bf16.mxu0 %v11161_v17 }
 0x56f   :  { %v2692_v58 = vpop.xlane.xlu1 %2691  ;;  %v3192_v51 = vpack.c.bf16 %v3152_v11, %v3151_v36  ;;  %v3064_v23 = vadd.f32 %v8309_v49, %v2996_v20  ;;  %v2954_v32 = vmul.f32 %v6130_v42, %v11194_v46  ;;  %v3021_v6 = vmul.f32 %v8298_v1, %v2953_v0 }
 0x570   :  { %v6132_v37 = vpop.eup %6131  ;;  %6141 = vrsqrt.f32 %v2804_v59  ;;  %v2829_v18 = vadd.f32 1e-05, %v2765_v60  ;;  %v2766_v57 = vmul.f32 0.0078125, %v2692_v58  ;;  %v3127_v47 = vmax.f32 %v3063_v27, 0.0 }
 0x571   :  { %3572 = vmatmul.mubr.bf16.gmra.mrb[84].mxu1 %v3192_v51  ;;  %v2642_v16 = vpop.xlane.xlu0 %2641  ;;  %v3128_v43 = vmax.f32 %v3064_v23, 0.0  ;;  %v3022_v48 = vmul.f32 %v8570_v8, %v2954_v32  ;;  %v3089_v13 = vadd.f32 %v8309_v49, %v3021_v6  ;;  %v2929_v12 = vmul.f32 %v6132_v37, %v11195_v29 }
 0x572   :  { %v6134_v33 = vpop.eup %6133  ;;  %6143 = vrsqrt.f32 %v2829_v18  ;;  %v2830_v41 = vadd.f32 1e-05, %v2766_v57  ;;  %v2741_v1 = vmul.f32 0.0078125, %v2642_v16  ;;  %3581 = vmatprep.mubr.bf16.mxu1 %v11161_v17 }
 0x573   :  { %v2644_v45 = vpop.xlane.xlu1 %2643  ;;  %v3180_v21 = vpack.c.bf16 %v3128_v43, %v3127_v47  ;;  %v3090_v31 = vadd.f32 %v8576_v2, %v3022_v48  ;;  %v2930_v19 = vmul.f32 %v6134_v33, %v11196_v61  ;;  %v2997_v62 = vmul.f32 %v8570_v8, %v2929_v12 }
 0x574   :  { %v6136_v10 = vpop.eup %6135  ;;  %6145 = vrsqrt.f32 %v2830_v41  ;;  %v2805_v4 = vadd.f32 1e-05, %v2741_v1  ;;  %v2742_v49 = vmul.f32 0.0078125, %v2644_v45  ;;  %v3153_v26 = vmax.f32 %v3089_v13, 0.0 }
 0x575   :  { %3452 = vmatmul.mubr.bf16.gmra.mrb[108].mxu0 %v3180_v21  ;;  %v2694_v15 = vpop.xlane.xlu0 %2693  ;;  %v3154_v53 = vmax.f32 %v3090_v31, 0.0  ;;  %v2998_v14 = vmul.f32 %v8570_v8, %v2930_v19  ;;  %v2955_v25 = vmul.f32 %v6136_v10, %v8318_v30  ;;  %v3065_v9 = vadd.f32 %v8576_v2, %v2997_v62 }
 0x576   :  { %v6138_v35 = vpop.eup %6137  ;;  %6147 = vrsqrt.f32 %v2805_v4  ;;  %v2806_v24 = vadd.f32 1e-05, %v2742_v49  ;;  %v2767_v63 = vmul.f32 0.0078125, %v2694_v15  ;;  %3461 = vmatprep.mubr.bf16.mxu0 %v11161_v17 }
 0x577   :  { %v2696_v7 = vpop.xlane.xlu1 %2695  ;;  %v3193_v34 = vpack.c.bf16 %v3154_v53, %v3153_v26  ;;  %v3066_v36 = vadd.f32 %v8576_v2, %v2998_v14  ;;  %v2956_v11 = vmul.f32 %v6138_v35, %v8328_v3  ;;  %v3023_v20 = vmul.f32 %v8570_v8, %v2955_v25 }
 0x578   :  { %v6140_v55 = vpop.eup %6139  ;;  %6149 = vrsqrt.f32 %v2806_v24  ;;  %v2831_v0 = vadd.f32 1e-05, %v2767_v63  ;;  %v2768_v30 = vmul.f32 0.0078125, %v2696_v7  ;;  %v3129_v42 = vmax.f32 %v3065_v9, 0.0  ;;  %v11198_v63 = vld [vmem:[#allocation37_spill] sm:$0xff] }
 0x579   :  { %3582 = vmatmul.mubr.bf16.gmra.mrb[88].mxu1 %v3193_v34  ;;  %v2646_v59 = vpop.xlane.xlu0 %2645  ;;  %v3130_v60 = vmax.f32 %v3066_v36, 0.0  ;;  %v3024_v27 = vmul.f32 %v8570_v8, %v2956_v11  ;;  %v3091_v58 = vadd.f32 %v8576_v2, %v3023_v20  ;;  %v2931_v51 = vmul.f32 %v6140_v55, %v8332_v50  ;;  %v11199_v11 = vld [vmem:[#allocation47_spill] sm:$0xff] }
 0x57a   :  { %v6142_v23 = vpop.eup %6141  ;;  %6151 = vrsqrt.f32 %v2831_v0  ;;  %v2832_v46 = vadd.f32 1e-05, %v2768_v30  ;;  %v2743_v3 = vmul.f32 0.0078125, %v2646_v59  ;;  %3591 = vmatprep.mubr.bf16.mxu1 %v11161_v17 }
 0x57b   :  { %v2648_v32 = vpop.xlane.xlu1 %2647  ;;  %v3181_v6 = vpack.c.bf16 %v3130_v60, %v3129_v42  ;;  %v3092_v37 = vadd.f32 %v8576_v2, %v3024_v27  ;;  %v2932_v18 = vmul.f32 %v6142_v23, %v8339_v40  ;;  %v2999_v43 = vmul.f32 %v8570_v8, %v2931_v51  ;;  %v11200_v27 = vld [vmem:[#allocation48_spill] sm:$0xff] }
 0x57c   :  { %v6144_v57 = vpop.eup %6143  ;;  %6153 = vrsqrt.f32 %v2832_v46  ;;  %v2807_v47 = vadd.f32 1e-05, %v2743_v3  ;;  %v2744_v16 = vmul.f32 0.0078125, %v2648_v32  ;;  %v3155_v50 = vmax.f32 %v3091_v58, 0.0  ;;  %v11201_v3 = vld [vmem:[#allocation36_spill] sm:$0xff] }
 0x57d   :  { %3462 = vmatmul.mubr.bf16.gmra.mrb[112].mxu0 %v3181_v6  ;;  %v3156_v48 = vmax.f32 %v3092_v37, 0.0  ;;  %v3000_v13 = vmul.f32 %v8570_v8, %v2932_v18  ;;  %v2957_v29 = vmul.f32 %v6144_v57, %v8348_v54  ;;  %v3067_v40 = vadd.f32 %v8576_v2, %v2999_v43 }
 0x57e   :  { %v6146_v12 = vpop.eup %6145  ;;  %6155 = vrsqrt.f32 %v2807_v47  ;;  %v2808_v33 = vadd.f32 1e-05, %v2744_v16  ;;  %3471 = vmatprep.mubr.bf16.mxu0 %v11161_v17 }
 0x57f   :  { %v3194_v41 = vpack.c.bf16 %v3156_v48, %v3155_v50  ;;  %v3068_v1 = vadd.f32 %v8576_v2, %v3000_v13  ;;  %v2958_v45 = vmul.f32 %v6146_v12, %v8354_v44  ;;  %v3025_v21 = vmul.f32 %v8570_v8, %v2957_v29  ;;  %v11197_v44 = vld [vmem:[#allocation28_spill] sm:$0xff] }
 0x580   :  { %v6148_v31 = vpop.eup %6147  ;;  %6157 = vrsqrt.f32 %v2808_v33  ;;  %v3131_v61 = vmax.f32 %v3067_v40, 0.0 }
 0x581   :  { %3592 = vmatmul.mubr.bf16.gmra.mrb[92].mxu1 %v3194_v41  ;;  %v3132_v19 = vmax.f32 %v3068_v1, 0.0  ;;  %v3026_v54 = vmul.f32 %v8570_v8, %v2958_v45  ;;  %v3093_v10 = vadd.f32 %v8576_v2, %v3025_v21  ;;  %v2933_v4 = vmul.f32 %v6148_v31, %v8359_v5 }
 0x582   :  { %v6150_v49 = vpop.eup %6149  ;;  %3601 = vmatprep.mubr.bf16.mxu1 %v11161_v17  ;;  %v3219_v1 = vlaneseq }
 0x583   :  { %v3182_v62 = vpack.c.bf16 %v3132_v19, %v3131_v61  ;;  %v3094_v15 = vadd.f32 %v8576_v2, %v3026_v54  ;;  %v2934_v26 = vmul.f32 %v6150_v49, %v11197_v44  ;;  %v3001_v14 = vmul.f32 %v8570_v8, %v2933_v4 }
 0x584   :  { %v6152_v53 = vpop.eup %6151  ;;  %v3157_v25 = vmax.f32 %v3093_v10, 0.0  ;;  %v3220_v10 = vshrl.u32 %v3219_v1, 7 }
 0x585   :  { %3472 = vmatmul.mubr.bf16.gmra.mrb[116].mxu0 %v3182_v62  ;;  %v3158_v35 = vmax.f32 %v3094_v15, 0.0  ;;  %v3002_v24 = vmul.f32 %v8570_v8, %v2934_v26  ;;  %v2959_v9 = vmul.f32 %v6152_v53, %v11198_v63  ;;  %v3069_v5 = vadd.f32 %v8576_v2, %v3001_v14  ;;  %v3217_v62 = vld [vmem:[#allocation14] ss:$4 sm:$0x3] }
 0x586   :  { %v6154_v7 = vpop.eup %6153  ;;  %3481 = vmatprep.mubr.bf16.mxu0 %v11161_v17  ;;  %v8629_v49 = vsub.s32 0, %v3220_v10  ;;  %v8631_v15 = vsub.s32 1, %v3220_v10 }
 0x587   :  { %v3195_v34 = vpack.c.bf16 %v3158_v35, %v3157_v25  ;;  %v3070_v36 = vadd.f32 %v8576_v2, %v3002_v24  ;;  %v2960_v20 = vmul.f32 %v6154_v7, %v11199_v11  ;;  %v3027_v55 = vmul.f32 %v8570_v8, %v2959_v9  ;;  %v11204_v25 = vld [vmem:[#allocation42_spill] sm:$0xff] }
 0x588   :  { %v6156_v0 = vpop.eup %6155  ;;  %v3133_v30 = vmax.f32 %v3069_v5, 0.0  ;;  %11202 = vst [vmem:[#allocation40_spill] sm:$0xff] %v8629_v49  ;;  %11203 = vst [vmem:[#allocation41_spill] sm:$0xff] %v8631_v15  ;;  %v8634_v26 = vrot.slane %v3217_v62, %v8629_v49  ;;  %v8637_v14 = vrot.slane %v3217_v62, %v8631_v15  ;;  %v11205_v5 = vld [vmem:[#allocation34_spill] sm:$0xff] }
 0x589   :  { %3602 = vmatmul.mubr.bf16.gmra.mrb[96].mxu1 %v3195_v34  ;;  %v3134_v42 = vmax.f32 %v3070_v36, 0.0  ;;  %v3028_v59 = vmul.f32 %v8570_v8, %v2960_v20  ;;  %v3095_v60 = vadd.f32 %v8576_v2, %v3027_v55  ;;  %v2935_v58 = vmul.f32 %v6156_v0, %v11200_v27 }
 0x58a   :  { %v6158_v51 = vpop.eup %6157  ;;  %3611 = vmatprep.mubr.bf16.mxu1 %v11161_v17 }
 0x58b   :  { %v3183_v23 = vpack.c.bf16 %v3134_v42, %v3133_v30  ;;  %v3096_v46 = vadd.f32 %v8576_v2, %v3028_v59  ;;  %v2936_v32 = vmul.f32 %v6158_v51, %v11201_v3  ;;  %v3003_v6 = vmul.f32 %v8570_v8, %v2935_v58  ;;  %v11206_v58 = vld [vmem:[#allocation50_spill] sm:$0xff] }
 0x58c   :  { %v3159_v37 = vmax.f32 %v3095_v60, 0.0 }
 0x58d   :  { %3482 = vmatmul.mubr.bf16.gmra.mrb[120].mxu0 %v3183_v23  ;;  %v3160_v18 = vmax.f32 %v3096_v46, 0.0  ;;  %v3004_v57 = vmul.f32 %v8570_v8, %v2936_v32  ;;  %v3071_v47 = vadd.f32 %v8576_v2, %v3003_v6 }
 0x58e   :  { %3491 = vmatprep.mubr.bf16.mxu0 %v11161_v17 }
 0x58f   :  { %v3196_v16 = vpack.c.bf16 %v3160_v18, %v3159_v37  ;;  %v3072_v43 = vadd.f32 %v8576_v2, %v3004_v57  ;;  %v3135_v50 = vmax.f32 %v3071_v47, 0.0  ;;  %v11207_v57 = vld [vmem:[#allocation26_spill] sm:$0xff] }
 0x591   :  { %3612 = vmatmul.mubr.bf16.gmra.mrb[100].mxu1 %v3196_v16  ;;  %v3136_v48 = vmax.f32 %v3072_v43, 0.0 }
 0x592   :  { %3621 = vmatprep.mubr.bf16.mxu1 %v11161_v17 }
 0x593   :  { %v3184_v13 = vpack.c.bf16 %v3136_v48, %v3135_v50 }
 0x595   :  { %3492 = vmatmul.mubr.bf16.gmra.mrb[124].mxu0 %v3184_v13 }
 0x596   :  { %3501 = vmatprep.mubr.bf16.mxu0 %v11161_v17 }
 0x599   :  { %v2698_v29 = vpop.xlane.xlu0 %2697 }
 0x59a   :  { %v2769_v12 = vmul.f32 0.0078125, %v2698_v29 }
 0x59b   :  { %v2700_v33 = vpop.xlane.xlu1 %2699 }
 0x59c   :  { %v2833_v40 = vadd.f32 1e-05, %v2769_v12  ;;  %v2770_v41 = vmul.f32 0.0078125, %v2700_v33 }
 0x59d   :  { %v2650_v45 = vpop.xlane.xlu0 %2649 }
 0x59e   :  { %6159 = vrsqrt.f32 %v2833_v40  ;;  %v2834_v21 = vadd.f32 1e-05, %v2770_v41  ;;  %v2745_v31 = vmul.f32 0.0078125, %v2650_v45 }
 0x59f   :  { %v2652_v61 = vpop.xlane.xlu1 %2651 }
 0x5a0   :  { %6161 = vrsqrt.f32 %v2834_v21  ;;  %v2809_v19 = vadd.f32 1e-05, %v2745_v31  ;;  %v2746_v54 = vmul.f32 0.0078125, %v2652_v61 }
 0x5a2   :  { %6163 = vrsqrt.f32 %v2809_v19  ;;  %v2810_v4 = vadd.f32 1e-05, %v2746_v54 }
 0x5a4   :  { %6165 = vrsqrt.f32 %v2810_v4 }
 0x5a8   :  { %v6160_v44 = vpop.eup %6159 }
 0x5a9   :  { %v2702_v53 = vpop.xlane.xlu0 %2701  ;;  %v2961_v35 = vmul.f32 %v6160_v44, %v11204_v25  ;;  %v11208_v25 = vld [vmem:[#allocation51_spill] sm:$0xff] }
 0x5aa   :  { %v6162_v24 = vpop.eup %6161  ;;  %v2771_v63 = vmul.f32 0.0078125, %v2702_v53 }
 0x5ab   :  { %v2704_v9 = vpop.xlane.xlu1 %2703  ;;  %v3343_v7 = vpop.f32.mrb[64].mxu0  ;;  %v2962_v34 = vmul.f32 %v6162_v24, %v11205_v5  ;;  %v3029_v36 = vmul.f32 %v8570_v8, %v2961_v35 }
 0x5ac   :  { %v6164_v11 = vpop.eup %6163  ;;  %v2835_v20 = vadd.f32 1e-05, %v2771_v63  ;;  %v2772_v55 = vmul.f32 0.0078125, %v2704_v9  ;;  %v8643_v0 = vadd.f32 %v3343_v7, %v8634_v26  ;;  %v3345_v30 = vpop.f32.mrb[65].mxu0  ;;  %v11209_v63 = vld [vmem:[#allocation29_spill] sm:$0xff] }
 0x5ad   :  { %v8646_v42 = vadd.f32 %v3345_v30, %v8637_v14  ;;  %v3347_v59 = vpop.f32.mrb[66].mxu0  ;;  %v3030_v60 = vmul.f32 %v8570_v8, %v2962_v34  ;;  %v3097_v27 = vadd.f32 %v8576_v2, %v3029_v36  ;;  %v2937_v51 = vmul.f32 %v6164_v11, %v11206_v58 }
 0x5ae   :  { %v6166_v23 = vpop.eup %6165  ;;  %6167 = vrsqrt.f32 %v2835_v20  ;;  %v2836_v46 = vadd.f32 1e-05, %v2772_v55  ;;  %v8652_v3 = vadd.f32 %v3347_v59, %v8634_v26  ;;  %v3349_v32 = vpop.f32.mrb[67].mxu0 }
 0x5af   :  { %v3666_v6 = vadd.f32 %v8646_v42, %v8643_v0  ;;  %v8657_v37 = vadd.f32 %v3349_v32, %v8637_v14  ;;  %v3098_v18 = vadd.f32 %v8576_v2, %v3030_v60  ;;  %v2938_v47 = vmul.f32 %v6166_v23, %v11207_v57 }
 0x5b0   :  { %6169 = vrsqrt.f32 %v2836_v46  ;;  %v3005_v16 = vmul.f32 %v8570_v8, %v2937_v51  ;;  %v3161_v50 = vmax.f32 %v3097_v27, 0.0 }
 0x5b1   :  { %v3669_v43 = vadd.f32 %v8657_v37, %v8652_v3  ;;  %3667 = vadd.xlane.f32.xlu0 %v3666_v6  ;;  %v3162_v48 = vmax.f32 %v3098_v18, 0.0  ;;  %v3006_v13 = vmul.f32 %v8570_v8, %v2938_v47 }
 0x5b2   :  { %v3073_v29 = vadd.f32 %v8576_v2, %v3005_v16 }
 0x5b3   :  { %v3353_v12 = vpop.f32.mrb[68].mxu0  ;;  %3670 = vadd.xlane.f32.xlu1 %v3669_v43  ;;  %v3197_v33 = vpack.c.bf16 %v3162_v48, %v3161_v50  ;;  %v3074_v1 = vadd.f32 %v8576_v2, %v3006_v13 }
 0x5b4   :  { %v8667_v40 = vadd.f32 %v3353_v12, %v8634_v26  ;;  %v3355_v41 = vpop.f32.mrb[69].mxu0  ;;  %v3137_v19 = vmax.f32 %v3073_v29, 0.0 }
 0x5b5   :  { %v8671_v45 = vadd.f32 %v3355_v41, %v8637_v14  ;;  %v3357_v21 = vpop.f32.mrb[70].mxu0  ;;  %3622 = vmatmul.mubr.bf16.gmra.mrb[104].mxu1 %v3197_v33  ;;  %v3138_v54 = vmax.f32 %v3074_v1, 0.0 }
 0x5b6   :  { %v8674_v31 = vadd.f32 %v3357_v21, %v8634_v26  ;;  %v3359_v61 = vpop.f32.mrb[71].mxu0  ;;  %3631 = vmatprep.mubr.bf16.mxu1 %v11161_v17 }
 0x5b7   :  { %v3672_v10 = vadd.f32 %v8671_v45, %v8667_v40  ;;  %v8680_v4 = vadd.f32 %v3359_v61, %v8637_v14  ;;  %v3185_v44 = vpack.c.bf16 %v3138_v54, %v3137_v19 }
 0x5b8   :  { %v6168_v62 = vpop.eup %6167 }
 0x5b9   :  { %v3675_v53 = vadd.f32 %v8680_v4, %v8674_v31  ;;  %3673 = vadd.xlane.f32.xlu0 %v3672_v10  ;;  %v2963_v35 = vmul.f32 %v6168_v62, %v11208_v25  ;;  %3502 = vmatmul.mubr.bf16.gmra.mrb[128].mxu0 %v3185_v44 }
 0x5ba   :  { %v6170_v24 = vpop.eup %6169  ;;  %3511 = vmatprep.mubr.bf16.mxu0 %v11161_v17 }
 0x5bb   :  { %3676 = vadd.xlane.f32.xlu1 %v3675_v53  ;;  %v2964_v9 = vmul.f32 %v6170_v24, %v11209_v63  ;;  %v3031_v7 = vmul.f32 %v8570_v8, %v2963_v35 }
 0x5bd   :  { %v3032_v5 = vmul.f32 %v8570_v8, %v2964_v9  ;;  %v3099_v34 = vadd.f32 %v8576_v2, %v3031_v7 }
 0x5bf   :  { %v3100_v36 = vadd.f32 %v8576_v2, %v3032_v5  ;;  %v3163_v11 = vmax.f32 %v3099_v34, 0.0 }
 0x5c1   :  { %v3164_v20 = vmax.f32 %v3100_v36, 0.0 }
 0x5c3   :  { %v3198_v55 = vpack.c.bf16 %v3164_v20, %v3163_v11 }
 0x5c5   :  { %3632 = vmatmul.mubr.bf16.gmra.mrb[108].mxu1 %v3198_v55  ;;  %v2654_v30 = vpop.xlane.xlu0 %2653 }
 0x5c6   :  { %v2747_v59 = vmul.f32 0.0078125, %v2654_v30  ;;  %3641 = vmatprep.mubr.bf16.mxu1 %v11161_v17 }
 0x5c7   :  { %v2656_v60 = vpop.xlane.xlu1 %2655 }
 0x5c8   :  { %v2811_v27 = vadd.f32 1e-05, %v2747_v59  ;;  %v2748_v58 = vmul.f32 0.0078125, %v2656_v60 }
 0x5c9   :  { %v2706_v51 = vpop.xlane.xlu0 %2705 }
 0x5ca   :  { %6171 = vrsqrt.f32 %v2811_v27  ;;  %v2812_v23 = vadd.f32 1e-05, %v2748_v58  ;;  %v2773_v46 = vmul.f32 0.0078125, %v2706_v51 }
 0x5cb   :  { %v2708_v32 = vpop.xlane.xlu1 %2707 }
 0x5cc   :  { %6173 = vrsqrt.f32 %v2812_v23  ;;  %v2837_v6 = vadd.f32 1e-05, %v2773_v46  ;;  %v2774_v18 = vmul.f32 0.0078125, %v2708_v32 }
 0x5ce   :  { %6175 = vrsqrt.f32 %v2837_v6  ;;  %v2838_v57 = vadd.f32 1e-05, %v2774_v18 }
 0x5d0   :  { %6177 = vrsqrt.f32 %v2838_v57 }
 0x5d4   :  { %v6172_v47 = vpop.eup %6171 }
 0x5d5   :  { %v2939_v16 = vmul.f32 %v6172_v47, %v8447_v56 }
 0x5d6   :  { %v6174_v43 = vpop.eup %6173 }
 0x5d7   :  { %v2940_v50 = vmul.f32 %v6174_v43, %v8453_v22  ;;  %v3007_v48 = vmul.f32 %v8570_v8, %v2939_v16 }
 0x5d8   :  { %v6176_v13 = vpop.eup %6175 }
 0x5d9   :  { %v2710_v29 = vpop.xlane.xlu0 %2709  ;;  %v3008_v12 = vmul.f32 %v8570_v8, %v2940_v50  ;;  %v3075_v33 = vadd.f32 %v8576_v2, %v3007_v48  ;;  %v2965_v41 = vmul.f32 %v6176_v13, %v8459_v39 }
 0x5da   :  { %v6178_v1 = vpop.eup %6177  ;;  %v2775_v21 = vmul.f32 0.0078125, %v2710_v29 }
 0x5db   :  { %v2712_v61 = vpop.xlane.xlu1 %2711  ;;  %v3076_v19 = vadd.f32 %v8576_v2, %v3008_v12  ;;  %v2966_v56 = vmul.f32 %v6178_v1, %v8466_v52  ;;  %v3033_v54 = vmul.f32 %v8570_v8, %v2965_v41  ;;  %v3139_v62 = vmax.f32 %v3075_v33, 0.0 }
 0x5dc   :  { %v2839_v22 = vadd.f32 1e-05, %v2775_v21  ;;  %v2776_v10 = vmul.f32 0.0078125, %v2712_v61 }
 0x5dd   :  { %v3140_v44 = vmax.f32 %v3076_v19, 0.0  ;;  %v3034_v53 = vmul.f32 %v8570_v8, %v2966_v56  ;;  %v3101_v25 = vadd.f32 %v8576_v2, %v3033_v54 }
 0x5de   :  { %6179 = vrsqrt.f32 %v2839_v22  ;;  %v2840_v35 = vadd.f32 1e-05, %v2776_v10 }
 0x5df   :  { %v3186_v39 = vpack.c.bf16 %v3140_v44, %v3139_v62  ;;  %v3102_v24 = vadd.f32 %v8576_v2, %v3034_v53  ;;  %v3165_v63 = vmax.f32 %v3101_v25, 0.0 }
 0x5e0   :  { %6181 = vrsqrt.f32 %v2840_v35 }
 0x5e1   :  { %3512 = vmatmul.mubr.bf16.gmra.mrb[132].mxu0 %v3186_v39  ;;  %v3166_v9 = vmax.f32 %v3102_v24, 0.0 }
 0x5e3   :  { %v3199_v52 = vpack.c.bf16 %v3166_v9, %v3165_v63 }
 0x5e5   :  { %3642 = vmatmul.mubr.bf16.gmra.mrb[112].mxu1 %v3199_v52 }
 0x5e6   :  { %3651 = vmatprep.mubr.bf16.mxu1 %v11161_v17 }
 0x5e8   :  { %v6180_v7 = vpop.eup %6179 }
 0x5e9   :  { %v2967_v5 = vmul.f32 %v6180_v7, %v8496_v38 }
 0x5ea   :  { %v6182_v34 = vpop.eup %6181 }
 0x5eb   :  { %v2968_v36 = vmul.f32 %v6182_v34, %v8501_v28  ;;  %v3035_v11 = vmul.f32 %v8570_v8, %v2967_v5 }
 0x5ed   :  { %v3036_v20 = vmul.f32 %v8570_v8, %v2968_v36  ;;  %v3103_v55 = vadd.f32 %v8576_v2, %v3035_v11 }
 0x5ef   :  { %v3104_v30 = vadd.f32 %v8576_v2, %v3036_v20  ;;  %v3167_v59 = vmax.f32 %v3103_v55, 0.0 }
 0x5f1   :  { %v3168_v60 = vmax.f32 %v3104_v30, 0.0 }
 0x5f3   :  { %v3200_v27 = vpack.c.bf16 %v3168_v60, %v3167_v59 }
 0x5f5   :  { %3652 = vmatmul.mubr.bf16.gmra.mrb[116].mxu1 %v3200_v27 }
 0x600   :  { %v3363_v58 = vpop.f32.mrb[72].mxu0 }
 0x601   :  { %v8712_v17 = vadd.f32 %v3363_v58, %v8634_v26  ;;  %v3365_v38 = vpop.f32.mrb[73].mxu0 }
 0x602   :  { %v8715_v51 = vadd.f32 %v3365_v38, %v8637_v14  ;;  %v3367_v28 = vpop.f32.mrb[74].mxu0 }
 0x603   :  { %v8718_v23 = vadd.f32 %v3367_v28, %v8634_v26  ;;  %v3369_v8 = vpop.f32.mrb[75].mxu0 }
 0x604   :  { %v3678_v2 = vadd.f32 %v8715_v51, %v8712_v17  ;;  %v8723_v46 = vadd.f32 %v3369_v8, %v8637_v14 }
 0x606   :  { %v3681_v32 = vadd.f32 %v8723_v46, %v8718_v23  ;;  %3679 = vadd.xlane.f32.xlu0 %v3678_v2 }
 0x608   :  { %v3373_v6 = vpop.f32.mrb[76].mxu0  ;;  %3682 = vadd.xlane.f32.xlu1 %v3681_v32 }
 0x609   :  { %v8728_v18 = vadd.f32 %v3373_v6, %v8634_v26  ;;  %v3375_v57 = vpop.f32.mrb[77].mxu0 }
 0x60a   :  { %v8731_v47 = vadd.f32 %v3375_v57, %v8637_v14  ;;  %v3377_v16 = vpop.f32.mrb[78].mxu0 }
 0x60b   :  { %11210 = vst [vmem:[#allocation35_spill] sm:$0xff] %v8728_v18  ;;  %v3379_v43 = vpop.f32.mrb[79].mxu0  ;;  %v8736_v48 = vadd.f32 %v3377_v16, %v8634_v26 }
 0x60c   :  { %11211 = vst [vmem:[#allocation32_spill] sm:$0xff] %v8731_v47  ;;  %v3684_v50 = vadd.f32 %v8731_v47, %v8728_v18  ;;  %v8739_v13 = vadd.f32 %v3379_v43, %v8637_v14 }
 0x60d   :  { %11212 = vst [vmem:[#allocation45_spill] sm:$0xff] %v8736_v48 }
 0x60e   :  { %11213 = vst [vmem:[#allocation46_spill] sm:$0xff] %v8739_v13  ;;  %3685 = vadd.xlane.f32.xlu1 %v3684_v50  ;;  %v3687_v29 = vadd.f32 %v8739_v13, %v8736_v48 }
 0x610   :  { %v3383_v12 = vpop.f32.mrb[80].mxu0 }
 0x611   :  { %v8744_v33 = vadd.f32 %v3383_v12, %v8634_v26  ;;  %v3385_v41 = vpop.f32.mrb[81].mxu0 }
 0x612   :  { %v8747_v1 = vadd.f32 %v3385_v41, %v8637_v14  ;;  %3688 = vadd.xlane.f32.xlu1 %v3687_v29  ;;  %v3387_v21 = vpop.f32.mrb[82].mxu0 }
 0x613   :  { %v8750_v61 = vadd.f32 %v3387_v21, %v8634_v26  ;;  %v3389_v19 = vpop.f32.mrb[83].mxu0 }
 0x614   :  { %v3690_v56 = vadd.f32 %v8747_v1, %v8744_v33  ;;  %v8755_v54 = vadd.f32 %v3389_v19, %v8637_v14 }
 0x615   :  { %11214 = vst [vmem:[#allocation30_spill] sm:$0xff] %v8750_v61 }
 0x616   :  { %11215 = vst [vmem:[#allocation33_spill] sm:$0xff] %v8755_v54  ;;  %v3693_v22 = vadd.f32 %v8755_v54, %v8750_v61  ;;  %3691 = vadd.xlane.f32.xlu0 %v3690_v56 }
 0x618   :  { %v3393_v10 = vpop.f32.mrb[84].mxu0  ;;  %3694 = vadd.xlane.f32.xlu1 %v3693_v22 }
 0x619   :  { %v8760_v62 = vadd.f32 %v3393_v10, %v8634_v26  ;;  %v3395_v44 = vpop.f32.mrb[85].mxu0 }
 0x61a   :  { %v8763_v53 = vadd.f32 %v3395_v44, %v8637_v14  ;;  %v3397_v25 = vpop.f32.mrb[86].mxu0 }
 0x61b   :  { %11216 = vst [vmem:[#allocation43_spill] sm:$0xff] %v8760_v62  ;;  %v8766_v35 = vadd.f32 %v3397_v25, %v8634_v26  ;;  %v3399_v39 = vpop.f32.mrb[87].mxu0 }
 0x61c   :  { %11217 = vst [vmem:[#allocation44_spill] sm:$0xff] %v8763_v53  ;;  %v3696_v24 = vadd.f32 %v8763_v53, %v8760_v62  ;;  %v8771_v63 = vadd.f32 %v3399_v39, %v8637_v14  ;;  %v3523_v9 = vpop.f32.mrb[64].mxu1 }
 0x61d   :  { %v3525_v52 = vpop.f32.mrb[65].mxu1 }
 0x61e   :  { %v3699_v7 = vadd.f32 %v8771_v63, %v8766_v35  ;;  %3697 = vadd.xlane.f32.xlu1 %v3696_v24  ;;  %v3527_v5 = vpop.f32.mrb[66].mxu1 }
 0x61f   :  { %v3529_v34 = vpop.f32.mrb[67].mxu1 }
 0x620   :  { %v3403_v36 = vpop.f32.mrb[88].mxu0  ;;  %3700 = vadd.xlane.f32.xlu0 %v3699_v7 }
 0x621   :  { %v8776_v11 = vadd.f32 %v3403_v36, %v8634_v26  ;;  %v3405_v20 = vpop.f32.mrb[89].mxu0 }
 0x622   :  { %v8779_v55 = vadd.f32 %v3405_v20, %v8637_v14  ;;  %v3407_v30 = vpop.f32.mrb[90].mxu0 }
 0x623   :  { %11218 = vst [vmem:[#allocation53_spill] sm:$0xff] %v8776_v11  ;;  %v8782_v59 = vadd.f32 %v3407_v30, %v8634_v26  ;;  %v3409_v60 = vpop.f32.mrb[91].mxu0 }
 0x624   :  { %11219 = vst [vmem:[#allocation54_spill] sm:$0xff] %v8779_v55  ;;  %v3702_v27 = vadd.f32 %v8779_v55, %v8776_v11  ;;  %v8787_v58 = vadd.f32 %v3409_v60, %v8637_v14  ;;  %v3533_v38 = vpop.f32.mrb[68].mxu1 }
 0x625   :  { %v3535_v28 = vpop.f32.mrb[69].mxu1 }
 0x626   :  { %v3705_v8 = vadd.f32 %v8787_v58, %v8782_v59  ;;  %3703 = vadd.xlane.f32.xlu1 %v3702_v27  ;;  %v8791_v2 = vpop.f32.mrb[70].mxu1 }
 0x627   :  { %v8793_v32 = vpop.f32.mrb[71].mxu1 }
 0x628   :  { %v3413_v6 = vpop.f32.mrb[92].mxu0  ;;  %3706 = vadd.xlane.f32.xlu0 %v3705_v8 }
 0x629   :  { %v8796_v57 = vadd.f32 %v3413_v6, %v8634_v26  ;;  %v3415_v16 = vpop.f32.mrb[93].mxu0 }
 0x62a   :  { %v8799_v43 = vadd.f32 %v3415_v16, %v8637_v14  ;;  %v3417_v50 = vpop.f32.mrb[94].mxu0  ;;  %v8830_v16 = vadd.f32 %v3523_v9, %v8634_v26 }
 0x62b   :  { %v3419_v29 = vpop.f32.mrb[95].mxu0  ;;  %v8804_v41 = vadd.f32 %v3417_v50, %v8634_v26  ;;  %v8833_v50 = vadd.f32 %v3525_v52, %v8637_v14  ;;  %v8847_v52 = vadd.f32 %v3527_v5, %v8634_v26 }
 0x62c   :  { %v3708_v12 = vadd.f32 %v8799_v43, %v8796_v57  ;;  %v8807_v21 = vadd.f32 %v3419_v29, %v8637_v14  ;;  %v8809_v19 = vpop.f32.mrb[72].mxu1  ;;  %11222 = vst [vmem:[#allocation55_spill] sm:$0xff] %v8830_v16 }
 0x62d   :  { %v8811_v56 = vpop.f32.mrb[73].mxu1  ;;  %11223 = vst [vmem:[#allocation59_spill] sm:$0xff] %v8833_v50  ;;  %v3774_v9 = vadd.f32 %v8833_v50, %v8830_v16  ;;  %11224 = vst [vmem:[#allocation57_spill] sm:$0xff] %v8847_v52  ;;  %v8873_v16 = vadd.f32 %v3535_v28, %v8637_v14  ;;  %v8935_v61 = vadd.f32 %v8809_v19, %v8634_v26 }
 0x62e   :  { %v3547_v22 = vpop.f32.mrb[74].mxu1  ;;  %3709 = vadd.xlane.f32.xlu0 %v3708_v12  ;;  %v3711_v44 = vadd.f32 %v8807_v21, %v8804_v41 }
 0x62f   :  { %v3549_v10 = vpop.f32.mrb[75].mxu1  ;;  %11227 = vst [vmem:[#allocation27_spill] sm:$0xff] %v8873_v16  ;;  %v8887_v28 = vadd.f32 %v3547_v22, %v8634_v26  ;;  %11238 = vst [vmem:[#allocation36_spill] sm:$0xff] %v8935_v61 }
 0x630   :  { %v3423_v25 = vpop.f32.mrb[96].mxu0 }
 0x631   :  { %v8816_v39 = vadd.f32 %v3423_v25, %v8634_v26  ;;  %v3425_v24 = vpop.f32.mrb[97].mxu0  ;;  %11229 = vst [vmem:[#allocation25_spill] sm:$0xff] %v8887_v28 }
 0x632   :  { %v8819_v7 = vadd.f32 %v3425_v24, %v8637_v14  ;;  %v3427_v36 = vpop.f32.mrb[98].mxu0  ;;  %3712 = vadd.xlane.f32.xlu0 %v3711_v44 }
 0x633   :  { %v8822_v20 = vadd.f32 %v3427_v36, %v8634_v26  ;;  %v3429_v30 = vpop.f32.mrb[99].mxu0 }
 0x634   :  { %v3714_v60 = vadd.f32 %v8819_v7, %v8816_v39  ;;  %v8827_v27 = vadd.f32 %v3429_v30, %v8637_v14  ;;  %v3553_v8 = vpop.f32.mrb[76].mxu1  ;;  %v8850_v30 = vadd.f32 %v3529_v34, %v8637_v14 }
 0x635   :  { %11220 = vst [vmem:[#allocation56_spill] sm:$0xff] %v8822_v20  ;;  %v3555_v6 = vpop.f32.mrb[77].mxu1 }
 0x636   :  { %11221 = vst [vmem:[#allocation58_spill] sm:$0xff] %v8827_v27  ;;  %v3717_v29 = vadd.f32 %v8827_v27, %v8822_v20  ;;  %v8837_v12 = vpop.f32.mrb[78].mxu1  ;;  %3715 = vadd.xlane.f32.xlu0 %v3714_v60  ;;  %11225 = vst [vmem:[#allocation60_spill] sm:$0xff] %v8850_v30  ;;  %v3777_v34 = vadd.f32 %v8850_v30, %v8847_v52 }
 0x637   :  { %v8839_v44 = vpop.f32.mrb[79].mxu1 }
 0x638   :  { %3718 = vadd.xlane.f32.xlu1 %v3717_v29  ;;  %v3433_v25 = vpop.f32.mrb[100].mxu0 }
 0x639   :  { %v8842_v24 = vadd.f32 %v3433_v25, %v8634_v26  ;;  %v3435_v36 = vpop.f32.mrb[101].mxu0 }
 0x63a   :  { %v8853_v15 = vadd.f32 %v3435_v36, %v8637_v14  ;;  %v3437_v60 = vpop.f32.mrb[102].mxu0  ;;  %v8870_v36 = vadd.f32 %v3533_v38, %v8634_v26 }
 0x63b   :  { %v3439_v49 = vpop.f32.mrb[103].mxu0  ;;  %v8858_v25 = vadd.f32 %v3437_v60, %v8634_v26 }
 0x63c   :  { %v3720_v29 = vadd.f32 %v8853_v15, %v8842_v24  ;;  %v8861_v27 = vadd.f32 %v3439_v49, %v8637_v14  ;;  %3775 = vadd.xlane.f32.xlu1 %v3774_v9  ;;  %v8863_v5 = vpop.f32.mrb[80].mxu1  ;;  %11226 = vst [vmem:[#allocation61_spill] sm:$0xff] %v8870_v36  ;;  %v3780_v38 = vadd.f32 %v8873_v16, %v8870_v36 }
 0x63d   :  { %v8865_v50 = vpop.f32.mrb[81].mxu1  ;;  %v8913_v36 = vadd.f32 %v3555_v6, %v8637_v14 }
 0x63e   :  { %3721 = vadd.xlane.f32.xlu0 %v3720_v29  ;;  %v8875_v60 = vpop.f32.mrb[82].mxu1  ;;  %v3723_v49 = vadd.f32 %v8861_v27, %v8858_v25  ;;  %v8890_v29 = vadd.f32 %v3549_v10, %v8637_v14 }
 0x63f   :  { %v8877_v20 = vpop.f32.mrb[83].mxu1  ;;  %11235 = vst [vmem:[#allocation37_spill] sm:$0xff] %v8913_v36 }
 0x640   :  { %3778 = vadd.xlane.f32.xlu1 %v3777_v34  ;;  %v3443_v9 = vpop.f32.mrb[104].mxu0  ;;  %11230 = vst [vmem:[#allocation38_spill] sm:$0xff] %v8890_v29 }
 0x641   :  { %v8882_v55 = vadd.f32 %v3443_v9, %v8634_v26  ;;  %v3445_v30 = vpop.f32.mrb[105].mxu0 }
 0x642   :  { %v8893_v52 = vadd.f32 %v3445_v30, %v8637_v14  ;;  %3724 = vadd.xlane.f32.xlu0 %v3723_v49  ;;  %v3447_v11 = vpop.f32.mrb[106].mxu0  ;;  %v3789_v30 = vadd.f32 %v8890_v29, %v8887_v28  ;;  %v8910_v49 = vadd.f32 %v3553_v8, %v8634_v26 }
 0x643   :  { %11228 = vst [vmem:[#allocation49_spill] sm:$0xff] %v8882_v55  ;;  %v3449_v34 = vpop.f32.mrb[107].mxu0  ;;  %v8898_v53 = vadd.f32 %v3447_v11, %v8634_v26 }
 0x644   :  { %11231 = vst [vmem:[#allocation39_spill] sm:$0xff] %v8893_v52  ;;  %v3726_v9 = vadd.f32 %v8893_v52, %v8882_v55  ;;  %v8901_v16 = vadd.f32 %v3449_v34, %v8637_v14  ;;  %3781 = vadd.xlane.f32.xlu1 %v3780_v38  ;;  %v8903_v22 = vpop.f32.mrb[84].mxu1  ;;  %11234 = vst [vmem:[#allocation28_spill] sm:$0xff] %v8910_v49  ;;  %v8921_v38 = vadd.f32 %v8791_v2, %v8634_v26 }
 0x645   :  { %11232 = vst [vmem:[#allocation31_spill] sm:$0xff] %v8898_v53  ;;  %v8905_v10 = vpop.f32.mrb[85].mxu1  ;;  %v8925_v34 = vadd.f32 %v8793_v32, %v8637_v14  ;;  %v8939_v32 = vadd.f32 %v8811_v56, %v8637_v14 }
 0x646   :  { %11233 = vst [vmem:[#allocation52_spill] sm:$0xff] %v8901_v16  ;;  %3727 = vadd.xlane.f32.xlu0 %v3726_v9  ;;  %v8915_v11 = vpop.f32.mrb[86].mxu1  ;;  %11236 = vst [vmem:[#allocation47_spill] sm:$0xff] %v8921_v38  ;;  %v3729_v8 = vadd.f32 %v8901_v16, %v8898_v53  ;;  %v3792_v9 = vadd.f32 %v8913_v36, %v8910_v49 }
 0x647   :  { %v8917_v62 = vpop.f32.mrb[87].mxu1  ;;  %11237 = vst [vmem:[#allocation48_spill] sm:$0xff] %v8925_v34  ;;  %v3783_v2 = vadd.f32 %v8925_v34, %v8921_v38  ;;  %11239 = vst [vmem:[#allocation42_spill] sm:$0xff] %v8939_v32  ;;  %v3786_v34 = vadd.f32 %v8939_v32, %v8935_v61 }
 0x648   :  { %3790 = vadd.xlane.f32.xlu1 %v3789_v30  ;;  %v3453_v29 = vpop.f32.mrb[108].mxu0 }
 0x649   :  { %v3455_v6 = vpop.f32.mrb[109].mxu0  ;;  %v8952_v19 = vadd.f32 %v3453_v29, %v8634_v26 }
 0x64a   :  { %3730 = vadd.xlane.f32.xlu0 %v3729_v8  ;;  %v3457_v28 = vpop.f32.mrb[110].mxu0  ;;  %v8955_v38 = vadd.f32 %v3455_v6, %v8637_v14 }
 0x64b   :  { %v3459_v54 = vpop.f32.mrb[111].mxu0  ;;  %11240 = vst [vmem:[#allocation34_spill] sm:$0xff] %v8952_v19  ;;  %v8963_v53 = vadd.f32 %v3457_v28, %v8634_v26 }
 0x64c   :  { %3793 = vadd.xlane.f32.xlu1 %v3792_v9  ;;  %v8941_v30 = vpop.f32.mrb[88].mxu1  ;;  %11241 = vst [vmem:[#allocation50_spill] sm:$0xff] %v8955_v38  ;;  %v3732_v16 = vadd.f32 %v8955_v38, %v8952_v19  ;;  %v8966_v29 = vadd.f32 %v3459_v54, %v8637_v14 }
 0x64d   :  { %v8943_v13 = vpop.f32.mrb[89].mxu1  ;;  %11243 = vst [vmem:[#allocation51_spill] sm:$0xff] %v8963_v53 }
 0x64e   :  { %3784 = vadd.xlane.f32.xlu0 %v3783_v2  ;;  %v8945_v8 = vpop.f32.mrb[90].mxu1  ;;  %11244 = vst [vmem:[#allocation29_spill] sm:$0xff] %v8966_v29  ;;  %v3735_v28 = vadd.f32 %v8966_v29, %v8963_v53  ;;  %v8997_v29 = vadd.f32 %v8837_v12, %v8634_v26  ;;  %v9015_v12 = vadd.f32 %v8863_v5, %v8634_v26 }
 0x64f   :  { %v8947_v36 = vpop.f32.mrb[91].mxu1 }
 0x650   :  { %v3463_v56 = vpop.f32.mrb[112].mxu0  ;;  %11250 = vst [vmem:[#allocation67_spill] sm:$0xff] %v8997_v29  ;;  %11252 = vst [vmem:[#allocation69_spill] sm:$0xff] %v9015_v12 }
 0x651   :  { %v3465_v9 = vpop.f32.mrb[113].mxu0  ;;  %v8984_v54 = vadd.f32 %v3463_v56, %v8634_v26  ;;  %v9001_v56 = vadd.f32 %v8839_v44, %v8637_v14  ;;  %v9019_v44 = vadd.f32 %v8865_v50, %v8637_v14 }
 0x652   :  { %3787 = vadd.xlane.f32.xlu0 %v3786_v34  ;;  %v3467_v49 = vpop.f32.mrb[114].mxu0 }
 0x653   :  { %v8958_v48 = vadd.f32 %v3467_v49, %v8634_v26  ;;  %v3469_v2 = vpop.f32.mrb[115].mxu0  ;;  %11246 = vst [vmem:[#allocation63_spill] sm:$0xff] %v8984_v54  ;;  %11251 = vst [vmem:[#allocation68_spill] sm:$0xff] %v9001_v56  ;;  %v3798_v53 = vadd.f32 %v9019_v44, %v9015_v12 }
 0x654   :  { %v8969_v6 = vadd.f32 %v3469_v2, %v8637_v14  ;;  %v8971_v32 = vpop.f32.mrb[92].mxu1  ;;  %v8987_v2 = vadd.f32 %v3465_v9, %v8637_v14  ;;  %11253 = vst [vmem:[#allocation70_spill] sm:$0xff] %v9019_v44 }
 0x655   :  { %11242 = vst [vmem:[#allocation26_spill] sm:$0xff] %v8958_v48  ;;  %v8973_v34 = vpop.f32.mrb[93].mxu1 }
 0x656   :  { %11245 = vst [vmem:[#allocation62_spill] sm:$0xff] %v8969_v6  ;;  %v3741_v49 = vadd.f32 %v8969_v6, %v8958_v48  ;;  %3733 = vadd.xlane.f32.xlu0 %v3732_v16  ;;  %v8977_v61 = vpop.f32.mrb[94].mxu1  ;;  %11247 = vst [vmem:[#allocation64_spill] sm:$0xff] %v8987_v2  ;;  %v3738_v9 = vadd.f32 %v8987_v2, %v8984_v54 }
 0x657   :  { %v8979_v38 = vpop.f32.mrb[95].mxu1 }
 0x658   :  { %3742 = vadd.xlane.f32.xlu1 %v3741_v49  ;;  %v3473_v19 = vpop.f32.mrb[116].mxu0 }
 0x659   :  { %v8990_v47 = vadd.f32 %v3473_v19, %v8634_v26  ;;  %v3475_v6 = vpop.f32.mrb[117].mxu0 }
 0x65a   :  { %v8993_v16 = vadd.f32 %v3475_v6, %v8637_v14  ;;  %3736 = vadd.xlane.f32.xlu0 %v3735_v28  ;;  %v3477_v48 = vpop.f32.mrb[118].mxu0 }
 0x65b   :  { %11248 = vst [vmem:[#allocation65_spill] sm:$0xff] %v8990_v47  ;;  %v3479_v18 = vpop.f32.mrb[119].mxu0  ;;  %v9034_v50 = vadd.f32 %v3477_v48, %v8634_v26 }
 0x65c   :  { %11249 = vst [vmem:[#allocation66_spill] sm:$0xff] %v8993_v16  ;;  %v3744_v19 = vadd.f32 %v8993_v16, %v8990_v47  ;;  %v9007_v49 = vpop.f32.mrb[96].mxu1  ;;  %v3795_v16 = vadd.f32 %v9001_v56, %v8997_v29  ;;  %v9037_v55 = vadd.f32 %v3479_v18, %v8637_v14  ;;  %v9057_v18 = vadd.f32 %v8875_v60, %v8634_v26 }
 0x65d   :  { %v9009_v6 = vpop.f32.mrb[97].mxu1 }
 0x65e   :  { %3739 = vadd.xlane.f32.xlu0 %v3738_v9  ;;  %3745 = vadd.xlane.f32.xlu1 %v3744_v19  ;;  %v9011_v28 = vpop.f32.mrb[98].mxu1  ;;  %11256 = vst [vmem:[#allocation73_spill] sm:$0xff] %v9037_v55 }
 0x65f   :  { %v9021_v2 = vpop.f32.mrb[99].mxu1 }
 0x660   :  { %v3483_v47 = vpop.f32.mrb[120].mxu0 }
 0x661   :  { %v9026_v54 = vadd.f32 %v3483_v47, %v8634_v26  ;;  %v3485_v9 = vpop.f32.mrb[121].mxu0 }
 0x662   :  { %v9029_v19 = vadd.f32 %v3485_v9, %v8637_v14  ;;  %3796 = vadd.xlane.f32.xlu0 %v3795_v16  ;;  %v3487_v5 = vpop.f32.mrb[122].mxu0 }
 0x663   :  { %11254 = vst [vmem:[#allocation71_spill] sm:$0xff] %v9026_v54  ;;  %v3489_v52 = vpop.f32.mrb[123].mxu0  ;;  %v9042_v56 = vadd.f32 %v3487_v5, %v8634_v26  ;;  %v9061_v5 = vadd.f32 %v8877_v20, %v8637_v14  ;;  %v9075_v20 = vadd.f32 %v8903_v22, %v8634_v26 }
 0x664   :  { %11255 = vst [vmem:[#allocation72_spill] sm:$0xff] %v9029_v19  ;;  %v3750_v47 = vadd.f32 %v9029_v19, %v9026_v54  ;;  %v9045_v9 = vadd.f32 %v3489_v52, %v8637_v14  ;;  %v9047_v16 = vpop.f32.mrb[100].mxu1  ;;  %v3747_v52 = vadd.f32 %v9037_v55, %v9034_v50  ;;  %v9079_v55 = vadd.f32 %v8905_v10, %v8637_v14 }
 0x665   :  { %11257 = vst [vmem:[#allocation74_spill] sm:$0xff] %v9042_v56  ;;  %v9049_v29 = vpop.f32.mrb[101].mxu1 }
 0x666   :  { %11258 = vst [vmem:[#allocation75_spill] sm:$0xff] %v9045_v9  ;;  %3799 = vadd.xlane.f32.xlu0 %v3798_v53  ;;  %3751 = vadd.xlane.f32.xlu1 %v3750_v47  ;;  %v9051_v48 = vpop.f32.mrb[102].mxu1  ;;  %v3753_v19 = vadd.f32 %v9045_v9, %v9042_v56  ;;  %v9085_v56 = vadd.f32 %v8945_v8, %v8634_v26 }
 0x667   :  { %v9053_v44 = vpop.f32.mrb[103].mxu1  ;;  %v3804_v10 = vadd.f32 %v9079_v55, %v9075_v20  ;;  %v9101_v8 = vadd.f32 %v8917_v62, %v8637_v14  ;;  %v9119_v62 = vadd.f32 %v8943_v13, %v8637_v14 }
 0x668   :  { %v3493_v53 = vpop.f32.mrb[124].mxu0  ;;  %11260 = vst [vmem:[#allocation77_spill] sm:$0xff] %v9085_v56 }
 0x669   :  { %v9068_v47 = vadd.f32 %v3493_v53, %v8634_v26  ;;  %v3495_v54 = vpop.f32.mrb[125].mxu0  ;;  %v3801_v53 = vadd.f32 %v9061_v5, %v9057_v18  ;;  %11263 = vst [vmem:[#allocation80_spill] sm:$0xff] %v9101_v8 }
 0x66a   :  { %v9071_v12 = vadd.f32 %v3495_v54, %v8637_v14  ;;  %3748 = vadd.xlane.f32.xlu0 %v3747_v52  ;;  %3754 = vadd.xlane.f32.xlu1 %v3753_v19  ;;  %v3497_v60 = vpop.f32.mrb[126].mxu0  ;;  %v9089_v54 = vadd.f32 %v8947_v36, %v8637_v14  ;;  %v9097_v19 = vadd.f32 %v8915_v11, %v8634_v26 }
 0x66b   :  { %v3499_v9 = vpop.f32.mrb[127].mxu0  ;;  %v9106_v52 = vadd.f32 %v3497_v60, %v8634_v26  ;;  %v9115_v11 = vadd.f32 %v8941_v30, %v8634_v26  ;;  %v9131_v30 = vadd.f32 %v8973_v34, %v8637_v14 }
 0x66c   :  { %11259 = vst [vmem:[#allocation76_spill] sm:$0xff] %v9071_v12  ;;  %11261 = vst [vmem:[#allocation78_spill] sm:$0xff] %v9089_v54  ;;  %v3756_v22 = vadd.f32 %v9071_v12, %v9068_v47  ;;  %v3813_v36 = vadd.f32 %v9089_v54, %v9085_v56  ;;  %v9155_v12 = vadd.f32 %v8977_v61, %v8634_v26 }
 0x66d   :  { %11262 = vst [vmem:[#allocation79_spill] sm:$0xff] %v9097_v19  ;;  %11264 = vst [vmem:[#allocation81_spill] sm:$0xff] %v9106_v52  ;;  %v9171_v61 = vadd.f32 %v9009_v6, %v8637_v14 }
 0x66e   :  { %3802 = vadd.xlane.f32.xlu0 %v3801_v53  ;;  %3757 = vadd.xlane.f32.xlu1 %v3756_v22  ;;  %v9109_v53 = vadd.f32 %v3499_v9, %v8637_v14  ;;  %v3807_v22 = vadd.f32 %v9101_v8, %v9097_v19  ;;  %v3810_v9 = vadd.f32 %v9119_v62, %v9115_v11 }
 0x66f   :  { %11269 = vst [vmem:[#allocation86_spill] sm:$0xff] %v9155_v12  ;;  %11272 = vst [vmem:[#allocation89_spill] sm:$0xff] %v9171_v61 }
 0x670   :  { %11265 = vst [vmem:[#allocation82_spill] sm:$0xff] %v9109_v53  ;;  %v3759_v60 = vadd.f32 %v9109_v53, %v9106_v52 }
 0x672   :  { %3805 = vadd.xlane.f32.xlu0 %v3804_v10  ;;  %3814 = vadd.xlane.f32.xlu1 %v3813_v36  ;;  %v9127_v10 = vadd.f32 %v8971_v32, %v8634_v26 }
 0x674   :  { %v3816_v13 = vadd.f32 %v9131_v30, %v9127_v10 }
 0x676   :  { %3808 = vadd.xlane.f32.xlu0 %v3807_v22  ;;  %3760 = vadd.xlane.f32.xlu1 %v3759_v60 }
 0x67a   :  { %3811 = vadd.xlane.f32.xlu0 %v3810_v9 }
 0x67e   :  { %3817 = vadd.xlane.f32.xlu0 %v3816_v13 }
 0x688   :  { %v3623_v36 = vpop.f32.mrb[104].mxu1 }
 0x689   :  { %v3625_v8 = vpop.f32.mrb[105].mxu1 }
 0x68a   :  { %v9135_v22 = vpop.f32.mrb[106].mxu1 }
 0x68b   :  { %v9137_v60 = vpop.f32.mrb[107].mxu1 }
 0x68c   :  { %v3503_v19 = vpop.f32.mrb[128].mxu0 }
 0x68d   :  { %v9140_v53 = vadd.f32 %v3503_v19, %v8634_v26  ;;  %v3505_v32 = vpop.f32.mrb[129].mxu0  ;;  %v9159_v19 = vadd.f32 %v8979_v38, %v8637_v14 }
 0x68e   :  { %v9143_v52 = vadd.f32 %v3505_v32, %v8637_v14  ;;  %v3507_v34 = vpop.f32.mrb[130].mxu0 }
 0x68f   :  { %11266 = vst [vmem:[#allocation83_spill] sm:$0xff] %v9140_v53  ;;  %v9146_v9 = vadd.f32 %v3507_v34, %v8634_v26  ;;  %v3509_v54 = vpop.f32.mrb[131].mxu0  ;;  %11270 = vst [vmem:[#allocation87_spill] sm:$0xff] %v9159_v19  ;;  %v3668_v34 = vpop.xlane.xlu0 %3667 }
 0x690   :  { %11267 = vst [vmem:[#allocation84_spill] sm:$0xff] %v9143_v52  ;;  %v3762_v13 = vadd.f32 %v9143_v52, %v9140_v53  ;;  %v9151_v56 = vadd.f32 %v3509_v54, %v8637_v14  ;;  %v3819_v52 = vadd.f32 %v9159_v19, %v9155_v12  ;;  %v9167_v54 = vadd.f32 %v9007_v49, %v8634_v26 }
 0x691   :  { %v9183_v19 = vadd.f32 %v9011_v28, %v8634_v26  ;;  %v9187_v49 = vadd.f32 %v9021_v2, %v8637_v14  ;;  %v9201_v28 = vadd.f32 %v9051_v48, %v8634_v26  ;;  %v9205_v2 = vadd.f32 %v9053_v44, %v8637_v14 }
 0x692   :  { %11268 = vst [vmem:[#allocation85_spill] sm:$0xff] %v9151_v56  ;;  %v3765_v32 = vadd.f32 %v9151_v56, %v9146_v9  ;;  %3763 = vadd.xlane.f32.xlu1 %v3762_v13  ;;  %11271 = vst [vmem:[#allocation88_spill] sm:$0xff] %v9167_v54  ;;  %v3859_v56 = vmul.f32 0.00390625, %v3668_v34 }
 0x693   :  { %11273 = vst [vmem:[#allocation90_spill] sm:$0xff] %v9183_v19  ;;  %11274 = vst [vmem:[#allocation91_spill] sm:$0xff] %v9187_v49  ;;  %v3674_v12 = vpop.xlane.xlu0 %3673 }
 0x694   :  { %3766 = vadd.xlane.f32.xlu0 %v3765_v32  ;;  %v3822_v32 = vadd.f32 %v9171_v61, %v9167_v54  ;;  %v9195_v34 = vsub.f32 %v8646_v42, %v3859_v56  ;;  %v3825_v61 = vadd.f32 %v9187_v49, %v9183_v19 }
 0x696   :  { %11276 = vst [vmem:[#allocation93_spill] sm:$0xff] %v9195_v34  ;;  %v4052_v42 = vmul.f32 %v9195_v34, %v9195_v34 }
 0x697   :  { %v3680_v49 = vpop.xlane.xlu0 %3679 }
 0x698   :  { %v9173_v53 = vpop.f32.mrb[108].mxu1  ;;  %3820 = vadd.xlane.f32.xlu0 %v3819_v52  ;;  %v9192_v52 = vsub.f32 %v8643_v0, %v3859_v56  ;;  %v3861_v56 = vmul.f32 0.00390625, %v3674_v12  ;;  %v3863_v19 = vmul.f32 0.00390625, %v3680_v49 }
 0x699   :  { %v9175_v38 = vpop.f32.mrb[109].mxu1 }
 0x69a   :  { %v9177_v13 = vpop.f32.mrb[110].mxu1  ;;  %11275 = vst [vmem:[#allocation92_spill] sm:$0xff] %v9192_v52  ;;  %v4051_v0 = vmul.f32 %v9192_v52, %v9192_v52  ;;  %v9214_v54 = vsub.f32 %v8667_v40, %v3861_v56  ;;  %v9217_v44 = vsub.f32 %v8671_v45, %v3861_v56  ;;  %v9223_v52 = vadd.f32 %v3625_v8, %v8637_v14 }
 0x69b   :  { %v9189_v6 = vpop.f32.mrb[111].mxu1  ;;  %v9226_v34 = vsub.f32 %v8712_v17, %v3863_v19  ;;  %v9229_v49 = vsub.f32 %v8715_v51, %v3863_v19 }
 0x69c   :  { %3823 = vadd.xlane.f32.xlu0 %v3822_v32  ;;  %v3831_v32 = vadd.f32 %v9205_v2, %v9201_v28  ;;  %v4179_v48 = vadd.f32 %v4052_v42, %v4051_v0  ;;  %11277 = vst [vmem:[#allocation94_spill] sm:$0xff] %v9217_v44  ;;  %v4055_v40 = vmul.f32 %v9214_v54, %v9214_v54 }
 0x69d   :  { %11278 = vst [vmem:[#allocation95_spill] sm:$0xff] %v9226_v34  ;;  %11279 = vst [vmem:[#allocation96_spill] sm:$0xff] %v9229_v49  ;;  %v4056_v45 = vmul.f32 %v9217_v44, %v9217_v44  ;;  %v4059_v42 = vmul.f32 %v9226_v34, %v9226_v34  ;;  %v4060_v17 = vmul.f32 %v9229_v49, %v9229_v49  ;;  %v3671_v44 = vpop.xlane.xlu1 %3670 }
 0x6a0   :  { %3826 = vadd.xlane.f32.xlu0 %v3825_v61  ;;  %v9220_v61 = vadd.f32 %v3623_v36, %v8634_v26 }
 0x6a2   :  { %v3834_v36 = vadd.f32 %v9223_v52, %v9220_v61 }
 0x6a3   :  { %v3692_v12 = vpop.xlane.xlu0 %3691 }
 0x6a4   :  { %3832 = vadd.xlane.f32.xlu0 %v3831_v32  ;;  %v3867_v0 = vmul.f32 0.00390625, %v3692_v12  ;;  %v4185_v32 = vadd.f32 %v4056_v45, %v4055_v40 }
 0x6a6   :  { %v9242_v51 = vsub.f32 %v8744_v33, %v3867_v0  ;;  %v9245_v19 = vsub.f32 %v8747_v1, %v3867_v0  ;;  %v3860_v0 = vmul.f32 0.00390625, %v3671_v44 }
 0x6a8   :  { %4180 = vadd.xlane.f32.xlu0 %v4179_v48  ;;  %11280 = vst [vmem:[#allocation97_spill] sm:$0xff] %v9242_v51  ;;  %11281 = vst [vmem:[#allocation98_spill] sm:$0xff] %v9245_v19  ;;  %v4191_v48 = vadd.f32 %v4060_v17, %v4059_v42  ;;  %v4067_v12 = vmul.f32 %v9242_v51, %v9242_v51  ;;  %v9333_v51 = vadd.f32 %v9135_v22, %v8634_v26 }
 0x6ac   :  { %3835 = vadd.xlane.f32.xlu0 %v3834_v36  ;;  %v4068_v36 = vmul.f32 %v9245_v19, %v9245_v19  ;;  %v3677_v19 = vpop.xlane.xlu1 %3676 }
 0x6ad   :  { %v3701_v8 = vpop.xlane.xlu0 %3700 }
 0x6ae   :  { %v3870_v56 = vmul.f32 0.00390625, %v3701_v8 }
 0x6b0   :  { %4186 = vadd.xlane.f32.xlu0 %v4185_v32  ;;  %v9252_v34 = vsub.f32 %v8766_v35, %v3870_v56  ;;  %v9255_v33 = vsub.f32 %v8771_v63, %v3870_v56  ;;  %v4203_v32 = vadd.f32 %v4068_v36, %v4067_v12  ;;  %v9286_v12 = vsub.f32 %v8652_v3, %v3860_v0 }
 0x6b1   :  { %v9291_v36 = vsub.f32 %v8657_v37, %v3860_v0  ;;  %v9301_v3 = vadd.f32 %v9047_v16, %v8634_v26 }
 0x6b2   :  { %11282 = vst [vmem:[#allocation99_spill] sm:$0xff] %v9252_v34  ;;  %11283 = vst [vmem:[#allocation100_spill] sm:$0xff] %v9255_v33  ;;  %v4073_v35 = vmul.f32 %v9252_v34, %v9252_v34  ;;  %v4074_v63 = vmul.f32 %v9255_v33, %v9255_v33  ;;  %v4053_v16 = vmul.f32 %v9286_v12, %v9286_v12 }
 0x6b4   :  { %v3513_v49 = vpop.f32.mrb[132].mxu0  ;;  %4192 = vadd.xlane.f32.xlu0 %v4191_v48 }
 0x6b5   :  { %v9258_v1 = vadd.f32 %v3513_v49, %v8634_v26  ;;  %v3515_v40 = vpop.f32.mrb[133].mxu0  ;;  %v3707_v45 = vpop.xlane.xlu0 %3706 }
 0x6b6   :  { %v9261_v8 = vadd.f32 %v3515_v40, %v8637_v14  ;;  %v3872_v42 = vmul.f32 0.00390625, %v3707_v45  ;;  %v3517_v17 = vpop.f32.mrb[134].mxu0 }
 0x6b7   :  { %v3519_v56 = vpop.f32.mrb[135].mxu0  ;;  %v9273_v44 = vadd.f32 %v3517_v17, %v8634_v26 }
 0x6b8   :  { %v3768_v49 = vadd.f32 %v9261_v8, %v9258_v1  ;;  %v9270_v48 = vsub.f32 %v8782_v59, %v3872_v42  ;;  %v9275_v40 = vpop.f32.mrb[112].mxu1  ;;  %v9278_v45 = vsub.f32 %v8787_v58, %v3872_v42  ;;  %v9281_v34 = vadd.f32 %v3519_v56, %v8637_v14  ;;  %4204 = vadd.xlane.f32.xlu0 %v4203_v32 }
 0x6b9   :  { %v9283_v33 = vpop.f32.mrb[113].mxu1  ;;  %v4212_v32 = vadd.f32 %v4074_v63, %v4073_v35  ;;  %v4054_v35 = vmul.f32 %v9291_v36, %v9291_v36 }
 0x6ba   :  { %11284 = vst [vmem:[#allocation101_spill] sm:$0xff] %v9270_v48  ;;  %11285 = vst [vmem:[#allocation102_spill] sm:$0xff] %v9278_v45  ;;  %3769 = vadd.xlane.f32.xlu1 %v3768_v49  ;;  %v9288_v59 = vpop.f32.mrb[114].mxu1  ;;  %v4077_v17 = vmul.f32 %v9270_v48, %v9270_v48  ;;  %v4078_v58 = vmul.f32 %v9278_v45, %v9278_v45  ;;  %v9305_v49 = vadd.f32 %v9049_v29, %v8637_v14 }
 0x6bb   :  { %v9297_v42 = vpop.f32.mrb[115].mxu1  ;;  %v3710_v56 = vpop.xlane.xlu0 %3709  ;;  %v3771_v37 = vadd.f32 %v9281_v34, %v9273_v44 }
 0x6bc   :  { %v3873_v0 = vmul.f32 0.00390625, %v3710_v56  ;;  %4213 = vadd.xlane.f32.xlu0 %v4212_v32  ;;  %v4218_v63 = vadd.f32 %v4078_v58, %v4077_v17  ;;  %v3828_v56 = vadd.f32 %v9305_v49, %v9301_v3  ;;  %v3862_v58 = vmul.f32 0.00390625, %v3677_v19 }
 0x6be   :  { %v9310_v48 = vsub.f32 %v8796_v57, %v3873_v0  ;;  %v9313_v45 = vsub.f32 %v8799_v43, %v3873_v0  ;;  %3772 = vadd.xlane.f32.xlu1 %v3771_v37 }
 0x6bf   :  { %v3713_v29 = vpop.xlane.xlu0 %3712 }
 0x6c0   :  { %11286 = vst [vmem:[#allocation103_spill] sm:$0xff] %v9310_v48  ;;  %11287 = vst [vmem:[#allocation104_spill] sm:$0xff] %v9313_v45  ;;  %v4079_v57 = vmul.f32 %v9310_v48, %v9310_v48  ;;  %v4080_v43 = vmul.f32 %v9313_v45, %v9313_v45  ;;  %v3874_v32 = vmul.f32 0.00390625, %v3713_v29  ;;  %4219 = vadd.xlane.f32.xlu0 %v4218_v63 }
 0x6c1   :  { %v9337_v48 = vadd.f32 %v9137_v60, %v8637_v14  ;;  %v4182_v63 = vadd.f32 %v4054_v35, %v4053_v16  ;;  %v9359_v16 = vadd.f32 %v9173_v53, %v8634_v26 }
 0x6c2   :  { %v9326_v37 = vsub.f32 %v8804_v41, %v3874_v32  ;;  %v9329_v0 = vsub.f32 %v8807_v21, %v3874_v32  ;;  %3829 = vadd.xlane.f32.xlu1 %v3828_v56  ;;  %v4221_v17 = vadd.f32 %v4080_v43, %v4079_v57  ;;  %v3683_v56 = vpop.xlane.xlu1 %3682  ;;  %v9350_v57 = vsub.f32 %v8674_v31, %v3862_v58 }
 0x6c3   :  { %v3716_v45 = vpop.xlane.xlu0 %3715  ;;  %v9353_v43 = vsub.f32 %v8680_v4, %v3862_v58 }
 0x6c4   :  { %11288 = vst [vmem:[#allocation105_spill] sm:$0xff] %v9326_v37  ;;  %11289 = vst [vmem:[#allocation106_spill] sm:$0xff] %v9329_v0  ;;  %v4081_v29 = vmul.f32 %v9326_v37, %v9326_v37  ;;  %v4082_v41 = vmul.f32 %v9329_v0, %v9329_v0  ;;  %v3875_v21 = vmul.f32 0.00390625, %v3716_v45  ;;  %4222 = vadd.xlane.f32.xlu0 %v4221_v17 }
 0x6c5   :  { %11292 = vst [vmem:[#allocation109_spill] sm:$0xff] %v9350_v57  ;;  %11293 = vst [vmem:[#allocation110_spill] sm:$0xff] %v9353_v43  ;;  %v3837_v45 = vadd.f32 %v9337_v48, %v9333_v51 }
 0x6c6   :  { %v9344_v19 = vsub.f32 %v8816_v39, %v3875_v21  ;;  %v9347_v22 = vsub.f32 %v8819_v7, %v3875_v21  ;;  %4183 = vadd.xlane.f32.xlu1 %v4182_v63  ;;  %v4224_v60 = vadd.f32 %v4082_v41, %v4081_v29  ;;  %v9363_v39 = vadd.f32 %v9175_v38, %v8637_v14  ;;  %v3686_v4 = vpop.xlane.xlu1 %3685 }
 0x6c7   :  { %v4057_v29 = vmul.f32 %v9350_v57, %v9350_v57  ;;  %v4058_v41 = vmul.f32 %v9353_v43, %v9353_v43  ;;  %v11310_v43 = vld [vmem:[#allocation52_spill] sm:$0xff] }
 0x6c8   :  { %11290 = vst [vmem:[#allocation107_spill] sm:$0xff] %v9344_v19  ;;  %11291 = vst [vmem:[#allocation108_spill] sm:$0xff] %v9347_v22  ;;  %v4083_v7 = vmul.f32 %v9344_v19, %v9344_v19  ;;  %v4084_v31 = vmul.f32 %v9347_v22, %v9347_v22  ;;  %v9369_v35 = vpop.f32.mrb[116].mxu1  ;;  %4225 = vadd.xlane.f32.xlu0 %v4224_v60  ;;  %v3840_v21 = vadd.f32 %v9363_v39, %v9359_v16 }
 0x6c9   :  { %v9371_v32 = vpop.f32.mrb[117].mxu1  ;;  %v3864_v60 = vmul.f32 0.00390625, %v3683_v56 }
 0x6ca   :  { %3838 = vadd.xlane.f32.xlu1 %v3837_v45  ;;  %v9373_v17 = vpop.f32.mrb[118].mxu1  ;;  %v4227_v38 = vadd.f32 %v4084_v31, %v4083_v7  ;;  %v9385_v45 = vadd.f32 %v9177_v13, %v8634_v26  ;;  %v9389_v7 = vadd.f32 %v9189_v6, %v8637_v14  ;;  %v3689_v31 = vpop.xlane.xlu1 %3688 }
 0x6cb   :  { %v9375_v53 = vpop.f32.mrb[119].mxu1  ;;  %v3722_v58 = vpop.xlane.xlu0 %3721 }
 0x6cc   :  { %v3877_v63 = vmul.f32 0.00390625, %v3722_v58  ;;  %4228 = vadd.xlane.f32.xlu0 %v4227_v38  ;;  %v4188_v38 = vadd.f32 %v4058_v41, %v4057_v29  ;;  %v9417_v41 = vadd.f32 %v9275_v40, %v8634_v26 }
 0x6ce   :  { %3841 = vadd.xlane.f32.xlu1 %v3840_v21  ;;  %v9392_v22 = vsub.f32 %v8842_v24, %v3877_v63  ;;  %v9395_v19 = vsub.f32 %v8853_v15, %v3877_v63  ;;  %v9402_v21 = vsub.f32 %v8718_v23, %v3864_v60  ;;  %v9411_v15 = vsub.f32 %v8723_v46, %v3864_v60  ;;  %v3695_v29 = vpop.xlane.xlu1 %3694 }
 0x6cf   :  { %v3725_v0 = vpop.xlane.xlu0 %3724 }
 0x6d0   :  { %11294 = vst [vmem:[#allocation111_spill] sm:$0xff] %v9392_v22  ;;  %11295 = vst [vmem:[#allocation112_spill] sm:$0xff] %v9395_v19  ;;  %v3878_v58 = vmul.f32 0.00390625, %v3725_v0  ;;  %v4087_v56 = vmul.f32 %v9392_v22, %v9392_v22  ;;  %v4088_v13 = vmul.f32 %v9395_v19, %v9395_v19  ;;  %v3843_v0 = vadd.f32 %v9389_v7, %v9385_v45  ;;  %v11302_v19 = vld [vmem:[#allocation39_spill] sm:$0xff] }
 0x6d1   :  { %11296 = vst [vmem:[#allocation113_spill] sm:$0xff] %v9402_v21  ;;  %11299 = vst [vmem:[#allocation116_spill] sm:$0xff] %v9411_v15 }
 0x6d2   :  { %v9405_v6 = vsub.f32 %v8858_v25, %v3878_v58  ;;  %v9408_v24 = vsub.f32 %v8861_v27, %v3878_v58  ;;  %4189 = vadd.xlane.f32.xlu1 %v4188_v38  ;;  %v4233_v63 = vadd.f32 %v4088_v13, %v4087_v56  ;;  %v9421_v25 = vadd.f32 %v9283_v33, %v8637_v14  ;;  %v11300_v58 = vld [vmem:[#allocation49_spill] sm:$0xff]  ;;  %v3698_v22 = vpop.xlane.xlu1 %3697 }
 0x6d3   :  { %v3728_v23 = vpop.xlane.xlu0 %3727  ;;  %v4061_v33 = vmul.f32 %v9402_v21, %v9402_v21  ;;  %v3865_v13 = vmul.f32 0.00390625, %v3686_v4 }
 0x6d4   :  { %11297 = vst [vmem:[#allocation114_spill] sm:$0xff] %v9405_v6  ;;  %11298 = vst [vmem:[#allocation115_spill] sm:$0xff] %v9408_v24  ;;  %v4089_v27 = vmul.f32 %v9405_v6, %v9405_v6  ;;  %v4090_v46 = vmul.f32 %v9408_v24, %v9408_v24  ;;  %v3879_v60 = vmul.f32 0.00390625, %v3728_v23  ;;  %4234 = vadd.xlane.f32.xlu0 %v4233_v63 }
 0x6d5   :  { %v4062_v6 = vmul.f32 %v9411_v15, %v9411_v15  ;;  %v3846_v23 = vadd.f32 %v9421_v25, %v9417_v41  ;;  %v11308_v15 = vld [vmem:[#allocation31_spill] sm:$0xff] }
 0x6d6   :  { %v9428_v38 = vsub.f32 %v11300_v58, %v3879_v60  ;;  %v9431_v40 = vsub.f32 %v11302_v19, %v3879_v60  ;;  %3844 = vadd.xlane.f32.xlu1 %v3843_v0  ;;  %v4236_v56 = vadd.f32 %v4090_v46, %v4089_v27  ;;  %v11304_v46 = vld [vmem:[#allocation35_spill] sm:$0xff]  ;;  %v11306_v60 = vld [vmem:[#allocation32_spill] sm:$0xff]  ;;  %v9449_v24 = vpop.xlane.xlu1 %3703 }
 0x6d7   :  { %v3731_v37 = vpop.xlane.xlu0 %3730  ;;  %v9444_v4 = vsub.f32 %v11304_v46, %v3865_v13  ;;  %v9447_v58 = vsub.f32 %v11306_v60, %v3865_v13  ;;  %v4194_v13 = vadd.f32 %v4062_v6, %v4061_v33  ;;  %v11312_v46 = vld [vmem:[#allocation36_spill] sm:$0xff] }
 0x6d8   :  { %11301 = vst [vmem:[#allocation49_spill] sm:$0xff] %v9428_v38  ;;  %11303 = vst [vmem:[#allocation39_spill] sm:$0xff] %v9431_v40  ;;  %v4091_v63 = vmul.f32 %v9428_v38, %v9428_v38  ;;  %v4092_v19 = vmul.f32 %v9431_v40, %v9431_v40  ;;  %v3880_v0 = vmul.f32 0.00390625, %v3731_v37  ;;  %4237 = vadd.xlane.f32.xlu0 %v4236_v56  ;;  %v11318_v40 = vld [vmem:[#allocation46_spill] sm:$0xff] }
 0x6d9   :  { %11305 = vst [vmem:[#allocation35_spill] sm:$0xff] %v9444_v4  ;;  %11307 = vst [vmem:[#allocation32_spill] sm:$0xff] %v9447_v58  ;;  %v9461_v37 = vadd.f32 %v9288_v59, %v8634_v26  ;;  %v9465_v56 = vadd.f32 %v9297_v42, %v8637_v14  ;;  %v4064_v59 = vmul.f32 %v9447_v58, %v9447_v58 }
 0x6da   :  { %3847 = vadd.xlane.f32.xlu1 %v3846_v23  ;;  %v4239_v27 = vadd.f32 %v4092_v19, %v4091_v63  ;;  %v9452_v21 = vsub.f32 %v11308_v15, %v3880_v0  ;;  %v9455_v38 = vsub.f32 %v11310_v43, %v3880_v0  ;;  %v4063_v43 = vmul.f32 %v9444_v4, %v9444_v4  ;;  %v3719_v19 = vpop.xlane.xlu1 %3718  ;;  %v11329_v4 = vld [vmem:[#allocation51_spill] sm:$0xff] }
 0x6db   :  { %v9457_v57 = vpop.xlane.xlu0 %3784  ;;  %v3866_v63 = vmul.f32 0.00390625, %v3689_v31  ;;  %v3849_v6 = vadd.f32 %v9465_v56, %v9461_v37 }
 0x6dc   :  { %11309 = vst [vmem:[#allocation31_spill] sm:$0xff] %v9452_v21  ;;  %11311 = vst [vmem:[#allocation52_spill] sm:$0xff] %v9455_v38  ;;  %v4093_v23 = vmul.f32 %v9452_v21, %v9452_v21  ;;  %v4094_v15 = vmul.f32 %v9455_v38, %v9455_v38  ;;  %4240 = vadd.xlane.f32.xlu0 %v4239_v27  ;;  %v11314_v27 = vld [vmem:[#allocation42_spill] sm:$0xff]  ;;  %v11316_v38 = vld [vmem:[#allocation45_spill] sm:$0xff] }
 0x6dd   :  { %v9484_v21 = vsub.f32 %v11316_v38, %v3866_v63  ;;  %v9487_v31 = vsub.f32 %v11318_v40, %v3866_v63  ;;  %v3868_v40 = vmul.f32 0.00390625, %v3695_v29  ;;  %v11322_v63 = vld [vmem:[#allocation34_spill] sm:$0xff] }
 0x6de   :  { %4195 = vadd.xlane.f32.xlu1 %v4194_v13  ;;  %v4242_v42 = vadd.f32 %v4094_v15, %v4093_v23  ;;  %v9491_v23 = vadd.f32 %v9369_v35, %v8634_v26  ;;  %v11324_v35 = vld [vmem:[#allocation50_spill] sm:$0xff] }
 0x6df   :  { %v3788_v0 = vpop.xlane.xlu0 %3787  ;;  %11317 = vst [vmem:[#allocation45_spill] sm:$0xff] %v9484_v21  ;;  %11319 = vst [vmem:[#allocation46_spill] sm:$0xff] %v9487_v31 }
 0x6e0   :  { %v3899_v33 = vmul.f32 0.00390625, %v3788_v0  ;;  %4243 = vadd.xlane.f32.xlu0 %v4242_v42  ;;  %11320 = vst [vmem:[#allocation117_spill] sm:$0xff] %v9491_v23  ;;  %v4197_v0 = vadd.f32 %v4064_v59, %v4063_v43  ;;  %v9495_v42 = vadd.f32 %v9371_v32, %v8637_v14  ;;  %v4065_v32 = vmul.f32 %v9484_v21, %v9484_v21 }
 0x6e2   :  { %v9478_v60 = vsub.f32 %v11312_v46, %v3899_v33  ;;  %v9481_v13 = vsub.f32 %v11314_v27, %v3899_v33  ;;  %3850 = vadd.xlane.f32.xlu1 %v3849_v6  ;;  %11321 = vst [vmem:[#allocation118_spill] sm:$0xff] %v9495_v42  ;;  %v9501_v46 = vpop.xlane.xlu1 %3775 }
 0x6e3   :  { %v3734_v15 = vpop.xlane.xlu0 %3733 }
 0x6e4   :  { %11313 = vst [vmem:[#allocation36_spill] sm:$0xff] %v9478_v60  ;;  %11315 = vst [vmem:[#allocation42_spill] sm:$0xff] %v9481_v13  ;;  %v4131_v33 = vmul.f32 %v9478_v60, %v9478_v60  ;;  %v4132_v38 = vmul.f32 %v9481_v13, %v9481_v13  ;;  %v3881_v6 = vmul.f32 0.00390625, %v3734_v15  ;;  %v4066_v60 = vmul.f32 %v9487_v31, %v9487_v31 }
 0x6e5   :  { %v3852_v15 = vadd.f32 %v9495_v42, %v9491_v23  ;;  %v3869_v31 = vmul.f32 0.00390625, %v3698_v22 }
 0x6e6   :  { %v9504_v27 = vsub.f32 %v11322_v63, %v3881_v6  ;;  %v9507_v58 = vsub.f32 %v11324_v35, %v3881_v6  ;;  %4198 = vadd.xlane.f32.xlu1 %v4197_v0  ;;  %v4299_v43 = vadd.f32 %v4132_v38, %v4131_v33  ;;  %v11326_v0 = vld [vmem:[#allocation30_spill] sm:$0xff]  ;;  %v11327_v35 = vld [vmem:[#allocation33_spill] sm:$0xff]  ;;  %v9525_v21 = vpop.xlane.xlu1 %3778  ;;  %v4200_v22 = vadd.f32 %v4066_v60, %v4065_v32  ;;  %v11339_v60 = vld [vmem:[#allocation44_spill] sm:$0xff] }
 0x6e7   :  { %v3737_v59 = vpop.xlane.xlu0 %3736  ;;  %v9520_v33 = vsub.f32 %v11326_v0, %v3868_v40  ;;  %v9523_v13 = vsub.f32 %v11327_v35, %v3868_v40  ;;  %v9559_v32 = vsub.f32 %v11339_v60, %v3869_v31 }
 0x6e8   :  { %11323 = vst [vmem:[#allocation34_spill] sm:$0xff] %v9504_v27  ;;  %11325 = vst [vmem:[#allocation50_spill] sm:$0xff] %v9507_v58  ;;  %v4095_v29 = vmul.f32 %v9504_v27, %v9504_v27  ;;  %v4096_v63 = vmul.f32 %v9507_v58, %v9507_v58  ;;  %4300 = vadd.xlane.f32.xlu0 %v4299_v43  ;;  %v3882_v6 = vmul.f32 0.00390625, %v3737_v59  ;;  %v11331_v27 = vld [vmem:[#allocation29_spill] sm:$0xff] }
 0x6e9   :  { %11328 = vst [vmem:[#allocation30_spill] sm:$0xff] %v9523_v13  ;;  %v9535_v43 = vadd.f32 %v9373_v17, %v8634_v26  ;;  %v9539_v59 = vadd.f32 %v9375_v53, %v8637_v14  ;;  %v11335_v26 = vld [vmem:[#allocation64_spill] sm:$0xff]  ;;  %v4070_v14 = vmul.f32 %v9523_v13, %v9523_v13  ;;  %v11337_v53 = vld [vmem:[#allocation43_spill] sm:$0xff]  ;;  %v11352_v13 = vld [vmem:[#allocation69_spill] sm:$0xff] }
 0x6ea   :  { %3853 = vadd.xlane.f32.xlu1 %v3852_v15  ;;  %v4245_v38 = vadd.f32 %v4096_v63, %v4095_v29  ;;  %v9528_v42 = vsub.f32 %v11329_v4, %v3882_v6  ;;  %v9531_v23 = vsub.f32 %v11331_v27, %v3882_v6  ;;  %v4069_v27 = vmul.f32 %v9520_v33, %v9520_v33  ;;  %v11333_v29 = vld [vmem:[#allocation63_spill] sm:$0xff] }
 0x6eb   :  { %v3740_v58 = vpop.xlane.xlu0 %3739  ;;  %11340 = vst [vmem:[#allocation43_spill] sm:$0xff] %v9559_v32  ;;  %v3855_v35 = vadd.f32 %v9539_v59, %v9535_v43 }
 0x6ec   :  { %11330 = vst [vmem:[#allocation33_spill] sm:$0xff] %v9528_v42  ;;  %11332 = vst [vmem:[#allocation51_spill] sm:$0xff] %v9531_v23  ;;  %v3883_v40 = vmul.f32 0.00390625, %v3740_v58  ;;  %4246 = vadd.xlane.f32.xlu0 %v4245_v38  ;;  %v4097_v15 = vmul.f32 %v9528_v42, %v9528_v42  ;;  %v4098_v4 = vmul.f32 %v9531_v23, %v9531_v23  ;;  %v3871_v38 = vmul.f32 0.00390625, %v9449_v24  ;;  %v11343_v23 = vld [vmem:[#allocation68_spill] sm:$0xff] }
 0x6ed   :  { %v9556_v58 = vsub.f32 %v11337_v53, %v3869_v31  ;;  %v4072_v24 = vmul.f32 %v9559_v32, %v9559_v32 }
 0x6ee   :  { %v9548_v63 = vsub.f32 %v11333_v29, %v3883_v40  ;;  %v9551_v17 = vsub.f32 %v11335_v26, %v3883_v40  ;;  %4201 = vadd.xlane.f32.xlu1 %v4200_v22  ;;  %v4248_v0 = vadd.f32 %v4098_v4, %v4097_v15  ;;  %v3876_v29 = vmul.f32 0.00390625, %v3719_v19  ;;  %v3782_v26 = vpop.xlane.xlu1 %3781  ;;  %v11341_v4 = vld [vmem:[#allocation67_spill] sm:$0xff] }
 0x6ef   :  { %11338 = vst [vmem:[#allocation64_spill] sm:$0xff] %v9556_v58  ;;  %v3797_v6 = vpop.xlane.xlu0 %3796  ;;  %v4071_v15 = vmul.f32 %v9556_v58, %v9556_v58 }
 0x6f0   :  { %11334 = vst [vmem:[#allocation29_spill] sm:$0xff] %v9548_v63  ;;  %11336 = vst [vmem:[#allocation63_spill] sm:$0xff] %v9551_v17  ;;  %v4099_v40 = vmul.f32 %v9548_v63, %v9548_v63  ;;  %v4100_v22 = vmul.f32 %v9551_v17, %v9551_v17  ;;  %v3902_v53 = vmul.f32 0.00390625, %v3797_v6  ;;  %4249 = vadd.xlane.f32.xlu0 %v4248_v0  ;;  %v11345_v17 = vld [vmem:[#allocation53_spill] sm:$0xff]  ;;  %v11346_v6 = vld [vmem:[#allocation54_spill] sm:$0xff] }
 0x6f1   :  { %v9579_v19 = vsub.f32 %v11345_v17, %v3871_v38  ;;  %v9582_v0 = vsub.f32 %v11346_v6, %v3871_v38  ;;  %v3895_v17 = vmul.f32 0.00390625, %v9501_v46 }
 0x6f2   :  { %3856 = vadd.xlane.f32.xlu1 %v3855_v35  ;;  %v4251_v31 = vadd.f32 %v4100_v22, %v4099_v40  ;;  %v9573_v60 = vsub.f32 %v11341_v4, %v3902_v53  ;;  %v9576_v63 = vsub.f32 %v11343_v23, %v3902_v53  ;;  %v4206_v40 = vadd.f32 %v4070_v14, %v4069_v27  ;;  %v11348_v22 = vld [vmem:[#allocation56_spill] sm:$0xff]  ;;  %v11350_v23 = vld [vmem:[#allocation58_spill] sm:$0xff]  ;;  %v3791_v14 = vpop.xlane.xlu1 %3790 }
 0x6f3   :  { %v3800_v42 = vpop.xlane.xlu0 %3799  ;;  %11347 = vst [vmem:[#allocation68_spill] sm:$0xff] %v9582_v0  ;;  %v9585_v58 = vsub.f32 %v11348_v22, %v3876_v29  ;;  %v9592_v53 = vsub.f32 %v11350_v23, %v3876_v29  ;;  %v4076_v29 = vmul.f32 %v9582_v0, %v9582_v0 }
 0x6f4   :  { %11342 = vst [vmem:[#allocation44_spill] sm:$0xff] %v9573_v60  ;;  %11344 = vst [vmem:[#allocation67_spill] sm:$0xff] %v9576_v63  ;;  %v3903_v35 = vmul.f32 0.00390625, %v3800_v42  ;;  %v4137_v32 = vmul.f32 %v9573_v60, %v9573_v60  ;;  %v4138_v4 = vmul.f32 %v9576_v63, %v9576_v63  ;;  %4252 = vadd.xlane.f32.xlu0 %v4251_v31  ;;  %v11354_v42 = vld [vmem:[#allocation70_spill] sm:$0xff] }
 0x6f5   :  { %11349 = vst [vmem:[#allocation53_spill] sm:$0xff] %v9585_v58  ;;  %11351 = vst [vmem:[#allocation54_spill] sm:$0xff] %v9592_v53  ;;  %v4209_v60 = vadd.f32 %v4072_v24, %v4071_v15  ;;  %v4075_v63 = vmul.f32 %v9579_v19, %v9579_v19  ;;  %v11356_v15 = vld [vmem:[#allocation55_spill] sm:$0xff] }
 0x6f6   :  { %v9596_v38 = vsub.f32 %v11352_v13, %v3903_v35  ;;  %v9599_v27 = vsub.f32 %v11354_v42, %v3903_v35  ;;  %4207 = vadd.xlane.f32.xlu1 %v4206_v40  ;;  %v4308_v22 = vadd.f32 %v4138_v4, %v4137_v32  ;;  %v4085_v35 = vmul.f32 %v9585_v58, %v9585_v58  ;;  %v11357_v4 = vld [vmem:[#allocation59_spill] sm:$0xff] }
 0x6f7   :  { %v3749_v6 = vpop.xlane.xlu0 %3748  ;;  %v4086_v32 = vmul.f32 %v9592_v53, %v9592_v53  ;;  %v9614_v24 = vsub.f32 %v11356_v15, %v3895_v17  ;;  %v9617_v23 = vsub.f32 %v11357_v4, %v3895_v17  ;;  %v3896_v42 = vmul.f32 0.00390625, %v9525_v21  ;;  %v3794_v53 = vpop.xlane.xlu1 %3793 }
 0x6f8   :  { %11353 = vst [vmem:[#allocation56_spill] sm:$0xff] %v9596_v38  ;;  %11355 = vst [vmem:[#allocation58_spill] sm:$0xff] %v9599_v27  ;;  %v4139_v46 = vmul.f32 %v9596_v38, %v9596_v38  ;;  %v4140_v13 = vmul.f32 %v9599_v27, %v9599_v27  ;;  %v3886_v31 = vmul.f32 0.00390625, %v3749_v6  ;;  %4309 = vadd.xlane.f32.xlu0 %v4308_v22  ;;  %v11359_v6 = vld [vmem:[#allocation73_spill] sm:$0xff] }
 0x6f9   :  { %11358 = vst [vmem:[#allocation69_spill] sm:$0xff] %v9617_v23  ;;  %v4215_v0 = vadd.f32 %v4076_v29, %v4075_v63  ;;  %v4230_v21 = vadd.f32 %v4086_v32, %v4085_v35  ;;  %v4124_v63 = vmul.f32 %v9617_v23, %v9617_v23  ;;  %v11360_v29 = vld [vmem:[#allocation57_spill] sm:$0xff]  ;;  %v3900_v32 = vmul.f32 0.00390625, %v3791_v14  ;;  %v11367_v14 = vld [vmem:[#allocation27_spill] sm:$0xff] }
 0x6fa   :  { %4210 = vadd.xlane.f32.xlu1 %v4209_v60  ;;  %v4311_v40 = vadd.f32 %v4140_v13, %v4139_v46  ;;  %v9621_v27 = vsub.f32 %v9034_v50, %v3886_v31  ;;  %v9624_v22 = vsub.f32 %v11359_v6, %v3886_v31  ;;  %v9641_v46 = vsub.f32 %v11360_v29, %v3896_v42 }
 0x6fb   :  { %v3803_v38 = vpop.xlane.xlu0 %3802 }
 0x6fc   :  { %v3904_v58 = vmul.f32 0.00390625, %v3803_v38  ;;  %v4105_v15 = vmul.f32 %v9621_v27, %v9621_v27  ;;  %v4106_v60 = vmul.f32 %v9624_v22, %v9624_v22  ;;  %4312 = vadd.xlane.f32.xlu0 %v4311_v40  ;;  %v4123_v38 = vmul.f32 %v9614_v24, %v9614_v24  ;;  %11361 = vst [vmem:[#allocation70_spill] sm:$0xff] %v9641_v46  ;;  %v11362_v40 = vld [vmem:[#allocation60_spill] sm:$0xff] }
 0x6fd   :  { %v9644_v4 = vsub.f32 %v11362_v40, %v3896_v42 }
 0x6fe   :  { %v9631_v17 = vsub.f32 %v9057_v18, %v3904_v58  ;;  %v9634_v50 = vsub.f32 %v9061_v5, %v3904_v58  ;;  %4216 = vadd.xlane.f32.xlu1 %v4215_v0  ;;  %v4260_v31 = vadd.f32 %v4106_v60, %v4105_v15  ;;  %v3897_v18 = vmul.f32 0.00390625, %v3782_v26  ;;  %v3743_v0 = vpop.xlane.xlu1 %3742 }
 0x6ff   :  { %v3806_v13 = vpop.xlane.xlu0 %3805  ;;  %11363 = vst [vmem:[#allocation55_spill] sm:$0xff] %v9644_v4  ;;  %v4287_v26 = vadd.f32 %v4124_v63, %v4123_v38  ;;  %v4125_v60 = vmul.f32 %v9641_v46, %v9641_v46  ;;  %v4126_v40 = vmul.f32 %v9644_v4, %v9644_v4  ;;  %v11368_v38 = vld [vmem:[#allocation25_spill] sm:$0xff]  ;;  %v3901_v4 = vmul.f32 0.00390625, %v3794_v53  ;;  %v11372_v53 = vld [vmem:[#allocation28_spill] sm:$0xff] }
 0x700   :  { %v4141_v5 = vmul.f32 %v9631_v17, %v9631_v17  ;;  %v4142_v58 = vmul.f32 %v9634_v50, %v9634_v50  ;;  %v3905_v35 = vmul.f32 0.00390625, %v3806_v13  ;;  %4261 = vadd.xlane.f32.xlu0 %v4260_v31  ;;  %v11366_v13 = vld [vmem:[#allocation61_spill] sm:$0xff]  ;;  %v9673_v63 = vsub.f32 %v11368_v38, %v3900_v32 }
 0x701   :  { %v9663_v31 = vsub.f32 %v11366_v13, %v3897_v18  ;;  %v3884_v38 = vmul.f32 0.00390625, %v3743_v0 }
 0x702   :  { %4231 = vadd.xlane.f32.xlu1 %v4230_v21  ;;  %v4314_v6 = vadd.f32 %v4142_v58, %v4141_v5  ;;  %v9651_v29 = vsub.f32 %v9075_v20, %v3905_v35  ;;  %v9654_v15 = vsub.f32 %v9079_v55, %v3905_v35  ;;  %v9666_v21 = vsub.f32 %v11367_v14, %v3897_v18  ;;  %v3746_v20 = vpop.xlane.xlu1 %3745  ;;  %v11370_v58 = vld [vmem:[#allocation38_spill] sm:$0xff] }
 0x703   :  { %v9656_v42 = vpop.xlane.xlu0 %3808  ;;  %11369 = vst [vmem:[#allocation57_spill] sm:$0xff] %v9673_v63  ;;  %v9676_v35 = vsub.f32 %v11370_v58, %v3900_v32  ;;  %v4127_v18 = vmul.f32 %v9663_v31, %v9663_v31 }
 0x704   :  { %11364 = vst [vmem:[#allocation59_spill] sm:$0xff] %v9651_v29  ;;  %11365 = vst [vmem:[#allocation73_spill] sm:$0xff] %v9654_v15  ;;  %v4143_v55 = vmul.f32 %v9651_v29, %v9651_v29  ;;  %v4144_v5 = vmul.f32 %v9654_v15, %v9654_v15  ;;  %4315 = vadd.xlane.f32.xlu0 %v4314_v6  ;;  %v4128_v14 = vmul.f32 %v9666_v21, %v9666_v21 }
 0x705   :  { %11371 = vst [vmem:[#allocation60_spill] sm:$0xff] %v9676_v35  ;;  %v4290_v29 = vadd.f32 %v4126_v40, %v4125_v60  ;;  %v4133_v6 = vmul.f32 %v9673_v63, %v9673_v63  ;;  %v4134_v32 = vmul.f32 %v9676_v35, %v9676_v35 }
 0x706   :  { %4288 = vadd.xlane.f32.xlu1 %v4287_v26  ;;  %v4317_v46 = vadd.f32 %v4144_v5, %v4143_v55  ;;  %v3752_v23 = vpop.xlane.xlu1 %3751  ;;  %v9687_v26 = vsub.f32 %v11372_v53, %v3901_v4  ;;  %v11374_v55 = vld [vmem:[#allocation37_spill] sm:$0xff] }
 0x707   :  { %v3812_v13 = vpop.xlane.xlu0 %3811  ;;  %v9690_v5 = vsub.f32 %v11374_v55, %v3901_v4 }
 0x708   :  { %v3907_v15 = vmul.f32 0.00390625, %v3812_v13  ;;  %4318 = vadd.xlane.f32.xlu0 %v4317_v46  ;;  %11373 = vst [vmem:[#allocation61_spill] sm:$0xff] %v9687_v26  ;;  %v4293_v13 = vadd.f32 %v4128_v14, %v4127_v18 }
 0x709   :  { %11375 = vst [vmem:[#allocation27_spill] sm:$0xff] %v9690_v5  ;;  %v4136_v0 = vmul.f32 %v9690_v5, %v9690_v5 }
 0x70a   :  { %4291 = vadd.xlane.f32.xlu1 %v4290_v29  ;;  %v9693_v58 = vsub.f32 %v9115_v11, %v3907_v15  ;;  %v9696_v60 = vsub.f32 %v9119_v62, %v3907_v15  ;;  %v4302_v11 = vadd.f32 %v4134_v32, %v4133_v6  ;;  %v4135_v62 = vmul.f32 %v9687_v26, %v9687_v26  ;;  %v11377_v15 = vld [vmem:[#allocation26_spill] sm:$0xff]  ;;  %v3755_v14 = vpop.xlane.xlu1 %3754 }
 0x70b   :  { %v3818_v46 = vpop.xlane.xlu0 %3817  ;;  %v9713_v18 = vsub.f32 %v11377_v15, %v3884_v38 }
 0x70c   :  { %v3909_v40 = vmul.f32 0.00390625, %v3818_v46  ;;  %v4147_v35 = vmul.f32 %v9693_v58, %v9693_v58  ;;  %v4148_v53 = vmul.f32 %v9696_v60, %v9696_v60  ;;  %v11379_v46 = vld [vmem:[#allocation62_spill] sm:$0xff] }
 0x70d   :  { %11378 = vst [vmem:[#allocation38_spill] sm:$0xff] %v9713_v18  ;;  %v9716_v63 = vsub.f32 %v11379_v46, %v3884_v38  ;;  %v4101_v15 = vmul.f32 %v9713_v18, %v9713_v18  ;;  %v11381_v38 = vld [vmem:[#allocation65_spill] sm:$0xff] }
 0x70e   :  { %v9703_v29 = vsub.f32 %v9127_v10, %v3909_v40  ;;  %v9706_v4 = vsub.f32 %v9131_v30, %v3909_v40  ;;  %4294 = vadd.xlane.f32.xlu1 %v4293_v13  ;;  %v4323_v55 = vadd.f32 %v4148_v53, %v4147_v35  ;;  %v3885_v10 = vmul.f32 0.00390625, %v3746_v20  ;;  %v11383_v20 = vld [vmem:[#allocation66_spill] sm:$0xff]  ;;  %v3758_v5 = vpop.xlane.xlu1 %3757 }
 0x70f   :  { %11380 = vst [vmem:[#allocation28_spill] sm:$0xff] %v9716_v63  ;;  %v3887_v40 = vmul.f32 0.00390625, %v3752_v23  ;;  %v4305_v13 = vadd.f32 %v4136_v0, %v4135_v62  ;;  %v4102_v35 = vmul.f32 %v9716_v63, %v9716_v63  ;;  %v11387_v23 = vld [vmem:[#allocation72_spill] sm:$0xff] }
 0x710   :  { %11376 = vst [vmem:[#allocation25_spill] sm:$0xff] %v9706_v4  ;;  %v4151_v30 = vmul.f32 %v9703_v29, %v9703_v29  ;;  %v4152_v6 = vmul.f32 %v9706_v4, %v9706_v4  ;;  %4324 = vadd.xlane.f32.xlu0 %v4323_v55  ;;  %v9727_v53 = vsub.f32 %v11381_v38, %v3885_v10  ;;  %v11385_v55 = vld [vmem:[#allocation71_spill] sm:$0xff] }
 0x711   :  { %v9730_v46 = vsub.f32 %v11383_v20, %v3885_v10  ;;  %v9736_v62 = vsub.f32 %v11387_v23, %v3887_v40  ;;  %v4254_v38 = vadd.f32 %v4102_v35, %v4101_v15  ;;  %v11389_v20 = vld [vmem:[#allocation74_spill] sm:$0xff] }
 0x712   :  { %4303 = vadd.xlane.f32.xlu1 %v4302_v11  ;;  %v4329_v32 = vadd.f32 %v4152_v6, %v4151_v30  ;;  %11382 = vst [vmem:[#allocation37_spill] sm:$0xff] %v9727_v53  ;;  %v9733_v11 = vsub.f32 %v11385_v55, %v3887_v40  ;;  %v4103_v0 = vmul.f32 %v9727_v53, %v9727_v53  ;;  %v3888_v6 = vmul.f32 0.00390625, %v3755_v14  ;;  %v11391_v40 = vld [vmem:[#allocation75_spill] sm:$0xff] }
 0x713   :  { %11384 = vst [vmem:[#allocation26_spill] sm:$0xff] %v9730_v46  ;;  %11388 = vst [vmem:[#allocation65_spill] sm:$0xff] %v9736_v62  ;;  %v4104_v30 = vmul.f32 %v9730_v46, %v9730_v46  ;;  %v3889_v53 = vmul.f32 0.00390625, %v3758_v5 }
 0x714   :  { %4330 = vadd.xlane.f32.xlu0 %v4329_v32  ;;  %11386 = vst [vmem:[#allocation62_spill] sm:$0xff] %v9733_v11  ;;  %v4107_v10 = vmul.f32 %v9733_v11, %v9733_v11  ;;  %v4108_v32 = vmul.f32 %v9736_v62, %v9736_v62  ;;  %v9747_v55 = vsub.f32 %v11389_v20, %v3888_v6  ;;  %v11394_v62 = vld [vmem:[#allocation76_spill] sm:$0xff] }
 0x715   :  { %v9750_v23 = vsub.f32 %v11391_v40, %v3888_v6  ;;  %v4257_v63 = vadd.f32 %v4104_v30, %v4103_v0  ;;  %v9760_v20 = vsub.f32 %v11394_v62, %v3889_v53  ;;  %v11396_v6 = vld [vmem:[#allocation77_spill] sm:$0xff] }
 0x716   :  { %4306 = vadd.xlane.f32.xlu1 %v4305_v13  ;;  %v3815_v13 = vpop.xlane.xlu1 %3814  ;;  %11390 = vst [vmem:[#allocation66_spill] sm:$0xff] %v9747_v55  ;;  %v4263_v14 = vadd.f32 %v4108_v32, %v4107_v10  ;;  %v4109_v15 = vmul.f32 %v9747_v55, %v9747_v55  ;;  %v11409_v55 = vld [vmem:[#allocation87_spill] sm:$0xff] }
 0x717   :  { %11392 = vst [vmem:[#allocation71_spill] sm:$0xff] %v9750_v23  ;;  %v3908_v18 = vmul.f32 0.00390625, %v3815_v13  ;;  %v4110_v35 = vmul.f32 %v9750_v23, %v9750_v23  ;;  %11395 = vst [vmem:[#allocation74_spill] sm:$0xff] %v9760_v20 }
 0x719   :  { %v9763_v40 = vsub.f32 %v11396_v6, %v3908_v18  ;;  %v4266_v13 = vadd.f32 %v4110_v35, %v4109_v15  ;;  %v11401_v6 = vld [vmem:[#allocation85_spill] sm:$0xff] }
 0x71a   :  { %4255 = vadd.xlane.f32.xlu1 %v4254_v38  ;;  %v9757_v38 = vsub.f32 %v9068_v47, %v3889_v53  ;;  %v3761_v11 = vpop.xlane.xlu1 %3760  ;;  %v4112_v47 = vmul.f32 %v9760_v20, %v9760_v20 }
 0x71b   :  { %11397 = vst [vmem:[#allocation75_spill] sm:$0xff] %v9763_v40  ;;  %v3890_v32 = vmul.f32 0.00390625, %v3761_v11 }
 0x71c   :  { %11393 = vst [vmem:[#allocation72_spill] sm:$0xff] %v9757_v38  ;;  %v4111_v10 = vmul.f32 %v9757_v38, %v9757_v38  ;;  %v11407_v38 = vld [vmem:[#allocation86_spill] sm:$0xff] }
 0x71e   :  { %4258 = vadd.xlane.f32.xlu1 %v4257_v63  ;;  %v11398_v63 = vld [vmem:[#allocation78_spill] sm:$0xff] }
 0x71f   :  { %v9766_v0 = vsub.f32 %v11398_v63, %v3908_v18  ;;  %v3764_v53 = vpop.xlane.xlu1 %3763  ;;  %v4149_v18 = vmul.f32 %v9763_v40, %v9763_v40  ;;  %v4269_v40 = vadd.f32 %v4112_v47, %v4111_v10 }
 0x720   :  { %v3891_v20 = vmul.f32 0.00390625, %v3764_v53  ;;  %v11413_v53 = vld [vmem:[#allocation84_spill] sm:$0xff] }
 0x721   :  { %v3767_v5 = vpop.xlane.xlu0 %3766  ;;  %11399 = vst [vmem:[#allocation76_spill] sm:$0xff] %v9766_v0 }
 0x722   :  { %4264 = vadd.xlane.f32.xlu1 %v4263_v14  ;;  %v3892_v30 = vmul.f32 0.00390625, %v3767_v5  ;;  %v4150_v5 = vmul.f32 %v9766_v0, %v9766_v0 }
 0x724   :  { %v9773_v62 = vsub.f32 %v9146_v9, %v3892_v30  ;;  %v9776_v23 = vsub.f32 %v11401_v6, %v3892_v30  ;;  %v11403_v9 = vld [vmem:[#allocation81_spill] sm:$0xff]  ;;  %v11405_v30 = vld [vmem:[#allocation82_spill] sm:$0xff] }
 0x725   :  { %v3821_v14 = vpop.xlane.xlu0 %3820  ;;  %v9787_v35 = vsub.f32 %v11403_v9, %v3890_v32  ;;  %v9790_v6 = vsub.f32 %v11405_v30, %v3890_v32  ;;  %v4326_v32 = vadd.f32 %v4150_v5, %v4149_v18 }
 0x726   :  { %11400 = vst [vmem:[#allocation77_spill] sm:$0xff] %v9773_v62  ;;  %11402 = vst [vmem:[#allocation78_spill] sm:$0xff] %v9776_v23  ;;  %4267 = vadd.xlane.f32.xlu1 %v4266_v13  ;;  %v4117_v63 = vmul.f32 %v9773_v62, %v9773_v62  ;;  %v4118_v11 = vmul.f32 %v9776_v23, %v9776_v23  ;;  %v3910_v15 = vmul.f32 0.00390625, %v3821_v14 }
 0x727   :  { %11404 = vst [vmem:[#allocation85_spill] sm:$0xff] %v9787_v35  ;;  %11406 = vst [vmem:[#allocation81_spill] sm:$0xff] %v9790_v6  ;;  %v4113_v10 = vmul.f32 %v9787_v35, %v9787_v35 }
 0x728   :  { %v9793_v13 = vsub.f32 %v11407_v38, %v3910_v15  ;;  %v9796_v0 = vsub.f32 %v11409_v55, %v3910_v15  ;;  %v4278_v46 = vadd.f32 %v4118_v11, %v4117_v63  ;;  %v4114_v38 = vmul.f32 %v9790_v6, %v9790_v6  ;;  %v11411_v55 = vld [vmem:[#allocation83_spill] sm:$0xff]  ;;  %v11415_v63 = vld [vmem:[#allocation88_spill] sm:$0xff]  ;;  %v11417_v15 = vld [vmem:[#allocation89_spill] sm:$0xff] }
 0x729   :  { %v3824_v62 = vpop.xlane.xlu0 %3823  ;;  %v9807_v47 = vsub.f32 %v11411_v55, %v3891_v20 }
 0x72a   :  { %11408 = vst [vmem:[#allocation82_spill] sm:$0xff] %v9793_v13  ;;  %11410 = vst [vmem:[#allocation86_spill] sm:$0xff] %v9796_v0  ;;  %4270 = vadd.xlane.f32.xlu1 %v4269_v40  ;;  %v4153_v14 = vmul.f32 %v9793_v13, %v9793_v13  ;;  %v4154_v9 = vmul.f32 %v9796_v0, %v9796_v0  ;;  %v3911_v23 = vmul.f32 0.00390625, %v3824_v62  ;;  %4279 = vadd.xlane.f32.xlu0 %v4278_v46 }
 0x72b   :  { %11412 = vst [vmem:[#allocation87_spill] sm:$0xff] %v9807_v47  ;;  %v9810_v40 = vsub.f32 %v11413_v53, %v3891_v20  ;;  %v4115_v20 = vmul.f32 %v9807_v47, %v9807_v47 }
 0x72c   :  { %v9813_v11 = vsub.f32 %v11415_v63, %v3911_v23  ;;  %v9816_v30 = vsub.f32 %v11417_v15, %v3911_v23  ;;  %v4332_v46 = vadd.f32 %v4154_v9, %v4153_v14  ;;  %v4272_v63 = vadd.f32 %v4114_v38, %v4113_v10  ;;  %v11419_v23 = vld [vmem:[#allocation90_spill] sm:$0xff]  ;;  %v11421_v14 = vld [vmem:[#allocation91_spill] sm:$0xff] }
 0x72d   :  { %11414 = vst [vmem:[#allocation83_spill] sm:$0xff] %v9810_v40  ;;  %v3827_v62 = vpop.xlane.xlu0 %3826  ;;  %v4116_v53 = vmul.f32 %v9810_v40, %v9810_v40  ;;  %v3898_v10 = vmul.f32 0.00390625, %v9457_v57 }
 0x72e   :  { %11416 = vst [vmem:[#allocation84_spill] sm:$0xff] %v9813_v11  ;;  %11418 = vst [vmem:[#allocation88_spill] sm:$0xff] %v9816_v30  ;;  %4327 = vadd.xlane.f32.xlu1 %v4326_v32  ;;  %v4155_v18 = vmul.f32 %v9813_v11, %v9813_v11  ;;  %v4156_v5 = vmul.f32 %v9816_v30, %v9816_v30  ;;  %v3912_v55 = vmul.f32 0.00390625, %v3827_v62  ;;  %4333 = vadd.xlane.f32.xlu0 %v4332_v46 }
 0x72f   :  { %v4275_v30 = vadd.f32 %v4116_v53, %v4115_v20 }
 0x730   :  { %v9827_v15 = vsub.f32 %v11419_v23, %v3912_v55  ;;  %v9830_v9 = vsub.f32 %v11421_v14, %v3912_v55  ;;  %v4335_v32 = vadd.f32 %v4156_v5, %v4155_v18  ;;  %v11423_v23 = vld [vmem:[#allocation47_spill] sm:$0xff]  ;;  %v11425_v5 = vld [vmem:[#allocation48_spill] sm:$0xff]  ;;  %v3906_v14 = vmul.f32 0.00390625, %v9656_v42 }
 0x731   :  { %v3833_v11 = vpop.xlane.xlu0 %3832  ;;  %v9838_v18 = vsub.f32 %v11423_v23, %v3898_v10  ;;  %v11429_v42 = vld [vmem:[#allocation79_spill] sm:$0xff] }
 0x732   :  { %11420 = vst [vmem:[#allocation89_spill] sm:$0xff] %v9827_v15  ;;  %11422 = vst [vmem:[#allocation90_spill] sm:$0xff] %v9830_v9  ;;  %4273 = vadd.xlane.f32.xlu1 %v4272_v63  ;;  %v4157_v62 = vmul.f32 %v9827_v15, %v9827_v15  ;;  %v4158_v46 = vmul.f32 %v9830_v9, %v9830_v9  ;;  %4336 = vadd.xlane.f32.xlu0 %v4335_v32 }
 0x733   :  { %11424 = vst [vmem:[#allocation91_spill] sm:$0xff] %v9838_v18  ;;  %v9841_v63 = vsub.f32 %v11425_v5, %v3898_v10  ;;  %v4129_v53 = vmul.f32 %v9838_v18, %v9838_v18 }
 0x734   :  { %v4338_v47 = vadd.f32 %v4158_v46, %v4157_v62  ;;  %v9859_v62 = vsub.f32 %v11429_v42, %v3906_v14 }
 0x735   :  { %v4181_v40 = vpop.xlane.xlu0 %4180  ;;  %11426 = vst [vmem:[#allocation47_spill] sm:$0xff] %v9841_v63  ;;  %v4130_v32 = vmul.f32 %v9841_v63, %v9841_v63 }
 0x736   :  { %4276 = vadd.xlane.f32.xlu1 %v4275_v30  ;;  %4339 = vadd.xlane.f32.xlu0 %v4338_v47  ;;  %11430 = vst [vmem:[#allocation79_spill] sm:$0xff] %v9859_v62  ;;  %v4145_v23 = vmul.f32 %v9859_v62, %v9859_v62 }
 0x739   :  { %v3836_v38 = vpop.xlane.xlu0 %3835 }
 0x73a   :  { %v3915_v55 = vmul.f32 0.00390625, %v3836_v38 }
 0x73c   :  { %v9845_v9 = vsub.f32 %v9220_v61, %v3915_v55  ;;  %v9848_v20 = vsub.f32 %v9223_v52, %v3915_v55  ;;  %v11431_v61 = vld [vmem:[#allocation80_spill] sm:$0xff]  ;;  %v3914_v52 = vmul.f32 0.00390625, %v3833_v11  ;;  %v4296_v55 = vadd.f32 %v4130_v32, %v4129_v53 }
 0x73d   :  { %v4187_v30 = vpop.xlane.xlu0 %4186  ;;  %v9862_v46 = vsub.f32 %v11431_v61, %v3906_v14  ;;  %v4371_v32 = vmul.f32 0.00390625, %v4181_v40 }
 0x73e   :  { %11427 = vst [vmem:[#allocation48_spill] sm:$0xff] %v9845_v9  ;;  %11428 = vst [vmem:[#allocation119_spill] sm:$0xff] %v9848_v20  ;;  %v4163_v57 = vmul.f32 %v9845_v9, %v9845_v9  ;;  %v4164_v47 = vmul.f32 %v9848_v20, %v9848_v20  ;;  %v9869_v20 = vsub.f32 %v9201_v28, %v3914_v52 }
 0x73f   :  { %11432 = vst [vmem:[#allocation80_spill] sm:$0xff] %v9862_v46  ;;  %v4146_v5 = vmul.f32 %v9862_v46, %v9862_v46  ;;  %v9872_v42 = vsub.f32 %v9205_v2, %v3914_v52  ;;  %v4435_v40 = vadd.f32 1e-05, %v4371_v32 }
 0x740   :  { %v4347_v10 = vadd.f32 %v4164_v47, %v4163_v57  ;;  %11433 = vst [vmem:[#allocation120_spill] sm:$0xff] %v9869_v20  ;;  %v4161_v57 = vmul.f32 %v9869_v20, %v9869_v20 }
 0x741   :  { %v4193_v38 = vpop.xlane.xlu0 %4192  ;;  %11434 = vst [vmem:[#allocation121_spill] sm:$0xff] %v9872_v42  ;;  %v4162_v47 = vmul.f32 %v9872_v42, %v9872_v42  ;;  %v4320_v53 = vadd.f32 %v4146_v5, %v4145_v23  ;;  %6183 = vrsqrt.f32 %v4435_v40 }
 0x742   :  { %4348 = vadd.xlane.f32.xlu0 %v4347_v10  ;;  %v4373_v10 = vmul.f32 0.00390625, %v4187_v30 }
 0x743   :  { %v4344_v23 = vadd.f32 %v4162_v47, %v4161_v57 }
 0x745   :  { %v9874_v9 = vpop.xlane.xlu0 %4204 }
 0x746   :  { %4297 = vadd.xlane.f32.xlu0 %v4296_v55 }
 0x747   :  { %v3770_v11 = vpop.xlane.xlu1 %3769 }
 0x748   :  { %v3893_v14 = vmul.f32 0.00390625, %v3770_v11 }
 0x749   :  { %v9886_v2 = vpop.xlane.xlu0 %4213 }
 0x74a   :  { %v9881_v61 = vsub.f32 %v9258_v1, %v3893_v14  ;;  %v9884_v28 = vsub.f32 %v9261_v8, %v3893_v14  ;;  %4321 = vadd.xlane.f32.xlu0 %v4320_v53  ;;  %v4437_v53 = vadd.f32 1e-05, %v4373_v10 }
 0x74b   :  { %v3773_v52 = vpop.xlane.xlu1 %3772 }
 0x74c   :  { %11435 = vst [vmem:[#allocation122_spill] sm:$0xff] %v9881_v61  ;;  %11436 = vst [vmem:[#allocation123_spill] sm:$0xff] %v9884_v28  ;;  %v4119_v55 = vmul.f32 %v9881_v61, %v9881_v61  ;;  %v4120_v11 = vmul.f32 %v9884_v28, %v9884_v28  ;;  %v3894_v42 = vmul.f32 0.00390625, %v3773_v52  ;;  %6185 = vrsqrt.f32 %v4437_v53 }
 0x74d   :  { %v9902_v46 = vpop.xlane.xlu0 %4219 }
 0x74e   :  { %v9893_v1 = vsub.f32 %v9273_v44, %v3894_v42  ;;  %v9896_v8 = vsub.f32 %v9281_v34, %v3894_v42  ;;  %4345 = vadd.xlane.f32.xlu0 %v4344_v23  ;;  %v4281_v14 = vadd.f32 %v4120_v11, %v4119_v55 }
 0x74f   :  { %v3830_v5 = vpop.xlane.xlu1 %3829 }
 0x750   :  { %11437 = vst [vmem:[#allocation124_spill] sm:$0xff] %v9893_v1  ;;  %11438 = vst [vmem:[#allocation125_spill] sm:$0xff] %v9896_v8  ;;  %v4121_v30 = vmul.f32 %v9893_v1, %v9893_v1  ;;  %v4122_v20 = vmul.f32 %v9896_v8, %v9896_v8  ;;  %v3913_v57 = vmul.f32 0.00390625, %v3830_v5  ;;  %4282 = vadd.xlane.f32.xlu1 %v4281_v14  ;;  %v4375_v5 = vmul.f32 0.00390625, %v4193_v38 }
 0x751   :  { %v9914_v55 = vpop.xlane.xlu0 %4222 }
 0x752   :  { %v9905_v44 = vsub.f32 %v9301_v3, %v3913_v57  ;;  %v9908_v34 = vsub.f32 %v9305_v49, %v3913_v57  ;;  %v4284_v32 = vadd.f32 %v4122_v20, %v4121_v30  ;;  %v3663_v49 = vld [vmem:[#allocation14 + $0x1] ss:$4 sm:$0x3]  ;;  %v6184_v30 = vpop.eup %6183 }
 0x753   :  { %v4184_v42 = vpop.xlane.xlu1 %4183 }
 0x754   :  { %11439 = vst [vmem:[#allocation126_spill] sm:$0xff] %v9905_v44  ;;  %11440 = vst [vmem:[#allocation127_spill] sm:$0xff] %v9908_v34  ;;  %v4372_v47 = vmul.f32 0.00390625, %v4184_v42  ;;  %v4159_v52 = vmul.f32 %v9905_v44, %v9905_v44  ;;  %v4160_v10 = vmul.f32 %v9908_v34, %v9908_v34  ;;  %4285 = vadd.xlane.f32.xlu1 %v4284_v32  ;;  %v4439_v32 = vadd.f32 1e-05, %v4375_v5  ;;  %v11447_v34 = vld [vmem:[#allocation41_spill] sm:$0xff] }
 0x755   :  { %v9922_v57 = vpop.xlane.xlu0 %4225  ;;  %v11448_v44 = vld [vmem:[#allocation93_spill] sm:$0xff] }
 0x756   :  { %v4436_v11 = vadd.f32 1e-05, %v4372_v47  ;;  %v4341_v3 = vadd.f32 %v4160_v10, %v4159_v52  ;;  %v6186_v52 = vpop.eup %6185  ;;  %v11443_v10 = vld [vmem:[#allocation40_spill] sm:$0xff] }
 0x757   :  { %v3839_v23 = vpop.xlane.xlu1 %3838  ;;  %v4567_v15 = vmul.f32 %v6186_v52, %v9214_v54 }
 0x758   :  { %v3916_v40 = vmul.f32 0.00390625, %v3839_v23  ;;  %6187 = vrsqrt.f32 %v4436_v11  ;;  %4342 = vadd.xlane.f32.xlu1 %v4341_v3  ;;  %v9929_v11 = vrot.slane %v3663_v49, %v11443_v10 }
 0x759   :  { %6189 = vrsqrt.f32 %v4439_v32 }
 0x75a   :  { %v9917_v14 = vsub.f32 %v9333_v51, %v3916_v40  ;;  %v9920_v20 = vsub.f32 %v9337_v48, %v3916_v40  ;;  %v11444_v51 = vld [vmem:[#allocation92_spill] sm:$0xff] }
 0x75b   :  { %v3842_v53 = vpop.xlane.xlu1 %3841  ;;  %v4563_v23 = vmul.f32 %v6184_v30, %v11444_v51 }
 0x75c   :  { %11441 = vst [vmem:[#allocation128_spill] sm:$0xff] %v9917_v14  ;;  %11442 = vst [vmem:[#allocation129_spill] sm:$0xff] %v9920_v20  ;;  %v3917_v42 = vmul.f32 0.00390625, %v3842_v53  ;;  %v4165_v47 = vmul.f32 %v9917_v14, %v9917_v14  ;;  %v4166_v38 = vmul.f32 %v9920_v20, %v9920_v20  ;;  %v3665_v53 = vld [vmem:[#allocation14 + $0x2] ss:$4 sm:$0x3]  ;;  %v9939_v14 = vrot.slane %v3663_v49, %v11447_v34 }
 0x75d   :  { %v4564_v20 = vmul.f32 %v6184_v30, %v11448_v44  ;;  %v9951_v49 = vrot.slane %v3665_v53, %v11443_v10  ;;  %v4702_v44 = vmul.f32 %v9929_v11, %v4563_v23 }
 0x75e   :  { %v9933_v48 = vsub.f32 %v9359_v16, %v3917_v42  ;;  %v9936_v3 = vsub.f32 %v9363_v39, %v3917_v42  ;;  %v4350_v5 = vadd.f32 %v4166_v38, %v4165_v47  ;;  %v11449_v39 = vld [vmem:[#allocation94_spill] sm:$0xff]  ;;  %v9948_v47 = vpop.xlane.xlu0 %4228 }
 0x75f   :  { %v4190_v40 = vpop.xlane.xlu1 %4189  ;;  %v4568_v42 = vmul.f32 %v6186_v52, %v11449_v39  ;;  %v4706_v39 = vmul.f32 %v9929_v11, %v4567_v15 }
 0x760   :  { %11445 = vst [vmem:[#allocation40_spill] sm:$0xff] %v9933_v48  ;;  %11446 = vst [vmem:[#allocation92_spill] sm:$0xff] %v9936_v3  ;;  %v4374_v62 = vmul.f32 0.00390625, %v4190_v40  ;;  %v4167_v51 = vmul.f32 %v9933_v48, %v9933_v48  ;;  %v4168_v16 = vmul.f32 %v9936_v3, %v9936_v3  ;;  %4351 = vadd.xlane.f32.xlu1 %v4350_v5 }
 0x761   :  { %v9955_v40 = vrot.slane %v3665_v53, %v11447_v34  ;;  %v4703_v48 = vmul.f32 %v9939_v14, %v4564_v20  ;;  %v4707_v10 = vmul.f32 %v9939_v14, %v4568_v42  ;;  %v4841_v34 = vadd.f32 %v9951_v49, %v4702_v44 }
 0x762   :  { %v6188_v38 = vpop.eup %6187  ;;  %v4438_v30 = vadd.f32 1e-05, %v4374_v62  ;;  %v4353_v32 = vadd.f32 %v4168_v16, %v4167_v51  ;;  %v9964_v51 = vpop.xlane.xlu0 %4234  ;;  %v4379_v20 = vmul.f32 0.00390625, %v9874_v9 }
 0x763   :  { %v3845_v54 = vpop.xlane.xlu1 %3844  ;;  %v4565_v5 = vmul.f32 %v6188_v38, %v9286_v12  ;;  %v4566_v52 = vmul.f32 %v6188_v38, %v9291_v36  ;;  %v4842_v15 = vadd.f32 %v9955_v40, %v4703_v48  ;;  %v4845_v38 = vadd.f32 %v9951_v49, %v4706_v39 }
 0x764   :  { %6191 = vrsqrt.f32 %v4438_v30  ;;  %v3918_v3 = vmul.f32 0.00390625, %v3845_v54  ;;  %4354 = vadd.xlane.f32.xlu1 %v4353_v32  ;;  %v4846_v44 = vadd.f32 %v9955_v40, %v4707_v10  ;;  %v6190_v32 = vpop.eup %6189 }
 0x765   :  { %v4704_v62 = vmul.f32 %v9929_v11, %v4565_v5  ;;  %v4705_v23 = vmul.f32 %v9939_v14, %v4566_v52  ;;  %v4443_v5 = vadd.f32 1e-05, %v4379_v20 }
 0x766   :  { %v9969_v12 = vsub.f32 %v9385_v45, %v3918_v3  ;;  %v9975_v42 = vsub.f32 %v9389_v7, %v3918_v3  ;;  %v9983_v7 = vpop.xlane.xlu0 %4237  ;;  %v4382_v3 = vmul.f32 0.00390625, %v9886_v2 }
 0x767   :  { %v3848_v36 = vpop.xlane.xlu1 %3847  ;;  %v4843_v53 = vadd.f32 %v9951_v49, %v4704_v62  ;;  %v4844_v16 = vadd.f32 %v9955_v40, %v4705_v23  ;;  %6193 = vrsqrt.f32 %v4443_v5 }
 0x768   :  { %11450 = vst [vmem:[#allocation41_spill] sm:$0xff] %v9969_v12  ;;  %11451 = vst [vmem:[#allocation93_spill] sm:$0xff] %v9975_v42  ;;  %v3919_v30 = vmul.f32 0.00390625, %v3848_v36  ;;  %v4169_v45 = vmul.f32 %v9969_v12, %v9969_v12  ;;  %v4170_v48 = vmul.f32 %v9975_v42, %v9975_v42  ;;  %v4446_v12 = vadd.f32 1e-05, %v4382_v3 }
 0x769   :  { %v4971_v54 = vmax.f32 %v4841_v34, %v4843_v53  ;;  %v4984_v9 = vmax.f32 %v4842_v15, %v4844_v16  ;;  %v11454_v34 = vld [vmem:[#allocation95_spill] sm:$0xff]  ;;  %v11455_v15 = vld [vmem:[#allocation96_spill] sm:$0xff]  ;;  %v4384_v3 = vmul.f32 0.00390625, %v9902_v46 }
 0x76a   :  { %v9987_v39 = vsub.f32 %v9417_v41, %v3919_v30  ;;  %v9990_v10 = vsub.f32 %v9421_v25, %v3919_v30  ;;  %v4571_v36 = vmul.f32 %v6190_v32, %v11454_v34  ;;  %v4572_v20 = vmul.f32 %v6190_v32, %v11455_v15  ;;  %v11456_v41 = vld [vmem:[#allocation109_spill] sm:$0xff]  ;;  %v10004_v15 = vpop.xlane.xlu0 %4240 }
 0x76b   :  { %v4196_v52 = vpop.xlane.xlu1 %4195  ;;  %v4972_v62 = vmax.f32 %v4971_v54, %v4845_v38  ;;  %v4985_v23 = vmax.f32 %v4984_v9, %v4846_v44  ;;  %v4356_v16 = vadd.f32 %v4170_v48, %v4169_v45  ;;  %v11457_v9 = vld [vmem:[#allocation110_spill] sm:$0xff] }
 0x76c   :  { %11452 = vst [vmem:[#allocation94_spill] sm:$0xff] %v9987_v39  ;;  %11453 = vst [vmem:[#allocation130_spill] sm:$0xff] %v9990_v10  ;;  %v4376_v53 = vmul.f32 0.00390625, %v4196_v52  ;;  %v4171_v38 = vmul.f32 %v9987_v39, %v9987_v39  ;;  %v4172_v2 = vmul.f32 %v9990_v10, %v9990_v10  ;;  %v4710_v45 = vmul.f32 %v9929_v11, %v4571_v36  ;;  %v11475_v10 = vld [vmem:[#allocation102_spill] sm:$0xff] }
 0x76d   :  { %4357 = vadd.xlane.f32.xlu1 %v4356_v16  ;;  %v4711_v5 = vmul.f32 %v9939_v14, %v4572_v20 }
 0x76e   :  { %v6192_v42 = vpop.eup %6191  ;;  %v4440_v30 = vadd.f32 1e-05, %v4376_v53  ;;  %v4359_v32 = vadd.f32 %v4172_v2, %v4171_v38  ;;  %v5911_v2 = vld [vmem:[#allocation15 + $0x40] sm:$0xff]  }
 0x76f   :  { %v3851_v44 = vpop.xlane.xlu1 %3850  ;;  %v4569_v54 = vmul.f32 %v6192_v42, %v11456_v41  ;;  %v4570_v25 = vmul.f32 %v6192_v42, %v11457_v9  ;;  %5659 = vmatprep.subr.bf16.mxu1 %v5911_v2  ;;  %v11464_v2 = vld [vmem:[#allocation97_spill] sm:$0xff] }
 0x770   :  { %v3920_v34 = vmul.f32 0.00390625, %v3851_v44  ;;  %6195 = vrsqrt.f32 %v4440_v30  ;;  %v5912_v44 = vld [vmem:[#allocation15] sm:$0xff]  }
 0x771   :  { %v4708_v48 = vmul.f32 %v9929_v11, %v4569_v54  ;;  %v4709_v52 = vmul.f32 %v9939_v14, %v4570_v25  ;;  %4360 = vadd.xlane.f32.xlu1 %v4359_v32  ;;  %6197 = vrsqrt.f32 %v4446_v12  ;;  %v4850_v54 = vadd.f32 %v9955_v40, %v4711_v5  ;;  %5660 = vmatpush3.bf16.msra.mxu1 %v5912_v44  ;;  %v11460_v5 = vld [vmem:[#allocation117_spill] sm:$0xff] }
 0x772   :  { %v10007_v41 = vsub.f32 %v9461_v37, %v3920_v34  ;;  %v10010_v42 = vsub.f32 %v9465_v56, %v3920_v34  ;;  %v4849_v56 = vadd.f32 %v9951_v49, %v4710_v45  ;;  %v4385_v25 = vmul.f32 0.00390625, %v9914_v55  ;;  %v6194_v45 = vpop.eup %6193 }
 0x773   :  { %v4199_v53 = vpop.xlane.xlu1 %4198  ;;  %v4847_v36 = vadd.f32 %v9951_v49, %v4708_v48  ;;  %v4848_v20 = vadd.f32 %v9955_v40, %v4709_v52  ;;  %v4448_v32 = vadd.f32 1e-05, %v4384_v3  ;;  %v4386_v48 = vmul.f32 0.00390625, %v9922_v57  ;;  %v11462_v3 = vld [vmem:[#allocation118_spill] sm:$0xff] }
 0x774   :  { %11458 = vst [vmem:[#allocation95_spill] sm:$0xff] %v10007_v41  ;;  %11459 = vst [vmem:[#allocation96_spill] sm:$0xff] %v10010_v42  ;;  %v4173_v16 = vmul.f32 %v10007_v41, %v10007_v41  ;;  %v4174_v38 = vmul.f32 %v10010_v42, %v10010_v42  ;;  %v4377_v37 = vmul.f32 0.00390625, %v4199_v53  ;;  %v10027_v42 = vpop.xlane.xlu0 %4243  ;;  %v4387_v55 = vmul.f32 0.00390625, %v9948_v47 }
 0x775   :  { %v4973_v46 = vmax.f32 %v4972_v62, %v4847_v36  ;;  %v4986_v9 = vmax.f32 %v4985_v23, %v4848_v20  ;;  %v4449_v23 = vadd.f32 1e-05, %v4385_v25  ;;  %v4579_v44 = vmul.f32 %v6194_v45, %v11464_v2 }
 0x776   :  { %v4441_v30 = vadd.f32 1e-05, %v4377_v37  ;;  %v4362_v12 = vadd.f32 %v4174_v38, %v4173_v16  ;;  %v4450_v16 = vadd.f32 1e-05, %v4386_v48 }
 0x777   :  { %v3854_v34 = vpop.xlane.xlu1 %3853  ;;  %v10023_v52 = vmax.f32 %v4973_v46, %v4849_v56  ;;  %v10025_v53 = vmax.f32 %v4986_v9, %v4850_v54  ;;  %v4451_v46 = vadd.f32 1e-05, %v4387_v55  ;;  %v11465_v9 = vld [vmem:[#allocation113_spill] sm:$0xff] }
 0x778   :  { %6199 = vrsqrt.f32 %v4441_v30  ;;  %v3921_v62 = vmul.f32 0.00390625, %v3854_v34  ;;  %4363 = vadd.xlane.f32.xlu1 %v4362_v12  ;;  %v10036_v38 = vpop.xlane.xlu0 %4300  ;;  %v11466_v30 = vld [vmem:[#allocation116_spill] sm:$0xff] }
 0x779   :  { %6201 = vrsqrt.f32 %v4448_v32  ;;  %v4389_v32 = vmul.f32 0.00390625, %v9964_v51  ;;  %v4411_v39 = vmul.f32 0.00390625, %v10036_v38 }
 0x77a   :  { %v10031_v36 = vsub.f32 %v11460_v5, %v3921_v62  ;;  %v10034_v20 = vsub.f32 %v11462_v3, %v3921_v62  ;;  %v6196_v37 = vpop.eup %6195  ;;  %6203 = vrsqrt.f32 %v4449_v23 }
 0x77b   :  { %v4202_v57 = vpop.xlane.xlu1 %4201  ;;  %v4573_v25 = vmul.f32 %v6196_v37, %v11465_v9  ;;  %v4574_v34 = vmul.f32 %v6196_v37, %v11466_v30  ;;  %v6198_v12 = vpop.eup %6197  ;;  %6205 = vrsqrt.f32 %v4450_v16  ;;  %v4718_v9 = vmul.f32 %v9929_v11, %v4579_v44 }
 0x77c   :  { %11461 = vst [vmem:[#allocation109_spill] sm:$0xff] %v10031_v36  ;;  %11463 = vst [vmem:[#allocation110_spill] sm:$0xff] %v10034_v20  ;;  %v4175_v56 = vmul.f32 %v10031_v36, %v10031_v36  ;;  %v4176_v47 = vmul.f32 %v10034_v20, %v10034_v20  ;;  %v4378_v54 = vmul.f32 0.00390625, %v4202_v57  ;;  %v5913_v36 = vld [vmem:[#allocation15 + $0x48] sm:$0xff]   ;;  %v11467_v57 = vld [vmem:[#allocation98_spill] sm:$0xff]  ;;  %v4390_v37 = vmul.f32 0.00390625, %v9983_v7  ;;  %v10053_v16 = vpop.xlane.xlu0 %4246 }
 0x77d   :  { %v4712_v3 = vmul.f32 %v9929_v11, %v4573_v25  ;;  %v4713_v2 = vmul.f32 %v9939_v14, %v4574_v34  ;;  %v5914_v20 = vld [vmem:[#allocation15 + $0x8] sm:$0xff]   ;;  %v4580_v55 = vmul.f32 %v6194_v45, %v11467_v57  ;;  %5661 = vmatprep.subr.bf16.mxu1 %v5913_v36  ;;  %v4453_v30 = vadd.f32 1e-05, %v4389_v32  ;;  %v11469_v34 = vld [vmem:[#allocation35_spill] sm:$0xff] }
 0x77e   :  { %v4442_v48 = vadd.f32 1e-05, %v4378_v54  ;;  %v4365_v5 = vadd.f32 %v4176_v47, %v4175_v56  ;;  %v11468_v54 = vld [vmem:[#allocation99_spill] sm:$0xff]  ;;  %5662 = vmatpush3.bf16.msra.mxu1 %v5914_v20  ;;  %v10070_v20 = vadd.f32 %v9951_v49, %v4718_v9 }
 0x77f   :  { %v3857_v62 = vpop.xlane.xlu1 %3856  ;;  %v4851_v51 = vadd.f32 %v9951_v49, %v4712_v3  ;;  %v4852_v23 = vadd.f32 %v9955_v40, %v4713_v2  ;;  %v4585_v25 = vmul.f32 %v6198_v12, %v11468_v54  ;;  %v10061_v3 = vmul.f32 %v9939_v14, %v4580_v55  ;;  %v5915_v54 = vld [vmem:[#allocation15 + $0x50] sm:$0xff]  }
 0x780   :  { %6207 = vrsqrt.f32 %v4442_v48  ;;  %4366 = vadd.xlane.f32.xlu1 %v4365_v5  ;;  %v3922_v56 = vmul.f32 0.00390625, %v3857_v62  ;;  %v11470_v48 = vld [vmem:[#allocation32_spill] sm:$0xff]  ;;  %v4454_v2 = vadd.f32 1e-05, %v4390_v37  ;;  %v10081_v9 = vpop.xlane.xlu0 %4249  ;;  %5663 = vmatprep.subr.bf16.mxu1 %v5915_v54  ;;  %v11480_v54 = vld [vmem:[#allocation105_spill] sm:$0xff] }
 0x781   :  { %6209 = vrsqrt.f32 %v4451_v46  ;;  %v4975_v44 = vmax.f32 %v10023_v52, %v4851_v51  ;;  %v4988_v7 = vmax.f32 %v10025_v53, %v4852_v23  ;;  %v4391_v52 = vmul.f32 0.00390625, %v10004_v15  ;;  %v11473_v51 = vld [vmem:[#allocation100_spill] sm:$0xff] }
 0x782   :  { %v6200_v47 = vpop.eup %6199  ;;  %v10064_v36 = vsub.f32 %v9535_v43, %v3922_v56  ;;  %v10067_v62 = vsub.f32 %v9539_v59, %v3922_v56  ;;  %v4586_v55 = vmul.f32 %v6198_v12, %v11473_v51  ;;  %v10077_v37 = vmul.f32 %v9929_v11, %v4585_v25  ;;  %v5916_v12 = vld [vmem:[#allocation15 + $0x10] sm:$0xff]  }
 0x783   :  { %v4208_v45 = vpop.xlane.xlu1 %4207  ;;  %v4575_v46 = vmul.f32 %v6200_v47, %v11469_v34  ;;  %v4576_v5 = vmul.f32 %v6200_v47, %v11470_v48  ;;  %v6202_v32 = vpop.eup %6201  ;;  %6211 = vrsqrt.f32 %v4453_v30  ;;  %v11474_v25 = vld [vmem:[#allocation101_spill] sm:$0xff]  ;;  %5664 = vmatpush3.bf16.msra.mxu1 %v5916_v12 }
 0x784   :  { %11471 = vst [vmem:[#allocation117_spill] sm:$0xff] %v10064_v36  ;;  %11472 = vst [vmem:[#allocation118_spill] sm:$0xff] %v10067_v62  ;;  %v4380_v43 = vmul.f32 0.00390625, %v4208_v45  ;;  %v4177_v15 = vmul.f32 %v10064_v36, %v10064_v36  ;;  %v4178_v47 = vmul.f32 %v10067_v62, %v10067_v62  ;;  %v6204_v34 = vpop.eup %6203  ;;  %6213 = vrsqrt.f32 %v4454_v2 }
 0x785   :  { %v4714_v53 = vmul.f32 %v9929_v11, %v4575_v46  ;;  %v4715_v57 = vmul.f32 %v9939_v14, %v4576_v5  ;;  %v4589_v46 = vmul.f32 %v6202_v32, %v11474_v25  ;;  %v6206_v48 = vpop.eup %6205  ;;  %v4455_v5 = vadd.f32 1e-05, %v4391_v52  ;;  %v11477_v25 = vld [vmem:[#allocation46_spill] sm:$0xff] }
 0x786   :  { %v4444_v30 = vadd.f32 1e-05, %v4380_v43  ;;  %v4725_v36 = vmul.f32 %v9939_v14, %v4586_v55  ;;  %v4590_v62 = vmul.f32 %v6202_v32, %v11475_v10  ;;  %v11476_v43 = vld [vmem:[#allocation45_spill] sm:$0xff]  ;;  %v4593_v10 = vmul.f32 %v6206_v48, %v11480_v54 }
 0x787   :  { %v4211_v23 = vpop.xlane.xlu1 %4210  ;;  %v4853_v59 = vadd.f32 %v9951_v49, %v4714_v53  ;;  %v4854_v56 = vadd.f32 %v9955_v40, %v4715_v57  ;;  %v4392_v53 = vmul.f32 0.00390625, %v10027_v42  ;;  %v4368_v42 = vadd.f32 %v4178_v47, %v4177_v15  ;;  %v11481_v15 = vld [vmem:[#allocation106_spill] sm:$0xff] }
 0x788   :  { %v4381_v45 = vmul.f32 0.00390625, %v4211_v23  ;;  %6215 = vrsqrt.f32 %v4444_v30  ;;  %v10100_v30 = vpop.xlane.xlu0 %4252  ;;  %v4594_v47 = vmul.f32 %v6206_v48, %v11481_v15  ;;  %v4393_v48 = vmul.f32 0.00390625, %v10053_v16 }
 0x789   :  { %v4976_v57 = vmax.f32 %v4975_v44, %v4853_v59  ;;  %v4989_v51 = vmax.f32 %v4988_v7, %v4854_v56  ;;  %v4728_v44 = vmul.f32 %v9929_v11, %v4589_v46  ;;  %v11478_v7 = vld [vmem:[#allocation103_spill] sm:$0xff]  ;;  %v11479_v56 = vld [vmem:[#allocation104_spill] sm:$0xff]  ;;  %6217 = vrsqrt.f32 %v4455_v5  ;;  %4369 = vadd.xlane.f32.xlu1 %v4368_v42 }
 0x78a   :  { %v6208_v41 = vpop.eup %6207  ;;  %v4445_v18 = vadd.f32 1e-05, %v4381_v45  ;;  %v4591_v59 = vmul.f32 %v6204_v34, %v11478_v7  ;;  %v4592_v55 = vmul.f32 %v6204_v34, %v11479_v56  ;;  %v4456_v38 = vadd.f32 1e-05, %v4392_v53  ;;  %v11482_v46 = vld [vmem:[#allocation107_spill] sm:$0xff]  ;;  %v11483_v34 = vld [vmem:[#allocation108_spill] sm:$0xff] }
 0x78b   :  { %v4217_v63 = vpop.xlane.xlu1 %4216  ;;  %v6210_v2 = vpop.eup %6209  ;;  %v4577_v23 = vmul.f32 %v6208_v41, %v11476_v43  ;;  %v4578_v52 = vmul.f32 %v6208_v41, %v11477_v25  ;;  %v4729_v41 = vmul.f32 %v9939_v14, %v4590_v62  ;;  %v4475_v7 = vadd.f32 1e-05, %v4411_v39  ;;  %v5917_v39 = vld [vmem:[#allocation15 + $0x58] sm:$0xff]  }
 0x78c   :  { %v4595_v45 = vmul.f32 %v6210_v2, %v11482_v46  ;;  %6219 = vrsqrt.f32 %v4445_v18  ;;  %v4596_v25 = vmul.f32 %v6210_v2, %v11483_v34  ;;  %v4731_v42 = vmul.f32 %v9939_v14, %v4592_v55  ;;  %v5918_v2 = vld [vmem:[#allocation15 + $0x18] sm:$0xff]   ;;  %v10130_v15 = vpop.xlane.xlu0 %4309  ;;  %5665 = vmatprep.subr.bf16.mxu1 %v5917_v39 }
 0x78d   :  { %v4716_v32 = vmul.f32 %v9929_v11, %v4577_v23  ;;  %v4717_v12 = vmul.f32 %v9939_v14, %v4578_v52  ;;  %v6212_v23 = vpop.eup %6211  ;;  %v4730_v52 = vmul.f32 %v9929_v11, %v4591_v59  ;;  %v4732_v62 = vmul.f32 %v9929_v11, %v4593_v10  ;;  %5666 = vmatpush3.bf16.msra.mxu1 %v5918_v2 }
 0x78e   :  { %v4383_v56 = vmul.f32 0.00390625, %v4217_v63  ;;  %6221 = vrsqrt.f32 %v4456_v38  ;;  %v10122_v59 = vadd.f32 %v9951_v49, %v10077_v37  ;;  %v4733_v63 = vmul.f32 %v9939_v14, %v4594_v47 }
 0x78f   :  { %v4232_v43 = vpop.xlane.xlu1 %4231  ;;  %v4855_v5 = vadd.f32 %v9951_v49, %v4716_v32  ;;  %v4856_v53 = vadd.f32 %v9955_v40, %v4717_v12  ;;  %v6214_v32 = vpop.eup %6213  ;;  %v10118_v12 = vadd.f32 %v9955_v40, %v10061_v3  ;;  %v4734_v16 = vmul.f32 %v9929_v11, %v4595_v45 }
 0x790   :  { %v4447_v55 = vadd.f32 1e-05, %v4383_v56  ;;  %6223 = vrsqrt.f32 %v4475_v7  ;;  %v10133_v46 = vadd.f32 %v9955_v40, %v4725_v36  ;;  %v10136_v37 = vadd.f32 %v9951_v49, %v4728_v44  ;;  %v4313_v61 = vpop.xlane.xlu0 %4312 }
 0x791   :  { %v10112_v18 = vmax.f32 %v4976_v57, %v4855_v5  ;;  %v10114_v54 = vmax.f32 %v4989_v51, %v4856_v53  ;;  %v4735_v57 = vmul.f32 %v9939_v14, %v4596_v25  ;;  %v11484_v51 = vld [vmem:[#allocation111_spill] sm:$0xff]  ;;  %v10139_v47 = vadd.f32 %v9955_v40, %v4729_v41  ;;  %v11485_v5 = vld [vmem:[#allocation30_spill] sm:$0xff] }
 0x792   :  { %v4599_v38 = vmul.f32 %v6212_v23, %v11484_v51  ;;  %v6216_v3 = vpop.eup %6215  ;;  %6225 = vrsqrt.f32 %v4447_v55  ;;  %v10142_v45 = vadd.f32 %v9951_v49, %v4730_v52  ;;  %v10145_v34 = vadd.f32 %v9955_v40, %v4731_v42  ;;  %v11487_v55 = vld [vmem:[#allocation114_spill] sm:$0xff] }
 0x793   :  { %v10125_v10 = vpop.xlane.xlu1 %4288  ;;  %v10148_v25 = vadd.f32 %v9951_v49, %v4732_v62  ;;  %v4457_v7 = vadd.f32 1e-05, %v4393_v48  ;;  %v10151_v36 = vadd.f32 %v9955_v40, %v4733_v63  ;;  %v4581_v44 = vmul.f32 %v6216_v3, %v9520_v33  ;;  %v6218_v39 = vpop.eup %6217  ;;  %v11486_v62 = vld [vmem:[#allocation112_spill] sm:$0xff] }
 0x794   :  { %v4582_v41 = vmul.f32 %v6216_v3, %v11485_v5  ;;  %v4388_v53 = vmul.f32 0.00390625, %v4232_v43  ;;  %v10158_v52 = vadd.f32 %v9951_v49, %v4734_v16  ;;  %v10161_v42 = vadd.f32 %v9955_v40, %v4735_v57  ;;  %v11488_v5 = vld [vmem:[#allocation115_spill] sm:$0xff]  ;;  %v11489_v16 = vld [vmem:[#allocation64_spill] sm:$0xff] }
 0x795   :  { %v4600_v2 = vmul.f32 %v6212_v23, %v11486_v62  ;;  %v4738_v48 = vmul.f32 %v9929_v11, %v4599_v38  ;;  %v4601_v51 = vmul.f32 %v6214_v32, %v11487_v55  ;;  %v4394_v33 = vmul.f32 0.00390625, %v10081_v9  ;;  %v11490_v57 = vld [vmem:[#allocation43_spill] sm:$0xff]  ;;  %v11491_v23 = vld [vmem:[#allocation49_spill] sm:$0xff] }
 0x796   :  { %v6220_v63 = vpop.eup %6219  ;;  %v4720_v43 = vmul.f32 %v9929_v11, %v4581_v44  ;;  %v4721_v3 = vmul.f32 %v9939_v14, %v4582_v41  ;;  %v4602_v8 = vmul.f32 %v6214_v32, %v11488_v5  ;;  %6227 = vrsqrt.f32 %v4457_v7  ;;  %v5919_v5 = vld [vmem:[#allocation15 + $0x60] sm:$0xff]  }
 0x797   :  { %v10155_v56 = vpop.xlane.xlu1 %4291  ;;  %v4583_v1 = vmul.f32 %v6220_v63, %v11489_v16  ;;  %v4584_v28 = vmul.f32 %v6220_v63, %v11490_v57  ;;  %v4603_v62 = vmul.f32 %v6218_v39, %v11491_v23  ;;  %v4452_v0 = vadd.f32 1e-05, %v4388_v53  ;;  %v5920_v16 = vld [vmem:[#allocation15 + $0x20] sm:$0xff]   ;;  %5667 = vmatprep.subr.bf16.mxu1 %v5919_v5 }
 0x798   :  { %v4859_v38 = vadd.f32 %v9951_v49, %v4720_v43  ;;  %v4860_v55 = vadd.f32 %v9955_v40, %v4721_v3  ;;  %v6222_v44 = vpop.eup %6221  ;;  %v4739_v41 = vmul.f32 %v9939_v14, %v4600_v2  ;;  %v10179_v32 = vadd.f32 %v9951_v49, %v4738_v48  ;;  %v11492_v57 = vld [vmem:[#allocation39_spill] sm:$0xff]  ;;  %5668 = vmatpush3.bf16.msra.mxu1 %v5920_v16  ;;  %v11495_v5 = vld [vmem:[#allocation36_spill] sm:$0xff] }
 0x799   :  { %v4722_v7 = vmul.f32 %v9929_v11, %v4583_v1  ;;  %v4723_v63 = vmul.f32 %v9939_v14, %v4584_v28  ;;  %v4604_v23 = vmul.f32 %v6218_v39, %v11492_v57  ;;  %v4458_v43 = vadd.f32 1e-05, %v4394_v33  ;;  %v11493_v33 = vld [vmem:[#allocation31_spill] sm:$0xff] }
 0x79a   :  { %v4997_v3 = vmax.f32 %v10070_v20, %v4859_v38  ;;  %v5010_v53 = vmax.f32 %v10118_v12, %v4860_v55  ;;  %v6224_v13 = vpop.eup %6223  ;;  %v4740_v6 = vmul.f32 %v9929_v11, %v4601_v51  ;;  %v4395_v2 = vmul.f32 0.00390625, %v10100_v30  ;;  %v11494_v12 = vld [vmem:[#allocation52_spill] sm:$0xff] }
 0x79b   :  { %v10175_v9 = vpop.xlane.xlu1 %4294  ;;  %v4861_v48 = vadd.f32 %v9951_v49, %v4722_v7  ;;  %v4862_v1 = vadd.f32 %v9955_v40, %v4723_v63  ;;  %v4741_v35 = vmul.f32 %v9939_v14, %v4602_v8  ;;  %v4742_v39 = vmul.f32 %v9929_v11, %v4603_v62  ;;  %v4262_v7 = vpop.xlane.xlu0 %4261  ;;  %v11496_v8 = vld [vmem:[#allocation68_spill] sm:$0xff] }
 0x79c   :  { %v6226_v28 = vpop.eup %6225  ;;  %v4605_v57 = vmul.f32 %v6222_v44, %v11493_v33  ;;  %6229 = vrsqrt.f32 %v4452_v0  ;;  %v4606_v51 = vmul.f32 %v6222_v44, %v11494_v12  ;;  %v4743_v63 = vmul.f32 %v9939_v14, %v4604_v23 }
 0x79d   :  { %v4998_v38 = vmax.f32 %v4997_v3, %v4861_v48  ;;  %v5011_v30 = vmax.f32 %v5010_v53, %v4862_v1  ;;  %v4587_v55 = vmul.f32 %v6226_v28, %v9579_v19  ;;  %v4643_v26 = vmul.f32 %v6224_v13, %v11495_v5  ;;  %v5922_v1 = vld [vmem:[#allocation15 + $0x28] sm:$0xff]  }
 0x79e   :  { %6231 = vrsqrt.f32 %v4458_v43  ;;  %v4588_v62 = vmul.f32 %v6226_v28, %v11496_v8  ;;  %v4459_v4 = vadd.f32 1e-05, %v4395_v2  ;;  %v10204_v44 = vadd.f32 %v9955_v40, %v4739_v41  ;;  %v5921_v41 = vld [vmem:[#allocation15 + $0x68] sm:$0xff]  }
 0x79f   :  { %v10193_v20 = vpop.xlane.xlu1 %4303  ;;  %v4726_v0 = vmul.f32 %v9929_v11, %v4587_v55  ;;  %v4999_v33 = vmax.f32 %v4998_v38, %v10122_v59  ;;  %v5012_v16 = vmax.f32 %v5011_v30, %v10133_v46  ;;  %v10207_v19 = vadd.f32 %v9951_v49, %v4740_v6  ;;  %v4316_v30 = vpop.xlane.xlu0 %4315  ;;  %5669 = vmatprep.subr.bf16.mxu1 %v5921_v41  ;;  %v11498_v55 = vld [vmem:[#allocation34_spill] sm:$0xff] }
 0x7a0   :  { %v4414_v23 = vmul.f32 0.00390625, %v10130_v15  ;;  %v4727_v3 = vmul.f32 %v9939_v14, %v4588_v62  ;;  %v6228_v43 = vpop.eup %6227  ;;  %v10212_v53 = vadd.f32 %v9955_v40, %v4741_v35  ;;  %v4744_v2 = vmul.f32 %v9929_v11, %v4605_v57  ;;  %v11497_v15 = vld [vmem:[#allocation42_spill] sm:$0xff]  ;;  %5670 = vmatpush3.bf16.msra.mxu1 %v5922_v1 }
 0x7a1   :  { %v4745_v59 = vmul.f32 %v9939_v14, %v4606_v51  ;;  %v4865_v46 = vadd.f32 %v9951_v49, %v4726_v0  ;;  %v10220_v6 = vadd.f32 %v9951_v49, %v4742_v39  ;;  %v4644_v28 = vmul.f32 %v6224_v13, %v11497_v15  ;;  %v11499_v0 = vld [vmem:[#allocation50_spill] sm:$0xff] }
 0x7a2   :  { %v4782_v12 = vmul.f32 %v9929_v11, %v4643_v26  ;;  %v4866_v35 = vadd.f32 %v9955_v40, %v4727_v3  ;;  %v10226_v38 = vadd.f32 %v9955_v40, %v4743_v63  ;;  %6233 = vrsqrt.f32 %v4459_v4 }
 0x7a3   :  { %v10217_v48 = vpop.xlane.xlu1 %4306  ;;  %v4415_v57 = vmul.f32 0.00390625, %v4313_v61  ;;  %v5000_v51 = vmax.f32 %v4999_v33, %v4865_v46  ;;  %v4607_v5 = vmul.f32 %v6228_v43, %v11498_v55  ;;  %v4478_v8 = vadd.f32 1e-05, %v4414_v23  ;;  %v11500_v46 = vld [vmem:[#allocation53_spill] sm:$0xff] }
 0x7a4   :  { %v5013_v62 = vmax.f32 %v5012_v16, %v4866_v35  ;;  %v4398_v39 = vmul.f32 0.00390625, %v4262_v7  ;;  %v10230_v13 = vadd.f32 %v9951_v49, %v4744_v2  ;;  %v10233_v26 = vadd.f32 %v9955_v40, %v4745_v59  ;;  %v11501_v59 = vld [vmem:[#allocation54_spill] sm:$0xff] }
 0x7a5   :  { %v4608_v63 = vmul.f32 %v6228_v43, %v11499_v0  ;;  %v5001_v4 = vmax.f32 %v5000_v51, %v10136_v37  ;;  %v4783_v33 = vmul.f32 %v9939_v14, %v4644_v28  ;;  %v10239_v3 = vadd.f32 %v9951_v49, %v4782_v12 }
 0x7a6   :  { %v6230_v61 = vpop.eup %6229  ;;  %v5014_v16 = vmax.f32 %v5013_v62, %v10139_v47  ;;  %v4416_v7 = vmul.f32 0.00390625, %v4316_v30  ;;  %v4479_v23 = vadd.f32 1e-05, %v4415_v57  ;;  %v4746_v37 = vmul.f32 %v9929_v11, %v4607_v5 }
 0x7a7   :  { %v5002_v2 = vmax.f32 %v5001_v4, %v10142_v45  ;;  %v4597_v41 = vmul.f32 %v6230_v61, %v11500_v46  ;;  %v4598_v1 = vmul.f32 %v6230_v61, %v11501_v59  ;;  %v10245_v15 = vpop.xlane.xlu1 %4255  ;;  %6235 = vrsqrt.f32 %v4478_v8  ;;  %v4319_v8 = vpop.xlane.xlu0 %4318  ;;  %v11503_v4 = vld [vmem:[#allocation51_spill] sm:$0xff]  ;;  %v5923_v59 = vld [vmem:[#allocation15 + $0x70] sm:$0xff]  }
 0x7a8   :  { %v6232_v43 = vpop.eup %6231  ;;  %v5015_v28 = vmax.f32 %v5014_v16, %v10145_v34  ;;  %v4462_v12 = vadd.f32 1e-05, %v4398_v39  ;;  %v4747_v35 = vmul.f32 %v9939_v14, %v4608_v63  ;;  %v4978_v51 = vrot.slane %v10112_v18, 4  ;;  %v11502_v34 = vld [vmem:[#allocation33_spill] sm:$0xff]  ;;  %5671 = vmatprep.subr.bf16.mxu1 %v5923_v59 }
 0x7a9   :  { %v10251_v47 = vmax.f32 %v5002_v2, %v10148_v25  ;;  %v4736_v45 = vmul.f32 %v9929_v11, %v4597_v41  ;;  %v4737_v57 = vmul.f32 %v9939_v14, %v4598_v1  ;;  %v4480_v55 = vadd.f32 1e-05, %v4416_v7  ;;  %v5924_v1 = vld [vmem:[#allocation15 + $0x30] sm:$0xff]  }
 0x7aa   :  { %v10257_v30 = vmax.f32 %v5015_v28, %v10151_v36  ;;  %v4407_v5 = vmul.f32 0.00390625, %v10125_v10  ;;  %v4609_v62 = vmul.f32 %v6232_v43, %v11502_v34  ;;  %6237 = vrsqrt.f32 %v4479_v23  ;;  %5672 = vmatpush3.bf16.msra.mxu1 %v5924_v1  ;;  %v11507_v1 = vld [vmem:[#allocation67_spill] sm:$0xff] }
 0x7ab   :  { %v4875_v39 = vadd.f32 %v9951_v49, %v4736_v45  ;;  %v4876_v25 = vadd.f32 %v9955_v40, %v4737_v57  ;;  %v10264_v0 = vadd.f32 %v9955_v40, %v4783_v33  ;;  %v4991_v63 = vrot.slane %v10114_v54, 4  ;;  %v10273_v2 = vpop.xlane.xlu1 %4258  ;;  %v11504_v57 = vld [vmem:[#allocation29_spill] sm:$0xff] }
 0x7ac   :  { %v4610_v61 = vmul.f32 %v6232_v43, %v11503_v4  ;;  %6239 = vrsqrt.f32 %v4462_v12  ;;  %v6234_v36 = vpop.eup %6233  ;;  %v10269_v16 = vadd.f32 %v9951_v49, %v4746_v37  ;;  %v4417_v23 = vmul.f32 0.00390625, %v4319_v8  ;;  %v5925_v43 = vld [vmem:[#allocation15 + $0x78] sm:$0xff]   ;;  %v4325_v12 = vpop.xlane.xlu0 %4324 }
 0x7ad   :  { %v5023_v10 = vmax.f32 %v10158_v52, %v4875_v39  ;;  %v5036_v7 = vmax.f32 %v10161_v42, %v4876_v25  ;;  %v4979_v46 = vmax.f32 %v10112_v18, %v4978_v51  ;;  %6241 = vrsqrt.f32 %v4480_v55  ;;  %v11505_v55 = vld [vmem:[#allocation63_spill] sm:$0xff]  ;;  %5673 = vmatprep.subr.bf16.mxu1 %v5925_v43 }
 0x7ae   :  { %v4471_v33 = vadd.f32 1e-05, %v4407_v5  ;;  %v4408_v41 = vmul.f32 0.00390625, %v10155_v56  ;;  %v10278_v28 = vadd.f32 %v9955_v40, %v4747_v35  ;;  %v4748_v37 = vmul.f32 %v9929_v11, %v4609_v62 }
 0x7af   :  { %v5024_v52 = vmax.f32 %v5023_v10, %v10179_v32  ;;  %v5037_v42 = vmax.f32 %v5036_v7, %v10204_v44  ;;  %v4992_v45 = vmax.f32 %v10114_v54, %v4991_v63  ;;  %v4749_v18 = vmul.f32 %v9939_v14, %v4610_v61  ;;  %v5926_v32 = vld [vmem:[#allocation15 + $0x38] sm:$0xff]  }
 0x7b0   :  { %v4611_v51 = vmul.f32 %v6234_v36, %v11504_v57  ;;  %v4409_v56 = vmul.f32 0.00390625, %v10175_v9  ;;  %v4612_v5 = vmul.f32 %v6234_v36, %v11505_v55  ;;  %v4481_v34 = vadd.f32 1e-05, %v4417_v23  ;;  %v11506_v23 = vld [vmem:[#allocation44_spill] sm:$0xff]  ;;  %5674 = vmatpush3.bf16.msra.mxu1 %v5926_v32 }
 0x7b1   :  { %v5025_v35 = vmax.f32 %v5024_v52, %v10207_v19  ;;  %v5038_v8 = vmax.f32 %v5037_v42, %v10212_v53  ;;  %v6236_v44 = vpop.eup %6235  ;;  %v4980_v62 = vrot.slane %v4979_v46, 2  ;;  %6243 = vrsqrt.f32 %v4471_v33  ;;  %v10298_v53 = vpop.xlane.xlu1 %4264 }
 0x7b2   :  { %v4472_v54 = vadd.f32 1e-05, %v4408_v41  ;;  %v4419_v39 = vmul.f32 0.00390625, %v4325_v12  ;;  %v5004_v25 = vrot.slane %v10251_v47, 4  ;;  %v4412_v19 = vmul.f32 0.00390625, %v10193_v20  ;;  %v4331_v52 = vpop.xlane.xlu0 %4330 }
 0x7b3   :  { %v10292_v9 = vmax.f32 %v5025_v35, %v10220_v6  ;;  %v10295_v63 = vmax.f32 %v5038_v8, %v10226_v38  ;;  %v4993_v4 = vrot.slane %v4992_v45, 2  ;;  %v10301_v61 = vadd.f32 %v9951_v49, %v4748_v37  ;;  %v11509_v8 = vld [vmem:[#allocation58_spill] sm:$0xff] }
 0x7b4   :  { %v4750_v36 = vmul.f32 %v9929_v11, %v4611_v51  ;;  %v4473_v10 = vadd.f32 1e-05, %v4409_v56  ;;  %v6238_v7 = vpop.eup %6237  ;;  %v4649_v33 = vmul.f32 %v6236_v44, %v11506_v23  ;;  %6245 = vrsqrt.f32 %v4481_v34 }
 0x7b5   :  { %v5027_v6 = vmax.f32 %v10292_v9, %v10230_v13  ;;  %v4981_v41 = vmax.f32 %v4979_v46, %v4980_v62  ;;  %v10310_v59 = vadd.f32 %v9955_v40, %v4749_v18  ;;  %v4650_v43 = vmul.f32 %v6236_v44, %v11507_v1  ;;  %v11508_v46 = vld [vmem:[#allocation56_spill] sm:$0xff]  ;;  %v10324_v44 = vpop.xlane.xlu1 %4267 }
 0x7b6   :  { %v6240_v20 = vpop.eup %6239  ;;  %v4483_v37 = vadd.f32 1e-05, %v4419_v39  ;;  %v4751_v42 = vmul.f32 %v9939_v14, %v4612_v5  ;;  %v5005_v12 = vmax.f32 %v10251_v47, %v5004_v25  ;;  %6247 = vrsqrt.f32 %v4472_v54 }
 0x7b7   :  { %v4476_v57 = vadd.f32 1e-05, %v4412_v19  ;;  %v6242_v51 = vpop.eup %6241  ;;  %v10315_v56 = vmax.f32 %v4992_v45, %v4993_v4  ;;  %v10318_v55 = vadd.f32 %v9951_v49, %v4750_v36  ;;  %v4651_v35 = vmul.f32 %v6238_v7, %v11508_v46 }
 0x7b8   :  { %6249 = vrsqrt.f32 %v4473_v10  ;;  %v4788_v18 = vmul.f32 %v9929_v11, %v4649_v33  ;;  %v4652_v34 = vmul.f32 %v6238_v7, %v11509_v8  ;;  %v4617_v32 = vmul.f32 %v6240_v20, %v9621_v27 }
 0x7b9   :  { %v4421_v5 = vmul.f32 0.00390625, %v4331_v52  ;;  %v4982_v47 = vrot.slane %v4981_v41, 1  ;;  %v4789_v62 = vmul.f32 %v9939_v14, %v4650_v43  ;;  %v4618_v45 = vmul.f32 %v6240_v20, %v9624_v22 }
 0x7ba   :  { %6251 = vrsqrt.f32 %v4483_v37  ;;  %v5006_v54 = vrot.slane %v5005_v12, 2  ;;  %v4653_v39 = vmul.f32 %v6242_v51, %v9631_v17  ;;  %v4413_v25 = vmul.f32 0.00390625, %v10217_v48 }
 0x7bb   :  { %6253 = vrsqrt.f32 %v4476_v57  ;;  %v6244_v19 = vpop.eup %6243  ;;  %v10332_v27 = vadd.f32 %v9955_v40, %v4751_v42  ;;  %v4790_v36 = vmul.f32 %v9929_v11, %v4651_v35  ;;  %v4396_v10 = vmul.f32 0.00390625, %v10245_v15  ;;  %v4271_v57 = vpop.xlane.xlu1 %4270 }
 0x7bc   :  { %v10337_v22 = vadd.f32 %v9951_v49, %v4788_v18  ;;  %v4791_v7 = vmul.f32 %v9939_v14, %v4652_v34  ;;  %v4756_v17 = vmul.f32 %v9929_v11, %v4617_v32  ;;  %v4485_v23 = vadd.f32 1e-05, %v4421_v5 }
 0x7bd   :  { %v10342_v48 = vadd.f32 %v9955_v40, %v4789_v62  ;;  %v4757_v33 = vmul.f32 %v9939_v14, %v4618_v45  ;;  %v4654_v20 = vmul.f32 %v6242_v51, %v9634_v50  ;;  %v4397_v1 = vmul.f32 0.00390625, %v10273_v2 }
 0x7be   :  { %v6246_v43 = vpop.eup %6245  ;;  %v4983_v15 = vmax.f32 %v4981_v41, %v4982_v47  ;;  %v5007_v37 = vmax.f32 %v5005_v12, %v5006_v54  ;;  %v4792_v52 = vmul.f32 %v9929_v11, %v4653_v39  ;;  %v4477_v42 = vadd.f32 1e-05, %v4413_v25  ;;  %v11510_v41 = vld [vmem:[#allocation69_spill] sm:$0xff]  ;;  %v11511_v47 = vld [vmem:[#allocation59_spill] sm:$0xff] }
 0x7bf   :  { %v10349_v46 = vadd.f32 %v9951_v49, %v4790_v36  ;;  %v5017_v35 = vrot.slane %v10257_v30, 4  ;;  %v4635_v18 = vmul.f32 %v6244_v19, %v9614_v24  ;;  %v4460_v8 = vadd.f32 1e-05, %v4396_v10  ;;  %v11512_v54 = vld [vmem:[#allocation73_spill] sm:$0xff] }
 0x7c0   :  { %v6248_v34 = vpop.eup %6247  ;;  %v10354_v50 = vadd.f32 %v9955_v40, %v4791_v7  ;;  %v10357_v2 = vadd.f32 %v9951_v49, %v4756_v17  ;;  %v4636_v12 = vmul.f32 %v6244_v19, %v11510_v41  ;;  %6255 = vrsqrt.f32 %v4485_v23  ;;  %v11513_v7 = vld [vmem:[#allocation70_spill] sm:$0xff]  ;;  %v4280_v41 = vpop.xlane.xlu0 %4279 }
 0x7c1   :  { %v10361_v32 = vadd.f32 %v9955_v40, %v4757_v33  ;;  %v4793_v5 = vmul.f32 %v9939_v14, %v4654_v20  ;;  %v4655_v62 = vmul.f32 %v6246_v43, %v11511_v47  ;;  %v4461_v24 = vadd.f32 1e-05, %v4397_v1  ;;  %v11514_v20 = vld [vmem:[#allocation55_spill] sm:$0xff] }
 0x7c2   :  { %v6250_v51 = vpop.eup %6249  ;;  %v10366_v45 = vadd.f32 %v9951_v49, %v4792_v52  ;;  %v4656_v39 = vmul.f32 %v6246_v43, %v11512_v54  ;;  %6257 = vrsqrt.f32 %v4477_v42  ;;  %v5008_v25 = vrot.slane %v5007_v37, 1  ;;  %v4328_v43 = vpop.xlane.xlu1 %4327 }
 0x7c3   :  { %v10370_v19 = vmax.f32 %v10257_v30, %v5017_v35  ;;  %v4774_v10 = vmul.f32 %v9929_v11, %v4635_v18  ;;  %v4637_v17 = vmul.f32 %v6248_v34, %v11513_v7  ;;  %6259 = vrsqrt.f32 %v4460_v8 }
 0x7c4   :  { %v6252_v36 = vpop.eup %6251  ;;  %v4775_v33 = vmul.f32 %v9939_v14, %v4636_v12  ;;  %v4638_v1 = vmul.f32 %v6248_v34, %v11514_v20  ;;  %v4639_v52 = vmul.f32 %v6250_v51, %v9663_v31  ;;  %v5009_v42 = vmax.f32 %v5007_v37, %v5008_v25 }
 0x7c5   :  { %v6254_v23 = vpop.eup %6253  ;;  %v4794_v47 = vmul.f32 %v9929_v11, %v4655_v62  ;;  %v4640_v30 = vmul.f32 %v6250_v51, %v9666_v21  ;;  %6261 = vrsqrt.f32 %v4461_v24  ;;  %v4399_v35 = vmul.f32 0.00390625, %v10298_v53  ;;  %v11515_v62 = vld [vmem:[#allocation57_spill] sm:$0xff] }
 0x7c6   :  { %v10381_v18 = vadd.f32 %v9955_v40, %v4793_v5  ;;  %v4795_v8 = vmul.f32 %v9939_v14, %v4656_v39  ;;  %v4659_v12 = vmul.f32 %v6252_v36, %v9693_v58  ;;  %v10386_v34 = vsel %vm5195_vm3, %v5009_v42, %v4983_v15 }
 0x7c7   :  { %v4776_v31 = vmul.f32 %v9929_v11, %v4637_v17  ;;  %v4660_v37 = vmul.f32 %v6252_v36, %v9696_v60  ;;  %v4645_v54 = vmul.f32 %v6254_v23, %v11515_v62  ;;  %v4400_v21 = vmul.f32 0.00390625, %v10324_v44  ;;  %v4334_v17 = vpop.xlane.xlu0 %4333  ;;  %v11518_v62 = vld [vmem:[#allocation25_spill] sm:$0xff] }
 0x7c8   :  { %v10393_v53 = vadd.f32 %v9951_v49, %v4774_v10  ;;  %v4777_v51 = vmul.f32 %v9939_v14, %v4638_v1  ;;  %v4778_v5 = vmul.f32 %v9929_v11, %v4639_v52  ;;  %v4401_v24 = vmul.f32 0.00390625, %v4271_v57  ;;  %v11517_v10 = vld [vmem:[#allocation60_spill] sm:$0xff] }
 0x7c9   :  { %v10398_v58 = vadd.f32 %v9955_v40, %v4775_v33  ;;  %v10401_v15 = vadd.f32 %v9951_v49, %v4794_v47  ;;  %v4779_v60 = vmul.f32 %v9939_v14, %v4640_v30  ;;  %v4463_v39 = vadd.f32 1e-05, %v4399_v35  ;;  %v4274_v33 = vpop.xlane.xlu1 %4273 }
 0x7ca   :  { %v6256_v25 = vpop.eup %6255  ;;  %v5028_v44 = vmax.f32 %v5027_v6, %v10269_v16  ;;  %v10409_v36 = vadd.f32 %v9955_v40, %v4795_v8  ;;  %v4798_v57 = vmul.f32 %v9929_v11, %v4659_v12  ;;  %v4646_v7 = vmul.f32 %v6254_v23, %v11517_v10  ;;  %v11521_v10 = vld [vmem:[#allocation27_spill] sm:$0xff] }
 0x7cb   :  { %v10414_v20 = vadd.f32 %v9951_v49, %v4776_v31  ;;  %v4799_v1 = vmul.f32 %v9939_v14, %v4660_v37  ;;  %v4784_v52 = vmul.f32 %v9929_v11, %v4645_v54  ;;  %v4464_v42 = vadd.f32 1e-05, %v4400_v21 }
 0x7cc   :  { %11516 = vst [vmem:[#allocation97_spill] sm:$0xff] %v10409_v36  ;;  %v6258_v47 = vpop.eup %6257  ;;  %v10419_v13 = vadd.f32 %v9955_v40, %v4777_v51  ;;  %v10422_v16 = vadd.f32 %v9951_v49, %v4778_v5  ;;  %v4465_v9 = vadd.f32 1e-05, %v4401_v24  ;;  %v4420_v6 = vmul.f32 0.00390625, %v4328_v43 }
 0x7cd   :  { %v6260_v23 = vpop.eup %6259  ;;  %v10425_v30 = vadd.f32 %v9955_v40, %v4779_v60  ;;  %v4663_v35 = vmul.f32 %v6256_v25, %v9703_v29  ;;  %6263 = vrsqrt.f32 %v4463_v39  ;;  %v4402_v8 = vmul.f32 0.00390625, %v4274_v33  ;;  %v11519_v29 = vld [vmem:[#allocation61_spill] sm:$0xff]  ;;  %v11520_v60 = vld [vmem:[#allocation38_spill] sm:$0xff]  ;;  %v4277_v4 = vpop.xlane.xlu1 %4276 }
 0x7ce   :  { %v5029_v12 = vmax.f32 %v5028_v44, %v10301_v61  ;;  %v10430_v31 = vadd.f32 %v9951_v49, %v4798_v57  ;;  %v4785_v37 = vmul.f32 %v9939_v14, %v4646_v7  ;;  %v4664_v54 = vmul.f32 %v6256_v25, %v11518_v62  ;;  %v4337_v44 = vpop.xlane.xlu0 %4336  ;;  %v11522_v25 = vld [vmem:[#allocation28_spill] sm:$0xff] }
 0x7cf   :  { %v6262_v21 = vpop.eup %6261  ;;  %v10435_v43 = vadd.f32 %v9955_v40, %v4799_v1  ;;  %v4923_v51 = vadd.f32 %v9951_v49, %v4784_v52  ;;  %6265 = vrsqrt.f32 %v4464_v42  ;;  %v4404_v5 = vmul.f32 0.00390625, %v4280_v41  ;;  %v11523_v42 = vld [vmem:[#allocation37_spill] sm:$0xff] }
 0x7d0   :  { %v4647_v24 = vmul.f32 %v6258_v47, %v11519_v29  ;;  %v4613_v39 = vmul.f32 %v6260_v23, %v11520_v60  ;;  %6267 = vrsqrt.f32 %v4465_v9  ;;  %v4484_v61 = vadd.f32 1e-05, %v4420_v6  ;;  %v11524_v60 = vld [vmem:[#allocation26_spill] sm:$0xff] }
 0x7d1   :  { %v4802_v57 = vmul.f32 %v9929_v11, %v4663_v35  ;;  %v4648_v7 = vmul.f32 %v6258_v47, %v11521_v10  ;;  %v4614_v33 = vmul.f32 %v6260_v23, %v11522_v25  ;;  %v4466_v62 = vadd.f32 1e-05, %v4402_v8 }
 0x7d2   :  { %v4924_v1 = vadd.f32 %v9955_v40, %v4785_v37  ;;  %v4803_v52 = vmul.f32 %v9939_v14, %v4664_v54  ;;  %v4615_v41 = vmul.f32 %v6262_v21, %v11523_v42  ;;  %v4422_v38 = vmul.f32 0.00390625, %v4334_v17 }
 0x7d3   :  { %v5101_v29 = vmax.f32 %v10239_v3, %v4923_v51  ;;  %v4616_v9 = vmul.f32 %v6262_v21, %v11524_v60  ;;  %v4468_v6 = vadd.f32 1e-05, %v4404_v5  ;;  %v5019_v35 = vrot.slane %v10370_v19, 2 }
 0x7d4   :  { %v4786_v47 = vmul.f32 %v9929_v11, %v4647_v24  ;;  %v4752_v23 = vmul.f32 %v9929_v11, %v4613_v39  ;;  %6269 = vrsqrt.f32 %v4484_v61  ;;  %v4423_v8 = vmul.f32 0.00390625, %v4337_v44  ;;  %v4340_v24 = vpop.xlane.xlu0 %4339 }
 0x7d5   :  { %v10452_v37 = vadd.f32 %v9951_v49, %v4802_v57  ;;  %v4787_v54 = vmul.f32 %v9939_v14, %v4648_v7  ;;  %v4753_v17 = vmul.f32 %v9939_v14, %v4614_v33  ;;  %6271 = vrsqrt.f32 %v4466_v62 }
 0x7d6   :  { %v10457_v3 = vadd.f32 %v9955_v40, %v4803_v52  ;;  %v4754_v21 = vmul.f32 %v9929_v11, %v4615_v41  ;;  %v4486_v51 = vadd.f32 1e-05, %v4422_v38  ;;  %v4403_v5 = vmul.f32 0.00390625, %v4277_v4 }
 0x7d7   :  { %v6264_v10 = vpop.eup %6263  ;;  %v4755_v39 = vmul.f32 %v9939_v14, %v4616_v9  ;;  %6273 = vrsqrt.f32 %v4468_v6  ;;  %v5020_v61 = vmax.f32 %v10370_v19, %v5019_v35  ;;  %v5030_v44 = vrot.slane %v5029_v12, 4  ;;  %v11527_v9 = vld [vmem:[#allocation65_spill] sm:$0xff] }
 0x7d8   :  { %v5114_v57 = vmax.f32 %v10264_v0, %v4924_v1  ;;  %v4925_v7 = vadd.f32 %v9951_v49, %v4786_v47  ;;  %v4891_v25 = vadd.f32 %v9951_v49, %v4752_v23  ;;  %v4487_v33 = vadd.f32 1e-05, %v4423_v8  ;;  %v11526_v1 = vld [vmem:[#allocation62_spill] sm:$0xff] }
 0x7d9   :  { %v6266_v62 = vpop.eup %6265  ;;  %v4926_v52 = vadd.f32 %v9955_v40, %v4787_v54  ;;  %v4892_v38 = vadd.f32 %v9955_v40, %v4753_v17  ;;  %v10467_v4 = vmul.f32 0.00390625, %v4340_v24  ;;  %v11525_v42 = vrot.slane %v10315_v56, 1  ;;  %v11528_v24 = vld [vmem:[#allocation66_spill] sm:$0xff] }
 0x7da   :  { %v6268_v19 = vpop.eup %6267  ;;  %v4893_v0 = vadd.f32 %v9951_v49, %v4754_v21  ;;  %v4619_v60 = vmul.f32 %v6264_v10, %v11526_v1  ;;  %v4620_v6 = vmul.f32 %v6264_v10, %v11527_v9  ;;  %v4467_v35 = vadd.f32 1e-05, %v4403_v5  ;;  %v11530_v10 = vld [vmem:[#allocation71_spill] sm:$0xff] }
 0x7db   :  { %v10472_v41 = vmax.f32 %v10315_v56, %v11525_v42  ;;  %v4894_v47 = vadd.f32 %v9955_v40, %v4755_v39  ;;  %6275 = vrsqrt.f32 %v4486_v51  ;;  %v5021_v23 = vrot.slane %v5020_v61, 1  ;;  %v11531_v51 = vld [vmem:[#allocation72_spill] sm:$0xff] }
 0x7dc   :  { %v5031_v8 = vmax.f32 %v5029_v12, %v5030_v44  ;;  %v10478_v54 = vmax.f32 %v5101_v29, %v4925_v7  ;;  %v5049_v17 = vmax.f32 %v10318_v55, %v4891_v25  ;;  %v4621_v56 = vmul.f32 %v6266_v62, %v11528_v24  ;;  %v10491_v12 = vpop.xlane.xlu0 %4348  ;;  %v11534_v24 = vld [vmem:[#allocation85_spill] sm:$0xff] }
 0x7dd   :  { %v11529_v21 = vmax.f32 %v10295_v63, %v10233_v26  ;;  %v10486_v1 = vmax.f32 %v5114_v57, %v4926_v52  ;;  %v5062_v5 = vmax.f32 %v10332_v27, %v4892_v38  ;;  %v4622_v39 = vmul.f32 %v6266_v62, %v11530_v10  ;;  %v4283_v29 = vpop.xlane.xlu1 %4282  ;;  %v11532_v63 = vld [vmem:[#allocation74_spill] sm:$0xff] }
 0x7de   :  { %v4623_v9 = vmul.f32 %v6268_v19, %v11531_v51  ;;  %v6270_v44 = vpop.eup %6269  ;;  %v5050_v55 = vmax.f32 %v5049_v17, %v4893_v0  ;;  %v4758_v7 = vmul.f32 %v9929_v11, %v4619_v60  ;;  %v4759_v25 = vmul.f32 %v9939_v14, %v4620_v6 }
 0x7df   :  { %v5041_v42 = vmax.f32 %v11529_v21, %v10278_v28  ;;  %6277 = vrsqrt.f32 %v4487_v33  ;;  %v6272_v26 = vpop.eup %6271  ;;  %v5063_v28 = vmax.f32 %v5062_v5, %v4894_v47  ;;  %v4624_v57 = vmul.f32 %v6268_v19, %v11532_v63  ;;  %v11536_v63 = vld [vmem:[#allocation77_spill] sm:$0xff] }
 0x7e0   :  { %6279 = vrsqrt.f32 %v4467_v35  ;;  %v10496_v27 = vmax.f32 %v5020_v61, %v5021_v23  ;;  %v4760_v52 = vmul.f32 %v9929_v11, %v4621_v56  ;;  %v5032_v38 = vrot.slane %v5031_v8, 2  ;;  %v11533_v35 = vld [vmem:[#allocation75_spill] sm:$0xff]  ;;  %v4298_v10 = vpop.xlane.xlu0 %4297  ;;  %v11538_v33 = vld [vmem:[#allocation81_spill] sm:$0xff] }
 0x7e1   :  { %v10502_v0 = vmax.f32 %v5041_v42, %v10310_v59  ;;  %v6274_v60 = vpop.eup %6273  ;;  %v4761_v6 = vmul.f32 %v9939_v14, %v4622_v39  ;;  %v4762_v19 = vmul.f32 %v9929_v11, %v4623_v9  ;;  %v4661_v61 = vmul.f32 %v6270_v44, %v11533_v35  ;;  %v11535_v42 = vld [vmem:[#allocation76_spill] sm:$0xff]  ;;  %v4286_v51 = vpop.xlane.xlu1 %4285  ;;  %v11537_v35 = vld [vmem:[#allocation78_spill] sm:$0xff] }
 0x7e2   :  { %v4897_v47 = vadd.f32 %v9951_v49, %v4758_v7  ;;  %v4898_v23 = vadd.f32 %v9955_v40, %v4759_v25  ;;  %v5051_v17 = vmax.f32 %v5050_v55, %v10357_v2  ;;  %v4625_v56 = vmul.f32 %v6272_v26, %v11534_v24 }
 0x7e3   :  { %v5064_v59 = vmax.f32 %v5063_v28, %v10361_v32  ;;  %v4763_v21 = vmul.f32 %v9939_v14, %v4624_v57  ;;  %v4662_v5 = vmul.f32 %v6270_v44, %v11535_v42  ;;  %v4405_v39 = vmul.f32 0.00390625, %v4283_v29 }
 0x7e4   :  { %v4899_v9 = vadd.f32 %v9951_v49, %v4760_v52  ;;  %v4629_v7 = vmul.f32 %v6274_v60, %v11536_v63  ;;  %v4630_v25 = vmul.f32 %v6274_v60, %v11537_v35  ;;  %v4626_v2 = vmul.f32 %v6272_v26, %v11538_v33 }
 0x7e5   :  { %v6276_v55 = vpop.eup %6275  ;;  %v4900_v24 = vadd.f32 %v9955_v40, %v4761_v6  ;;  %v4901_v32 = vadd.f32 %v9951_v49, %v4762_v19  ;;  %v4800_v28 = vmul.f32 %v9929_v11, %v4661_v61  ;;  %v4469_v44 = vadd.f32 1e-05, %v4405_v39 }
 0x7e6   :  { %v5052_v57 = vmax.f32 %v5051_v17, %v4897_v47  ;;  %v4764_v29 = vmul.f32 %v9929_v11, %v4625_v56  ;;  %v4410_v42 = vmul.f32 0.00390625, %v4298_v10  ;;  %v4406_v62 = vmul.f32 0.00390625, %v4286_v51  ;;  %v11539_v56 = vld [vmem:[#allocation82_spill] sm:$0xff] }
 0x7e7   :  { %v5065_v52 = vmax.f32 %v5064_v59, %v4898_v23  ;;  %v4902_v63 = vadd.f32 %v9955_v40, %v4763_v21  ;;  %v4801_v60 = vmul.f32 %v9939_v14, %v4662_v5  ;;  %v5033_v35 = vmax.f32 %v5031_v8, %v5032_v38  ;;  %v11540_v59 = vld [vmem:[#allocation86_spill] sm:$0xff] }
 0x7e8   :  { %v5053_v33 = vmax.f32 %v5052_v57, %v4899_v9  ;;  %v4768_v6 = vmul.f32 %v9929_v11, %v4629_v7  ;;  %v4765_v19 = vmul.f32 %v9939_v14, %v4626_v2  ;;  %v4470_v36 = vadd.f32 1e-05, %v4406_v62  ;;  %v11541_v9 = vld [vmem:[#allocation84_spill] sm:$0xff]  ;;  %v11542_v2 = vld [vmem:[#allocation87_spill] sm:$0xff] }
 0x7e9   :  { %v6278_v26 = vpop.eup %6277  ;;  %v5066_v39 = vmax.f32 %v5065_v52, %v4900_v24  ;;  %v4939_v47 = vadd.f32 %v9951_v49, %v4800_v28  ;;  %6281 = vrsqrt.f32 %v4469_v44  ;;  %v5034_v17 = vrot.slane %v5033_v35, 1  ;;  %v11543_v57 = vld [vmem:[#allocation88_spill] sm:$0xff] }
 0x7ea   :  { %v6280_v61 = vpop.eup %6279  ;;  %v4665_v23 = vmul.f32 %v6276_v55, %v11539_v56  ;;  %v4666_v21 = vmul.f32 %v6276_v55, %v11540_v59  ;;  %v4903_v5 = vadd.f32 %v9951_v49, %v4764_v29  ;;  %v4474_v8 = vadd.f32 1e-05, %v4410_v42  ;;  %v11544_v55 = vld [vmem:[#allocation83_spill] sm:$0xff]  ;;  %v4343_v29 = vpop.xlane.xlu1 %4342 }
 0x7eb   :  { %v5054_v38 = vmax.f32 %v5053_v33, %v4901_v32  ;;  %v5067_v10 = vmax.f32 %v5066_v39, %v4902_v63  ;;  %v4940_v51 = vadd.f32 %v9955_v40, %v4801_v60  ;;  %6283 = vrsqrt.f32 %v4470_v36  ;;  %v4322_v39 = vpop.xlane.xlu0 %4321 }
 0x7ec   :  { %v4904_v62 = vadd.f32 %v9955_v40, %v4765_v19  ;;  %v4667_v7 = vmul.f32 %v6278_v26, %v11541_v9  ;;  %v4627_v24 = vmul.f32 %v6280_v61, %v11542_v2  ;;  %v5035_v28 = vmax.f32 %v5033_v35, %v5034_v17 }
 0x7ed   :  { %v5127_v44 = vmax.f32 %v10430_v31, %v4939_v47  ;;  %v4668_v52 = vmul.f32 %v6278_v26, %v11543_v57  ;;  %v4628_v56 = vmul.f32 %v6280_v61, %v11544_v55  ;;  %v5043_v32 = vrot.slane %v10502_v0, 4 }
 0x7ee   :  { %v5055_v42 = vmax.f32 %v5054_v38, %v4903_v5  ;;  %6285 = vrsqrt.f32 %v4474_v8  ;;  %v10542_v36 = vsel %vm5197_vm4, %v5035_v28, %v10386_v34  ;;  %v10547_v63 = vsel %vm5195_vm3, %v10496_v27, %v10472_v41  ;;  %v4352_v17 = vpop.xlane.xlu1 %4351 }
 0x7ef   :  { %v4769_v31 = vmul.f32 %v9939_v14, %v4630_v25  ;;  %v5140_v60 = vmax.f32 %v10435_v43, %v4940_v51  ;;  %v4804_v35 = vmul.f32 %v9929_v11, %v4665_v23  ;;  %v4805_v26 = vmul.f32 %v9939_v14, %v4666_v21 }
 0x7f0   :  { %v5068_v33 = vmax.f32 %v5067_v10, %v4904_v62  ;;  %v4806_v19 = vmul.f32 %v9929_v11, %v4667_v7  ;;  %v4766_v61 = vmul.f32 %v9929_v11, %v4627_v24  ;;  %v4488_v34 = vadd.f32 1e-05, %v10467_v4  ;;  %v11547_v10 = vld [vmem:[#allocation122_spill] sm:$0xff] }
 0x7f1   :  { %v11545_v41 = vmax.f32 %v10478_v54, %v10337_v22  ;;  %v11546_v43 = vmax.f32 %v10486_v1, %v10342_v48  ;;  %v4807_v47 = vmul.f32 %v9939_v14, %v4668_v52  ;;  %v5044_v23 = vmax.f32 %v10502_v0, %v5043_v32 }
 0x7f2   :  { %v4907_v4 = vadd.f32 %v9951_v49, %v4768_v6  ;;  %v10572_v59 = vmax.f32 %v5127_v44, %v10452_v37  ;;  %v5056_v21 = vrot.slane %v5055_v42, 4  ;;  %v4767_v22 = vmul.f32 %v9939_v14, %v4628_v56  ;;  %v4346_v44 = vpop.xlane.xlu0 %4345  ;;  %v4355_v55 = vpop.xlane.xlu1 %4354 }
 0x7f3   :  { %v10560_v27 = vmax.f32 %v11545_v41, %v10349_v46  ;;  %v10566_v25 = vmax.f32 %v11546_v43, %v10354_v50  ;;  %v6282_v46 = vpop.eup %6281  ;;  %v4908_v54 = vadd.f32 %v9955_v40, %v4769_v31  ;;  %v10577_v48 = vmax.f32 %v5140_v60, %v10457_v3  ;;  %v11548_v3 = vld [vmem:[#allocation123_spill] sm:$0xff]  ;;  %v11549_v60 = vld [vmem:[#allocation124_spill] sm:$0xff] }
 0x7f4   :  { %v4943_v50 = vadd.f32 %v9951_v49, %v4804_v35  ;;  %v10581_v1 = vadd.f32 %v9955_v40, %v4805_v26  ;;  %v5069_v0 = vrot.slane %v5068_v33, 4  ;;  %v4945_v6 = vadd.f32 %v9951_v49, %v4806_v19  ;;  %v11550_v26 = vld [vmem:[#allocation125_spill] sm:$0xff] }
 0x7f5   :  { %v4905_v37 = vadd.f32 %v9951_v49, %v4766_v61  ;;  %v4427_v5 = vmul.f32 0.00390625, %v10491_v12  ;;  %v6284_v8 = vpop.eup %6283  ;;  %v10587_v38 = vadd.f32 %v9955_v40, %v4807_v47  ;;  %v4631_v51 = vmul.f32 %v6282_v46, %v11547_v10 }
 0x7f6   :  { %v4632_v62 = vmul.f32 %v6282_v46, %v11548_v3  ;;  %v5045_v9 = vrot.slane %v5044_v23, 2  ;;  %v5129_v7 = vmax.f32 %v10572_v59, %v4943_v50  ;;  %v5057_v2 = vmax.f32 %v5055_v42, %v5056_v21  ;;  %v11551_v21 = vld [vmem:[#allocation91_spill] sm:$0xff] }
 0x7f7   :  { %v4906_v24 = vadd.f32 %v9955_v40, %v4767_v22  ;;  %v4418_v28 = vmul.f32 0.00390625, %v4322_v39  ;;  %6287 = vrsqrt.f32 %v4488_v34  ;;  %v4770_v57 = vmul.f32 %v9929_v11, %v4631_v51  ;;  %v11552_v22 = vld [vmem:[#allocation47_spill] sm:$0xff] }
 0x7f8   :  { %v4771_v12 = vmul.f32 %v9939_v14, %v4632_v62  ;;  %v4425_v52 = vmul.f32 0.00390625, %v4343_v29  ;;  %v6286_v56 = vpop.eup %6285  ;;  %v5075_v32 = vmax.f32 %v4905_v37, %v4907_v4  ;;  %v4491_v31 = vadd.f32 1e-05, %v4427_v5 }
 0x7f9   :  { %v4633_v35 = vmul.f32 %v6284_v8, %v11549_v60  ;;  %v4634_v19 = vmul.f32 %v6284_v8, %v11550_v26  ;;  %v4426_v61 = vmul.f32 0.00390625, %v4346_v44  ;;  %v4909_v42 = vadd.f32 %v9951_v49, %v4770_v57 }
 0x7fa   :  { %v4910_v39 = vadd.f32 %v9955_v40, %v4771_v12  ;;  %v5046_v41 = vmax.f32 %v5044_v23, %v5045_v9  ;;  %v5088_v34 = vmax.f32 %v4906_v24, %v4908_v54  ;;  %v4482_v43 = vadd.f32 1e-05, %v4418_v28  ;;  %v4358_v37 = vpop.xlane.xlu1 %4357 }
 0x7fb   :  { %v4772_v47 = vmul.f32 %v9929_v11, %v4633_v35  ;;  %v4773_v29 = vmul.f32 %v9939_v14, %v4634_v19  ;;  %v5058_v59 = vrot.slane %v5057_v2, 2  ;;  %v4641_v4 = vmul.f32 %v6286_v56, %v11551_v21  ;;  %v11553_v19 = vld [vmem:[#allocation89_spill] sm:$0xff] }
 0x7fc   :  { %v4642_v46 = vmul.f32 %v6286_v56, %v11552_v22  ;;  %v4489_v50 = vadd.f32 1e-05, %v4425_v52  ;;  %v5076_v5 = vmax.f32 %v5075_v32, %v4909_v42  ;;  %v5089_v8 = vmax.f32 %v5088_v34, %v4910_v39 }
 0x7fd   :  { %v4911_v10 = vadd.f32 %v9951_v49, %v4772_v47  ;;  %v4912_v51 = vadd.f32 %v9955_v40, %v4773_v29  ;;  %v5070_v23 = vmax.f32 %v5068_v33, %v5069_v0  ;;  %6289 = vrsqrt.f32 %v4491_v31  ;;  %v11555_v47 = vld [vmem:[#allocation97_spill] sm:$0xff] }
 0x7fe   :  { %v4490_v54 = vadd.f32 1e-05, %v4426_v61  ;;  %v5047_v3 = vrot.slane %v5046_v41, 1  ;;  %6291 = vrsqrt.f32 %v4482_v43  ;;  %v4428_v24 = vmul.f32 0.00390625, %v4352_v17  ;;  %v4361_v31 = vpop.xlane.xlu1 %4360 }
 0x7ff   :  { %v5077_v62 = vmax.f32 %v5076_v5, %v4911_v10  ;;  %v5090_v9 = vmax.f32 %v5089_v8, %v4912_v51  ;;  %v5142_v28 = vmax.f32 %v10577_v48, %v10581_v1  ;;  %v5059_v44 = vmax.f32 %v5057_v2, %v5058_v59 }
 0x800   :  { %v4780_v57 = vmul.f32 %v9929_v11, %v4641_v4  ;;  %6293 = vrsqrt.f32 %v4489_v50  ;;  %v4781_v12 = vmul.f32 %v9939_v14, %v4642_v46  ;;  %v4429_v0 = vmul.f32 0.00390625, %v4355_v55 }
 0x801   :  { %v5078_v52 = vmax.f32 %v5077_v62, %v10393_v53  ;;  %v5091_v33 = vmax.f32 %v5090_v9, %v10398_v58  ;;  %v6288_v56 = vpop.eup %6287  ;;  %v10611_v32 = vmax.f32 %v5129_v7, %v4945_v6  ;;  %v5105_v17 = vmax.f32 %v10560_v27, %v10366_v45  ;;  %v11557_v9 = vld [vmem:[#allocation79_spill] sm:$0xff] }
 0x802   :  { %v5048_v60 = vmax.f32 %v5046_v41, %v5047_v3  ;;  %v5071_v48 = vrot.slane %v5070_v23, 2  ;;  %6295 = vrsqrt.f32 %v4490_v54  ;;  %v4492_v35 = vadd.f32 1e-05, %v4428_v24 }
 0x803   :  { %v5079_v1 = vmax.f32 %v5078_v52, %v10414_v20  ;;  %v5092_v2 = vmax.f32 %v5091_v33, %v10419_v13  ;;  %v5060_v26 = vrot.slane %v5059_v44, 1  ;;  %v4919_v53 = vadd.f32 %v9951_v49, %v4780_v57  ;;  %v11554_v20 = vld [vmem:[#allocation90_spill] sm:$0xff] }
 0x804   :  { %v5118_v58 = vmax.f32 %v10566_v25, %v10381_v18  ;;  %v4430_v6 = vmul.f32 0.00390625, %v4358_v37  ;;  %v4920_v7 = vadd.f32 %v9955_v40, %v4781_v12  ;;  %v4493_v27 = vadd.f32 1e-05, %v4429_v0  ;;  %v11558_v33 = vld [vmem:[#allocation126_spill] sm:$0xff] }
 0x805   :  { %v5080_v45 = vmax.f32 %v5079_v1, %v10422_v16  ;;  %v5093_v55 = vmax.f32 %v5092_v2, %v10425_v30  ;;  %v4669_v61 = vmul.f32 %v6288_v56, %v11553_v19  ;;  %v4670_v42 = vmul.f32 %v6288_v56, %v11554_v20  ;;  %v4364_v39 = vpop.xlane.xlu1 %4363  ;;  %v11559_v56 = vld [vmem:[#allocation119_spill] sm:$0xff] }
 0x806   :  { %v4431_v13 = vmul.f32 0.00390625, %v4361_v31  ;;  %v10627_v41 = vsel %vm5197_vm4, %v5048_v60, %v10547_v63  ;;  %6297 = vrsqrt.f32 %v4492_v35  ;;  %v5072_v18 = vmax.f32 %v5070_v23, %v5071_v48  ;;  %v11556_v23 = vld [vmem:[#allocation48_spill] sm:$0xff] }
 0x807   :  { %v5081_v25 = vmax.f32 %v5080_v45, %v4919_v53  ;;  %v5094_v34 = vmax.f32 %v5093_v55, %v4920_v7  ;;  %v6290_v43 = vpop.eup %6289  ;;  %v10630_v16 = vmax.f32 %v5142_v28, %v10587_v38  ;;  %v10633_v30 = vmax.f32 %v5105_v17, %v10401_v15  ;;  %v11560_v31 = vld [vmem:[#allocation80_spill] sm:$0xff]  ;;  %v11562_v45 = vld [vmem:[#allocation127_spill] sm:$0xff] }
 0x808   :  { %v10636_v29 = vmax.f32 %v5118_v58, %v11555_v47  ;;  %v4494_v59 = vadd.f32 1e-05, %v4430_v6  ;;  %v6292_v21 = vpop.eup %6291  ;;  %6299 = vrsqrt.f32 %v4493_v27  ;;  %v4432_v4 = vmul.f32 0.00390625, %v4364_v39  ;;  %v11561_v35 = vld [vmem:[#allocation120_spill] sm:$0xff]  ;;  %v11565_v47 = vld [vmem:[#allocation129_spill] sm:$0xff] }
 0x809   :  { %v5082_v63 = vrot.slane %v5081_v25, 4  ;;  %v5095_v22 = vrot.slane %v5094_v34, 4  ;;  %v4808_v50 = vmul.f32 %v9929_v11, %v4669_v61  ;;  %v4809_v37 = vmul.f32 %v9939_v14, %v4670_v42 }
 0x80a   :  { %v6294_v46 = vpop.eup %6293  ;;  %v4495_v5 = vadd.f32 1e-05, %v4431_v13  ;;  %v5061_v38 = vmax.f32 %v5059_v44, %v5060_v26  ;;  %v5073_v10 = vrot.slane %v5072_v18, 1  ;;  %v4675_v54 = vmul.f32 %v6290_v43, %v11556_v23 }
 0x80b   :  { %v5083_v15 = vmax.f32 %v5081_v25, %v5082_v63  ;;  %v5096_v51 = vmax.f32 %v5094_v34, %v5095_v22  ;;  %6301 = vrsqrt.f32 %v4494_v59  ;;  %v4657_v24 = vmul.f32 %v6292_v21, %v11557_v9  ;;  %v11564_v34 = vld [vmem:[#allocation128_spill] sm:$0xff] }
 0x80c   :  { %v6296_v62 = vpop.eup %6295  ;;  %v4496_v28 = vadd.f32 1e-05, %v4432_v4  ;;  %v4947_v52 = vadd.f32 %v9951_v49, %v4808_v50  ;;  %v10644_v44 = vadd.f32 %v9955_v40, %v4809_v37  ;;  %v4671_v0 = vmul.f32 %v6294_v46, %v11558_v33  ;;  %v11566_v37 = vld [vmem:[#allocation40_spill] sm:$0xff]  ;;  %v11569_v33 = vld [vmem:[#allocation93_spill] sm:$0xff] }
 0x80d   :  { %v4367_v8 = vpop.xlane.xlu1 %4366  ;;  %v5084_v57 = vrot.slane %v5083_v15, 2  ;;  %v5097_v12 = vrot.slane %v5096_v51, 2  ;;  %6303 = vrsqrt.f32 %v4495_v5  ;;  %v4676_v17 = vmul.f32 %v6290_v43, %v11559_v56 }
 0x80e   :  { %v4433_v3 = vmul.f32 0.00390625, %v4367_v8  ;;  %v4658_v60 = vmul.f32 %v6292_v21, %v11560_v31  ;;  %v5074_v1 = vmax.f32 %v5072_v18, %v5073_v10  ;;  %v4814_v2 = vmul.f32 %v9929_v11, %v4675_v54  ;;  %v11563_v18 = vld [vmem:[#allocation121_spill] sm:$0xff] }
 0x80f   :  { %v4673_v26 = vmul.f32 %v6296_v62, %v11561_v35  ;;  %v5085_v53 = vmax.f32 %v5083_v15, %v5084_v57  ;;  %v5200_v58 = vsel %vm5199_vm5, %v5061_v38, %v10542_v36  ;;  %v4796_v7 = vmul.f32 %v9929_v11, %v4657_v24 }
 0x810   :  { %v4497_v48 = vadd.f32 1e-05, %v4433_v3  ;;  %v6298_v6 = vpop.eup %6297  ;;  %v4672_v27 = vmul.f32 %v6294_v46, %v11562_v45  ;;  %6305 = vrsqrt.f32 %v4496_v28  ;;  %v5098_v55 = vmax.f32 %v5096_v51, %v5097_v12  ;;  %v11567_v51 = vld [vmem:[#allocation92_spill] sm:$0xff] }
 0x811   :  { %v5131_v19 = vmax.f32 %v10611_v32, %v4947_v52  ;;  %v5144_v61 = vmax.f32 %v10630_v16, %v10644_v44  ;;  %v4810_v20 = vmul.f32 %v9929_v11, %v4671_v0  ;;  %v5086_v42 = vrot.slane %v5085_v53, 1  ;;  %v11568_v52 = vld [vmem:[#allocation41_spill] sm:$0xff] }
 0x812   :  { %v6300_v13 = vpop.eup %6299  ;;  %v4815_v39 = vmul.f32 %v9939_v14, %v4676_v17  ;;  %v4797_v36 = vmul.f32 %v9939_v14, %v4658_v60  ;;  %v4674_v25 = vmul.f32 %v6296_v62, %v11563_v18  ;;  %6307 = vrsqrt.f32 %v4497_v48  ;;  %v11573_v18 = vld [vmem:[#allocation96_spill] sm:$0xff] }
 0x813   :  { %v4677_v43 = vmul.f32 %v6298_v6, %v11564_v34  ;;  %v4678_v59 = vmul.f32 %v6298_v6, %v11565_v47  ;;  %v5087_v21 = vmax.f32 %v5085_v53, %v5086_v42  ;;  %v5099_v32 = vrot.slane %v5098_v55, 1 }
 0x814   :  { %v4953_v4 = vadd.f32 %v9951_v49, %v4814_v2  ;;  %v4935_v16 = vadd.f32 %v9951_v49, %v4796_v7  ;;  %v4812_v63 = vmul.f32 %v9929_v11, %v4673_v26  ;;  %v4811_v22 = vmul.f32 %v9939_v14, %v4672_v27  ;;  %v11570_v2 = vld [vmem:[#allocation94_spill] sm:$0xff] }
 0x815   :  { %v6302_v46 = vpop.eup %6301  ;;  %v4949_v50 = vadd.f32 %v9951_v49, %v4810_v20  ;;  %v4679_v5 = vmul.f32 %v6300_v13, %v11566_v37  ;;  %v5100_v38 = vmax.f32 %v5098_v55, %v5099_v32  ;;  %v10671_v8 = vsel %vm5201_vm6, %v5087_v21, %v5200_v58  ;;  %v11571_v26 = vld [vmem:[#allocation130_spill] sm:$0xff]  ;;  %v11574_v21 = vld [vmem:[#allocation109_spill] sm:$0xff] }
 0x816   :  { %v4954_v10 = vadd.f32 %v9955_v40, %v4815_v39  ;;  %v4813_v15 = vmul.f32 %v9939_v14, %v4674_v25  ;;  %v4680_v23 = vmul.f32 %v6300_v13, %v11567_v51  ;;  %v5211_v54 = vsel %vm5199_vm5, %v5074_v1, %v10627_v41  ;;  %v4370_v28 = vpop.xlane.xlu1 %4369  ;;  %v11572_v39 = vld [vmem:[#allocation95_spill] sm:$0xff] }
 0x817   :  { %v6304_v3 = vpop.eup %6303  ;;  %v4936_v62 = vadd.f32 %v9955_v40, %v4797_v36  ;;  %v4816_v9 = vmul.f32 %v9929_v11, %v4677_v43  ;;  %v4817_v24 = vmul.f32 %v9939_v14, %v4678_v59  ;;  %v10682_v57 = vsel %vm5201_vm6, %v5100_v38, %v5211_v54 }
 0x818   :  { %v4950_v12 = vadd.f32 %v9955_v40, %v4811_v22  ;;  %v4681_v44 = vmul.f32 %v6302_v46, %v11568_v52  ;;  %v4682_v0 = vmul.f32 %v6302_v46, %v11569_v33  ;;  %v4434_v56 = vmul.f32 0.00390625, %v4370_v28 }
 0x819   :  { %v5107_v41 = vmax.f32 %v10633_v30, %v4935_v16  ;;  %v4951_v17 = vadd.f32 %v9951_v49, %v4812_v63  ;;  %v5132_v31 = vmax.f32 %v5131_v19, %v4949_v50  ;;  %v4818_v60 = vmul.f32 %v9929_v11, %v4679_v5  ;;  %v11575_v16 = vld [vmem:[#allocation110_spill] sm:$0xff] }
 0x81a   :  { %v6306_v48 = vpop.eup %6305  ;;  %v4819_v1 = vmul.f32 %v9939_v14, %v4680_v23  ;;  %v4683_v35 = vmul.f32 %v6304_v3, %v11570_v2  ;;  %v4684_v53 = vmul.f32 %v6304_v3, %v11571_v26  ;;  %v4498_v58 = vadd.f32 1e-05, %v4434_v56 }
 0x81b   :  { %v5120_v6 = vmax.f32 %v10636_v29, %v4936_v62  ;;  %v4952_v7 = vadd.f32 %v9955_v40, %v4813_v15  ;;  %v4955_v45 = vadd.f32 %v9951_v49, %v4816_v9  ;;  %v4956_v30 = vadd.f32 %v9955_v40, %v4817_v24 }
 0x81c   :  { %v6308_v27 = vpop.eup %6307  ;;  %v5145_v55 = vmax.f32 %v5144_v61, %v4950_v12  ;;  %v4820_v19 = vmul.f32 %v9929_v11, %v4681_v44  ;;  %v4821_v20 = vmul.f32 %v9939_v14, %v4682_v0  ;;  %6309 = vrsqrt.f32 %v4498_v58 }
 0x81d   :  { %v5108_v42 = vrot.slane %v5107_v41, 4  ;;  %v5133_v13 = vmax.f32 %v5132_v31, %v4951_v17  ;;  %v4685_v36 = vmul.f32 %v6306_v48, %v11572_v39  ;;  %v4686_v25 = vmul.f32 %v6306_v48, %v11573_v18  ;;  %v11576_v31 = vld [vmem:[#allocation117_spill] sm:$0xff]  ;;  %v11577_v48 = vld [vmem:[#allocation118_spill] sm:$0xff] }
 0x81e   :  { %v4957_v29 = vadd.f32 %v9951_v49, %v4818_v60  ;;  %v4958_v34 = vadd.f32 %v9955_v40, %v4819_v1  ;;  %v4822_v43 = vmul.f32 %v9929_v11, %v4683_v35  ;;  %v4823_v47 = vmul.f32 %v9939_v14, %v4684_v53 }
 0x81f   :  { %v5153_v61 = vmax.f32 %v4953_v4, %v4955_v45  ;;  %v5166_v59 = vmax.f32 %v4954_v10, %v4956_v30  ;;  %v4687_v32 = vmul.f32 %v6308_v27, %v11574_v21  ;;  %v4688_v63 = vmul.f32 %v6308_v27, %v11575_v16 }
 0x820   :  { %v4959_v22 = vadd.f32 %v9951_v49, %v4820_v19  ;;  %v4960_v46 = vadd.f32 %v9955_v40, %v4821_v20  ;;  %v5121_v50 = vrot.slane %v5120_v6, 4  ;;  %v5146_v37 = vmax.f32 %v5145_v55, %v4952_v7 }
 0x821   :  { %v4824_v5 = vmul.f32 %v9929_v11, %v4685_v36  ;;  %v4825_v38 = vmul.f32 %v9939_v14, %v4686_v25  ;;  %v5154_v15 = vmax.f32 %v5153_v61, %v4957_v29  ;;  %v5167_v51 = vmax.f32 %v5166_v59, %v4958_v34 }
 0x822   :  { %v4961_v23 = vadd.f32 %v9951_v49, %v4822_v43  ;;  %v4962_v4 = vadd.f32 %v9955_v40, %v4823_v47  ;;  %v5109_v10 = vmax.f32 %v5107_v41, %v5108_v42  ;;  %v4826_v54 = vmul.f32 %v9929_v11, %v4687_v32 }
 0x823   :  { %v4827_v3 = vmul.f32 %v9939_v14, %v4688_v63  ;;  %v5134_v62 = vrot.slane %v5133_v13, 4  ;;  %v5155_v9 = vmax.f32 %v5154_v15, %v4959_v22  ;;  %v5168_v24 = vmax.f32 %v5167_v51, %v4960_v46 }
 0x824   :  { %v5122_v28 = vmax.f32 %v5120_v6, %v5121_v50  ;;  %v5147_v12 = vrot.slane %v5146_v37, 4  ;;  %v4963_v52 = vadd.f32 %v9951_v49, %v4824_v5  ;;  %v4964_v44 = vadd.f32 %v9955_v40, %v4825_v38 }
 0x825   :  { %v5156_v0 = vmax.f32 %v5155_v9, %v4961_v23  ;;  %v5169_v56 = vmax.f32 %v5168_v24, %v4962_v4  ;;  %v4965_v17 = vadd.f32 %v9951_v49, %v4826_v54  ;;  %v4966_v41 = vadd.f32 %v9955_v40, %v4827_v3 }
 0x826   :  { %v6310_v33 = vpop.eup %6309  ;;  %v5110_v2 = vrot.slane %v5109_v10, 2  ;;  %v5123_v35 = vrot.slane %v5122_v28, 2  ;;  %v5135_v26 = vmax.f32 %v5133_v13, %v5134_v62  ;;  %v5148_v53 = vmax.f32 %v5146_v37, %v5147_v12 }
 0x827   :  { %v4689_v60 = vmul.f32 %v6310_v33, %v11576_v31  ;;  %v4690_v1 = vmul.f32 %v6310_v33, %v11577_v48  ;;  %v5157_v58 = vmax.f32 %v5156_v0, %v4963_v52  ;;  %v5170_v6 = vmax.f32 %v5169_v56, %v4964_v44  ;;  %v5571_v52 = vld [vmem:[#allocation17] ss:$0 sm:$0xff] }
 0x828   :  { %v5136_v20 = vrot.slane %v5135_v26, 2  ;;  %v5149_v42 = vrot.slane %v5148_v53, 2  ;;  %v5111_v36 = vmax.f32 %v5109_v10, %v5110_v2  ;;  %v5124_v18 = vmax.f32 %v5122_v28, %v5123_v35 }
 0x829   :  { %v4828_v7 = vmul.f32 %v9929_v11, %v4689_v60  ;;  %v4829_v45 = vmul.f32 %v9939_v14, %v4690_v1  ;;  %v5158_v30 = vmax.f32 %v5157_v58, %v4965_v17  ;;  %v5171_v19 = vmax.f32 %v5170_v6, %v4966_v41  ;;  %v5589_v6 = vld [vmem:[#allocation17 + $0x2] ss:$0 sm:$0xff] }
 0x82a   :  { %v5137_v34 = vmax.f32 %v5135_v26, %v5136_v20  ;;  %v5150_v43 = vmax.f32 %v5148_v53, %v5149_v42  ;;  %v5112_v47 = vrot.slane %v5111_v36, 1  ;;  %v5125_v11 = vrot.slane %v5124_v18, 1  ;;  %v5588_v53 = vld [vmem:[#allocation17 + $0x1] ss:$0 sm:$0xff] }
 0x82b   :  { %v4967_v27 = vadd.f32 %v9951_v49, %v4828_v7  ;;  %v4968_v55 = vadd.f32 %v9955_v40, %v4829_v45 }
 0x82c   :  { %v5138_v49 = vrot.slane %v5137_v34, 1  ;;  %v5151_v32 = vrot.slane %v5150_v43, 1  ;;  %v5113_v40 = vmax.f32 %v5111_v36, %v5112_v47  ;;  %v5126_v16 = vmax.f32 %v5124_v18, %v5125_v11 }
 0x82d   :  { %v5159_v39 = vmax.f32 %v5158_v30, %v4967_v27  ;;  %v5172_v25 = vmax.f32 %v5171_v19, %v4968_v55 }
 0x82e   :  { %v5204_v37 = vsel %vm5203_vm7, %v5113_v40, %v10671_v8  ;;  %v5213_v5 = vsel %vm5203_vm7, %v5126_v16, %v10682_v57  ;;  %v5139_v38 = vmax.f32 %v5137_v34, %v5138_v49  ;;  %v5152_v15 = vmax.f32 %v5150_v43, %v5151_v32 }
 0x82f   :  { %v5160_v13 = vrot.slane %v5159_v39, 4  ;;  %v5173_v29 = vrot.slane %v5172_v25, 4 }
 0x830   :  { %v5206_v4 = vsel %vm5205_vm8, %v5139_v38, %v5204_v37  ;;  %v5214_v10 = vsel %vm5205_vm8, %v5152_v15, %v5213_v5 }
 0x831   :  { %v5161_v61 = vmax.f32 %v5159_v39, %v5160_v13  ;;  %v5174_v14 = vmax.f32 %v5172_v25, %v5173_v29 }
 0x833   :  { %v5162_v59 = vrot.slane %v5161_v61, 2  ;;  %v5175_v21 = vrot.slane %v5174_v14, 2 }
 0x835   :  { %v5163_v63 = vmax.f32 %v5161_v61, %v5162_v59  ;;  %v5176_v22 = vmax.f32 %v5174_v14, %v5175_v21 }
 0x837   :  { %v5164_v46 = vrot.slane %v5163_v63, 1  ;;  %v5177_v50 = vrot.slane %v5176_v22, 1 }
 0x839   :  { %v5165_v51 = vmax.f32 %v5163_v63, %v5164_v46  ;;  %v5178_v23 = vmax.f32 %v5176_v22, %v5177_v50 }
 0x83b   :  { %v5208_v54 = vsel %vm5207_vm9, %v5165_v51, %v5206_v4  ;;  %v5215_v3 = vsel %vm5207_vm9, %v5178_v23, %v5214_v10 }
 0x83c   :  { %v5227_v62 = vmax.f32 %v5208_v54, 0.0  ;;  %v5228_v9 = vmax.f32 %v5215_v3, 0.0 }
 0x83e   :  { %v5229_v24 = vpack.c.bf16 %v5227_v62, %v5227_v62  ;;  %v5230_v28 = vpack.c.bf16 %v5228_v9, %v5228_v9 }
 0x840   :  { %5396 = vmatprep.mubr.bf16.mxu1 %v5230_v28 }
 0x841   :  { %5397 = vmatmul.mubr.bf16.vlgmr.msra.gmra.mrb[120].mxu1 %v5229_v24 }
 0x914   :  { %v5675_v12 = vpop.f32.mrb[120].mxu1 }
 0x915   :  { %v5676_v8 = vpop.f32.mrb[121].mxu1 }
 0x916   :  { %v5677_v44 = vadd.f32 %v5676_v8, %v5675_v12  ;;  %v5678_v57 = vpop.f32.mrb[122].mxu1 }
 0x917   :  { %v5679_v33 = vpop.f32.mrb[123].mxu1 }
 0x918   :  { %v5399_v0 = vadd.f32 %v5677_v44, %v5571_v52 }
 0x91a   :  { %v5406_v56 = vsel %vm774_vm2, %v5399_v0, 0.0 }
 0x91b   :  { %5407 = vadd.xlane.f32.xlu0 %v5406_v56 }
 0x9a8   :  { %v5408_v17 = vpop.xlane.xlu0 %5407 }
 0x9a9   :  { %v5409_v41 = vmul.f32 0.015625, %v5408_v17 }
 0x9ab   :  { %v5410_v31 = vsub.f32 %v5399_v0, %v5409_v41 }
 0x9ad   :  { %v5411_v60 = vmul.f32 %v5410_v31, %v5410_v31 }
 0x9af   :  { %v5412_v48 = vsel %vm774_vm2, %v5411_v60, 0.0 }
 0x9b0   :  { %5413 = vadd.xlane.f32.xlu1 %v5412_v48 }
 0xa3d   :  { %v5414_v1 = vpop.xlane.xlu1 %5413 }
 0xa3e   :  { %v5415_v2 = vmul.f32 0.015625, %v5414_v1 }
 0xa40   :  { %v5416_v35 = vadd.f32 1e-05, %v5415_v2 }
 0xa42   :  { %6311 = vrsqrt.f32 %v5416_v35 }
 0xa4c   :  { %v6312_v26 = vpop.eup %6311 }
 0xa4d   :  { %v5418_v58 = vmul.f32 %v6312_v26, %v5410_v31 }
 0xa4f   :  { %v5423_v7 = vmul.f32 %v5588_v53, %v5418_v58 }
 0xa51   :  { %v5428_v45 = vadd.f32 %v5589_v6, %v5423_v7 }
 0xa53   :  { %5429 = vst.msk [vmem:[#allocation18] sm:$0xff] %vm774_vm2, %v5428_v45 }
 0xa54   :  { %6527 = shalt.err (!%p6524_p6)
}
 0xa55   :  { %s6528_s25 = scalar_lea.hbm %s10751_s9, 128 }
 0xa56   :  { %p6529_p7 = scmp.ne.s32.totalorder %s10751_s9, %s6528_s25  ;;  %p6532_p8 = scmp.lt.u32.totalorder %s6528_s25, %s10751_s9 }
 0xa58   :  { %p6534_p9 = pnand %p6532_p8, %p6529_p7 }
 0xa5a   :  { %6537 = shalt.err (!%p6534_p9)
}
 0xa5b   :  { %5439 = dma.vmem_to_hbm [thread:$0]  %s5437_s23, 128, %s10751_s9, [#allocation5]  }
 0xa5c   :  { %6548 = dma.done.wait [#allocation5], 128  }
 0xa5d   :  { %6549 = vsyncadd [#allocation5], 4294967168 }
 0xa5e   :  { %5443 = vsyncpa [#allocation4], 1 }
 0xa5f   :  { %5444 = vsyncpa [#allocation7], 1 }
 0xa60   :  { %5445 = vsyncpa [#allocation10], 1 }
 0xa61   :  { %5446 = vsyncpa [#allocation13], 1 }
 0xa62   :  { %5447 = vsyncpa [#allocation16], 1 }
 0xa63   :  { %5448 = vsyncpa [#allocation5], 1 }

</bundles_post_ra>
